<compile_context>
chip_gen: v7x
topology: tpu7x:2x2x1
jax: 0.10.0
libtpu: 0.0.40
codegen_flags: <defaults>
</compile_context>

<pallas_src>
import functools

import jax
import jax.numpy as jnp
from jax import lax
from jax.experimental import pallas as pl
from jax.experimental.pallas import tpu as pltpu

LANE = 128  # vreg lane width / output-channel padding granularity


def _round_up(x, m):
    return (x + m - 1) // m * m


# ---------------------------------------------------------------------------
# Pallas kernel: fused im2col (in VMEM) + matmul + bias + LeakyReLU
# ---------------------------------------------------------------------------
def _fused_conv_kernel(x_ref, w_ref, b_ref, o_ref, patch_ref, *,
                       KH, KW, OH, OW, CIN, CP, apply_act, slope):
    # x_ref:     (HP, WP, CIN)            bf16  padded input image (one batch elem)
    # w_ref:     (KH*KW*CP, COUTP)        bf16  weight matrix (per-tap stride CP)
    # b_ref:     (1, COUTP)               f32   bias row
    # o_ref:     (OH*OW, COUTP)           bf16/f32 output block
    # patch_ref: (OH*OW, KH*KW*CP)        f32   VMEM scratch (im2col patches)
    M = OH * OW
    KTOT = KH * KW * CP
    if CP != CIN:
        # per-tap channel padding exists -> zero the scratch so stale VMEM
        # (possibly NaN bit patterns) never reaches the MXU accumulation.
        patch_ref[...] = jnp.zeros((M, KTOT), jnp.float32)

    # Build the patch matrix entirely on-chip (never touches HBM).
    for i in range(KH):
        for j in range(KW):
            c0 = (i * KW + j) * CP  # lane-aligned: CP is a multiple of 128 or == CIN
            for oh in range(OH):
                patch_ref[oh * OW:(oh + 1) * OW, c0:c0 + CIN] = (
                    x_ref[oh + i, j:j + OW, :].astype(jnp.float32))

    patches = patch_ref[...].astype(jnp.bfloat16)      # bf16 MXU operand
    acc = jnp.dot(patches, w_ref[...], preferred_element_type=jnp.float32)
    acc = acc + b_ref[...]                              # f32 epilogue
    if apply_act:
        acc = jnp.where(acc >= 0, acc, slope * acc)     # LeakyReLU(0.2)
    o_ref[...] = acc.astype(o_ref.dtype)


def _fused_conv_pallas(xp, w_mat, b_row, *, OH, OW, KH, KW, CIN, CP,
                       apply_act, out_dtype):
    """xp: (B, HP, WP, CIN) bf16 padded (and s2d-folded) activation.
       w_mat: (KH*KW*CP, COUTP) bf16.  b_row: (1, COUTP) f32."""
    B, HP, WP, CINX = xp.shape
    KTOT, COUTP = w_mat.shape
    M = OH * OW
    kernel = functools.partial(_fused_conv_kernel, KH=KH, KW=KW, OH=OH, OW=OW,
                               CIN=CIN, CP=CP, apply_act=apply_act, slope=0.2)
    out = pl.pallas_call(
        kernel,
        out_shape=jax.ShapeDtypeStruct((B, M, COUTP), out_dtype),
        grid_spec=pltpu.PrefetchScalarGridSpec(
            num_scalar_prefetch=0,
            grid=(B,),
            in_specs=[
                pl.BlockSpec((None, HP, WP, CINX), lambda b: (b, 0, 0, 0)),
                pl.BlockSpec((KTOT, COUTP), lambda b: (0, 0)),
                pl.BlockSpec((1, COUTP), lambda b: (0, 0)),
            ],
            out_specs=pl.BlockSpec((None, M, COUTP), lambda b: (b, 0, 0)),
            scratch_shapes=[pltpu.VMEM((M, KTOT), jnp.float32)],
        ),
        compiler_params=pltpu.CompilerParams(
            dimension_semantics=("parallel",)),
    )(xp, w_mat, b_row)
    return out  # (B, OH*OW, COUTP)


# ---------------------------------------------------------------------------
# Plain-JAX glue: weight prep (s2d fold + padding), input prep, spectral norm
# ---------------------------------------------------------------------------
def _prep_weight(w_oihw, bias, stride, cin_carried):
    """(COUT, CIN, 4, 4) -> lane-padded matmul weight matching the kernel's
    patch layout. Returns (w_mat bf16, bias_row f32, KH, KW, CIN, CP, COUT)."""
    COUT, CIN_true, KH, KW = w_oihw.shape
    if cin_carried > CIN_true:  # previous layer carried zero-padded channels
        w_oihw = jnp.pad(w_oihw,
                         ((0, 0), (0, cin_carried - CIN_true), (0, 0), (0, 0)))
    CIN = cin_carried
    w = jnp.transpose(w_oihw, (2, 3, 1, 0))           # (KH, KW, CIN, COUT)
    if stride == 2:
        # Fold stride-2 into space-to-depth(2): k4 s2 == k2 s1 on 4*CIN channels.
        assert KH == 4 and KW == 4
        w = w.reshape(2, 2, 2, 2, CIN, COUT)          # (a, di, b, dj, ci, co)
        w = jnp.transpose(w, (0, 2, 1, 3, 4, 5))      # (a, b, di, dj, ci, co)
        w = w.reshape(2, 2, 4 * CIN, COUT)
        KH, KW, CIN = 2, 2, 4 * CIN
    CP = _round_up(CIN, LANE)                         # per-tap lane-aligned stride
    if CP != CIN:
        w = jnp.pad(w, ((0, 0), (0, 0), (0, CP - CIN), (0, 0)))
    COUTP = _round_up(COUT, LANE)                     # lane-dense output channels
    w_mat = w.reshape(KH * KW * CP, COUT)
    w_mat = jnp.pad(w_mat, ((0, 0), (0, COUTP - COUT))).astype(jnp.bfloat16)
    b_row = jnp.pad(bias, (0, COUTP - COUT)).astype(jnp.float32).reshape(1, COUTP)
    return w_mat, b_row, KH, KW, CIN, CP, COUT


def _prep_input(x, stride, kw=4, pad=1):
    """Spatial zero-pad and (for stride 2) space-to-depth(2)."""
    B, H, W, C = x.shape
    OH = (H + 2 * pad - kw) // stride + 1
    OW = (W + 2 * pad - kw) // stride + 1
    xp = jnp.pad(x, ((0, 0), (pad, pad), (pad, pad), (0, 0)))
    if stride == 2:
        Hp, Wp = H + 2 * pad, W + 2 * pad
        xp = jnp.pad(xp, ((0, 0), (0, Hp % 2), (0, Wp % 2), (0, 0)))
        H2, W2 = xp.shape[1] // 2, xp.shape[2] // 2
        xp = xp.reshape(B, H2, 2, W2, 2, C)
        xp = jnp.transpose(xp, (0, 1, 3, 2, 4, 5)).reshape(B, H2, W2, 4 * C)
    return xp, OH, OW


def _conv_lrelu_layer(x, w_oihw, bias, stride, apply_act, out_dtype):
    B = x.shape[0]
    cin_carried = x.shape[-1]
    w_mat, b_row, KH, KW, CIN, CP, _ = _prep_weight(w_oihw, bias, stride, cin_carried)
    xp, OH, OW = _prep_input(x, stride)
    assert xp.shape[-1] == CIN, (xp.shape, CIN)
    out = _fused_conv_pallas(xp, w_mat, b_row, OH=OH, OW=OW, KH=KH, KW=KW,
                             CIN=CIN, CP=CP, apply_act=apply_act,
                             out_dtype=out_dtype)
    return out.reshape(B, OH, OW, out.shape[-1])  # free row-major reshape


def _spectral_normalize(w, key, eps=1e-12):
    """Mimic torch.nn.utils.spectral_norm forward (1 power iteration, dim=0)."""
    # TODO(synk): torch keeps a persistent `u` buffer across forwards; we
    # approximate with a single power iteration at init time.
    cout = w.shape[0]
    w_mat = w.reshape(cout, -1)
    u = jax.random.normal(key, (cout,), dtype=w.dtype)
    u = u / (jnp.linalg.norm(u) + eps)
    v = w_mat.T @ u
    v = v / (jnp.linalg.norm(v) + eps)
    u = w_mat @ v
    u = u / (jnp.linalg.norm(u) + eps)
    sigma = u @ (w_mat @ v)
    return w / sigma


def init_params(key, input_nc, ndf=8, n_layers=3):
    """Deterministic init (normal * 0.02, zero bias where absent)."""
    cfg = [(input_nc, ndf, 2, True)]
    nf_mult = 1
    for n in range(1, n_layers):
        nf_prev, nf_mult = nf_mult, min(2 ** n, 8)
        cfg.append((ndf * nf_prev, ndf * nf_mult, 2, False))
    nf_prev, nf_mult = nf_mult, min(2 ** n_layers, 8)
    cfg.append((ndf * nf_prev, ndf * nf_mult, 1, False))
    cfg.append((ndf * nf_mult, 1, 1, True))

    params, strides = [], []
    for idx, (cin, cout, stride, has_bias) in enumerate(cfg):
        kw_, ku = jax.random.split(jax.random.fold_in(key, idx))
        w = 0.02 * jax.random.normal(kw_, (cout, cin, 4, 4), dtype=jnp.float32)
        w = _spectral_normalize(w, ku)
        b = (0.01 * jax.random.normal(jax.random.fold_in(key, 1000 + idx),
                                      (cout,), dtype=jnp.float32)
             if has_bias else jnp.zeros((cout,), jnp.float32))
        params.append({"w": w, "b": b})
        strides.append(stride)
    return params, tuple(strides)


@functools.partial(jax.jit, static_argnums=(2,))
def nlayer_discriminator_forward(x_nchw, params, strides):
    """x_nchw: (B, C, H, W) f32 -> (B, 1, H', W') f32 (NCHW)."""
    x = jnp.transpose(x_nchw, (0, 2, 3, 1)).astype(jnp.bfloat16)  # NCHW -> NHWC
    n = len(params)
    for i, (p, stride) in enumerate(zip(params, strides)):
        apply_act = i < n - 1  # last conv: no LeakyReLU (use_sigmoid=False)
        out_dtype = jnp.bfloat16 if apply_act else jnp.float32
        x = _conv_lrelu_layer(x, p["w"], p["b"], stride, apply_act, out_dtype)
    cout_last = params[-1]["w"].shape[0]
    x = x[..., :cout_last].astype(jnp.float32)       # drop lane padding
    return jnp.transpose(x, (0, 3, 1, 2))            # NHWC -> NCHW


# ---------------------------------------------------------------------------
# Pure-JAX reference (same bf16/f32 quantization points) for validation
# ---------------------------------------------------------------------------
def _reference_forward(x_nchw, params, strides):
    x = jnp.transpose(x_nchw, (0, 2, 3, 1)).astype(jnp.bfloat16)
    n = len(params)
    for i, (p, s) in enumerate(zip(params, strides)):
        w = jnp.transpose(p["w"], (2, 3, 1, 0)).astype(jnp.bfloat16)  # HWIO
        y = lax.conv_general_dilated(
            x, w, window_strides=(s, s), padding=((1, 1), (1, 1)),
            dimension_numbers=("NHWC", "HWIO", "NHWC"),
            preferred_element_type=jnp.float32)
        y = y + p["b"].astype(jnp.float32)
        if i < n - 1:
            x = jnp.where(y >= 0, y, 0.2 * y).astype(jnp.bfloat16)
        else:
            x = y
    return jnp.transpose(x, (0, 3, 1, 2))


if __name__ == "__main__":
    key = jax.random.PRNGKey(0)
    B, C, H, W = 2, 4, 32, 32  # 32x32 so all 5 convs yield valid spatial sizes
    x = jax.random.normal(jax.random.fold_in(key, 7), (B, C, H, W), dtype=jnp.float32)

    params, strides = init_params(jax.random.fold_in(key, 11),
                                  input_nc=C, ndf=8, n_layers=3)

    out = nlayer_discriminator_forward(x, params, strides)
    out = jax.block_until_ready(out)
    assert out.shape == (B, 1, 2, 2), out.shape
    assert bool(jnp.all(jnp.isfinite(out)))

    ref = jax.block_until_ready(_reference_forward(x, params, strides))
    max_err = float(jnp.max(jnp.abs(out - ref.astype(out.dtype))))
    assert max_err < 2e-2, f"max abs err {max_err}"

    print("KERNEL_OK")
</pallas_src>

<mosaic_0001>
module attributes {stable_mosaic.version = 11 : i64} {
  func.func @_fused_conv_kernel(%arg0: i32, %arg1: memref<1x17x17x16xbf16, #tpu.memory_space<vmem>>, %arg2: memref<512x128xbf16, #tpu.memory_space<vmem>>, %arg3: memref<1x128xf32, #tpu.memory_space<vmem>>, %arg4: memref<1x256x128xbf16, #tpu.memory_space<vmem>>, %arg5: memref<256x512xf32, #tpu.memory_space<vmem>>) attributes {dimension_semantics = [#tpu.dimension_semantics<parallel>], iteration_bounds = array<i64: 2>, scalar_prefetch = 0 : i64, scratch_operands = 1 : i64, tpu.core_type = #tpu.core_type<tc>, window_params = [{transform_indices = @transform_0, window_bounds = array<i64: 1, 17, 17, 16>}, {pipeline_mode = #tpu.pipeline_mode<synchronous>, transform_indices = @transform_1, window_bounds = array<i64: 512, 128>}, {pipeline_mode = #tpu.pipeline_mode<synchronous>, transform_indices = @transform_2, window_bounds = array<i64: 1, 128>}, {transform_indices = @transform_3, window_bounds = array<i64: 1, 256, 128>}]} {
    %cst = arith.constant 0.000000e+00 : f32
    %0 = vector.broadcast %cst : f32 to vector<256x512xf32>
    %c0 = arith.constant 0 : index
    %c0_0 = arith.constant 0 : index
    %1 = vector.load %arg5[%c0, %c0_0] : memref<256x512xf32, #tpu.memory_space<vmem>>, vector<256x512xf32>
    tpu.vector_store %arg5[%c0, %c0_0], %0 {strides = array<i32>} : memref<256x512xf32, #tpu.memory_space<vmem>>, vector<256x512xf32>,
    %c0_1 = arith.constant 0 : index
    %c0_2 = arith.constant 0 : index
    %c0_3 = arith.constant 0 : index
    %c0_4 = arith.constant 0 : index
    %2 = vector.load %arg1[%c0_1, %c0_2, %c0_3, %c0_4] : memref<1x17x17x16xbf16, #tpu.memory_space<vmem>>, vector<1x1x16x16xbf16>
    %3 = vector.shape_cast %2 : vector<1x1x16x16xbf16> to vector<16x16xbf16>
    %4 = arith.extf %3 : vector<16x16xbf16> to vector<16x16xf32>
    %c0_5 = arith.constant 0 : index
    %c0_6 = arith.constant 0 : index
    %5 = vector.load %arg5[%c0_5, %c0_6] : memref<256x512xf32, #tpu.memory_space<vmem>>, vector<16x16xf32>
    tpu.vector_store %arg5[%c0_5, %c0_6], %4 {strides = array<i32>} : memref<256x512xf32, #tpu.memory_space<vmem>>, vector<16x16xf32>,
    %c0_7 = arith.constant 0 : index
    %c1 = arith.constant 1 : index
    %c0_8 = arith.constant 0 : index
    %c0_9 = arith.constant 0 : index
    %6 = vector.load %arg1[%c0_7, %c1, %c0_8, %c0_9] : memref<1x17x17x16xbf16, #tpu.memory_space<vmem>>, vector<1x1x16x16xbf16>
    %7 = vector.shape_cast %6 : vector<1x1x16x16xbf16> to vector<16x16xbf16>
    %8 = arith.extf %7 : vector<16x16xbf16> to vector<16x16xf32>
    %c16 = arith.constant 16 : index
    %c0_10 = arith.constant 0 : index
    %9 = vector.load %arg5[%c16, %c0_10] : memref<256x512xf32, #tpu.memory_space<vmem>>, vector<16x16xf32>
    tpu.vector_store %arg5[%c16, %c0_10], %8 {strides = array<i32>} : memref<256x512xf32, #tpu.memory_space<vmem>>, vector<16x16xf32>,
    %c0_11 = arith.constant 0 : index
    %c2 = arith.constant 2 : index
    %c0_12 = arith.constant 0 : index
    %c0_13 = arith.constant 0 : index
    %10 = vector.load %arg1[%c0_11, %c2, %c0_12, %c0_13] : memref<1x17x17x16xbf16, #tpu.memory_space<vmem>>, vector<1x1x16x16xbf16>
    %11 = vector.shape_cast %10 : vector<1x1x16x16xbf16> to vector<16x16xbf16>
    %12 = arith.extf %11 : vector<16x16xbf16> to vector<16x16xf32>
    %c32 = arith.constant 32 : index
    %c0_14 = arith.constant 0 : index
    %13 = vector.load %arg5[%c32, %c0_14] : memref<256x512xf32, #tpu.memory_space<vmem>>, vector<16x16xf32>
    tpu.vector_store %arg5[%c32, %c0_14], %12 {strides = array<i32>} : memref<256x512xf32, #tpu.memory_space<vmem>>, vector<16x16xf32>,
    %c0_15 = arith.constant 0 : index
    %c3 = arith.constant 3 : index
    %c0_16 = arith.constant 0 : index
    %c0_17 = arith.constant 0 : index
    %14 = vector.load %arg1[%c0_15, %c3, %c0_16, %c0_17] : memref<1x17x17x16xbf16, #tpu.memory_space<vmem>>, vector<1x1x16x16xbf16>
    %15 = vector.shape_cast %14 : vector<1x1x16x16xbf16> to vector<16x16xbf16>
    %16 = arith.extf %15 : vector<16x16xbf16> to vector<16x16xf32>
    %c48 = arith.constant 48 : index
    %c0_18 = arith.constant 0 : index
    %17 = vector.load %arg5[%c48, %c0_18] : memref<256x512xf32, #tpu.memory_space<vmem>>, vector<16x16xf32>
    tpu.vector_store %arg5[%c48, %c0_18], %16 {strides = array<i32>} : memref<256x512xf32, #tpu.memory_space<vmem>>, vector<16x16xf32>,
    %c0_19 = arith.constant 0 : index
    %c4 = arith.constant 4 : index
    %c0_20 = arith.constant 0 : index
    %c0_21 = arith.constant 0 : index
    %18 = vector.load %arg1[%c0_19, %c4, %c0_20, %c0_21] : memref<1x17x17x16xbf16, #tpu.memory_space<vmem>>, vector<1x1x16x16xbf16>
    %19 = vector.shape_cast %18 : vector<1x1x16x16xbf16> to vector<16x16xbf16>
    %20 = arith.extf %19 : vector<16x16xbf16> to vector<16x16xf32>
    %c64 = arith.constant 64 : index
    %c0_22 = arith.constant 0 : index
    %21 = vector.load %arg5[%c64, %c0_22] : memref<256x512xf32, #tpu.memory_space<vmem>>, vector<16x16xf32>
    tpu.vector_store %arg5[%c64, %c0_22], %20 {strides = array<i32>} : memref<256x512xf32, #tpu.memory_space<vmem>>, vector<16x16xf32>,
    %c0_23 = arith.constant 0 : index
    %c5 = arith.constant 5 : index
    %c0_24 = arith.constant 0 : index
    %c0_25 = arith.constant 0 : index
    %22 = vector.load %arg1[%c0_23, %c5, %c0_24, %c0_25] : memref<1x17x17x16xbf16, #tpu.memory_space<vmem>>, vector<1x1x16x16xbf16>
    %23 = vector.shape_cast %22 : vector<1x1x16x16xbf16> to vector<16x16xbf16>
    %24 = arith.extf %23 : vector<16x16xbf16> to vector<16x16xf32>
    %c80 = arith.constant 80 : index
    %c0_26 = arith.constant 0 : index
    %25 = vector.load %arg5[%c80, %c0_26] : memref<256x512xf32, #tpu.memory_space<vmem>>, vector<16x16xf32>
    tpu.vector_store %arg5[%c80, %c0_26], %24 {strides = array<i32>} : memref<256x512xf32, #tpu.memory_space<vmem>>, vector<16x16xf32>,
    %c0_27 = arith.constant 0 : index
    %c6 = arith.constant 6 : index
    %c0_28 = arith.constant 0 : index
    %c0_29 = arith.constant 0 : index
    %26 = vector.load %arg1[%c0_27, %c6, %c0_28, %c0_29] : memref<1x17x17x16xbf16, #tpu.memory_space<vmem>>, vector<1x1x16x16xbf16>
    %27 = vector.shape_cast %26 : vector<1x1x16x16xbf16> to vector<16x16xbf16>
    %28 = arith.extf %27 : vector<16x16xbf16> to vector<16x16xf32>
    %c96 = arith.constant 96 : index
    %c0_30 = arith.constant 0 : index
    %29 = vector.load %arg5[%c96, %c0_30] : memref<256x512xf32, #tpu.memory_space<vmem>>, vector<16x16xf32>
    tpu.vector_store %arg5[%c96, %c0_30], %28 {strides = array<i32>} : memref<256x512xf32, #tpu.memory_space<vmem>>, vector<16x16xf32>,
    %c0_31 = arith.constant 0 : index
    %c7 = arith.constant 7 : index
    %c0_32 = arith.constant 0 : index
    %c0_33 = arith.constant 0 : index
    %30 = vector.load %arg1[%c0_31, %c7, %c0_32, %c0_33] : memref<1x17x17x16xbf16, #tpu.memory_space<vmem>>, vector<1x1x16x16xbf16>
    %31 = vector.shape_cast %30 : vector<1x1x16x16xbf16> to vector<16x16xbf16>
    %32 = arith.extf %31 : vector<16x16xbf16> to vector<16x16xf32>
    %c112 = arith.constant 112 : index
    %c0_34 = arith.constant 0 : index
    %33 = vector.load %arg5[%c112, %c0_34] : memref<256x512xf32, #tpu.memory_space<vmem>>, vector<16x16xf32>
    tpu.vector_store %arg5[%c112, %c0_34], %32 {strides = array<i32>} : memref<256x512xf32, #tpu.memory_space<vmem>>, vector<16x16xf32>,
    %c0_35 = arith.constant 0 : index
    %c8 = arith.constant 8 : index
    %c0_36 = arith.constant 0 : index
    %c0_37 = arith.constant 0 : index
    %34 = vector.load %arg1[%c0_35, %c8, %c0_36, %c0_37] : memref<1x17x17x16xbf16, #tpu.memory_space<vmem>>, vector<1x1x16x16xbf16>
    %35 = vector.shape_cast %34 : vector<1x1x16x16xbf16> to vector<16x16xbf16>
    %36 = arith.extf %35 : vector<16x16xbf16> to vector<16x16xf32>
    %c128 = arith.constant 128 : index
    %c0_38 = arith.constant 0 : index
    %37 = vector.load %arg5[%c128, %c0_38] : memref<256x512xf32, #tpu.memory_space<vmem>>, vector<16x16xf32>
    tpu.vector_store %arg5[%c128, %c0_38], %36 {strides = array<i32>} : memref<256x512xf32, #tpu.memory_space<vmem>>, vector<16x16xf32>,
    %c0_39 = arith.constant 0 : index
    %c9 = arith.constant 9 : index
    %c0_40 = arith.constant 0 : index
    %c0_41 = arith.constant 0 : index
    %38 = vector.load %arg1[%c0_39, %c9, %c0_40, %c0_41] : memref<1x17x17x16xbf16, #tpu.memory_space<vmem>>, vector<1x1x16x16xbf16>
    %39 = vector.shape_cast %38 : vector<1x1x16x16xbf16> to vector<16x16xbf16>
    %40 = arith.extf %39 : vector<16x16xbf16> to vector<16x16xf32>
    %c144 = arith.constant 144 : index
    %c0_42 = arith.constant 0 : index
    %41 = vector.load %arg5[%c144, %c0_42] : memref<256x512xf32, #tpu.memory_space<vmem>>, vector<16x16xf32>
    tpu.vector_store %arg5[%c144, %c0_42], %40 {strides = array<i32>} : memref<256x512xf32, #tpu.memory_space<vmem>>, vector<16x16xf32>,
    %c0_43 = arith.constant 0 : index
    %c10 = arith.constant 10 : index
    %c0_44 = arith.constant 0 : index
    %c0_45 = arith.constant 0 : index
    %42 = vector.load %arg1[%c0_43, %c10, %c0_44, %c0_45] : memref<1x17x17x16xbf16, #tpu.memory_space<vmem>>, vector<1x1x16x16xbf16>
    %43 = vector.shape_cast %42 : vector<1x1x16x16xbf16> to vector<16x16xbf16>
    %44 = arith.extf %43 : vector<16x16xbf16> to vector<16x16xf32>
    %c160 = arith.constant 160 : index
    %c0_46 = arith.constant 0 : index
    %45 = vector.load %arg5[%c160, %c0_46] : memref<256x512xf32, #tpu.memory_space<vmem>>, vector<16x16xf32>
    tpu.vector_store %arg5[%c160, %c0_46], %44 {strides = array<i32>} : memref<256x512xf32, #tpu.memory_space<vmem>>, vector<16x16xf32>,
    %c0_47 = arith.constant 0 : index
    %c11 = arith.constant 11 : index
    %c0_48 = arith.constant 0 : index
    %c0_49 = arith.constant 0 : index
    %46 = vector.load %arg1[%c0_47, %c11, %c0_48, %c0_49] : memref<1x17x17x16xbf16, #tpu.memory_space<vmem>>, vector<1x1x16x16xbf16>
    %47 = vector.shape_cast %46 : vector<1x1x16x16xbf16> to vector<16x16xbf16>
    %48 = arith.extf %47 : vector<16x16xbf16> to vector<16x16xf32>
    %c176 = arith.constant 176 : index
    %c0_50 = arith.constant 0 : index
    %49 = vector.load %arg5[%c176, %c0_50] : memref<256x512xf32, #tpu.memory_space<vmem>>, vector<16x16xf32>
    tpu.vector_store %arg5[%c176, %c0_50], %48 {strides = array<i32>} : memref<256x512xf32, #tpu.memory_space<vmem>>, vector<16x16xf32>,
    %c0_51 = arith.constant 0 : index
    %c12 = arith.constant 12 : index
    %c0_52 = arith.constant 0 : index
    %c0_53 = arith.constant 0 : index
    %50 = vector.load %arg1[%c0_51, %c12, %c0_52, %c0_53] : memref<1x17x17x16xbf16, #tpu.memory_space<vmem>>, vector<1x1x16x16xbf16>
    %51 = vector.shape_cast %50 : vector<1x1x16x16xbf16> to vector<16x16xbf16>
    %52 = arith.extf %51 : vector<16x16xbf16> to vector<16x16xf32>
    %c192 = arith.constant 192 : index
    %c0_54 = arith.constant 0 : index
    %53 = vector.load %arg5[%c192, %c0_54] : memref<256x512xf32, #tpu.memory_space<vmem>>, vector<16x16xf32>
    tpu.vector_store %arg5[%c192, %c0_54], %52 {strides = array<i32>} : memref<256x512xf32, #tpu.memory_space<vmem>>, vector<16x16xf32>,
    %c0_55 = arith.constant 0 : index
    %c13 = arith.constant 13 : index
    %c0_56 = arith.constant 0 : index
    %c0_57 = arith.constant 0 : index
    %54 = vector.load %arg1[%c0_55, %c13, %c0_56, %c0_57] : memref<1x17x17x16xbf16, #tpu.memory_space<vmem>>, vector<1x1x16x16xbf16>
    %55 = vector.shape_cast %54 : vector<1x1x16x16xbf16> to vector<16x16xbf16>
    %56 = arith.extf %55 : vector<16x16xbf16> to vector<16x16xf32>
    %c208 = arith.constant 208 : index
    %c0_58 = arith.constant 0 : index
    %57 = vector.load %arg5[%c208, %c0_58] : memref<256x512xf32, #tpu.memory_space<vmem>>, vector<16x16xf32>
    tpu.vector_store %arg5[%c208, %c0_58], %56 {strides = array<i32>} : memref<256x512xf32, #tpu.memory_space<vmem>>, vector<16x16xf32>,
    %c0_59 = arith.constant 0 : index
    %c14 = arith.constant 14 : index
    %c0_60 = arith.constant 0 : index
    %c0_61 = arith.constant 0 : index
    %58 = vector.load %arg1[%c0_59, %c14, %c0_60, %c0_61] : memref<1x17x17x16xbf16, #tpu.memory_space<vmem>>, vector<1x1x16x16xbf16>
    %59 = vector.shape_cast %58 : vector<1x1x16x16xbf16> to vector<16x16xbf16>
    %60 = arith.extf %59 : vector<16x16xbf16> to vector<16x16xf32>
    %c224 = arith.constant 224 : index
    %c0_62 = arith.constant 0 : index
    %61 = vector.load %arg5[%c224, %c0_62] : memref<256x512xf32, #tpu.memory_space<vmem>>, vector<16x16xf32>
    tpu.vector_store %arg5[%c224, %c0_62], %60 {strides = array<i32>} : memref<256x512xf32, #tpu.memory_space<vmem>>, vector<16x16xf32>,
    %c0_63 = arith.constant 0 : index
    %c15 = arith.constant 15 : index
    %c0_64 = arith.constant 0 : index
    %c0_65 = arith.constant 0 : index
    %62 = vector.load %arg1[%c0_63, %c15, %c0_64, %c0_65] : memref<1x17x17x16xbf16, #tpu.memory_space<vmem>>, vector<1x1x16x16xbf16>
    %63 = vector.shape_cast %62 : vector<1x1x16x16xbf16> to vector<16x16xbf16>
    %64 = arith.extf %63 : vector<16x16xbf16> to vector<16x16xf32>
    %c240 = arith.constant 240 : index
    %c0_66 = arith.constant 0 : index
    %65 = vector.load %arg5[%c240, %c0_66] : memref<256x512xf32, #tpu.memory_space<vmem>>, vector<16x16xf32>
    tpu.vector_store %arg5[%c240, %c0_66], %64 {strides = array<i32>} : memref<256x512xf32, #tpu.memory_space<vmem>>, vector<16x16xf32>,
    %c0_67 = arith.constant 0 : index
    %c0_68 = arith.constant 0 : index
    %c1_69 = arith.constant 1 : index
    %c0_70 = arith.constant 0 : index
    %66 = vector.load %arg1[%c0_67, %c0_68, %c1_69, %c0_70] : memref<1x17x17x16xbf16, #tpu.memory_space<vmem>>, vector<1x1x16x16xbf16>
    %67 = vector.shape_cast %66 : vector<1x1x16x16xbf16> to vector<16x16xbf16>
    %68 = arith.extf %67 : vector<16x16xbf16> to vector<16x16xf32>
    %c0_71 = arith.constant 0 : index
    %c128_72 = arith.constant 128 : index
    %69 = vector.load %arg5[%c0_71, %c128_72] : memref<256x512xf32, #tpu.memory_space<vmem>>, vector<16x16xf32>
    tpu.vector_store %arg5[%c0_71, %c128_72], %68 {strides = array<i32>} : memref<256x512xf32, #tpu.memory_space<vmem>>, vector<16x16xf32>,
    %c0_73 = arith.constant 0 : index
    %c1_74 = arith.constant 1 : index
    %c1_75 = arith.constant 1 : index
    %c0_76 = arith.constant 0 : index
    %70 = vector.load %arg1[%c0_73, %c1_74, %c1_75, %c0_76] : memref<1x17x17x16xbf16, #tpu.memory_space<vmem>>, vector<1x1x16x16xbf16>
    %71 = vector.shape_cast %70 : vector<1x1x16x16xbf16> to vector<16x16xbf16>
    %72 = arith.extf %71 : vector<16x16xbf16> to vector<16x16xf32>
    %c16_77 = arith.constant 16 : index
    %c128_78 = arith.constant 128 : index
    %73 = vector.load %arg5[%c16_77, %c128_78] : memref<256x512xf32, #tpu.memory_space<vmem>>, vector<16x16xf32>
    tpu.vector_store %arg5[%c16_77, %c128_78], %72 {strides = array<i32>} : memref<256x512xf32, #tpu.memory_space<vmem>>, vector<16x16xf32>,
    %c0_79 = arith.constant 0 : index
    %c2_80 = arith.constant 2 : index
    %c1_81 = arith.constant 1 : index
    %c0_82 = arith.constant 0 : index
    %74 = vector.load %arg1[%c0_79, %c2_80, %c1_81, %c0_82] : memref<1x17x17x16xbf16, #tpu.memory_space<vmem>>, vector<1x1x16x16xbf16>
    %75 = vector.shape_cast %74 : vector<1x1x16x16xbf16> to vector<16x16xbf16>
    %76 = arith.extf %75 : vector<16x16xbf16> to vector<16x16xf32>
    %c32_83 = arith.constant 32 : index
    %c128_84 = arith.constant 128 : index
    %77 = vector.load %arg5[%c32_83, %c128_84] : memref<256x512xf32, #tpu.memory_space<vmem>>, vector<16x16xf32>
    tpu.vector_store %arg5[%c32_83, %c128_84], %76 {strides = array<i32>} : memref<256x512xf32, #tpu.memory_space<vmem>>, vector<16x16xf32>,
    %c0_85 = arith.constant 0 : index
    %c3_86 = arith.constant 3 : index
    %c1_87 = arith.constant 1 : index
    %c0_88 = arith.constant 0 : index
    %78 = vector.load %arg1[%c0_85, %c3_86, %c1_87, %c0_88] : memref<1x17x17x16xbf16, #tpu.memory_space<vmem>>, vector<1x1x16x16xbf16>
    %79 = vector.shape_cast %78 : vector<1x1x16x16xbf16> to vector<16x16xbf16>
    %80 = arith.extf %79 : vector<16x16xbf16> to vector<16x16xf32>
    %c48_89 = arith.constant 48 : index
    %c128_90 = arith.constant 128 : index
    %81 = vector.load %arg5[%c48_89, %c128_90] : memref<256x512xf32, #tpu.memory_space<vmem>>, vector<16x16xf32>
    tpu.vector_store %arg5[%c48_89, %c128_90], %80 {strides = array<i32>} : memref<256x512xf32, #tpu.memory_space<vmem>>, vector<16x16xf32>,
    %c0_91 = arith.constant 0 : index
    %c4_92 = arith.constant 4 : index
    %c1_93 = arith.constant 1 : index
    %c0_94 = arith.constant 0 : index
    %82 = vector.load %arg1[%c0_91, %c4_92, %c1_93, %c0_94] : memref<1x17x17x16xbf16, #tpu.memory_space<vmem>>, vector<1x1x16x16xbf16>
    %83 = vector.shape_cast %82 : vector<1x1x16x16xbf16> to vector<16x16xbf16>
    %84 = arith.extf %83 : vector<16x16xbf16> to vector<16x16xf32>
    %c64_95 = arith.constant 64 : index
    %c128_96 = arith.constant 128 : index
    %85 = vector.load %arg5[%c64_95, %c128_96] : memref<256x512xf32, #tpu.memory_space<vmem>>, vector<16x16xf32>
    tpu.vector_store %arg5[%c64_95, %c128_96], %84 {strides = array<i32>} : memref<256x512xf32, #tpu.memory_space<vmem>>, vector<16x16xf32>,
    %c0_97 = arith.constant 0 : index
    %c5_98 = arith.constant 5 : index
    %c1_99 = arith.constant 1 : index
    %c0_100 = arith.constant 0 : index
    %86 = vector.load %arg1[%c0_97, %c5_98, %c1_99, %c0_100] : memref<1x17x17x16xbf16, #tpu.memory_space<vmem>>, vector<1x1x16x16xbf16>
    %87 = vector.shape_cast %86 : vector<1x1x16x16xbf16> to vector<16x16xbf16>
    %88 = arith.extf %87 : vector<16x16xbf16> to vector<16x16xf32>
    %c80_101 = arith.constant 80 : index
    %c128_102 = arith.constant 128 : index
    %89 = vector.load %arg5[%c80_101, %c128_102] : memref<256x512xf32, #tpu.memory_space<vmem>>, vector<16x16xf32>
    tpu.vector_store %arg5[%c80_101, %c128_102], %88 {strides = array<i32>} : memref<256x512xf32, #tpu.memory_space<vmem>>, vector<16x16xf32>,
    %c0_103 = arith.constant 0 : index
    %c6_104 = arith.constant 6 : index
    %c1_105 = arith.constant 1 : index
    %c0_106 = arith.constant 0 : index
    %90 = vector.load %arg1[%c0_103, %c6_104, %c1_105, %c0_106] : memref<1x17x17x16xbf16, #tpu.memory_space<vmem>>, vector<1x1x16x16xbf16>
    %91 = vector.shape_cast %90 : vector<1x1x16x16xbf16> to vector<16x16xbf16>
    %92 = arith.extf %91 : vector<16x16xbf16> to vector<16x16xf32>
    %c96_107 = arith.constant 96 : index
    %c128_108 = arith.constant 128 : index
    %93 = vector.load %arg5[%c96_107, %c128_108] : memref<256x512xf32, #tpu.memory_space<vmem>>, vector<16x16xf32>
    tpu.vector_store %arg5[%c96_107, %c128_108], %92 {strides = array<i32>} : memref<256x512xf32, #tpu.memory_space<vmem>>, vector<16x16xf32>,
    %c0_109 = arith.constant 0 : index
    %c7_110 = arith.constant 7 : index
    %c1_111 = arith.constant 1 : index
    %c0_112 = arith.constant 0 : index
    %94 = vector.load %arg1[%c0_109, %c7_110, %c1_111, %c0_112] : memref<1x17x17x16xbf16, #tpu.memory_space<vmem>>, vector<1x1x16x16xbf16>
    %95 = vector.shape_cast %94 : vector<1x1x16x16xbf16> to vector<16x16xbf16>
    %96 = arith.extf %95 : vector<16x16xbf16> to vector<16x16xf32>
    %c112_113 = arith.constant 112 : index
    %c128_114 = arith.constant 128 : index
    %97 = vector.load %arg5[%c112_113, %c128_114] : memref<256x512xf32, #tpu.memory_space<vmem>>, vector<16x16xf32>
    tpu.vector_store %arg5[%c112_113, %c128_114], %96 {strides = array<i32>} : memref<256x512xf32, #tpu.memory_space<vmem>>, vector<16x16xf32>,
    %c0_115 = arith.constant 0 : index
    %c8_116 = arith.constant 8 : index
    %c1_117 = arith.constant 1 : index
    %c0_118 = arith.constant 0 : index
    %98 = vector.load %arg1[%c0_115, %c8_116, %c1_117, %c0_118] : memref<1x17x17x16xbf16, #tpu.memory_space<vmem>>, vector<1x1x16x16xbf16>
    %99 = vector.shape_cast %98 : vector<1x1x16x16xbf16> to vector<16x16xbf16>
    %100 = arith.extf %99 : vector<16x16xbf16> to vector<16x16xf32>
    %c128_119 = arith.constant 128 : index
    %c128_120 = arith.constant 128 : index
    %101 = vector.load %arg5[%c128_119, %c128_120] : memref<256x512xf32, #tpu.memory_space<vmem>>, vector<16x16xf32>
    tpu.vector_store %arg5[%c128_119, %c128_120], %100 {strides = array<i32>} : memref<256x512xf32, #tpu.memory_space<vmem>>, vector<16x16xf32>,
    %c0_121 = arith.constant 0 : index
    %c9_122 = arith.constant 9 : index
    %c1_123 = arith.constant 1 : index
    %c0_124 = arith.constant 0 : index
    %102 = vector.load %arg1[%c0_121, %c9_122, %c1_123, %c0_124] : memref<1x17x17x16xbf16, #tpu.memory_space<vmem>>, vector<1x1x16x16xbf16>
    %103 = vector.shape_cast %102 : vector<1x1x16x16xbf16> to vector<16x16xbf16>
    %104 = arith.extf %103 : vector<16x16xbf16> to vector<16x16xf32>
    %c144_125 = arith.constant 144 : index
    %c128_126 = arith.constant 128 : index
    %105 = vector.load %arg5[%c144_125, %c128_126] : memref<256x512xf32, #tpu.memory_space<vmem>>, vector<16x16xf32>
    tpu.vector_store %arg5[%c144_125, %c128_126], %104 {strides = array<i32>} : memref<256x512xf32, #tpu.memory_space<vmem>>, vector<16x16xf32>,
    %c0_127 = arith.constant 0 : index
    %c10_128 = arith.constant 10 : index
    %c1_129 = arith.constant 1 : index
    %c0_130 = arith.constant 0 : index
    %106 = vector.load %arg1[%c0_127, %c10_128, %c1_129, %c0_130] : memref<1x17x17x16xbf16, #tpu.memory_space<vmem>>, vector<1x1x16x16xbf16>
    %107 = vector.shape_cast %106 : vector<1x1x16x16xbf16> to vector<16x16xbf16>
    %108 = arith.extf %107 : vector<16x16xbf16> to vector<16x16xf32>
    %c160_131 = arith.constant 160 : index
    %c128_132 = arith.constant 128 : index
    %109 = vector.load %arg5[%c160_131, %c128_132] : memref<256x512xf32, #tpu.memory_space<vmem>>, vector<16x16xf32>
    tpu.vector_store %arg5[%c160_131, %c128_132], %108 {strides = array<i32>} : memref<256x512xf32, #tpu.memory_space<vmem>>, vector<16x16xf32>,
    %c0_133 = arith.constant 0 : index
    %c11_134 = arith.constant 11 : index
    %c1_135 = arith.constant 1 : index
    %c0_136 = arith.constant 0 : index
    %110 = vector.load %arg1[%c0_133, %c11_134, %c1_135, %c0_136] : memref<1x17x17x16xbf16, #tpu.memory_space<vmem>>, vector<1x1x16x16xbf16>
    %111 = vector.shape_cast %110 : vector<1x1x16x16xbf16> to vector<16x16xbf16>
    %112 = arith.extf %111 : vector<16x16xbf16> to vector<16x16xf32>
    %c176_137 = arith.constant 176 : index
    %c128_138 = arith.constant 128 : index
    %113 = vector.load %arg5[%c176_137, %c128_138] : memref<256x512xf32, #tpu.memory_space<vmem>>, vector<16x16xf32>
    tpu.vector_store %arg5[%c176_137, %c128_138], %112 {strides = array<i32>} : memref<256x512xf32, #tpu.memory_space<vmem>>, vector<16x16xf32>,
    %c0_139 = arith.constant 0 : index
    %c12_140 = arith.constant 12 : index
    %c1_141 = arith.constant 1 : index
    %c0_142 = arith.constant 0 : index
    %114 = vector.load %arg1[%c0_139, %c12_140, %c1_141, %c0_142] : memref<1x17x17x16xbf16, #tpu.memory_space<vmem>>, vector<1x1x16x16xbf16>
    %115 = vector.shape_cast %114 : vector<1x1x16x16xbf16> to vector<16x16xbf16>
    %116 = arith.extf %115 : vector<16x16xbf16> to vector<16x16xf32>
    %c192_143 = arith.constant 192 : index
    %c128_144 = arith.constant 128 : index
    %117 = vector.load %arg5[%c192_143, %c128_144] : memref<256x512xf32, #tpu.memory_space<vmem>>, vector<16x16xf32>
    tpu.vector_store %arg5[%c192_143, %c128_144], %116 {strides = array<i32>} : memref<256x512xf32, #tpu.memory_space<vmem>>, vector<16x16xf32>,
    %c0_145 = arith.constant 0 : index
    %c13_146 = arith.constant 13 : index
    %c1_147 = arith.constant 1 : index
    %c0_148 = arith.constant 0 : index
    %118 = vector.load %arg1[%c0_145, %c13_146, %c1_147, %c0_148] : memref<1x17x17x16xbf16, #tpu.memory_space<vmem>>, vector<1x1x16x16xbf16>
    %119 = vector.shape_cast %118 : vector<1x1x16x16xbf16> to vector<16x16xbf16>
    %120 = arith.extf %119 : vector<16x16xbf16> to vector<16x16xf32>
    %c208_149 = arith.constant 208 : index
    %c128_150 = arith.constant 128 : index
    %121 = vector.load %arg5[%c208_149, %c128_150] : memref<256x512xf32, #tpu.memory_space<vmem>>, vector<16x16xf32>
    tpu.vector_store %arg5[%c208_149, %c128_150], %120 {strides = array<i32>} : memref<256x512xf32, #tpu.memory_space<vmem>>, vector<16x16xf32>,
    %c0_151 = arith.constant 0 : index
    %c14_152 = arith.constant 14 : index
    %c1_153 = arith.constant 1 : index
    %c0_154 = arith.constant 0 : index
    %122 = vector.load %arg1[%c0_151, %c14_152, %c1_153, %c0_154] : memref<1x17x17x16xbf16, #tpu.memory_space<vmem>>, vector<1x1x16x16xbf16>
    %123 = vector.shape_cast %122 : vector<1x1x16x16xbf16> to vector<16x16xbf16>
    %124 = arith.extf %123 : vector<16x16xbf16> to vector<16x16xf32>
    %c224_155 = arith.constant 224 : index
    %c128_156 = arith.constant 128 : index
    %125 = vector.load %arg5[%c224_155, %c128_156] : memref<256x512xf32, #tpu.memory_space<vmem>>, vector<16x16xf32>
    tpu.vector_store %arg5[%c224_155, %c128_156], %124 {strides = array<i32>} : memref<256x512xf32, #tpu.memory_space<vmem>>, vector<16x16xf32>,
    %c0_157 = arith.constant 0 : index
    %c15_158 = arith.constant 15 : index
    %c1_159 = arith.constant 1 : index
    %c0_160 = arith.constant 0 : index
    %126 = vector.load %arg1[%c0_157, %c15_158, %c1_159, %c0_160] : memref<1x17x17x16xbf16, #tpu.memory_space<vmem>>, vector<1x1x16x16xbf16>
    %127 = vector.shape_cast %126 : vector<1x1x16x16xbf16> to vector<16x16xbf16>
    %128 = arith.extf %127 : vector<16x16xbf16> to vector<16x16xf32>
    %c240_161 = arith.constant 240 : index
    %c128_162 = arith.constant 128 : index
    %129 = vector.load %arg5[%c240_161, %c128_162] : memref<256x512xf32, #tpu.memory_space<vmem>>, vector<16x16xf32>
    tpu.vector_store %arg5[%c240_161, %c128_162], %128 {strides = array<i32>} : memref<256x512xf32, #tpu.memory_space<vmem>>, vector<16x16xf32>,
    %c0_163 = arith.constant 0 : index
    %c1_164 = arith.constant 1 : index
    %c0_165 = arith.constant 0 : index
    %c0_166 = arith.constant 0 : index
    %130 = vector.load %arg1[%c0_163, %c1_164, %c0_165, %c0_166] : memref<1x17x17x16xbf16, #tpu.memory_space<vmem>>, vector<1x1x16x16xbf16>
    %131 = vector.shape_cast %130 : vector<1x1x16x16xbf16> to vector<16x16xbf16>
    %132 = arith.extf %131 : vector<16x16xbf16> to vector<16x16xf32>
    %c0_167 = arith.constant 0 : index
    %c256 = arith.constant 256 : index
    %133 = vector.load %arg5[%c0_167, %c256] : memref<256x512xf32, #tpu.memory_space<vmem>>, vector<16x16xf32>
    tpu.vector_store %arg5[%c0_167, %c256], %132 {strides = array<i32>} : memref<256x512xf32, #tpu.memory_space<vmem>>, vector<16x16xf32>,
    %c0_168 = arith.constant 0 : index
    %c2_169 = arith.constant 2 : index
    %c0_170 = arith.constant 0 : index
    %c0_171 = arith.constant 0 : index
    %134 = vector.load %arg1[%c0_168, %c2_169, %c0_170, %c0_171] : memref<1x17x17x16xbf16, #tpu.memory_space<vmem>>, vector<1x1x16x16xbf16>
    %135 = vector.shape_cast %134 : vector<1x1x16x16xbf16> to vector<16x16xbf16>
    %136 = arith.extf %135 : vector<16x16xbf16> to vector<16x16xf32>
    %c16_172 = arith.constant 16 : index
    %c256_173 = arith.constant 256 : index
    %137 = vector.load %arg5[%c16_172, %c256_173] : memref<256x512xf32, #tpu.memory_space<vmem>>, vector<16x16xf32>
    tpu.vector_store %arg5[%c16_172, %c256_173], %136 {strides = array<i32>} : memref<256x512xf32, #tpu.memory_space<vmem>>, vector<16x16xf32>,
    %c0_174 = arith.constant 0 : index
    %c3_175 = arith.constant 3 : index
    %c0_176 = arith.constant 0 : index
    %c0_177 = arith.constant 0 : index
    %138 = vector.load %arg1[%c0_174, %c3_175, %c0_176, %c0_177] : memref<1x17x17x16xbf16, #tpu.memory_space<vmem>>, vector<1x1x16x16xbf16>
    %139 = vector.shape_cast %138 : vector<1x1x16x16xbf16> to vector<16x16xbf16>
    %140 = arith.extf %139 : vector<16x16xbf16> to vector<16x16xf32>
    %c32_178 = arith.constant 32 : index
    %c256_179 = arith.constant 256 : index
    %141 = vector.load %arg5[%c32_178, %c256_179] : memref<256x512xf32, #tpu.memory_space<vmem>>, vector<16x16xf32>
    tpu.vector_store %arg5[%c32_178, %c256_179], %140 {strides = array<i32>} : memref<256x512xf32, #tpu.memory_space<vmem>>, vector<16x16xf32>,
    %c0_180 = arith.constant 0 : index
    %c4_181 = arith.constant 4 : index
    %c0_182 = arith.constant 0 : index
    %c0_183 = arith.constant 0 : index
    %142 = vector.load %arg1[%c0_180, %c4_181, %c0_182, %c0_183] : memref<1x17x17x16xbf16, #tpu.memory_space<vmem>>, vector<1x1x16x16xbf16>
    %143 = vector.shape_cast %142 : vector<1x1x16x16xbf16> to vector<16x16xbf16>
    %144 = arith.extf %143 : vector<16x16xbf16> to vector<16x16xf32>
    %c48_184 = arith.constant 48 : index
    %c256_185 = arith.constant 256 : index
    %145 = vector.load %arg5[%c48_184, %c256_185] : memref<256x512xf32, #tpu.memory_space<vmem>>, vector<16x16xf32>
    tpu.vector_store %arg5[%c48_184, %c256_185], %144 {strides = array<i32>} : memref<256x512xf32, #tpu.memory_space<vmem>>, vector<16x16xf32>,
    %c0_186 = arith.constant 0 : index
    %c5_187 = arith.constant 5 : index
    %c0_188 = arith.constant 0 : index
    %c0_189 = arith.constant 0 : index
    %146 = vector.load %arg1[%c0_186, %c5_187, %c0_188, %c0_189] : memref<1x17x17x16xbf16, #tpu.memory_space<vmem>>, vector<1x1x16x16xbf16>
    %147 = vector.shape_cast %146 : vector<1x1x16x16xbf16> to vector<16x16xbf16>
    %148 = arith.extf %147 : vector<16x16xbf16> to vector<16x16xf32>
    %c64_190 = arith.constant 64 : index
    %c256_191 = arith.constant 256 : index
    %149 = vector.load %arg5[%c64_190, %c256_191] : memref<256x512xf32, #tpu.memory_space<vmem>>, vector<16x16xf32>
    tpu.vector_store %arg5[%c64_190, %c256_191], %148 {strides = array<i32>} : memref<256x512xf32, #tpu.memory_space<vmem>>, vector<16x16xf32>,
    %c0_192 = arith.constant 0 : index
    %c6_193 = arith.constant 6 : index
    %c0_194 = arith.constant 0 : index
    %c0_195 = arith.constant 0 : index
    %150 = vector.load %arg1[%c0_192, %c6_193, %c0_194, %c0_195] : memref<1x17x17x16xbf16, #tpu.memory_space<vmem>>, vector<1x1x16x16xbf16>
    %151 = vector.shape_cast %150 : vector<1x1x16x16xbf16> to vector<16x16xbf16>
    %152 = arith.extf %151 : vector<16x16xbf16> to vector<16x16xf32>
    %c80_196 = arith.constant 80 : index
    %c256_197 = arith.constant 256 : index
    %153 = vector.load %arg5[%c80_196, %c256_197] : memref<256x512xf32, #tpu.memory_space<vmem>>, vector<16x16xf32>
    tpu.vector_store %arg5[%c80_196, %c256_197], %152 {strides = array<i32>} : memref<256x512xf32, #tpu.memory_space<vmem>>, vector<16x16xf32>,
    %c0_198 = arith.constant 0 : index
    %c7_199 = arith.constant 7 : index
    %c0_200 = arith.constant 0 : index
    %c0_201 = arith.constant 0 : index
    %154 = vector.load %arg1[%c0_198, %c7_199, %c0_200, %c0_201] : memref<1x17x17x16xbf16, #tpu.memory_space<vmem>>, vector<1x1x16x16xbf16>
    %155 = vector.shape_cast %154 : vector<1x1x16x16xbf16> to vector<16x16xbf16>
    %156 = arith.extf %155 : vector<16x16xbf16> to vector<16x16xf32>
    %c96_202 = arith.constant 96 : index
    %c256_203 = arith.constant 256 : index
    %157 = vector.load %arg5[%c96_202, %c256_203] : memref<256x512xf32, #tpu.memory_space<vmem>>, vector<16x16xf32>
    tpu.vector_store %arg5[%c96_202, %c256_203], %156 {strides = array<i32>} : memref<256x512xf32, #tpu.memory_space<vmem>>, vector<16x16xf32>,
    %c0_204 = arith.constant 0 : index
    %c8_205 = arith.constant 8 : index
    %c0_206 = arith.constant 0 : index
    %c0_207 = arith.constant 0 : index
    %158 = vector.load %arg1[%c0_204, %c8_205, %c0_206, %c0_207] : memref<1x17x17x16xbf16, #tpu.memory_space<vmem>>, vector<1x1x16x16xbf16>
    %159 = vector.shape_cast %158 : vector<1x1x16x16xbf16> to vector<16x16xbf16>
    %160 = arith.extf %159 : vector<16x16xbf16> to vector<16x16xf32>
    %c112_208 = arith.constant 112 : index
    %c256_209 = arith.constant 256 : index
    %161 = vector.load %arg5[%c112_208, %c256_209] : memref<256x512xf32, #tpu.memory_space<vmem>>, vector<16x16xf32>
    tpu.vector_store %arg5[%c112_208, %c256_209], %160 {strides = array<i32>} : memref<256x512xf32, #tpu.memory_space<vmem>>, vector<16x16xf32>,
    %c0_210 = arith.constant 0 : index
    %c9_211 = arith.constant 9 : index
    %c0_212 = arith.constant 0 : index
    %c0_213 = arith.constant 0 : index
    %162 = vector.load %arg1[%c0_210, %c9_211, %c0_212, %c0_213] : memref<1x17x17x16xbf16, #tpu.memory_space<vmem>>, vector<1x1x16x16xbf16>
    %163 = vector.shape_cast %162 : vector<1x1x16x16xbf16> to vector<16x16xbf16>
    %164 = arith.extf %163 : vector<16x16xbf16> to vector<16x16xf32>
    %c128_214 = arith.constant 128 : index
    %c256_215 = arith.constant 256 : index
    %165 = vector.load %arg5[%c128_214, %c256_215] : memref<256x512xf32, #tpu.memory_space<vmem>>, vector<16x16xf32>
    tpu.vector_store %arg5[%c128_214, %c256_215], %164 {strides = array<i32>} : memref<256x512xf32, #tpu.memory_space<vmem>>, vector<16x16xf32>,
    %c0_216 = arith.constant 0 : index
    %c10_217 = arith.constant 10 : index
    %c0_218 = arith.constant 0 : index
    %c0_219 = arith.constant 0 : index
    %166 = vector.load %arg1[%c0_216, %c10_217, %c0_218, %c0_219] : memref<1x17x17x16xbf16, #tpu.memory_space<vmem>>, vector<1x1x16x16xbf16>
    %167 = vector.shape_cast %166 : vector<1x1x16x16xbf16> to vector<16x16xbf16>
    %168 = arith.extf %167 : vector<16x16xbf16> to vector<16x16xf32>
    %c144_220 = arith.constant 144 : index
    %c256_221 = arith.constant 256 : index
    %169 = vector.load %arg5[%c144_220, %c256_221] : memref<256x512xf32, #tpu.memory_space<vmem>>, vector<16x16xf32>
    tpu.vector_store %arg5[%c144_220, %c256_221], %168 {strides = array<i32>} : memref<256x512xf32, #tpu.memory_space<vmem>>, vector<16x16xf32>,
    %c0_222 = arith.constant 0 : index
    %c11_223 = arith.constant 11 : index
    %c0_224 = arith.constant 0 : index
    %c0_225 = arith.constant 0 : index
    %170 = vector.load %arg1[%c0_222, %c11_223, %c0_224, %c0_225] : memref<1x17x17x16xbf16, #tpu.memory_space<vmem>>, vector<1x1x16x16xbf16>
    %171 = vector.shape_cast %170 : vector<1x1x16x16xbf16> to vector<16x16xbf16>
    %172 = arith.extf %171 : vector<16x16xbf16> to vector<16x16xf32>
    %c160_226 = arith.constant 160 : index
    %c256_227 = arith.constant 256 : index
    %173 = vector.load %arg5[%c160_226, %c256_227] : memref<256x512xf32, #tpu.memory_space<vmem>>, vector<16x16xf32>
    tpu.vector_store %arg5[%c160_226, %c256_227], %172 {strides = array<i32>} : memref<256x512xf32, #tpu.memory_space<vmem>>, vector<16x16xf32>,
    %c0_228 = arith.constant 0 : index
    %c12_229 = arith.constant 12 : index
    %c0_230 = arith.constant 0 : index
    %c0_231 = arith.constant 0 : index
    %174 = vector.load %arg1[%c0_228, %c12_229, %c0_230, %c0_231] : memref<1x17x17x16xbf16, #tpu.memory_space<vmem>>, vector<1x1x16x16xbf16>
    %175 = vector.shape_cast %174 : vector<1x1x16x16xbf16> to vector<16x16xbf16>
    %176 = arith.extf %175 : vector<16x16xbf16> to vector<16x16xf32>
    %c176_232 = arith.constant 176 : index
    %c256_233 = arith.constant 256 : index
    %177 = vector.load %arg5[%c176_232, %c256_233] : memref<256x512xf32, #tpu.memory_space<vmem>>, vector<16x16xf32>
    tpu.vector_store %arg5[%c176_232, %c256_233], %176 {strides = array<i32>} : memref<256x512xf32, #tpu.memory_space<vmem>>, vector<16x16xf32>,
    %c0_234 = arith.constant 0 : index
    %c13_235 = arith.constant 13 : index
    %c0_236 = arith.constant 0 : index
    %c0_237 = arith.constant 0 : index
    %178 = vector.load %arg1[%c0_234, %c13_235, %c0_236, %c0_237] : memref<1x17x17x16xbf16, #tpu.memory_space<vmem>>, vector<1x1x16x16xbf16>
    %179 = vector.shape_cast %178 : vector<1x1x16x16xbf16> to vector<16x16xbf16>
    %180 = arith.extf %179 : vector<16x16xbf16> to vector<16x16xf32>
    %c192_238 = arith.constant 192 : index
    %c256_239 = arith.constant 256 : index
    %181 = vector.load %arg5[%c192_238, %c256_239] : memref<256x512xf32, #tpu.memory_space<vmem>>, vector<16x16xf32>
    tpu.vector_store %arg5[%c192_238, %c256_239], %180 {strides = array<i32>} : memref<256x512xf32, #tpu.memory_space<vmem>>, vector<16x16xf32>,
    %c0_240 = arith.constant 0 : index
    %c14_241 = arith.constant 14 : index
    %c0_242 = arith.constant 0 : index
    %c0_243 = arith.constant 0 : index
    %182 = vector.load %arg1[%c0_240, %c14_241, %c0_242, %c0_243] : memref<1x17x17x16xbf16, #tpu.memory_space<vmem>>, vector<1x1x16x16xbf16>
    %183 = vector.shape_cast %182 : vector<1x1x16x16xbf16> to vector<16x16xbf16>
    %184 = arith.extf %183 : vector<16x16xbf16> to vector<16x16xf32>
    %c208_244 = arith.constant 208 : index
    %c256_245 = arith.constant 256 : index
    %185 = vector.load %arg5[%c208_244, %c256_245] : memref<256x512xf32, #tpu.memory_space<vmem>>, vector<16x16xf32>
    tpu.vector_store %arg5[%c208_244, %c256_245], %184 {strides = array<i32>} : memref<256x512xf32, #tpu.memory_space<vmem>>, vector<16x16xf32>,
    %c0_246 = arith.constant 0 : index
    %c15_247 = arith.constant 15 : index
    %c0_248 = arith.constant 0 : index
    %c0_249 = arith.constant 0 : index
    %186 = vector.load %arg1[%c0_246, %c15_247, %c0_248, %c0_249] : memref<1x17x17x16xbf16, #tpu.memory_space<vmem>>, vector<1x1x16x16xbf16>
    %187 = vector.shape_cast %186 : vector<1x1x16x16xbf16> to vector<16x16xbf16>
    %188 = arith.extf %187 : vector<16x16xbf16> to vector<16x16xf32>
    %c224_250 = arith.constant 224 : index
    %c256_251 = arith.constant 256 : index
    %189 = vector.load %arg5[%c224_250, %c256_251] : memref<256x512xf32, #tpu.memory_space<vmem>>, vector<16x16xf32>
    tpu.vector_store %arg5[%c224_250, %c256_251], %188 {strides = array<i32>} : memref<256x512xf32, #tpu.memory_space<vmem>>, vector<16x16xf32>,
    %c0_252 = arith.constant 0 : index
    %c16_253 = arith.constant 16 : index
    %c0_254 = arith.constant 0 : index
    %c0_255 = arith.constant 0 : index
    %190 = vector.load %arg1[%c0_252, %c16_253, %c0_254, %c0_255] : memref<1x17x17x16xbf16, #tpu.memory_space<vmem>>, vector<1x1x16x16xbf16>
    %191 = vector.shape_cast %190 : vector<1x1x16x16xbf16> to vector<16x16xbf16>
    %192 = arith.extf %191 : vector<16x16xbf16> to vector<16x16xf32>
    %c240_256 = arith.constant 240 : index
    %c256_257 = arith.constant 256 : index
    %193 = vector.load %arg5[%c240_256, %c256_257] : memref<256x512xf32, #tpu.memory_space<vmem>>, vector<16x16xf32>
    tpu.vector_store %arg5[%c240_256, %c256_257], %192 {strides = array<i32>} : memref<256x512xf32, #tpu.memory_space<vmem>>, vector<16x16xf32>,
    %c0_258 = arith.constant 0 : index
    %c1_259 = arith.constant 1 : index
    %c1_260 = arith.constant 1 : index
    %c0_261 = arith.constant 0 : index
    %194 = vector.load %arg1[%c0_258, %c1_259, %c1_260, %c0_261] : memref<1x17x17x16xbf16, #tpu.memory_space<vmem>>, vector<1x1x16x16xbf16>
    %195 = vector.shape_cast %194 : vector<1x1x16x16xbf16> to vector<16x16xbf16>
    %196 = arith.extf %195 : vector<16x16xbf16> to vector<16x16xf32>
    %c0_262 = arith.constant 0 : index
    %c384 = arith.constant 384 : index
    %197 = vector.load %arg5[%c0_262, %c384] : memref<256x512xf32, #tpu.memory_space<vmem>>, vector<16x16xf32>
    tpu.vector_store %arg5[%c0_262, %c384], %196 {strides = array<i32>} : memref<256x512xf32, #tpu.memory_space<vmem>>, vector<16x16xf32>,
    %c0_263 = arith.constant 0 : index
    %c2_264 = arith.constant 2 : index
    %c1_265 = arith.constant 1 : index
    %c0_266 = arith.constant 0 : index
    %198 = vector.load %arg1[%c0_263, %c2_264, %c1_265, %c0_266] : memref<1x17x17x16xbf16, #tpu.memory_space<vmem>>, vector<1x1x16x16xbf16>
    %199 = vector.shape_cast %198 : vector<1x1x16x16xbf16> to vector<16x16xbf16>
    %200 = arith.extf %199 : vector<16x16xbf16> to vector<16x16xf32>
    %c16_267 = arith.constant 16 : index
    %c384_268 = arith.constant 384 : index
    %201 = vector.load %arg5[%c16_267, %c384_268] : memref<256x512xf32, #tpu.memory_space<vmem>>, vector<16x16xf32>
    tpu.vector_store %arg5[%c16_267, %c384_268], %200 {strides = array<i32>} : memref<256x512xf32, #tpu.memory_space<vmem>>, vector<16x16xf32>,
    %c0_269 = arith.constant 0 : index
    %c3_270 = arith.constant 3 : index
    %c1_271 = arith.constant 1 : index
    %c0_272 = arith.constant 0 : index
    %202 = vector.load %arg1[%c0_269, %c3_270, %c1_271, %c0_272] : memref<1x17x17x16xbf16, #tpu.memory_space<vmem>>, vector<1x1x16x16xbf16>
    %203 = vector.shape_cast %202 : vector<1x1x16x16xbf16> to vector<16x16xbf16>
    %204 = arith.extf %203 : vector<16x16xbf16> to vector<16x16xf32>
    %c32_273 = arith.constant 32 : index
    %c384_274 = arith.constant 384 : index
    %205 = vector.load %arg5[%c32_273, %c384_274] : memref<256x512xf32, #tpu.memory_space<vmem>>, vector<16x16xf32>
    tpu.vector_store %arg5[%c32_273, %c384_274], %204 {strides = array<i32>} : memref<256x512xf32, #tpu.memory_space<vmem>>, vector<16x16xf32>,
    %c0_275 = arith.constant 0 : index
    %c4_276 = arith.constant 4 : index
    %c1_277 = arith.constant 1 : index
    %c0_278 = arith.constant 0 : index
    %206 = vector.load %arg1[%c0_275, %c4_276, %c1_277, %c0_278] : memref<1x17x17x16xbf16, #tpu.memory_space<vmem>>, vector<1x1x16x16xbf16>
    %207 = vector.shape_cast %206 : vector<1x1x16x16xbf16> to vector<16x16xbf16>
    %208 = arith.extf %207 : vector<16x16xbf16> to vector<16x16xf32>
    %c48_279 = arith.constant 48 : index
    %c384_280 = arith.constant 384 : index
    %209 = vector.load %arg5[%c48_279, %c384_280] : memref<256x512xf32, #tpu.memory_space<vmem>>, vector<16x16xf32>
    tpu.vector_store %arg5[%c48_279, %c384_280], %208 {strides = array<i32>} : memref<256x512xf32, #tpu.memory_space<vmem>>, vector<16x16xf32>,
    %c0_281 = arith.constant 0 : index
    %c5_282 = arith.constant 5 : index
    %c1_283 = arith.constant 1 : index
    %c0_284 = arith.constant 0 : index
    %210 = vector.load %arg1[%c0_281, %c5_282, %c1_283, %c0_284] : memref<1x17x17x16xbf16, #tpu.memory_space<vmem>>, vector<1x1x16x16xbf16>
    %211 = vector.shape_cast %210 : vector<1x1x16x16xbf16> to vector<16x16xbf16>
    %212 = arith.extf %211 : vector<16x16xbf16> to vector<16x16xf32>
    %c64_285 = arith.constant 64 : index
    %c384_286 = arith.constant 384 : index
    %213 = vector.load %arg5[%c64_285, %c384_286] : memref<256x512xf32, #tpu.memory_space<vmem>>, vector<16x16xf32>
    tpu.vector_store %arg5[%c64_285, %c384_286], %212 {strides = array<i32>} : memref<256x512xf32, #tpu.memory_space<vmem>>, vector<16x16xf32>,
    %c0_287 = arith.constant 0 : index
    %c6_288 = arith.constant 6 : index
    %c1_289 = arith.constant 1 : index
    %c0_290 = arith.constant 0 : index
    %214 = vector.load %arg1[%c0_287, %c6_288, %c1_289, %c0_290] : memref<1x17x17x16xbf16, #tpu.memory_space<vmem>>, vector<1x1x16x16xbf16>
    %215 = vector.shape_cast %214 : vector<1x1x16x16xbf16> to vector<16x16xbf16>
    %216 = arith.extf %215 : vector<16x16xbf16> to vector<16x16xf32>
    %c80_291 = arith.constant 80 : index
    %c384_292 = arith.constant 384 : index
    %217 = vector.load %arg5[%c80_291, %c384_292] : memref<256x512xf32, #tpu.memory_space<vmem>>, vector<16x16xf32>
    tpu.vector_store %arg5[%c80_291, %c384_292], %216 {strides = array<i32>} : memref<256x512xf32, #tpu.memory_space<vmem>>, vector<16x16xf32>,
    %c0_293 = arith.constant 0 : index
    %c7_294 = arith.constant 7 : index
    %c1_295 = arith.constant 1 : index
    %c0_296 = arith.constant 0 : index
    %218 = vector.load %arg1[%c0_293, %c7_294, %c1_295, %c0_296] : memref<1x17x17x16xbf16, #tpu.memory_space<vmem>>, vector<1x1x16x16xbf16>
    %219 = vector.shape_cast %218 : vector<1x1x16x16xbf16> to vector<16x16xbf16>
    %220 = arith.extf %219 : vector<16x16xbf16> to vector<16x16xf32>
    %c96_297 = arith.constant 96 : index
    %c384_298 = arith.constant 384 : index
    %221 = vector.load %arg5[%c96_297, %c384_298] : memref<256x512xf32, #tpu.memory_space<vmem>>, vector<16x16xf32>
    tpu.vector_store %arg5[%c96_297, %c384_298], %220 {strides = array<i32>} : memref<256x512xf32, #tpu.memory_space<vmem>>, vector<16x16xf32>,
    %c0_299 = arith.constant 0 : index
    %c8_300 = arith.constant 8 : index
    %c1_301 = arith.constant 1 : index
    %c0_302 = arith.constant 0 : index
    %222 = vector.load %arg1[%c0_299, %c8_300, %c1_301, %c0_302] : memref<1x17x17x16xbf16, #tpu.memory_space<vmem>>, vector<1x1x16x16xbf16>
    %223 = vector.shape_cast %222 : vector<1x1x16x16xbf16> to vector<16x16xbf16>
    %224 = arith.extf %223 : vector<16x16xbf16> to vector<16x16xf32>
    %c112_303 = arith.constant 112 : index
    %c384_304 = arith.constant 384 : index
    %225 = vector.load %arg5[%c112_303, %c384_304] : memref<256x512xf32, #tpu.memory_space<vmem>>, vector<16x16xf32>
    tpu.vector_store %arg5[%c112_303, %c384_304], %224 {strides = array<i32>} : memref<256x512xf32, #tpu.memory_space<vmem>>, vector<16x16xf32>,
    %c0_305 = arith.constant 0 : index
    %c9_306 = arith.constant 9 : index
    %c1_307 = arith.constant 1 : index
    %c0_308 = arith.constant 0 : index
    %226 = vector.load %arg1[%c0_305, %c9_306, %c1_307, %c0_308] : memref<1x17x17x16xbf16, #tpu.memory_space<vmem>>, vector<1x1x16x16xbf16>
    %227 = vector.shape_cast %226 : vector<1x1x16x16xbf16> to vector<16x16xbf16>
    %228 = arith.extf %227 : vector<16x16xbf16> to vector<16x16xf32>
    %c128_309 = arith.constant 128 : index
    %c384_310 = arith.constant 384 : index
    %229 = vector.load %arg5[%c128_309, %c384_310] : memref<256x512xf32, #tpu.memory_space<vmem>>, vector<16x16xf32>
    tpu.vector_store %arg5[%c128_309, %c384_310], %228 {strides = array<i32>} : memref<256x512xf32, #tpu.memory_space<vmem>>, vector<16x16xf32>,
    %c0_311 = arith.constant 0 : index
    %c10_312 = arith.constant 10 : index
    %c1_313 = arith.constant 1 : index
    %c0_314 = arith.constant 0 : index
    %230 = vector.load %arg1[%c0_311, %c10_312, %c1_313, %c0_314] : memref<1x17x17x16xbf16, #tpu.memory_space<vmem>>, vector<1x1x16x16xbf16>
    %231 = vector.shape_cast %230 : vector<1x1x16x16xbf16> to vector<16x16xbf16>
    %232 = arith.extf %231 : vector<16x16xbf16> to vector<16x16xf32>
    %c144_315 = arith.constant 144 : index
    %c384_316 = arith.constant 384 : index
    %233 = vector.load %arg5[%c144_315, %c384_316] : memref<256x512xf32, #tpu.memory_space<vmem>>, vector<16x16xf32>
    tpu.vector_store %arg5[%c144_315, %c384_316], %232 {strides = array<i32>} : memref<256x512xf32, #tpu.memory_space<vmem>>, vector<16x16xf32>,
    %c0_317 = arith.constant 0 : index
    %c11_318 = arith.constant 11 : index
    %c1_319 = arith.constant 1 : index
    %c0_320 = arith.constant 0 : index
    %234 = vector.load %arg1[%c0_317, %c11_318, %c1_319, %c0_320] : memref<1x17x17x16xbf16, #tpu.memory_space<vmem>>, vector<1x1x16x16xbf16>
    %235 = vector.shape_cast %234 : vector<1x1x16x16xbf16> to vector<16x16xbf16>
    %236 = arith.extf %235 : vector<16x16xbf16> to vector<16x16xf32>
    %c160_321 = arith.constant 160 : index
    %c384_322 = arith.constant 384 : index
    %237 = vector.load %arg5[%c160_321, %c384_322] : memref<256x512xf32, #tpu.memory_space<vmem>>, vector<16x16xf32>
    tpu.vector_store %arg5[%c160_321, %c384_322], %236 {strides = array<i32>} : memref<256x512xf32, #tpu.memory_space<vmem>>, vector<16x16xf32>,
    %c0_323 = arith.constant 0 : index
    %c12_324 = arith.constant 12 : index
    %c1_325 = arith.constant 1 : index
    %c0_326 = arith.constant 0 : index
    %238 = vector.load %arg1[%c0_323, %c12_324, %c1_325, %c0_326] : memref<1x17x17x16xbf16, #tpu.memory_space<vmem>>, vector<1x1x16x16xbf16>
    %239 = vector.shape_cast %238 : vector<1x1x16x16xbf16> to vector<16x16xbf16>
    %240 = arith.extf %239 : vector<16x16xbf16> to vector<16x16xf32>
    %c176_327 = arith.constant 176 : index
    %c384_328 = arith.constant 384 : index
    %241 = vector.load %arg5[%c176_327, %c384_328] : memref<256x512xf32, #tpu.memory_space<vmem>>, vector<16x16xf32>
    tpu.vector_store %arg5[%c176_327, %c384_328], %240 {strides = array<i32>} : memref<256x512xf32, #tpu.memory_space<vmem>>, vector<16x16xf32>,
    %c0_329 = arith.constant 0 : index
    %c13_330 = arith.constant 13 : index
    %c1_331 = arith.constant 1 : index
    %c0_332 = arith.constant 0 : index
    %242 = vector.load %arg1[%c0_329, %c13_330, %c1_331, %c0_332] : memref<1x17x17x16xbf16, #tpu.memory_space<vmem>>, vector<1x1x16x16xbf16>
    %243 = vector.shape_cast %242 : vector<1x1x16x16xbf16> to vector<16x16xbf16>
    %244 = arith.extf %243 : vector<16x16xbf16> to vector<16x16xf32>
    %c192_333 = arith.constant 192 : index
    %c384_334 = arith.constant 384 : index
    %245 = vector.load %arg5[%c192_333, %c384_334] : memref<256x512xf32, #tpu.memory_space<vmem>>, vector<16x16xf32>
    tpu.vector_store %arg5[%c192_333, %c384_334], %244 {strides = array<i32>} : memref<256x512xf32, #tpu.memory_space<vmem>>, vector<16x16xf32>,
    %c0_335 = arith.constant 0 : index
    %c14_336 = arith.constant 14 : index
    %c1_337 = arith.constant 1 : index
    %c0_338 = arith.constant 0 : index
    %246 = vector.load %arg1[%c0_335, %c14_336, %c1_337, %c0_338] : memref<1x17x17x16xbf16, #tpu.memory_space<vmem>>, vector<1x1x16x16xbf16>
    %247 = vector.shape_cast %246 : vector<1x1x16x16xbf16> to vector<16x16xbf16>
    %248 = arith.extf %247 : vector<16x16xbf16> to vector<16x16xf32>
    %c208_339 = arith.constant 208 : index
    %c384_340 = arith.constant 384 : index
    %249 = vector.load %arg5[%c208_339, %c384_340] : memref<256x512xf32, #tpu.memory_space<vmem>>, vector<16x16xf32>
    tpu.vector_store %arg5[%c208_339, %c384_340], %248 {strides = array<i32>} : memref<256x512xf32, #tpu.memory_space<vmem>>, vector<16x16xf32>,
    %c0_341 = arith.constant 0 : index
    %c15_342 = arith.constant 15 : index
    %c1_343 = arith.constant 1 : index
    %c0_344 = arith.constant 0 : index
    %250 = vector.load %arg1[%c0_341, %c15_342, %c1_343, %c0_344] : memref<1x17x17x16xbf16, #tpu.memory_space<vmem>>, vector<1x1x16x16xbf16>
    %251 = vector.shape_cast %250 : vector<1x1x16x16xbf16> to vector<16x16xbf16>
    %252 = arith.extf %251 : vector<16x16xbf16> to vector<16x16xf32>
    %c224_345 = arith.constant 224 : index
    %c384_346 = arith.constant 384 : index
    %253 = vector.load %arg5[%c224_345, %c384_346] : memref<256x512xf32, #tpu.memory_space<vmem>>, vector<16x16xf32>
    tpu.vector_store %arg5[%c224_345, %c384_346], %252 {strides = array<i32>} : memref<256x512xf32, #tpu.memory_space<vmem>>, vector<16x16xf32>,
    %c0_347 = arith.constant 0 : index
    %c16_348 = arith.constant 16 : index
    %c1_349 = arith.constant 1 : index
    %c0_350 = arith.constant 0 : index
    %254 = vector.load %arg1[%c0_347, %c16_348, %c1_349, %c0_350] : memref<1x17x17x16xbf16, #tpu.memory_space<vmem>>, vector<1x1x16x16xbf16>
    %255 = vector.shape_cast %254 : vector<1x1x16x16xbf16> to vector<16x16xbf16>
    %256 = arith.extf %255 : vector<16x16xbf16> to vector<16x16xf32>
    %c240_351 = arith.constant 240 : index
    %c384_352 = arith.constant 384 : index
    %257 = vector.load %arg5[%c240_351, %c384_352] : memref<256x512xf32, #tpu.memory_space<vmem>>, vector<16x16xf32>
    tpu.vector_store %arg5[%c240_351, %c384_352], %256 {strides = array<i32>} : memref<256x512xf32, #tpu.memory_space<vmem>>, vector<16x16xf32>,
    %c0_353 = arith.constant 0 : index
    %c0_354 = arith.constant 0 : index
    %258 = vector.load %arg5[%c0_353, %c0_354] : memref<256x512xf32, #tpu.memory_space<vmem>>, vector<256x512xf32>
    %259 = arith.truncf %258 : vector<256x512xf32> to vector<256x512xbf16>
    %c0_355 = arith.constant 0 : index
    %c0_356 = arith.constant 0 : index
    %260 = vector.load %arg2[%c0_355, %c0_356] : memref<512x128xbf16, #tpu.memory_space<vmem>>, vector<512x128xbf16>
    %cst_357 = arith.constant dense<0.000000e+00> : vector<256x128xf32>
    %261 = tpu.matmul %259, %260, %cst_357 {dimension_numbers = #tpu.dot_dimension_numbers<[1], [0], [0], [1], [0, 0, 1, 1], [], []>} : vector<256x512xbf16>, vector<512x128xbf16>, vector<256x128xf32> -> vector<256x128xf32>
    %c0_358 = arith.constant 0 : index
    %c0_359 = arith.constant 0 : index
    %262 = vector.load %arg3[%c0_358, %c0_359] : memref<1x128xf32, #tpu.memory_space<vmem>>, vector<1x128xf32>
    %263 = vector.broadcast %262 : vector<1x128xf32> to vector<256x128xf32>
    %264 = arith.addf %261, %263 : vector<256x128xf32>
    %cst_360 = arith.constant 0.000000e+00 : f32
    %265 = vector.broadcast %cst_360 : f32 to vector<256x128xf32>
    %266 = arith.cmpf oge, %264, %265 : vector<256x128xf32>
    %cst_361 = arith.constant 2.000000e-01 : f32
    %267 = vector.broadcast %cst_361 : f32 to vector<256x128xf32>
    %268 = arith.mulf %267, %264 : vector<256x128xf32>
    %269 = arith.select %266, %264, %268 : vector<256x128xi1>, vector<256x128xf32>
    %270 = arith.truncf %269 : vector<256x128xf32> to vector<256x128xbf16>
    %c0_362 = arith.constant 0 : index
    %c0_363 = arith.constant 0 : index
    %c0_364 = arith.constant 0 : index
    %271 = vector.load %arg4[%c0_362, %c0_363, %c0_364] : memref<1x256x128xbf16, #tpu.memory_space<vmem>>, vector<1x256x128xbf16>
    %272 = vector.shape_cast %271 : vector<1x256x128xbf16> to vector<256x128xbf16>
    %273 = vector.shape_cast %270 : vector<256x128xbf16> to vector<1x256x128xbf16>
    tpu.vector_store %arg4[%c0_362, %c0_363, %c0_364], %273 {strides = array<i32>} : memref<1x256x128xbf16, #tpu.memory_space<vmem>>, vector<1x256x128xbf16>,
    return
  }
  func.func @transform_0(%arg0: i32) -> (i32, i32, i32, i32) {
    %c0_i32 = arith.constant 0 : i32
    %c0_i32_0 = arith.constant 0 : i32
    %c0_i32_1 = arith.constant 0 : i32
    %c0_i32_2 = arith.constant 0 : i32
    return %arg0, %c0_i32, %c0_i32_0, %c0_i32_1 : i32, i32, i32, i32
  }
  func.func @transform_1(%arg0: i32) -> (i32, i32) {
    %c0_i32 = arith.constant 0 : i32
    %c0_i32_0 = arith.constant 0 : i32
    %c0_i32_1 = arith.constant 0 : i32
    return %c0_i32, %c0_i32_0 : i32, i32
  }
  func.func @transform_2(%arg0: i32) -> (i32, i32) {
    %c0_i32 = arith.constant 0 : i32
    %c0_i32_0 = arith.constant 0 : i32
    %c0_i32_1 = arith.constant 0 : i32
    return %c0_i32, %c0_i32_0 : i32, i32
  }
  func.func @transform_3(%arg0: i32) -> (i32, i32, i32) {
    %c0_i32 = arith.constant 0 : i32
    %c0_i32_0 = arith.constant 0 : i32
    %c0_i32_1 = arith.constant 0 : i32
    return %arg0, %c0_i32, %c0_i32_0 : i32, i32, i32
  }
}

module attributes {stable_mosaic.version = 11 : i64} {
  func.func @_fused_conv_kernel(%arg0: i32, %arg1: memref<1x9x9x512xbf16, #tpu.memory_space<vmem>>, %arg2: memref<2048x128xbf16, #tpu.memory_space<vmem>>, %arg3: memref<1x128xf32, #tpu.memory_space<vmem>>, %arg4: memref<1x64x128xbf16, #tpu.memory_space<vmem>>, %arg5: memref<64x2048xf32, #tpu.memory_space<vmem>>) attributes {dimension_semantics = [#tpu.dimension_semantics<parallel>], iteration_bounds = array<i64: 2>, scalar_prefetch = 0 : i64, scratch_operands = 1 : i64, tpu.core_type = #tpu.core_type<tc>, window_params = [{transform_indices = @transform_0, window_bounds = array<i64: 1, 9, 9, 512>}, {pipeline_mode = #tpu.pipeline_mode<synchronous>, transform_indices = @transform_1, window_bounds = array<i64: 2048, 128>}, {pipeline_mode = #tpu.pipeline_mode<synchronous>, transform_indices = @transform_2, window_bounds = array<i64: 1, 128>}, {transform_indices = @transform_3, window_bounds = array<i64: 1, 64, 128>}]} {
    %c0 = arith.constant 0 : index
    %c0_0 = arith.constant 0 : index
    %c0_1 = arith.constant 0 : index
    %c0_2 = arith.constant 0 : index
    %0 = vector.load %arg1[%c0, %c0_0, %c0_1, %c0_2] : memref<1x9x9x512xbf16, #tpu.memory_space<vmem>>, vector<1x1x8x512xbf16>
    %1 = vector.shape_cast %0 : vector<1x1x8x512xbf16> to vector<8x512xbf16>
    %2 = arith.extf %1 : vector<8x512xbf16> to vector<8x512xf32>
    %c0_3 = arith.constant 0 : index
    %c0_4 = arith.constant 0 : index
    %3 = vector.load %arg5[%c0_3, %c0_4] : memref<64x2048xf32, #tpu.memory_space<vmem>>, vector<8x512xf32>
    tpu.vector_store %arg5[%c0_3, %c0_4], %2 {strides = array<i32>} : memref<64x2048xf32, #tpu.memory_space<vmem>>, vector<8x512xf32>,
    %c0_5 = arith.constant 0 : index
    %c1 = arith.constant 1 : index
    %c0_6 = arith.constant 0 : index
    %c0_7 = arith.constant 0 : index
    %4 = vector.load %arg1[%c0_5, %c1, %c0_6, %c0_7] : memref<1x9x9x512xbf16, #tpu.memory_space<vmem>>, vector<1x1x8x512xbf16>
    %5 = vector.shape_cast %4 : vector<1x1x8x512xbf16> to vector<8x512xbf16>
    %6 = arith.extf %5 : vector<8x512xbf16> to vector<8x512xf32>
    %c8 = arith.constant 8 : index
    %c0_8 = arith.constant 0 : index
    %7 = vector.load %arg5[%c8, %c0_8] : memref<64x2048xf32, #tpu.memory_space<vmem>>, vector<8x512xf32>
    tpu.vector_store %arg5[%c8, %c0_8], %6 {strides = array<i32>} : memref<64x2048xf32, #tpu.memory_space<vmem>>, vector<8x512xf32>,
    %c0_9 = arith.constant 0 : index
    %c2 = arith.constant 2 : index
    %c0_10 = arith.constant 0 : index
    %c0_11 = arith.constant 0 : index
    %8 = vector.load %arg1[%c0_9, %c2, %c0_10, %c0_11] : memref<1x9x9x512xbf16, #tpu.memory_space<vmem>>, vector<1x1x8x512xbf16>
    %9 = vector.shape_cast %8 : vector<1x1x8x512xbf16> to vector<8x512xbf16>
    %10 = arith.extf %9 : vector<8x512xbf16> to vector<8x512xf32>
    %c16 = arith.constant 16 : index
    %c0_12 = arith.constant 0 : index
    %11 = vector.load %arg5[%c16, %c0_12] : memref<64x2048xf32, #tpu.memory_space<vmem>>, vector<8x512xf32>
    tpu.vector_store %arg5[%c16, %c0_12], %10 {strides = array<i32>} : memref<64x2048xf32, #tpu.memory_space<vmem>>, vector<8x512xf32>,
    %c0_13 = arith.constant 0 : index
    %c3 = arith.constant 3 : index
    %c0_14 = arith.constant 0 : index
    %c0_15 = arith.constant 0 : index
    %12 = vector.load %arg1[%c0_13, %c3, %c0_14, %c0_15] : memref<1x9x9x512xbf16, #tpu.memory_space<vmem>>, vector<1x1x8x512xbf16>
    %13 = vector.shape_cast %12 : vector<1x1x8x512xbf16> to vector<8x512xbf16>
    %14 = arith.extf %13 : vector<8x512xbf16> to vector<8x512xf32>
    %c24 = arith.constant 24 : index
    %c0_16 = arith.constant 0 : index
    %15 = vector.load %arg5[%c24, %c0_16] : memref<64x2048xf32, #tpu.memory_space<vmem>>, vector<8x512xf32>
    tpu.vector_store %arg5[%c24, %c0_16], %14 {strides = array<i32>} : memref<64x2048xf32, #tpu.memory_space<vmem>>, vector<8x512xf32>,
    %c0_17 = arith.constant 0 : index
    %c4 = arith.constant 4 : index
    %c0_18 = arith.constant 0 : index
    %c0_19 = arith.constant 0 : index
    %16 = vector.load %arg1[%c0_17, %c4, %c0_18, %c0_19] : memref<1x9x9x512xbf16, #tpu.memory_space<vmem>>, vector<1x1x8x512xbf16>
    %17 = vector.shape_cast %16 : vector<1x1x8x512xbf16> to vector<8x512xbf16>
    %18 = arith.extf %17 : vector<8x512xbf16> to vector<8x512xf32>
    %c32 = arith.constant 32 : index
    %c0_20 = arith.constant 0 : index
    %19 = vector.load %arg5[%c32, %c0_20] : memref<64x2048xf32, #tpu.memory_space<vmem>>, vector<8x512xf32>
    tpu.vector_store %arg5[%c32, %c0_20], %18 {strides = array<i32>} : memref<64x2048xf32, #tpu.memory_space<vmem>>, vector<8x512xf32>,
    %c0_21 = arith.constant 0 : index
    %c5 = arith.constant 5 : index
    %c0_22 = arith.constant 0 : index
    %c0_23 = arith.constant 0 : index
    %20 = vector.load %arg1[%c0_21, %c5, %c0_22, %c0_23] : memref<1x9x9x512xbf16, #tpu.memory_space<vmem>>, vector<1x1x8x512xbf16>
    %21 = vector.shape_cast %20 : vector<1x1x8x512xbf16> to vector<8x512xbf16>
    %22 = arith.extf %21 : vector<8x512xbf16> to vector<8x512xf32>
    %c40 = arith.constant 40 : index
    %c0_24 = arith.constant 0 : index
    %23 = vector.load %arg5[%c40, %c0_24] : memref<64x2048xf32, #tpu.memory_space<vmem>>, vector<8x512xf32>
    tpu.vector_store %arg5[%c40, %c0_24], %22 {strides = array<i32>} : memref<64x2048xf32, #tpu.memory_space<vmem>>, vector<8x512xf32>,
    %c0_25 = arith.constant 0 : index
    %c6 = arith.constant 6 : index
    %c0_26 = arith.constant 0 : index
    %c0_27 = arith.constant 0 : index
    %24 = vector.load %arg1[%c0_25, %c6, %c0_26, %c0_27] : memref<1x9x9x512xbf16, #tpu.memory_space<vmem>>, vector<1x1x8x512xbf16>
    %25 = vector.shape_cast %24 : vector<1x1x8x512xbf16> to vector<8x512xbf16>
    %26 = arith.extf %25 : vector<8x512xbf16> to vector<8x512xf32>
    %c48 = arith.constant 48 : index
    %c0_28 = arith.constant 0 : index
    %27 = vector.load %arg5[%c48, %c0_28] : memref<64x2048xf32, #tpu.memory_space<vmem>>, vector<8x512xf32>
    tpu.vector_store %arg5[%c48, %c0_28], %26 {strides = array<i32>} : memref<64x2048xf32, #tpu.memory_space<vmem>>, vector<8x512xf32>,
    %c0_29 = arith.constant 0 : index
    %c7 = arith.constant 7 : index
    %c0_30 = arith.constant 0 : index
    %c0_31 = arith.constant 0 : index
    %28 = vector.load %arg1[%c0_29, %c7, %c0_30, %c0_31] : memref<1x9x9x512xbf16, #tpu.memory_space<vmem>>, vector<1x1x8x512xbf16>
    %29 = vector.shape_cast %28 : vector<1x1x8x512xbf16> to vector<8x512xbf16>
    %30 = arith.extf %29 : vector<8x512xbf16> to vector<8x512xf32>
    %c56 = arith.constant 56 : index
    %c0_32 = arith.constant 0 : index
    %31 = vector.load %arg5[%c56, %c0_32] : memref<64x2048xf32, #tpu.memory_space<vmem>>, vector<8x512xf32>
    tpu.vector_store %arg5[%c56, %c0_32], %30 {strides = array<i32>} : memref<64x2048xf32, #tpu.memory_space<vmem>>, vector<8x512xf32>,
    %c0_33 = arith.constant 0 : index
    %c0_34 = arith.constant 0 : index
    %c1_35 = arith.constant 1 : index
    %c0_36 = arith.constant 0 : index
    %32 = vector.load %arg1[%c0_33, %c0_34, %c1_35, %c0_36] : memref<1x9x9x512xbf16, #tpu.memory_space<vmem>>, vector<1x1x8x512xbf16>
    %33 = vector.shape_cast %32 : vector<1x1x8x512xbf16> to vector<8x512xbf16>
    %34 = arith.extf %33 : vector<8x512xbf16> to vector<8x512xf32>
    %c0_37 = arith.constant 0 : index
    %c512 = arith.constant 512 : index
    %35 = vector.load %arg5[%c0_37, %c512] : memref<64x2048xf32, #tpu.memory_space<vmem>>, vector<8x512xf32>
    tpu.vector_store %arg5[%c0_37, %c512], %34 {strides = array<i32>} : memref<64x2048xf32, #tpu.memory_space<vmem>>, vector<8x512xf32>,
    %c0_38 = arith.constant 0 : index
    %c1_39 = arith.constant 1 : index
    %c1_40 = arith.constant 1 : index
    %c0_41 = arith.constant 0 : index
    %36 = vector.load %arg1[%c0_38, %c1_39, %c1_40, %c0_41] : memref<1x9x9x512xbf16, #tpu.memory_space<vmem>>, vector<1x1x8x512xbf16>
    %37 = vector.shape_cast %36 : vector<1x1x8x512xbf16> to vector<8x512xbf16>
    %38 = arith.extf %37 : vector<8x512xbf16> to vector<8x512xf32>
    %c8_42 = arith.constant 8 : index
    %c512_43 = arith.constant 512 : index
    %39 = vector.load %arg5[%c8_42, %c512_43] : memref<64x2048xf32, #tpu.memory_space<vmem>>, vector<8x512xf32>
    tpu.vector_store %arg5[%c8_42, %c512_43], %38 {strides = array<i32>} : memref<64x2048xf32, #tpu.memory_space<vmem>>, vector<8x512xf32>,
    %c0_44 = arith.constant 0 : index
    %c2_45 = arith.constant 2 : index
    %c1_46 = arith.constant 1 : index
    %c0_47 = arith.constant 0 : index
    %40 = vector.load %arg1[%c0_44, %c2_45, %c1_46, %c0_47] : memref<1x9x9x512xbf16, #tpu.memory_space<vmem>>, vector<1x1x8x512xbf16>
    %41 = vector.shape_cast %40 : vector<1x1x8x512xbf16> to vector<8x512xbf16>
    %42 = arith.extf %41 : vector<8x512xbf16> to vector<8x512xf32>
    %c16_48 = arith.constant 16 : index
    %c512_49 = arith.constant 512 : index
    %43 = vector.load %arg5[%c16_48, %c512_49] : memref<64x2048xf32, #tpu.memory_space<vmem>>, vector<8x512xf32>
    tpu.vector_store %arg5[%c16_48, %c512_49], %42 {strides = array<i32>} : memref<64x2048xf32, #tpu.memory_space<vmem>>, vector<8x512xf32>,
    %c0_50 = arith.constant 0 : index
    %c3_51 = arith.constant 3 : index
    %c1_52 = arith.constant 1 : index
    %c0_53 = arith.constant 0 : index
    %44 = vector.load %arg1[%c0_50, %c3_51, %c1_52, %c0_53] : memref<1x9x9x512xbf16, #tpu.memory_space<vmem>>, vector<1x1x8x512xbf16>
    %45 = vector.shape_cast %44 : vector<1x1x8x512xbf16> to vector<8x512xbf16>
    %46 = arith.extf %45 : vector<8x512xbf16> to vector<8x512xf32>
    %c24_54 = arith.constant 24 : index
    %c512_55 = arith.constant 512 : index
    %47 = vector.load %arg5[%c24_54, %c512_55] : memref<64x2048xf32, #tpu.memory_space<vmem>>, vector<8x512xf32>
    tpu.vector_store %arg5[%c24_54, %c512_55], %46 {strides = array<i32>} : memref<64x2048xf32, #tpu.memory_space<vmem>>, vector<8x512xf32>,
    %c0_56 = arith.constant 0 : index
    %c4_57 = arith.constant 4 : index
    %c1_58 = arith.constant 1 : index
    %c0_59 = arith.constant 0 : index
    %48 = vector.load %arg1[%c0_56, %c4_57, %c1_58, %c0_59] : memref<1x9x9x512xbf16, #tpu.memory_space<vmem>>, vector<1x1x8x512xbf16>
    %49 = vector.shape_cast %48 : vector<1x1x8x512xbf16> to vector<8x512xbf16>
    %50 = arith.extf %49 : vector<8x512xbf16> to vector<8x512xf32>
    %c32_60 = arith.constant 32 : index
    %c512_61 = arith.constant 512 : index
    %51 = vector.load %arg5[%c32_60, %c512_61] : memref<64x2048xf32, #tpu.memory_space<vmem>>, vector<8x512xf32>
    tpu.vector_store %arg5[%c32_60, %c512_61], %50 {strides = array<i32>} : memref<64x2048xf32, #tpu.memory_space<vmem>>, vector<8x512xf32>,
    %c0_62 = arith.constant 0 : index
    %c5_63 = arith.constant 5 : index
    %c1_64 = arith.constant 1 : index
    %c0_65 = arith.constant 0 : index
    %52 = vector.load %arg1[%c0_62, %c5_63, %c1_64, %c0_65] : memref<1x9x9x512xbf16, #tpu.memory_space<vmem>>, vector<1x1x8x512xbf16>
    %53 = vector.shape_cast %52 : vector<1x1x8x512xbf16> to vector<8x512xbf16>
    %54 = arith.extf %53 : vector<8x512xbf16> to vector<8x512xf32>
    %c40_66 = arith.constant 40 : index
    %c512_67 = arith.constant 512 : index
    %55 = vector.load %arg5[%c40_66, %c512_67] : memref<64x2048xf32, #tpu.memory_space<vmem>>, vector<8x512xf32>
    tpu.vector_store %arg5[%c40_66, %c512_67], %54 {strides = array<i32>} : memref<64x2048xf32, #tpu.memory_space<vmem>>, vector<8x512xf32>,
    %c0_68 = arith.constant 0 : index
    %c6_69 = arith.constant 6 : index
    %c1_70 = arith.constant 1 : index
    %c0_71 = arith.constant 0 : index
    %56 = vector.load %arg1[%c0_68, %c6_69, %c1_70, %c0_71] : memref<1x9x9x512xbf16, #tpu.memory_space<vmem>>, vector<1x1x8x512xbf16>
    %57 = vector.shape_cast %56 : vector<1x1x8x512xbf16> to vector<8x512xbf16>
    %58 = arith.extf %57 : vector<8x512xbf16> to vector<8x512xf32>
    %c48_72 = arith.constant 48 : index
    %c512_73 = arith.constant 512 : index
    %59 = vector.load %arg5[%c48_72, %c512_73] : memref<64x2048xf32, #tpu.memory_space<vmem>>, vector<8x512xf32>
    tpu.vector_store %arg5[%c48_72, %c512_73], %58 {strides = array<i32>} : memref<64x2048xf32, #tpu.memory_space<vmem>>, vector<8x512xf32>,
    %c0_74 = arith.constant 0 : index
    %c7_75 = arith.constant 7 : index
    %c1_76 = arith.constant 1 : index
    %c0_77 = arith.constant 0 : index
    %60 = vector.load %arg1[%c0_74, %c7_75, %c1_76, %c0_77] : memref<1x9x9x512xbf16, #tpu.memory_space<vmem>>, vector<1x1x8x512xbf16>
    %61 = vector.shape_cast %60 : vector<1x1x8x512xbf16> to vector<8x512xbf16>
    %62 = arith.extf %61 : vector<8x512xbf16> to vector<8x512xf32>
    %c56_78 = arith.constant 56 : index
    %c512_79 = arith.constant 512 : index
    %63 = vector.load %arg5[%c56_78, %c512_79] : memref<64x2048xf32, #tpu.memory_space<vmem>>, vector<8x512xf32>
    tpu.vector_store %arg5[%c56_78, %c512_79], %62 {strides = array<i32>} : memref<64x2048xf32, #tpu.memory_space<vmem>>, vector<8x512xf32>,
    %c0_80 = arith.constant 0 : index
    %c1_81 = arith.constant 1 : index
    %c0_82 = arith.constant 0 : index
    %c0_83 = arith.constant 0 : index
    %64 = vector.load %arg1[%c0_80, %c1_81, %c0_82, %c0_83] : memref<1x9x9x512xbf16, #tpu.memory_space<vmem>>, vector<1x1x8x512xbf16>
    %65 = vector.shape_cast %64 : vector<1x1x8x512xbf16> to vector<8x512xbf16>
    %66 = arith.extf %65 : vector<8x512xbf16> to vector<8x512xf32>
    %c0_84 = arith.constant 0 : index
    %c1024 = arith.constant 1024 : index
    %67 = vector.load %arg5[%c0_84, %c1024] : memref<64x2048xf32, #tpu.memory_space<vmem>>, vector<8x512xf32>
    tpu.vector_store %arg5[%c0_84, %c1024], %66 {strides = array<i32>} : memref<64x2048xf32, #tpu.memory_space<vmem>>, vector<8x512xf32>,
    %c0_85 = arith.constant 0 : index
    %c2_86 = arith.constant 2 : index
    %c0_87 = arith.constant 0 : index
    %c0_88 = arith.constant 0 : index
    %68 = vector.load %arg1[%c0_85, %c2_86, %c0_87, %c0_88] : memref<1x9x9x512xbf16, #tpu.memory_space<vmem>>, vector<1x1x8x512xbf16>
    %69 = vector.shape_cast %68 : vector<1x1x8x512xbf16> to vector<8x512xbf16>
    %70 = arith.extf %69 : vector<8x512xbf16> to vector<8x512xf32>
    %c8_89 = arith.constant 8 : index
    %c1024_90 = arith.constant 1024 : index
    %71 = vector.load %arg5[%c8_89, %c1024_90] : memref<64x2048xf32, #tpu.memory_space<vmem>>, vector<8x512xf32>
    tpu.vector_store %arg5[%c8_89, %c1024_90], %70 {strides = array<i32>} : memref<64x2048xf32, #tpu.memory_space<vmem>>, vector<8x512xf32>,
    %c0_91 = arith.constant 0 : index
    %c3_92 = arith.constant 3 : index
    %c0_93 = arith.constant 0 : index
    %c0_94 = arith.constant 0 : index
    %72 = vector.load %arg1[%c0_91, %c3_92, %c0_93, %c0_94] : memref<1x9x9x512xbf16, #tpu.memory_space<vmem>>, vector<1x1x8x512xbf16>
    %73 = vector.shape_cast %72 : vector<1x1x8x512xbf16> to vector<8x512xbf16>
    %74 = arith.extf %73 : vector<8x512xbf16> to vector<8x512xf32>
    %c16_95 = arith.constant 16 : index
    %c1024_96 = arith.constant 1024 : index
    %75 = vector.load %arg5[%c16_95, %c1024_96] : memref<64x2048xf32, #tpu.memory_space<vmem>>, vector<8x512xf32>
    tpu.vector_store %arg5[%c16_95, %c1024_96], %74 {strides = array<i32>} : memref<64x2048xf32, #tpu.memory_space<vmem>>, vector<8x512xf32>,
    %c0_97 = arith.constant 0 : index
    %c4_98 = arith.constant 4 : index
    %c0_99 = arith.constant 0 : index
    %c0_100 = arith.constant 0 : index
    %76 = vector.load %arg1[%c0_97, %c4_98, %c0_99, %c0_100] : memref<1x9x9x512xbf16, #tpu.memory_space<vmem>>, vector<1x1x8x512xbf16>
    %77 = vector.shape_cast %76 : vector<1x1x8x512xbf16> to vector<8x512xbf16>
    %78 = arith.extf %77 : vector<8x512xbf16> to vector<8x512xf32>
    %c24_101 = arith.constant 24 : index
    %c1024_102 = arith.constant 1024 : index
    %79 = vector.load %arg5[%c24_101, %c1024_102] : memref<64x2048xf32, #tpu.memory_space<vmem>>, vector<8x512xf32>
    tpu.vector_store %arg5[%c24_101, %c1024_102], %78 {strides = array<i32>} : memref<64x2048xf32, #tpu.memory_space<vmem>>, vector<8x512xf32>,
    %c0_103 = arith.constant 0 : index
    %c5_104 = arith.constant 5 : index
    %c0_105 = arith.constant 0 : index
    %c0_106 = arith.constant 0 : index
    %80 = vector.load %arg1[%c0_103, %c5_104, %c0_105, %c0_106] : memref<1x9x9x512xbf16, #tpu.memory_space<vmem>>, vector<1x1x8x512xbf16>
    %81 = vector.shape_cast %80 : vector<1x1x8x512xbf16> to vector<8x512xbf16>
    %82 = arith.extf %81 : vector<8x512xbf16> to vector<8x512xf32>
    %c32_107 = arith.constant 32 : index
    %c1024_108 = arith.constant 1024 : index
    %83 = vector.load %arg5[%c32_107, %c1024_108] : memref<64x2048xf32, #tpu.memory_space<vmem>>, vector<8x512xf32>
    tpu.vector_store %arg5[%c32_107, %c1024_108], %82 {strides = array<i32>} : memref<64x2048xf32, #tpu.memory_space<vmem>>, vector<8x512xf32>,
    %c0_109 = arith.constant 0 : index
    %c6_110 = arith.constant 6 : index
    %c0_111 = arith.constant 0 : index
    %c0_112 = arith.constant 0 : index
    %84 = vector.load %arg1[%c0_109, %c6_110, %c0_111, %c0_112] : memref<1x9x9x512xbf16, #tpu.memory_space<vmem>>, vector<1x1x8x512xbf16>
    %85 = vector.shape_cast %84 : vector<1x1x8x512xbf16> to vector<8x512xbf16>
    %86 = arith.extf %85 : vector<8x512xbf16> to vector<8x512xf32>
    %c40_113 = arith.constant 40 : index
    %c1024_114 = arith.constant 1024 : index
    %87 = vector.load %arg5[%c40_113, %c1024_114] : memref<64x2048xf32, #tpu.memory_space<vmem>>, vector<8x512xf32>
    tpu.vector_store %arg5[%c40_113, %c1024_114], %86 {strides = array<i32>} : memref<64x2048xf32, #tpu.memory_space<vmem>>, vector<8x512xf32>,
    %c0_115 = arith.constant 0 : index
    %c7_116 = arith.constant 7 : index
    %c0_117 = arith.constant 0 : index
    %c0_118 = arith.constant 0 : index
    %88 = vector.load %arg1[%c0_115, %c7_116, %c0_117, %c0_118] : memref<1x9x9x512xbf16, #tpu.memory_space<vmem>>, vector<1x1x8x512xbf16>
    %89 = vector.shape_cast %88 : vector<1x1x8x512xbf16> to vector<8x512xbf16>
    %90 = arith.extf %89 : vector<8x512xbf16> to vector<8x512xf32>
    %c48_119 = arith.constant 48 : index
    %c1024_120 = arith.constant 1024 : index
    %91 = vector.load %arg5[%c48_119, %c1024_120] : memref<64x2048xf32, #tpu.memory_space<vmem>>, vector<8x512xf32>
    tpu.vector_store %arg5[%c48_119, %c1024_120], %90 {strides = array<i32>} : memref<64x2048xf32, #tpu.memory_space<vmem>>, vector<8x512xf32>,
    %c0_121 = arith.constant 0 : index
    %c8_122 = arith.constant 8 : index
    %c0_123 = arith.constant 0 : index
    %c0_124 = arith.constant 0 : index
    %92 = vector.load %arg1[%c0_121, %c8_122, %c0_123, %c0_124] : memref<1x9x9x512xbf16, #tpu.memory_space<vmem>>, vector<1x1x8x512xbf16>
    %93 = vector.shape_cast %92 : vector<1x1x8x512xbf16> to vector<8x512xbf16>
    %94 = arith.extf %93 : vector<8x512xbf16> to vector<8x512xf32>
    %c56_125 = arith.constant 56 : index
    %c1024_126 = arith.constant 1024 : index
    %95 = vector.load %arg5[%c56_125, %c1024_126] : memref<64x2048xf32, #tpu.memory_space<vmem>>, vector<8x512xf32>
    tpu.vector_store %arg5[%c56_125, %c1024_126], %94 {strides = array<i32>} : memref<64x2048xf32, #tpu.memory_space<vmem>>, vector<8x512xf32>,
    %c0_127 = arith.constant 0 : index
    %c1_128 = arith.constant 1 : index
    %c1_129 = arith.constant 1 : index
    %c0_130 = arith.constant 0 : index
    %96 = vector.load %arg1[%c0_127, %c1_128, %c1_129, %c0_130] : memref<1x9x9x512xbf16, #tpu.memory_space<vmem>>, vector<1x1x8x512xbf16>
    %97 = vector.shape_cast %96 : vector<1x1x8x512xbf16> to vector<8x512xbf16>
    %98 = arith.extf %97 : vector<8x512xbf16> to vector<8x512xf32>
    %c0_131 = arith.constant 0 : index
    %c1536 = arith.constant 1536 : index
    %99 = vector.load %arg5[%c0_131, %c1536] : memref<64x2048xf32, #tpu.memory_space<vmem>>, vector<8x512xf32>
    tpu.vector_store %arg5[%c0_131, %c1536], %98 {strides = array<i32>} : memref<64x2048xf32, #tpu.memory_space<vmem>>, vector<8x512xf32>,
    %c0_132 = arith.constant 0 : index
    %c2_133 = arith.constant 2 : index
    %c1_134 = arith.constant 1 : index
    %c0_135 = arith.constant 0 : index
    %100 = vector.load %arg1[%c0_132, %c2_133, %c1_134, %c0_135] : memref<1x9x9x512xbf16, #tpu.memory_space<vmem>>, vector<1x1x8x512xbf16>
    %101 = vector.shape_cast %100 : vector<1x1x8x512xbf16> to vector<8x512xbf16>
    %102 = arith.extf %101 : vector<8x512xbf16> to vector<8x512xf32>
    %c8_136 = arith.constant 8 : index
    %c1536_137 = arith.constant 1536 : index
    %103 = vector.load %arg5[%c8_136, %c1536_137] : memref<64x2048xf32, #tpu.memory_space<vmem>>, vector<8x512xf32>
    tpu.vector_store %arg5[%c8_136, %c1536_137], %102 {strides = array<i32>} : memref<64x2048xf32, #tpu.memory_space<vmem>>, vector<8x512xf32>,
    %c0_138 = arith.constant 0 : index
    %c3_139 = arith.constant 3 : index
    %c1_140 = arith.constant 1 : index
    %c0_141 = arith.constant 0 : index
    %104 = vector.load %arg1[%c0_138, %c3_139, %c1_140, %c0_141] : memref<1x9x9x512xbf16, #tpu.memory_space<vmem>>, vector<1x1x8x512xbf16>
    %105 = vector.shape_cast %104 : vector<1x1x8x512xbf16> to vector<8x512xbf16>
    %106 = arith.extf %105 : vector<8x512xbf16> to vector<8x512xf32>
    %c16_142 = arith.constant 16 : index
    %c1536_143 = arith.constant 1536 : index
    %107 = vector.load %arg5[%c16_142, %c1536_143] : memref<64x2048xf32, #tpu.memory_space<vmem>>, vector<8x512xf32>
    tpu.vector_store %arg5[%c16_142, %c1536_143], %106 {strides = array<i32>} : memref<64x2048xf32, #tpu.memory_space<vmem>>, vector<8x512xf32>,
    %c0_144 = arith.constant 0 : index
    %c4_145 = arith.constant 4 : index
    %c1_146 = arith.constant 1 : index
    %c0_147 = arith.constant 0 : index
    %108 = vector.load %arg1[%c0_144, %c4_145, %c1_146, %c0_147] : memref<1x9x9x512xbf16, #tpu.memory_space<vmem>>, vector<1x1x8x512xbf16>
    %109 = vector.shape_cast %108 : vector<1x1x8x512xbf16> to vector<8x512xbf16>
    %110 = arith.extf %109 : vector<8x512xbf16> to vector<8x512xf32>
    %c24_148 = arith.constant 24 : index
    %c1536_149 = arith.constant 1536 : index
    %111 = vector.load %arg5[%c24_148, %c1536_149] : memref<64x2048xf32, #tpu.memory_space<vmem>>, vector<8x512xf32>
    tpu.vector_store %arg5[%c24_148, %c1536_149], %110 {strides = array<i32>} : memref<64x2048xf32, #tpu.memory_space<vmem>>, vector<8x512xf32>,
    %c0_150 = arith.constant 0 : index
    %c5_151 = arith.constant 5 : index
    %c1_152 = arith.constant 1 : index
    %c0_153 = arith.constant 0 : index
    %112 = vector.load %arg1[%c0_150, %c5_151, %c1_152, %c0_153] : memref<1x9x9x512xbf16, #tpu.memory_space<vmem>>, vector<1x1x8x512xbf16>
    %113 = vector.shape_cast %112 : vector<1x1x8x512xbf16> to vector<8x512xbf16>
    %114 = arith.extf %113 : vector<8x512xbf16> to vector<8x512xf32>
    %c32_154 = arith.constant 32 : index
    %c1536_155 = arith.constant 1536 : index
    %115 = vector.load %arg5[%c32_154, %c1536_155] : memref<64x2048xf32, #tpu.memory_space<vmem>>, vector<8x512xf32>
    tpu.vector_store %arg5[%c32_154, %c1536_155], %114 {strides = array<i32>} : memref<64x2048xf32, #tpu.memory_space<vmem>>, vector<8x512xf32>,
    %c0_156 = arith.constant 0 : index
    %c6_157 = arith.constant 6 : index
    %c1_158 = arith.constant 1 : index
    %c0_159 = arith.constant 0 : index
    %116 = vector.load %arg1[%c0_156, %c6_157, %c1_158, %c0_159] : memref<1x9x9x512xbf16, #tpu.memory_space<vmem>>, vector<1x1x8x512xbf16>
    %117 = vector.shape_cast %116 : vector<1x1x8x512xbf16> to vector<8x512xbf16>
    %118 = arith.extf %117 : vector<8x512xbf16> to vector<8x512xf32>
    %c40_160 = arith.constant 40 : index
    %c1536_161 = arith.constant 1536 : index
    %119 = vector.load %arg5[%c40_160, %c1536_161] : memref<64x2048xf32, #tpu.memory_space<vmem>>, vector<8x512xf32>
    tpu.vector_store %arg5[%c40_160, %c1536_161], %118 {strides = array<i32>} : memref<64x2048xf32, #tpu.memory_space<vmem>>, vector<8x512xf32>,
    %c0_162 = arith.constant 0 : index
    %c7_163 = arith.constant 7 : index
    %c1_164 = arith.constant 1 : index
    %c0_165 = arith.constant 0 : index
    %120 = vector.load %arg1[%c0_162, %c7_163, %c1_164, %c0_165] : memref<1x9x9x512xbf16, #tpu.memory_space<vmem>>, vector<1x1x8x512xbf16>
    %121 = vector.shape_cast %120 : vector<1x1x8x512xbf16> to vector<8x512xbf16>
    %122 = arith.extf %121 : vector<8x512xbf16> to vector<8x512xf32>
    %c48_166 = arith.constant 48 : index
    %c1536_167 = arith.constant 1536 : index
    %123 = vector.load %arg5[%c48_166, %c1536_167] : memref<64x2048xf32, #tpu.memory_space<vmem>>, vector<8x512xf32>
    tpu.vector_store %arg5[%c48_166, %c1536_167], %122 {strides = array<i32>} : memref<64x2048xf32, #tpu.memory_space<vmem>>, vector<8x512xf32>,
    %c0_168 = arith.constant 0 : index
    %c8_169 = arith.constant 8 : index
    %c1_170 = arith.constant 1 : index
    %c0_171 = arith.constant 0 : index
    %124 = vector.load %arg1[%c0_168, %c8_169, %c1_170, %c0_171] : memref<1x9x9x512xbf16, #tpu.memory_space<vmem>>, vector<1x1x8x512xbf16>
    %125 = vector.shape_cast %124 : vector<1x1x8x512xbf16> to vector<8x512xbf16>
    %126 = arith.extf %125 : vector<8x512xbf16> to vector<8x512xf32>
    %c56_172 = arith.constant 56 : index
    %c1536_173 = arith.constant 1536 : index
    %127 = vector.load %arg5[%c56_172, %c1536_173] : memref<64x2048xf32, #tpu.memory_space<vmem>>, vector<8x512xf32>
    tpu.vector_store %arg5[%c56_172, %c1536_173], %126 {strides = array<i32>} : memref<64x2048xf32, #tpu.memory_space<vmem>>, vector<8x512xf32>,
    %c0_174 = arith.constant 0 : index
    %c0_175 = arith.constant 0 : index
    %128 = vector.load %arg5[%c0_174, %c0_175] : memref<64x2048xf32, #tpu.memory_space<vmem>>, vector<64x2048xf32>
    %129 = arith.truncf %128 : vector<64x2048xf32> to vector<64x2048xbf16>
    %c0_176 = arith.constant 0 : index
    %c0_177 = arith.constant 0 : index
    %130 = vector.load %arg2[%c0_176, %c0_177] : memref<2048x128xbf16, #tpu.memory_space<vmem>>, vector<2048x128xbf16>
    %cst = arith.constant dense<0.000000e+00> : vector<64x128xf32>
    %131 = tpu.matmul %129, %130, %cst {dimension_numbers = #tpu.dot_dimension_numbers<[1], [0], [0], [1], [0, 0, 1, 1], [], []>} : vector<64x2048xbf16>, vector<2048x128xbf16>, vector<64x128xf32> -> vector<64x128xf32>
    %c0_178 = arith.constant 0 : index
    %c0_179 = arith.constant 0 : index
    %132 = vector.load %arg3[%c0_178, %c0_179] : memref<1x128xf32, #tpu.memory_space<vmem>>, vector<1x128xf32>
    %133 = vector.broadcast %132 : vector<1x128xf32> to vector<64x128xf32>
    %134 = arith.addf %131, %133 : vector<64x128xf32>
    %cst_180 = arith.constant 0.000000e+00 : f32
    %135 = vector.broadcast %cst_180 : f32 to vector<64x128xf32>
    %136 = arith.cmpf oge, %134, %135 : vector<64x128xf32>
    %cst_181 = arith.constant 2.000000e-01 : f32
    %137 = vector.broadcast %cst_181 : f32 to vector<64x128xf32>
    %138 = arith.mulf %137, %134 : vector<64x128xf32>
    %139 = arith.select %136, %134, %138 : vector<64x128xi1>, vector<64x128xf32>
    %140 = arith.truncf %139 : vector<64x128xf32> to vector<64x128xbf16>
    %c0_182 = arith.constant 0 : index
    %c0_183 = arith.constant 0 : index
    %c0_184 = arith.constant 0 : index
    %141 = vector.load %arg4[%c0_182, %c0_183, %c0_184] : memref<1x64x128xbf16, #tpu.memory_space<vmem>>, vector<1x64x128xbf16>
    %142 = vector.shape_cast %141 : vector<1x64x128xbf16> to vector<64x128xbf16>
    %143 = vector.shape_cast %140 : vector<64x128xbf16> to vector<1x64x128xbf16>
    tpu.vector_store %arg4[%c0_182, %c0_183, %c0_184], %143 {strides = array<i32>} : memref<1x64x128xbf16, #tpu.memory_space<vmem>>, vector<1x64x128xbf16>,
    return
  }
  func.func @transform_0(%arg0: i32) -> (i32, i32, i32, i32) {
    %c0_i32 = arith.constant 0 : i32
    %c0_i32_0 = arith.constant 0 : i32
    %c0_i32_1 = arith.constant 0 : i32
    %c0_i32_2 = arith.constant 0 : i32
    return %arg0, %c0_i32, %c0_i32_0, %c0_i32_1 : i32, i32, i32, i32
  }
  func.func @transform_1(%arg0: i32) -> (i32, i32) {
    %c0_i32 = arith.constant 0 : i32
    %c0_i32_0 = arith.constant 0 : i32
    %c0_i32_1 = arith.constant 0 : i32
    return %c0_i32, %c0_i32_0 : i32, i32
  }
  func.func @transform_2(%arg0: i32) -> (i32, i32) {
    %c0_i32 = arith.constant 0 : i32
    %c0_i32_0 = arith.constant 0 : i32
    %c0_i32_1 = arith.constant 0 : i32
    return %c0_i32, %c0_i32_0 : i32, i32
  }
  func.func @transform_3(%arg0: i32) -> (i32, i32, i32) {
    %c0_i32 = arith.constant 0 : i32
    %c0_i32_0 = arith.constant 0 : i32
    %c0_i32_1 = arith.constant 0 : i32
    return %arg0, %c0_i32, %c0_i32_0 : i32, i32, i32
  }
}

module attributes {stable_mosaic.version = 11 : i64} {
  func.func @_fused_conv_kernel(%arg0: i32, %arg1: memref<1x5x5x512xbf16, #tpu.memory_space<vmem>>, %arg2: memref<2048x128xbf16, #tpu.memory_space<vmem>>, %arg3: memref<1x128xf32, #tpu.memory_space<vmem>>, %arg4: memref<1x16x128xbf16, #tpu.memory_space<vmem>>, %arg5: memref<16x2048xf32, #tpu.memory_space<vmem>>) attributes {dimension_semantics = [#tpu.dimension_semantics<parallel>], iteration_bounds = array<i64: 2>, scalar_prefetch = 0 : i64, scratch_operands = 1 : i64, tpu.core_type = #tpu.core_type<tc>, window_params = [{transform_indices = @transform_0, window_bounds = array<i64: 1, 5, 5, 512>}, {pipeline_mode = #tpu.pipeline_mode<synchronous>, transform_indices = @transform_1, window_bounds = array<i64: 2048, 128>}, {pipeline_mode = #tpu.pipeline_mode<synchronous>, transform_indices = @transform_2, window_bounds = array<i64: 1, 128>}, {transform_indices = @transform_3, window_bounds = array<i64: 1, 16, 128>}]} {
    %c0 = arith.constant 0 : index
    %c0_0 = arith.constant 0 : index
    %c0_1 = arith.constant 0 : index
    %c0_2 = arith.constant 0 : index
    %0 = vector.load %arg1[%c0, %c0_0, %c0_1, %c0_2] : memref<1x5x5x512xbf16, #tpu.memory_space<vmem>>, vector<1x1x4x512xbf16>
    %1 = vector.shape_cast %0 : vector<1x1x4x512xbf16> to vector<4x512xbf16>
    %2 = arith.extf %1 : vector<4x512xbf16> to vector<4x512xf32>
    %c0_3 = arith.constant 0 : index
    %c0_4 = arith.constant 0 : index
    %3 = vector.load %arg5[%c0_3, %c0_4] : memref<16x2048xf32, #tpu.memory_space<vmem>>, vector<4x512xf32>
    tpu.vector_store %arg5[%c0_3, %c0_4], %2 {strides = array<i32>} : memref<16x2048xf32, #tpu.memory_space<vmem>>, vector<4x512xf32>,
    %c0_5 = arith.constant 0 : index
    %c1 = arith.constant 1 : index
    %c0_6 = arith.constant 0 : index
    %c0_7 = arith.constant 0 : index
    %4 = vector.load %arg1[%c0_5, %c1, %c0_6, %c0_7] : memref<1x5x5x512xbf16, #tpu.memory_space<vmem>>, vector<1x1x4x512xbf16>
    %5 = vector.shape_cast %4 : vector<1x1x4x512xbf16> to vector<4x512xbf16>
    %6 = arith.extf %5 : vector<4x512xbf16> to vector<4x512xf32>
    %c4 = arith.constant 4 : index
    %c0_8 = arith.constant 0 : index
    %7 = vector.load %arg5[%c4, %c0_8] : memref<16x2048xf32, #tpu.memory_space<vmem>>, vector<4x512xf32>
    tpu.vector_store %arg5[%c4, %c0_8], %6 {strides = array<i32>} : memref<16x2048xf32, #tpu.memory_space<vmem>>, vector<4x512xf32>,
    %c0_9 = arith.constant 0 : index
    %c2 = arith.constant 2 : index
    %c0_10 = arith.constant 0 : index
    %c0_11 = arith.constant 0 : index
    %8 = vector.load %arg1[%c0_9, %c2, %c0_10, %c0_11] : memref<1x5x5x512xbf16, #tpu.memory_space<vmem>>, vector<1x1x4x512xbf16>
    %9 = vector.shape_cast %8 : vector<1x1x4x512xbf16> to vector<4x512xbf16>
    %10 = arith.extf %9 : vector<4x512xbf16> to vector<4x512xf32>
    %c8 = arith.constant 8 : index
    %c0_12 = arith.constant 0 : index
    %11 = vector.load %arg5[%c8, %c0_12] : memref<16x2048xf32, #tpu.memory_space<vmem>>, vector<4x512xf32>
    tpu.vector_store %arg5[%c8, %c0_12], %10 {strides = array<i32>} : memref<16x2048xf32, #tpu.memory_space<vmem>>, vector<4x512xf32>,
    %c0_13 = arith.constant 0 : index
    %c3 = arith.constant 3 : index
    %c0_14 = arith.constant 0 : index
    %c0_15 = arith.constant 0 : index
    %12 = vector.load %arg1[%c0_13, %c3, %c0_14, %c0_15] : memref<1x5x5x512xbf16, #tpu.memory_space<vmem>>, vector<1x1x4x512xbf16>
    %13 = vector.shape_cast %12 : vector<1x1x4x512xbf16> to vector<4x512xbf16>
    %14 = arith.extf %13 : vector<4x512xbf16> to vector<4x512xf32>
    %c12 = arith.constant 12 : index
    %c0_16 = arith.constant 0 : index
    %15 = vector.load %arg5[%c12, %c0_16] : memref<16x2048xf32, #tpu.memory_space<vmem>>, vector<4x512xf32>
    tpu.vector_store %arg5[%c12, %c0_16], %14 {strides = array<i32>} : memref<16x2048xf32, #tpu.memory_space<vmem>>, vector<4x512xf32>,
    %c0_17 = arith.constant 0 : index
    %c0_18 = arith.constant 0 : index
    %c1_19 = arith.constant 1 : index
    %c0_20 = arith.constant 0 : index
    %16 = vector.load %arg1[%c0_17, %c0_18, %c1_19, %c0_20] : memref<1x5x5x512xbf16, #tpu.memory_space<vmem>>, vector<1x1x4x512xbf16>
    %17 = vector.shape_cast %16 : vector<1x1x4x512xbf16> to vector<4x512xbf16>
    %18 = arith.extf %17 : vector<4x512xbf16> to vector<4x512xf32>
    %c0_21 = arith.constant 0 : index
    %c512 = arith.constant 512 : index
    %19 = vector.load %arg5[%c0_21, %c512] : memref<16x2048xf32, #tpu.memory_space<vmem>>, vector<4x512xf32>
    tpu.vector_store %arg5[%c0_21, %c512], %18 {strides = array<i32>} : memref<16x2048xf32, #tpu.memory_space<vmem>>, vector<4x512xf32>,
    %c0_22 = arith.constant 0 : index
    %c1_23 = arith.constant 1 : index
    %c1_24 = arith.constant 1 : index
    %c0_25 = arith.constant 0 : index
    %20 = vector.load %arg1[%c0_22, %c1_23, %c1_24, %c0_25] : memref<1x5x5x512xbf16, #tpu.memory_space<vmem>>, vector<1x1x4x512xbf16>
    %21 = vector.shape_cast %20 : vector<1x1x4x512xbf16> to vector<4x512xbf16>
    %22 = arith.extf %21 : vector<4x512xbf16> to vector<4x512xf32>
    %c4_26 = arith.constant 4 : index
    %c512_27 = arith.constant 512 : index
    %23 = vector.load %arg5[%c4_26, %c512_27] : memref<16x2048xf32, #tpu.memory_space<vmem>>, vector<4x512xf32>
    tpu.vector_store %arg5[%c4_26, %c512_27], %22 {strides = array<i32>} : memref<16x2048xf32, #tpu.memory_space<vmem>>, vector<4x512xf32>,
    %c0_28 = arith.constant 0 : index
    %c2_29 = arith.constant 2 : index
    %c1_30 = arith.constant 1 : index
    %c0_31 = arith.constant 0 : index
    %24 = vector.load %arg1[%c0_28, %c2_29, %c1_30, %c0_31] : memref<1x5x5x512xbf16, #tpu.memory_space<vmem>>, vector<1x1x4x512xbf16>
    %25 = vector.shape_cast %24 : vector<1x1x4x512xbf16> to vector<4x512xbf16>
    %26 = arith.extf %25 : vector<4x512xbf16> to vector<4x512xf32>
    %c8_32 = arith.constant 8 : index
    %c512_33 = arith.constant 512 : index
    %27 = vector.load %arg5[%c8_32, %c512_33] : memref<16x2048xf32, #tpu.memory_space<vmem>>, vector<4x512xf32>
    tpu.vector_store %arg5[%c8_32, %c512_33], %26 {strides = array<i32>} : memref<16x2048xf32, #tpu.memory_space<vmem>>, vector<4x512xf32>,
    %c0_34 = arith.constant 0 : index
    %c3_35 = arith.constant 3 : index
    %c1_36 = arith.constant 1 : index
    %c0_37 = arith.constant 0 : index
    %28 = vector.load %arg1[%c0_34, %c3_35, %c1_36, %c0_37] : memref<1x5x5x512xbf16, #tpu.memory_space<vmem>>, vector<1x1x4x512xbf16>
    %29 = vector.shape_cast %28 : vector<1x1x4x512xbf16> to vector<4x512xbf16>
    %30 = arith.extf %29 : vector<4x512xbf16> to vector<4x512xf32>
    %c12_38 = arith.constant 12 : index
    %c512_39 = arith.constant 512 : index
    %31 = vector.load %arg5[%c12_38, %c512_39] : memref<16x2048xf32, #tpu.memory_space<vmem>>, vector<4x512xf32>
    tpu.vector_store %arg5[%c12_38, %c512_39], %30 {strides = array<i32>} : memref<16x2048xf32, #tpu.memory_space<vmem>>, vector<4x512xf32>,
    %c0_40 = arith.constant 0 : index
    %c1_41 = arith.constant 1 : index
    %c0_42 = arith.constant 0 : index
    %c0_43 = arith.constant 0 : index
    %32 = vector.load %arg1[%c0_40, %c1_41, %c0_42, %c0_43] : memref<1x5x5x512xbf16, #tpu.memory_space<vmem>>, vector<1x1x4x512xbf16>
    %33 = vector.shape_cast %32 : vector<1x1x4x512xbf16> to vector<4x512xbf16>
    %34 = arith.extf %33 : vector<4x512xbf16> to vector<4x512xf32>
    %c0_44 = arith.constant 0 : index
    %c1024 = arith.constant 1024 : index
    %35 = vector.load %arg5[%c0_44, %c1024] : memref<16x2048xf32, #tpu.memory_space<vmem>>, vector<4x512xf32>
    tpu.vector_store %arg5[%c0_44, %c1024], %34 {strides = array<i32>} : memref<16x2048xf32, #tpu.memory_space<vmem>>, vector<4x512xf32>,
    %c0_45 = arith.constant 0 : index
    %c2_46 = arith.constant 2 : index
    %c0_47 = arith.constant 0 : index
    %c0_48 = arith.constant 0 : index
    %36 = vector.load %arg1[%c0_45, %c2_46, %c0_47, %c0_48] : memref<1x5x5x512xbf16, #tpu.memory_space<vmem>>, vector<1x1x4x512xbf16>
    %37 = vector.shape_cast %36 : vector<1x1x4x512xbf16> to vector<4x512xbf16>
    %38 = arith.extf %37 : vector<4x512xbf16> to vector<4x512xf32>
    %c4_49 = arith.constant 4 : index
    %c1024_50 = arith.constant 1024 : index
    %39 = vector.load %arg5[%c4_49, %c1024_50] : memref<16x2048xf32, #tpu.memory_space<vmem>>, vector<4x512xf32>
    tpu.vector_store %arg5[%c4_49, %c1024_50], %38 {strides = array<i32>} : memref<16x2048xf32, #tpu.memory_space<vmem>>, vector<4x512xf32>,
    %c0_51 = arith.constant 0 : index
    %c3_52 = arith.constant 3 : index
    %c0_53 = arith.constant 0 : index
    %c0_54 = arith.constant 0 : index
    %40 = vector.load %arg1[%c0_51, %c3_52, %c0_53, %c0_54] : memref<1x5x5x512xbf16, #tpu.memory_space<vmem>>, vector<1x1x4x512xbf16>
    %41 = vector.shape_cast %40 : vector<1x1x4x512xbf16> to vector<4x512xbf16>
    %42 = arith.extf %41 : vector<4x512xbf16> to vector<4x512xf32>
    %c8_55 = arith.constant 8 : index
    %c1024_56 = arith.constant 1024 : index
    %43 = vector.load %arg5[%c8_55, %c1024_56] : memref<16x2048xf32, #tpu.memory_space<vmem>>, vector<4x512xf32>
    tpu.vector_store %arg5[%c8_55, %c1024_56], %42 {strides = array<i32>} : memref<16x2048xf32, #tpu.memory_space<vmem>>, vector<4x512xf32>,
    %c0_57 = arith.constant 0 : index
    %c4_58 = arith.constant 4 : index
    %c0_59 = arith.constant 0 : index
    %c0_60 = arith.constant 0 : index
    %44 = vector.load %arg1[%c0_57, %c4_58, %c0_59, %c0_60] : memref<1x5x5x512xbf16, #tpu.memory_space<vmem>>, vector<1x1x4x512xbf16>
    %45 = vector.shape_cast %44 : vector<1x1x4x512xbf16> to vector<4x512xbf16>
    %46 = arith.extf %45 : vector<4x512xbf16> to vector<4x512xf32>
    %c12_61 = arith.constant 12 : index
    %c1024_62 = arith.constant 1024 : index
    %47 = vector.load %arg5[%c12_61, %c1024_62] : memref<16x2048xf32, #tpu.memory_space<vmem>>, vector<4x512xf32>
    tpu.vector_store %arg5[%c12_61, %c1024_62], %46 {strides = array<i32>} : memref<16x2048xf32, #tpu.memory_space<vmem>>, vector<4x512xf32>,
    %c0_63 = arith.constant 0 : index
    %c1_64 = arith.constant 1 : index
    %c1_65 = arith.constant 1 : index
    %c0_66 = arith.constant 0 : index
    %48 = vector.load %arg1[%c0_63, %c1_64, %c1_65, %c0_66] : memref<1x5x5x512xbf16, #tpu.memory_space<vmem>>, vector<1x1x4x512xbf16>
    %49 = vector.shape_cast %48 : vector<1x1x4x512xbf16> to vector<4x512xbf16>
    %50 = arith.extf %49 : vector<4x512xbf16> to vector<4x512xf32>
    %c0_67 = arith.constant 0 : index
    %c1536 = arith.constant 1536 : index
    %51 = vector.load %arg5[%c0_67, %c1536] : memref<16x2048xf32, #tpu.memory_space<vmem>>, vector<4x512xf32>
    tpu.vector_store %arg5[%c0_67, %c1536], %50 {strides = array<i32>} : memref<16x2048xf32, #tpu.memory_space<vmem>>, vector<4x512xf32>,
    %c0_68 = arith.constant 0 : index
    %c2_69 = arith.constant 2 : index
    %c1_70 = arith.constant 1 : index
    %c0_71 = arith.constant 0 : index
    %52 = vector.load %arg1[%c0_68, %c2_69, %c1_70, %c0_71] : memref<1x5x5x512xbf16, #tpu.memory_space<vmem>>, vector<1x1x4x512xbf16>
    %53 = vector.shape_cast %52 : vector<1x1x4x512xbf16> to vector<4x512xbf16>
    %54 = arith.extf %53 : vector<4x512xbf16> to vector<4x512xf32>
    %c4_72 = arith.constant 4 : index
    %c1536_73 = arith.constant 1536 : index
    %55 = vector.load %arg5[%c4_72, %c1536_73] : memref<16x2048xf32, #tpu.memory_space<vmem>>, vector<4x512xf32>
    tpu.vector_store %arg5[%c4_72, %c1536_73], %54 {strides = array<i32>} : memref<16x2048xf32, #tpu.memory_space<vmem>>, vector<4x512xf32>,
    %c0_74 = arith.constant 0 : index
    %c3_75 = arith.constant 3 : index
    %c1_76 = arith.constant 1 : index
    %c0_77 = arith.constant 0 : index
    %56 = vector.load %arg1[%c0_74, %c3_75, %c1_76, %c0_77] : memref<1x5x5x512xbf16, #tpu.memory_space<vmem>>, vector<1x1x4x512xbf16>
    %57 = vector.shape_cast %56 : vector<1x1x4x512xbf16> to vector<4x512xbf16>
    %58 = arith.extf %57 : vector<4x512xbf16> to vector<4x512xf32>
    %c8_78 = arith.constant 8 : index
    %c1536_79 = arith.constant 1536 : index
    %59 = vector.load %arg5[%c8_78, %c1536_79] : memref<16x2048xf32, #tpu.memory_space<vmem>>, vector<4x512xf32>
    tpu.vector_store %arg5[%c8_78, %c1536_79], %58 {strides = array<i32>} : memref<16x2048xf32, #tpu.memory_space<vmem>>, vector<4x512xf32>,
    %c0_80 = arith.constant 0 : index
    %c4_81 = arith.constant 4 : index
    %c1_82 = arith.constant 1 : index
    %c0_83 = arith.constant 0 : index
    %60 = vector.load %arg1[%c0_80, %c4_81, %c1_82, %c0_83] : memref<1x5x5x512xbf16, #tpu.memory_space<vmem>>, vector<1x1x4x512xbf16>
    %61 = vector.shape_cast %60 : vector<1x1x4x512xbf16> to vector<4x512xbf16>
    %62 = arith.extf %61 : vector<4x512xbf16> to vector<4x512xf32>
    %c12_84 = arith.constant 12 : index
    %c1536_85 = arith.constant 1536 : index
    %63 = vector.load %arg5[%c12_84, %c1536_85] : memref<16x2048xf32, #tpu.memory_space<vmem>>, vector<4x512xf32>
    tpu.vector_store %arg5[%c12_84, %c1536_85], %62 {strides = array<i32>} : memref<16x2048xf32, #tpu.memory_space<vmem>>, vector<4x512xf32>,
    %c0_86 = arith.constant 0 : index
    %c0_87 = arith.constant 0 : index
    %64 = vector.load %arg5[%c0_86, %c0_87] : memref<16x2048xf32, #tpu.memory_space<vmem>>, vector<16x2048xf32>
    %65 = arith.truncf %64 : vector<16x2048xf32> to vector<16x2048xbf16>
    %c0_88 = arith.constant 0 : index
    %c0_89 = arith.constant 0 : index
    %66 = vector.load %arg2[%c0_88, %c0_89] : memref<2048x128xbf16, #tpu.memory_space<vmem>>, vector<2048x128xbf16>
    %cst = arith.constant dense<0.000000e+00> : vector<16x128xf32>
    %67 = tpu.matmul %65, %66, %cst {dimension_numbers = #tpu.dot_dimension_numbers<[1], [0], [0], [1], [0, 0, 1, 1], [], []>} : vector<16x2048xbf16>, vector<2048x128xbf16>, vector<16x128xf32> -> vector<16x128xf32>
    %c0_90 = arith.constant 0 : index
    %c0_91 = arith.constant 0 : index
    %68 = vector.load %arg3[%c0_90, %c0_91] : memref<1x128xf32, #tpu.memory_space<vmem>>, vector<1x128xf32>
    %69 = vector.broadcast %68 : vector<1x128xf32> to vector<16x128xf32>
    %70 = arith.addf %67, %69 : vector<16x128xf32>
    %cst_92 = arith.constant 0.000000e+00 : f32
    %71 = vector.broadcast %cst_92 : f32 to vector<16x128xf32>
    %72 = arith.cmpf oge, %70, %71 : vector<16x128xf32>
    %cst_93 = arith.constant 2.000000e-01 : f32
    %73 = vector.broadcast %cst_93 : f32 to vector<16x128xf32>
    %74 = arith.mulf %73, %70 : vector<16x128xf32>
    %75 = arith.select %72, %70, %74 : vector<16x128xi1>, vector<16x128xf32>
    %76 = arith.truncf %75 : vector<16x128xf32> to vector<16x128xbf16>
    %c0_94 = arith.constant 0 : index
    %c0_95 = arith.constant 0 : index
    %c0_96 = arith.constant 0 : index
    %77 = vector.load %arg4[%c0_94, %c0_95, %c0_96] : memref<1x16x128xbf16, #tpu.memory_space<vmem>>, vector<1x16x128xbf16>
    %78 = vector.shape_cast %77 : vector<1x16x128xbf16> to vector<16x128xbf16>
    %79 = vector.shape_cast %76 : vector<16x128xbf16> to vector<1x16x128xbf16>
    tpu.vector_store %arg4[%c0_94, %c0_95, %c0_96], %79 {strides = array<i32>} : memref<1x16x128xbf16, #tpu.memory_space<vmem>>, vector<1x16x128xbf16>,
    return
  }
  func.func @transform_0(%arg0: i32) -> (i32, i32, i32, i32) {
    %c0_i32 = arith.constant 0 : i32
    %c0_i32_0 = arith.constant 0 : i32
    %c0_i32_1 = arith.constant 0 : i32
    %c0_i32_2 = arith.constant 0 : i32
    return %arg0, %c0_i32, %c0_i32_0, %c0_i32_1 : i32, i32, i32, i32
  }
  func.func @transform_1(%arg0: i32) -> (i32, i32) {
    %c0_i32 = arith.constant 0 : i32
    %c0_i32_0 = arith.constant 0 : i32
    %c0_i32_1 = arith.constant 0 : i32
    return %c0_i32, %c0_i32_0 : i32, i32
  }
  func.func @transform_2(%arg0: i32) -> (i32, i32) {
    %c0_i32 = arith.constant 0 : i32
    %c0_i32_0 = arith.constant 0 : i32
    %c0_i32_1 = arith.constant 0 : i32
    return %c0_i32, %c0_i32_0 : i32, i32
  }
  func.func @transform_3(%arg0: i32) -> (i32, i32, i32) {
    %c0_i32 = arith.constant 0 : i32
    %c0_i32_0 = arith.constant 0 : i32
    %c0_i32_1 = arith.constant 0 : i32
    return %arg0, %c0_i32, %c0_i32_0 : i32, i32, i32
  }
}

module attributes {stable_mosaic.version = 11 : i64} {
  func.func @_fused_conv_kernel(%arg0: i32, %arg1: memref<1x6x6x128xbf16, #tpu.memory_space<vmem>>, %arg2: memref<2048x128xbf16, #tpu.memory_space<vmem>>, %arg3: memref<1x128xf32, #tpu.memory_space<vmem>>, %arg4: memref<1x9x128xbf16, #tpu.memory_space<vmem>>, %arg5: memref<9x2048xf32, #tpu.memory_space<vmem>>) attributes {dimension_semantics = [#tpu.dimension_semantics<parallel>], iteration_bounds = array<i64: 2>, scalar_prefetch = 0 : i64, scratch_operands = 1 : i64, tpu.core_type = #tpu.core_type<tc>, window_params = [{transform_indices = @transform_0, window_bounds = array<i64: 1, 6, 6, 128>}, {pipeline_mode = #tpu.pipeline_mode<synchronous>, transform_indices = @transform_1, window_bounds = array<i64: 2048, 128>}, {pipeline_mode = #tpu.pipeline_mode<synchronous>, transform_indices = @transform_2, window_bounds = array<i64: 1, 128>}, {transform_indices = @transform_3, window_bounds = array<i64: 1, 9, 128>}]} {
    %c0 = arith.constant 0 : index
    %c0_0 = arith.constant 0 : index
    %c0_1 = arith.constant 0 : index
    %c0_2 = arith.constant 0 : index
    %0 = vector.load %arg1[%c0, %c0_0, %c0_1, %c0_2] : memref<1x6x6x128xbf16, #tpu.memory_space<vmem>>, vector<1x1x3x128xbf16>
    %1 = vector.shape_cast %0 : vector<1x1x3x128xbf16> to vector<3x128xbf16>
    %2 = arith.extf %1 : vector<3x128xbf16> to vector<3x128xf32>
    %c0_3 = arith.constant 0 : index
    %c0_4 = arith.constant 0 : index
    %3 = vector.load %arg5[%c0_3, %c0_4] : memref<9x2048xf32, #tpu.memory_space<vmem>>, vector<3x128xf32>
    tpu.vector_store %arg5[%c0_3, %c0_4], %2 {strides = array<i32>} : memref<9x2048xf32, #tpu.memory_space<vmem>>, vector<3x128xf32>,
    %c0_5 = arith.constant 0 : index
    %c1 = arith.constant 1 : index
    %c0_6 = arith.constant 0 : index
    %c0_7 = arith.constant 0 : index
    %4 = vector.load %arg1[%c0_5, %c1, %c0_6, %c0_7] : memref<1x6x6x128xbf16, #tpu.memory_space<vmem>>, vector<1x1x3x128xbf16>
    %5 = vector.shape_cast %4 : vector<1x1x3x128xbf16> to vector<3x128xbf16>
    %6 = arith.extf %5 : vector<3x128xbf16> to vector<3x128xf32>
    %c3 = arith.constant 3 : index
    %c0_8 = arith.constant 0 : index
    %7 = vector.load %arg5[%c3, %c0_8] : memref<9x2048xf32, #tpu.memory_space<vmem>>, vector<3x128xf32>
    tpu.vector_store %arg5[%c3, %c0_8], %6 {strides = array<i32>} : memref<9x2048xf32, #tpu.memory_space<vmem>>, vector<3x128xf32>,
    %c0_9 = arith.constant 0 : index
    %c2 = arith.constant 2 : index
    %c0_10 = arith.constant 0 : index
    %c0_11 = arith.constant 0 : index
    %8 = vector.load %arg1[%c0_9, %c2, %c0_10, %c0_11] : memref<1x6x6x128xbf16, #tpu.memory_space<vmem>>, vector<1x1x3x128xbf16>
    %9 = vector.shape_cast %8 : vector<1x1x3x128xbf16> to vector<3x128xbf16>
    %10 = arith.extf %9 : vector<3x128xbf16> to vector<3x128xf32>
    %c6 = arith.constant 6 : index
    %c0_12 = arith.constant 0 : index
    %11 = vector.load %arg5[%c6, %c0_12] : memref<9x2048xf32, #tpu.memory_space<vmem>>, vector<3x128xf32>
    tpu.vector_store %arg5[%c6, %c0_12], %10 {strides = array<i32>} : memref<9x2048xf32, #tpu.memory_space<vmem>>, vector<3x128xf32>,
    %c0_13 = arith.constant 0 : index
    %c0_14 = arith.constant 0 : index
    %c1_15 = arith.constant 1 : index
    %c0_16 = arith.constant 0 : index
    %12 = vector.load %arg1[%c0_13, %c0_14, %c1_15, %c0_16] : memref<1x6x6x128xbf16, #tpu.memory_space<vmem>>, vector<1x1x3x128xbf16>
    %13 = vector.shape_cast %12 : vector<1x1x3x128xbf16> to vector<3x128xbf16>
    %14 = arith.extf %13 : vector<3x128xbf16> to vector<3x128xf32>
    %c0_17 = arith.constant 0 : index
    %c128 = arith.constant 128 : index
    %15 = vector.load %arg5[%c0_17, %c128] : memref<9x2048xf32, #tpu.memory_space<vmem>>, vector<3x128xf32>
    tpu.vector_store %arg5[%c0_17, %c128], %14 {strides = array<i32>} : memref<9x2048xf32, #tpu.memory_space<vmem>>, vector<3x128xf32>,
    %c0_18 = arith.constant 0 : index
    %c1_19 = arith.constant 1 : index
    %c1_20 = arith.constant 1 : index
    %c0_21 = arith.constant 0 : index
    %16 = vector.load %arg1[%c0_18, %c1_19, %c1_20, %c0_21] : memref<1x6x6x128xbf16, #tpu.memory_space<vmem>>, vector<1x1x3x128xbf16>
    %17 = vector.shape_cast %16 : vector<1x1x3x128xbf16> to vector<3x128xbf16>
    %18 = arith.extf %17 : vector<3x128xbf16> to vector<3x128xf32>
    %c3_22 = arith.constant 3 : index
    %c128_23 = arith.constant 128 : index
    %19 = vector.load %arg5[%c3_22, %c128_23] : memref<9x2048xf32, #tpu.memory_space<vmem>>, vector<3x128xf32>
    tpu.vector_store %arg5[%c3_22, %c128_23], %18 {strides = array<i32>} : memref<9x2048xf32, #tpu.memory_space<vmem>>, vector<3x128xf32>,
    %c0_24 = arith.constant 0 : index
    %c2_25 = arith.constant 2 : index
    %c1_26 = arith.constant 1 : index
    %c0_27 = arith.constant 0 : index
    %20 = vector.load %arg1[%c0_24, %c2_25, %c1_26, %c0_27] : memref<1x6x6x128xbf16, #tpu.memory_space<vmem>>, vector<1x1x3x128xbf16>
    %21 = vector.shape_cast %20 : vector<1x1x3x128xbf16> to vector<3x128xbf16>
    %22 = arith.extf %21 : vector<3x128xbf16> to vector<3x128xf32>
    %c6_28 = arith.constant 6 : index
    %c128_29 = arith.constant 128 : index
    %23 = vector.load %arg5[%c6_28, %c128_29] : memref<9x2048xf32, #tpu.memory_space<vmem>>, vector<3x128xf32>
    tpu.vector_store %arg5[%c6_28, %c128_29], %22 {strides = array<i32>} : memref<9x2048xf32, #tpu.memory_space<vmem>>, vector<3x128xf32>,
    %c0_30 = arith.constant 0 : index
    %c0_31 = arith.constant 0 : index
    %c2_32 = arith.constant 2 : index
    %c0_33 = arith.constant 0 : index
    %24 = vector.load %arg1[%c0_30, %c0_31, %c2_32, %c0_33] : memref<1x6x6x128xbf16, #tpu.memory_space<vmem>>, vector<1x1x3x128xbf16>
    %25 = vector.shape_cast %24 : vector<1x1x3x128xbf16> to vector<3x128xbf16>
    %26 = arith.extf %25 : vector<3x128xbf16> to vector<3x128xf32>
    %c0_34 = arith.constant 0 : index
    %c256 = arith.constant 256 : index
    %27 = vector.load %arg5[%c0_34, %c256] : memref<9x2048xf32, #tpu.memory_space<vmem>>, vector<3x128xf32>
    tpu.vector_store %arg5[%c0_34, %c256], %26 {strides = array<i32>} : memref<9x2048xf32, #tpu.memory_space<vmem>>, vector<3x128xf32>,
    %c0_35 = arith.constant 0 : index
    %c1_36 = arith.constant 1 : index
    %c2_37 = arith.constant 2 : index
    %c0_38 = arith.constant 0 : index
    %28 = vector.load %arg1[%c0_35, %c1_36, %c2_37, %c0_38] : memref<1x6x6x128xbf16, #tpu.memory_space<vmem>>, vector<1x1x3x128xbf16>
    %29 = vector.shape_cast %28 : vector<1x1x3x128xbf16> to vector<3x128xbf16>
    %30 = arith.extf %29 : vector<3x128xbf16> to vector<3x128xf32>
    %c3_39 = arith.constant 3 : index
    %c256_40 = arith.constant 256 : index
    %31 = vector.load %arg5[%c3_39, %c256_40] : memref<9x2048xf32, #tpu.memory_space<vmem>>, vector<3x128xf32>
    tpu.vector_store %arg5[%c3_39, %c256_40], %30 {strides = array<i32>} : memref<9x2048xf32, #tpu.memory_space<vmem>>, vector<3x128xf32>,
    %c0_41 = arith.constant 0 : index
    %c2_42 = arith.constant 2 : index
    %c2_43 = arith.constant 2 : index
    %c0_44 = arith.constant 0 : index
    %32 = vector.load %arg1[%c0_41, %c2_42, %c2_43, %c0_44] : memref<1x6x6x128xbf16, #tpu.memory_space<vmem>>, vector<1x1x3x128xbf16>
    %33 = vector.shape_cast %32 : vector<1x1x3x128xbf16> to vector<3x128xbf16>
    %34 = arith.extf %33 : vector<3x128xbf16> to vector<3x128xf32>
    %c6_45 = arith.constant 6 : index
    %c256_46 = arith.constant 256 : index
    %35 = vector.load %arg5[%c6_45, %c256_46] : memref<9x2048xf32, #tpu.memory_space<vmem>>, vector<3x128xf32>
    tpu.vector_store %arg5[%c6_45, %c256_46], %34 {strides = array<i32>} : memref<9x2048xf32, #tpu.memory_space<vmem>>, vector<3x128xf32>,
    %c0_47 = arith.constant 0 : index
    %c0_48 = arith.constant 0 : index
    %c3_49 = arith.constant 3 : index
    %c0_50 = arith.constant 0 : index
    %36 = vector.load %arg1[%c0_47, %c0_48, %c3_49, %c0_50] : memref<1x6x6x128xbf16, #tpu.memory_space<vmem>>, vector<1x1x3x128xbf16>
    %37 = vector.shape_cast %36 : vector<1x1x3x128xbf16> to vector<3x128xbf16>
    %38 = arith.extf %37 : vector<3x128xbf16> to vector<3x128xf32>
    %c0_51 = arith.constant 0 : index
    %c384 = arith.constant 384 : index
    %39 = vector.load %arg5[%c0_51, %c384] : memref<9x2048xf32, #tpu.memory_space<vmem>>, vector<3x128xf32>
    tpu.vector_store %arg5[%c0_51, %c384], %38 {strides = array<i32>} : memref<9x2048xf32, #tpu.memory_space<vmem>>, vector<3x128xf32>,
    %c0_52 = arith.constant 0 : index
    %c1_53 = arith.constant 1 : index
    %c3_54 = arith.constant 3 : index
    %c0_55 = arith.constant 0 : index
    %40 = vector.load %arg1[%c0_52, %c1_53, %c3_54, %c0_55] : memref<1x6x6x128xbf16, #tpu.memory_space<vmem>>, vector<1x1x3x128xbf16>
    %41 = vector.shape_cast %40 : vector<1x1x3x128xbf16> to vector<3x128xbf16>
    %42 = arith.extf %41 : vector<3x128xbf16> to vector<3x128xf32>
    %c3_56 = arith.constant 3 : index
    %c384_57 = arith.constant 384 : index
    %43 = vector.load %arg5[%c3_56, %c384_57] : memref<9x2048xf32, #tpu.memory_space<vmem>>, vector<3x128xf32>
    tpu.vector_store %arg5[%c3_56, %c384_57], %42 {strides = array<i32>} : memref<9x2048xf32, #tpu.memory_space<vmem>>, vector<3x128xf32>,
    %c0_58 = arith.constant 0 : index
    %c2_59 = arith.constant 2 : index
    %c3_60 = arith.constant 3 : index
    %c0_61 = arith.constant 0 : index
    %44 = vector.load %arg1[%c0_58, %c2_59, %c3_60, %c0_61] : memref<1x6x6x128xbf16, #tpu.memory_space<vmem>>, vector<1x1x3x128xbf16>
    %45 = vector.shape_cast %44 : vector<1x1x3x128xbf16> to vector<3x128xbf16>
    %46 = arith.extf %45 : vector<3x128xbf16> to vector<3x128xf32>
    %c6_62 = arith.constant 6 : index
    %c384_63 = arith.constant 384 : index
    %47 = vector.load %arg5[%c6_62, %c384_63] : memref<9x2048xf32, #tpu.memory_space<vmem>>, vector<3x128xf32>
    tpu.vector_store %arg5[%c6_62, %c384_63], %46 {strides = array<i32>} : memref<9x2048xf32, #tpu.memory_space<vmem>>, vector<3x128xf32>,
    %c0_64 = arith.constant 0 : index
    %c1_65 = arith.constant 1 : index
    %c0_66 = arith.constant 0 : index
    %c0_67 = arith.constant 0 : index
    %48 = vector.load %arg1[%c0_64, %c1_65, %c0_66, %c0_67] : memref<1x6x6x128xbf16, #tpu.memory_space<vmem>>, vector<1x1x3x128xbf16>
    %49 = vector.shape_cast %48 : vector<1x1x3x128xbf16> to vector<3x128xbf16>
    %50 = arith.extf %49 : vector<3x128xbf16> to vector<3x128xf32>
    %c0_68 = arith.constant 0 : index
    %c512 = arith.constant 512 : index
    %51 = vector.load %arg5[%c0_68, %c512] : memref<9x2048xf32, #tpu.memory_space<vmem>>, vector<3x128xf32>
    tpu.vector_store %arg5[%c0_68, %c512], %50 {strides = array<i32>} : memref<9x2048xf32, #tpu.memory_space<vmem>>, vector<3x128xf32>,
    %c0_69 = arith.constant 0 : index
    %c2_70 = arith.constant 2 : index
    %c0_71 = arith.constant 0 : index
    %c0_72 = arith.constant 0 : index
    %52 = vector.load %arg1[%c0_69, %c2_70, %c0_71, %c0_72] : memref<1x6x6x128xbf16, #tpu.memory_space<vmem>>, vector<1x1x3x128xbf16>
    %53 = vector.shape_cast %52 : vector<1x1x3x128xbf16> to vector<3x128xbf16>
    %54 = arith.extf %53 : vector<3x128xbf16> to vector<3x128xf32>
    %c3_73 = arith.constant 3 : index
    %c512_74 = arith.constant 512 : index
    %55 = vector.load %arg5[%c3_73, %c512_74] : memref<9x2048xf32, #tpu.memory_space<vmem>>, vector<3x128xf32>
    tpu.vector_store %arg5[%c3_73, %c512_74], %54 {strides = array<i32>} : memref<9x2048xf32, #tpu.memory_space<vmem>>, vector<3x128xf32>,
    %c0_75 = arith.constant 0 : index
    %c3_76 = arith.constant 3 : index
    %c0_77 = arith.constant 0 : index
    %c0_78 = arith.constant 0 : index
    %56 = vector.load %arg1[%c0_75, %c3_76, %c0_77, %c0_78] : memref<1x6x6x128xbf16, #tpu.memory_space<vmem>>, vector<1x1x3x128xbf16>
    %57 = vector.shape_cast %56 : vector<1x1x3x128xbf16> to vector<3x128xbf16>
    %58 = arith.extf %57 : vector<3x128xbf16> to vector<3x128xf32>
    %c6_79 = arith.constant 6 : index
    %c512_80 = arith.constant 512 : index
    %59 = vector.load %arg5[%c6_79, %c512_80] : memref<9x2048xf32, #tpu.memory_space<vmem>>, vector<3x128xf32>
    tpu.vector_store %arg5[%c6_79, %c512_80], %58 {strides = array<i32>} : memref<9x2048xf32, #tpu.memory_space<vmem>>, vector<3x128xf32>,
    %c0_81 = arith.constant 0 : index
    %c1_82 = arith.constant 1 : index
    %c1_83 = arith.constant 1 : index
    %c0_84 = arith.constant 0 : index
    %60 = vector.load %arg1[%c0_81, %c1_82, %c1_83, %c0_84] : memref<1x6x6x128xbf16, #tpu.memory_space<vmem>>, vector<1x1x3x128xbf16>
    %61 = vector.shape_cast %60 : vector<1x1x3x128xbf16> to vector<3x128xbf16>
    %62 = arith.extf %61 : vector<3x128xbf16> to vector<3x128xf32>
    %c0_85 = arith.constant 0 : index
    %c640 = arith.constant 640 : index
    %63 = vector.load %arg5[%c0_85, %c640] : memref<9x2048xf32, #tpu.memory_space<vmem>>, vector<3x128xf32>
    tpu.vector_store %arg5[%c0_85, %c640], %62 {strides = array<i32>} : memref<9x2048xf32, #tpu.memory_space<vmem>>, vector<3x128xf32>,
    %c0_86 = arith.constant 0 : index
    %c2_87 = arith.constant 2 : index
    %c1_88 = arith.constant 1 : index
    %c0_89 = arith.constant 0 : index
    %64 = vector.load %arg1[%c0_86, %c2_87, %c1_88, %c0_89] : memref<1x6x6x128xbf16, #tpu.memory_space<vmem>>, vector<1x1x3x128xbf16>
    %65 = vector.shape_cast %64 : vector<1x1x3x128xbf16> to vector<3x128xbf16>
    %66 = arith.extf %65 : vector<3x128xbf16> to vector<3x128xf32>
    %c3_90 = arith.constant 3 : index
    %c640_91 = arith.constant 640 : index
    %67 = vector.load %arg5[%c3_90, %c640_91] : memref<9x2048xf32, #tpu.memory_space<vmem>>, vector<3x128xf32>
    tpu.vector_store %arg5[%c3_90, %c640_91], %66 {strides = array<i32>} : memref<9x2048xf32, #tpu.memory_space<vmem>>, vector<3x128xf32>,
    %c0_92 = arith.constant 0 : index
    %c3_93 = arith.constant 3 : index
    %c1_94 = arith.constant 1 : index
    %c0_95 = arith.constant 0 : index
    %68 = vector.load %arg1[%c0_92, %c3_93, %c1_94, %c0_95] : memref<1x6x6x128xbf16, #tpu.memory_space<vmem>>, vector<1x1x3x128xbf16>
    %69 = vector.shape_cast %68 : vector<1x1x3x128xbf16> to vector<3x128xbf16>
    %70 = arith.extf %69 : vector<3x128xbf16> to vector<3x128xf32>
    %c6_96 = arith.constant 6 : index
    %c640_97 = arith.constant 640 : index
    %71 = vector.load %arg5[%c6_96, %c640_97] : memref<9x2048xf32, #tpu.memory_space<vmem>>, vector<3x128xf32>
    tpu.vector_store %arg5[%c6_96, %c640_97], %70 {strides = array<i32>} : memref<9x2048xf32, #tpu.memory_space<vmem>>, vector<3x128xf32>,
    %c0_98 = arith.constant 0 : index
    %c1_99 = arith.constant 1 : index
    %c2_100 = arith.constant 2 : index
    %c0_101 = arith.constant 0 : index
    %72 = vector.load %arg1[%c0_98, %c1_99, %c2_100, %c0_101] : memref<1x6x6x128xbf16, #tpu.memory_space<vmem>>, vector<1x1x3x128xbf16>
    %73 = vector.shape_cast %72 : vector<1x1x3x128xbf16> to vector<3x128xbf16>
    %74 = arith.extf %73 : vector<3x128xbf16> to vector<3x128xf32>
    %c0_102 = arith.constant 0 : index
    %c768 = arith.constant 768 : index
    %75 = vector.load %arg5[%c0_102, %c768] : memref<9x2048xf32, #tpu.memory_space<vmem>>, vector<3x128xf32>
    tpu.vector_store %arg5[%c0_102, %c768], %74 {strides = array<i32>} : memref<9x2048xf32, #tpu.memory_space<vmem>>, vector<3x128xf32>,
    %c0_103 = arith.constant 0 : index
    %c2_104 = arith.constant 2 : index
    %c2_105 = arith.constant 2 : index
    %c0_106 = arith.constant 0 : index
    %76 = vector.load %arg1[%c0_103, %c2_104, %c2_105, %c0_106] : memref<1x6x6x128xbf16, #tpu.memory_space<vmem>>, vector<1x1x3x128xbf16>
    %77 = vector.shape_cast %76 : vector<1x1x3x128xbf16> to vector<3x128xbf16>
    %78 = arith.extf %77 : vector<3x128xbf16> to vector<3x128xf32>
    %c3_107 = arith.constant 3 : index
    %c768_108 = arith.constant 768 : index
    %79 = vector.load %arg5[%c3_107, %c768_108] : memref<9x2048xf32, #tpu.memory_space<vmem>>, vector<3x128xf32>
    tpu.vector_store %arg5[%c3_107, %c768_108], %78 {strides = array<i32>} : memref<9x2048xf32, #tpu.memory_space<vmem>>, vector<3x128xf32>,
    %c0_109 = arith.constant 0 : index
    %c3_110 = arith.constant 3 : index
    %c2_111 = arith.constant 2 : index
    %c0_112 = arith.constant 0 : index
    %80 = vector.load %arg1[%c0_109, %c3_110, %c2_111, %c0_112] : memref<1x6x6x128xbf16, #tpu.memory_space<vmem>>, vector<1x1x3x128xbf16>
    %81 = vector.shape_cast %80 : vector<1x1x3x128xbf16> to vector<3x128xbf16>
    %82 = arith.extf %81 : vector<3x128xbf16> to vector<3x128xf32>
    %c6_113 = arith.constant 6 : index
    %c768_114 = arith.constant 768 : index
    %83 = vector.load %arg5[%c6_113, %c768_114] : memref<9x2048xf32, #tpu.memory_space<vmem>>, vector<3x128xf32>
    tpu.vector_store %arg5[%c6_113, %c768_114], %82 {strides = array<i32>} : memref<9x2048xf32, #tpu.memory_space<vmem>>, vector<3x128xf32>,
    %c0_115 = arith.constant 0 : index
    %c1_116 = arith.constant 1 : index
    %c3_117 = arith.constant 3 : index
    %c0_118 = arith.constant 0 : index
    %84 = vector.load %arg1[%c0_115, %c1_116, %c3_117, %c0_118] : memref<1x6x6x128xbf16, #tpu.memory_space<vmem>>, vector<1x1x3x128xbf16>
    %85 = vector.shape_cast %84 : vector<1x1x3x128xbf16> to vector<3x128xbf16>
    %86 = arith.extf %85 : vector<3x128xbf16> to vector<3x128xf32>
    %c0_119 = arith.constant 0 : index
    %c896 = arith.constant 896 : index
    %87 = vector.load %arg5[%c0_119, %c896] : memref<9x2048xf32, #tpu.memory_space<vmem>>, vector<3x128xf32>
    tpu.vector_store %arg5[%c0_119, %c896], %86 {strides = array<i32>} : memref<9x2048xf32, #tpu.memory_space<vmem>>, vector<3x128xf32>,
    %c0_120 = arith.constant 0 : index
    %c2_121 = arith.constant 2 : index
    %c3_122 = arith.constant 3 : index
    %c0_123 = arith.constant 0 : index
    %88 = vector.load %arg1[%c0_120, %c2_121, %c3_122, %c0_123] : memref<1x6x6x128xbf16, #tpu.memory_space<vmem>>, vector<1x1x3x128xbf16>
    %89 = vector.shape_cast %88 : vector<1x1x3x128xbf16> to vector<3x128xbf16>
    %90 = arith.extf %89 : vector<3x128xbf16> to vector<3x128xf32>
    %c3_124 = arith.constant 3 : index
    %c896_125 = arith.constant 896 : index
    %91 = vector.load %arg5[%c3_124, %c896_125] : memref<9x2048xf32, #tpu.memory_space<vmem>>, vector<3x128xf32>
    tpu.vector_store %arg5[%c3_124, %c896_125], %90 {strides = array<i32>} : memref<9x2048xf32, #tpu.memory_space<vmem>>, vector<3x128xf32>,
    %c0_126 = arith.constant 0 : index
    %c3_127 = arith.constant 3 : index
    %c3_128 = arith.constant 3 : index
    %c0_129 = arith.constant 0 : index
    %92 = vector.load %arg1[%c0_126, %c3_127, %c3_128, %c0_129] : memref<1x6x6x128xbf16, #tpu.memory_space<vmem>>, vector<1x1x3x128xbf16>
    %93 = vector.shape_cast %92 : vector<1x1x3x128xbf16> to vector<3x128xbf16>
    %94 = arith.extf %93 : vector<3x128xbf16> to vector<3x128xf32>
    %c6_130 = arith.constant 6 : index
    %c896_131 = arith.constant 896 : index
    %95 = vector.load %arg5[%c6_130, %c896_131] : memref<9x2048xf32, #tpu.memory_space<vmem>>, vector<3x128xf32>
    tpu.vector_store %arg5[%c6_130, %c896_131], %94 {strides = array<i32>} : memref<9x2048xf32, #tpu.memory_space<vmem>>, vector<3x128xf32>,
    %c0_132 = arith.constant 0 : index
    %c2_133 = arith.constant 2 : index
    %c0_134 = arith.constant 0 : index
    %c0_135 = arith.constant 0 : index
    %96 = vector.load %arg1[%c0_132, %c2_133, %c0_134, %c0_135] : memref<1x6x6x128xbf16, #tpu.memory_space<vmem>>, vector<1x1x3x128xbf16>
    %97 = vector.shape_cast %96 : vector<1x1x3x128xbf16> to vector<3x128xbf16>
    %98 = arith.extf %97 : vector<3x128xbf16> to vector<3x128xf32>
    %c0_136 = arith.constant 0 : index
    %c1024 = arith.constant 1024 : index
    %99 = vector.load %arg5[%c0_136, %c1024] : memref<9x2048xf32, #tpu.memory_space<vmem>>, vector<3x128xf32>
    tpu.vector_store %arg5[%c0_136, %c1024], %98 {strides = array<i32>} : memref<9x2048xf32, #tpu.memory_space<vmem>>, vector<3x128xf32>,
    %c0_137 = arith.constant 0 : index
    %c3_138 = arith.constant 3 : index
    %c0_139 = arith.constant 0 : index
    %c0_140 = arith.constant 0 : index
    %100 = vector.load %arg1[%c0_137, %c3_138, %c0_139, %c0_140] : memref<1x6x6x128xbf16, #tpu.memory_space<vmem>>, vector<1x1x3x128xbf16>
    %101 = vector.shape_cast %100 : vector<1x1x3x128xbf16> to vector<3x128xbf16>
    %102 = arith.extf %101 : vector<3x128xbf16> to vector<3x128xf32>
    %c3_141 = arith.constant 3 : index
    %c1024_142 = arith.constant 1024 : index
    %103 = vector.load %arg5[%c3_141, %c1024_142] : memref<9x2048xf32, #tpu.memory_space<vmem>>, vector<3x128xf32>
    tpu.vector_store %arg5[%c3_141, %c1024_142], %102 {strides = array<i32>} : memref<9x2048xf32, #tpu.memory_space<vmem>>, vector<3x128xf32>,
    %c0_143 = arith.constant 0 : index
    %c4 = arith.constant 4 : index
    %c0_144 = arith.constant 0 : index
    %c0_145 = arith.constant 0 : index
    %104 = vector.load %arg1[%c0_143, %c4, %c0_144, %c0_145] : memref<1x6x6x128xbf16, #tpu.memory_space<vmem>>, vector<1x1x3x128xbf16>
    %105 = vector.shape_cast %104 : vector<1x1x3x128xbf16> to vector<3x128xbf16>
    %106 = arith.extf %105 : vector<3x128xbf16> to vector<3x128xf32>
    %c6_146 = arith.constant 6 : index
    %c1024_147 = arith.constant 1024 : index
    %107 = vector.load %arg5[%c6_146, %c1024_147] : memref<9x2048xf32, #tpu.memory_space<vmem>>, vector<3x128xf32>
    tpu.vector_store %arg5[%c6_146, %c1024_147], %106 {strides = array<i32>} : memref<9x2048xf32, #tpu.memory_space<vmem>>, vector<3x128xf32>,
    %c0_148 = arith.constant 0 : index
    %c2_149 = arith.constant 2 : index
    %c1_150 = arith.constant 1 : index
    %c0_151 = arith.constant 0 : index
    %108 = vector.load %arg1[%c0_148, %c2_149, %c1_150, %c0_151] : memref<1x6x6x128xbf16, #tpu.memory_space<vmem>>, vector<1x1x3x128xbf16>
    %109 = vector.shape_cast %108 : vector<1x1x3x128xbf16> to vector<3x128xbf16>
    %110 = arith.extf %109 : vector<3x128xbf16> to vector<3x128xf32>
    %c0_152 = arith.constant 0 : index
    %c1152 = arith.constant 1152 : index
    %111 = vector.load %arg5[%c0_152, %c1152] : memref<9x2048xf32, #tpu.memory_space<vmem>>, vector<3x128xf32>
    tpu.vector_store %arg5[%c0_152, %c1152], %110 {strides = array<i32>} : memref<9x2048xf32, #tpu.memory_space<vmem>>, vector<3x128xf32>,
    %c0_153 = arith.constant 0 : index
    %c3_154 = arith.constant 3 : index
    %c1_155 = arith.constant 1 : index
    %c0_156 = arith.constant 0 : index
    %112 = vector.load %arg1[%c0_153, %c3_154, %c1_155, %c0_156] : memref<1x6x6x128xbf16, #tpu.memory_space<vmem>>, vector<1x1x3x128xbf16>
    %113 = vector.shape_cast %112 : vector<1x1x3x128xbf16> to vector<3x128xbf16>
    %114 = arith.extf %113 : vector<3x128xbf16> to vector<3x128xf32>
    %c3_157 = arith.constant 3 : index
    %c1152_158 = arith.constant 1152 : index
    %115 = vector.load %arg5[%c3_157, %c1152_158] : memref<9x2048xf32, #tpu.memory_space<vmem>>, vector<3x128xf32>
    tpu.vector_store %arg5[%c3_157, %c1152_158], %114 {strides = array<i32>} : memref<9x2048xf32, #tpu.memory_space<vmem>>, vector<3x128xf32>,
    %c0_159 = arith.constant 0 : index
    %c4_160 = arith.constant 4 : index
    %c1_161 = arith.constant 1 : index
    %c0_162 = arith.constant 0 : index
    %116 = vector.load %arg1[%c0_159, %c4_160, %c1_161, %c0_162] : memref<1x6x6x128xbf16, #tpu.memory_space<vmem>>, vector<1x1x3x128xbf16>
    %117 = vector.shape_cast %116 : vector<1x1x3x128xbf16> to vector<3x128xbf16>
    %118 = arith.extf %117 : vector<3x128xbf16> to vector<3x128xf32>
    %c6_163 = arith.constant 6 : index
    %c1152_164 = arith.constant 1152 : index
    %119 = vector.load %arg5[%c6_163, %c1152_164] : memref<9x2048xf32, #tpu.memory_space<vmem>>, vector<3x128xf32>
    tpu.vector_store %arg5[%c6_163, %c1152_164], %118 {strides = array<i32>} : memref<9x2048xf32, #tpu.memory_space<vmem>>, vector<3x128xf32>,
    %c0_165 = arith.constant 0 : index
    %c2_166 = arith.constant 2 : index
    %c2_167 = arith.constant 2 : index
    %c0_168 = arith.constant 0 : index
    %120 = vector.load %arg1[%c0_165, %c2_166, %c2_167, %c0_168] : memref<1x6x6x128xbf16, #tpu.memory_space<vmem>>, vector<1x1x3x128xbf16>
    %121 = vector.shape_cast %120 : vector<1x1x3x128xbf16> to vector<3x128xbf16>
    %122 = arith.extf %121 : vector<3x128xbf16> to vector<3x128xf32>
    %c0_169 = arith.constant 0 : index
    %c1280 = arith.constant 1280 : index
    %123 = vector.load %arg5[%c0_169, %c1280] : memref<9x2048xf32, #tpu.memory_space<vmem>>, vector<3x128xf32>
    tpu.vector_store %arg5[%c0_169, %c1280], %122 {strides = array<i32>} : memref<9x2048xf32, #tpu.memory_space<vmem>>, vector<3x128xf32>,
    %c0_170 = arith.constant 0 : index
    %c3_171 = arith.constant 3 : index
    %c2_172 = arith.constant 2 : index
    %c0_173 = arith.constant 0 : index
    %124 = vector.load %arg1[%c0_170, %c3_171, %c2_172, %c0_173] : memref<1x6x6x128xbf16, #tpu.memory_space<vmem>>, vector<1x1x3x128xbf16>
    %125 = vector.shape_cast %124 : vector<1x1x3x128xbf16> to vector<3x128xbf16>
    %126 = arith.extf %125 : vector<3x128xbf16> to vector<3x128xf32>
    %c3_174 = arith.constant 3 : index
    %c1280_175 = arith.constant 1280 : index
    %127 = vector.load %arg5[%c3_174, %c1280_175] : memref<9x2048xf32, #tpu.memory_space<vmem>>, vector<3x128xf32>
    tpu.vector_store %arg5[%c3_174, %c1280_175], %126 {strides = array<i32>} : memref<9x2048xf32, #tpu.memory_space<vmem>>, vector<3x128xf32>,
    %c0_176 = arith.constant 0 : index
    %c4_177 = arith.constant 4 : index
    %c2_178 = arith.constant 2 : index
    %c0_179 = arith.constant 0 : index
    %128 = vector.load %arg1[%c0_176, %c4_177, %c2_178, %c0_179] : memref<1x6x6x128xbf16, #tpu.memory_space<vmem>>, vector<1x1x3x128xbf16>
    %129 = vector.shape_cast %128 : vector<1x1x3x128xbf16> to vector<3x128xbf16>
    %130 = arith.extf %129 : vector<3x128xbf16> to vector<3x128xf32>
    %c6_180 = arith.constant 6 : index
    %c1280_181 = arith.constant 1280 : index
    %131 = vector.load %arg5[%c6_180, %c1280_181] : memref<9x2048xf32, #tpu.memory_space<vmem>>, vector<3x128xf32>
    tpu.vector_store %arg5[%c6_180, %c1280_181], %130 {strides = array<i32>} : memref<9x2048xf32, #tpu.memory_space<vmem>>, vector<3x128xf32>,
    %c0_182 = arith.constant 0 : index
    %c2_183 = arith.constant 2 : index
    %c3_184 = arith.constant 3 : index
    %c0_185 = arith.constant 0 : index
    %132 = vector.load %arg1[%c0_182, %c2_183, %c3_184, %c0_185] : memref<1x6x6x128xbf16, #tpu.memory_space<vmem>>, vector<1x1x3x128xbf16>
    %133 = vector.shape_cast %132 : vector<1x1x3x128xbf16> to vector<3x128xbf16>
    %134 = arith.extf %133 : vector<3x128xbf16> to vector<3x128xf32>
    %c0_186 = arith.constant 0 : index
    %c1408 = arith.constant 1408 : index
    %135 = vector.load %arg5[%c0_186, %c1408] : memref<9x2048xf32, #tpu.memory_space<vmem>>, vector<3x128xf32>
    tpu.vector_store %arg5[%c0_186, %c1408], %134 {strides = array<i32>} : memref<9x2048xf32, #tpu.memory_space<vmem>>, vector<3x128xf32>,
    %c0_187 = arith.constant 0 : index
    %c3_188 = arith.constant 3 : index
    %c3_189 = arith.constant 3 : index
    %c0_190 = arith.constant 0 : index
    %136 = vector.load %arg1[%c0_187, %c3_188, %c3_189, %c0_190] : memref<1x6x6x128xbf16, #tpu.memory_space<vmem>>, vector<1x1x3x128xbf16>
    %137 = vector.shape_cast %136 : vector<1x1x3x128xbf16> to vector<3x128xbf16>
    %138 = arith.extf %137 : vector<3x128xbf16> to vector<3x128xf32>
    %c3_191 = arith.constant 3 : index
    %c1408_192 = arith.constant 1408 : index
    %139 = vector.load %arg5[%c3_191, %c1408_192] : memref<9x2048xf32, #tpu.memory_space<vmem>>, vector<3x128xf32>
    tpu.vector_store %arg5[%c3_191, %c1408_192], %138 {strides = array<i32>} : memref<9x2048xf32, #tpu.memory_space<vmem>>, vector<3x128xf32>,
    %c0_193 = arith.constant 0 : index
    %c4_194 = arith.constant 4 : index
    %c3_195 = arith.constant 3 : index
    %c0_196 = arith.constant 0 : index
    %140 = vector.load %arg1[%c0_193, %c4_194, %c3_195, %c0_196] : memref<1x6x6x128xbf16, #tpu.memory_space<vmem>>, vector<1x1x3x128xbf16>
    %141 = vector.shape_cast %140 : vector<1x1x3x128xbf16> to vector<3x128xbf16>
    %142 = arith.extf %141 : vector<3x128xbf16> to vector<3x128xf32>
    %c6_197 = arith.constant 6 : index
    %c1408_198 = arith.constant 1408 : index
    %143 = vector.load %arg5[%c6_197, %c1408_198] : memref<9x2048xf32, #tpu.memory_space<vmem>>, vector<3x128xf32>
    tpu.vector_store %arg5[%c6_197, %c1408_198], %142 {strides = array<i32>} : memref<9x2048xf32, #tpu.memory_space<vmem>>, vector<3x128xf32>,
    %c0_199 = arith.constant 0 : index
    %c3_200 = arith.constant 3 : index
    %c0_201 = arith.constant 0 : index
    %c0_202 = arith.constant 0 : index
    %144 = vector.load %arg1[%c0_199, %c3_200, %c0_201, %c0_202] : memref<1x6x6x128xbf16, #tpu.memory_space<vmem>>, vector<1x1x3x128xbf16>
    %145 = vector.shape_cast %144 : vector<1x1x3x128xbf16> to vector<3x128xbf16>
    %146 = arith.extf %145 : vector<3x128xbf16> to vector<3x128xf32>
    %c0_203 = arith.constant 0 : index
    %c1536 = arith.constant 1536 : index
    %147 = vector.load %arg5[%c0_203, %c1536] : memref<9x2048xf32, #tpu.memory_space<vmem>>, vector<3x128xf32>
    tpu.vector_store %arg5[%c0_203, %c1536], %146 {strides = array<i32>} : memref<9x2048xf32, #tpu.memory_space<vmem>>, vector<3x128xf32>,
    %c0_204 = arith.constant 0 : index
    %c4_205 = arith.constant 4 : index
    %c0_206 = arith.constant 0 : index
    %c0_207 = arith.constant 0 : index
    %148 = vector.load %arg1[%c0_204, %c4_205, %c0_206, %c0_207] : memref<1x6x6x128xbf16, #tpu.memory_space<vmem>>, vector<1x1x3x128xbf16>
    %149 = vector.shape_cast %148 : vector<1x1x3x128xbf16> to vector<3x128xbf16>
    %150 = arith.extf %149 : vector<3x128xbf16> to vector<3x128xf32>
    %c3_208 = arith.constant 3 : index
    %c1536_209 = arith.constant 1536 : index
    %151 = vector.load %arg5[%c3_208, %c1536_209] : memref<9x2048xf32, #tpu.memory_space<vmem>>, vector<3x128xf32>
    tpu.vector_store %arg5[%c3_208, %c1536_209], %150 {strides = array<i32>} : memref<9x2048xf32, #tpu.memory_space<vmem>>, vector<3x128xf32>,
    %c0_210 = arith.constant 0 : index
    %c5 = arith.constant 5 : index
    %c0_211 = arith.constant 0 : index
    %c0_212 = arith.constant 0 : index
    %152 = vector.load %arg1[%c0_210, %c5, %c0_211, %c0_212] : memref<1x6x6x128xbf16, #tpu.memory_space<vmem>>, vector<1x1x3x128xbf16>
    %153 = vector.shape_cast %152 : vector<1x1x3x128xbf16> to vector<3x128xbf16>
    %154 = arith.extf %153 : vector<3x128xbf16> to vector<3x128xf32>
    %c6_213 = arith.constant 6 : index
    %c1536_214 = arith.constant 1536 : index
    %155 = vector.load %arg5[%c6_213, %c1536_214] : memref<9x2048xf32, #tpu.memory_space<vmem>>, vector<3x128xf32>
    tpu.vector_store %arg5[%c6_213, %c1536_214], %154 {strides = array<i32>} : memref<9x2048xf32, #tpu.memory_space<vmem>>, vector<3x128xf32>,
    %c0_215 = arith.constant 0 : index
    %c3_216 = arith.constant 3 : index
    %c1_217 = arith.constant 1 : index
    %c0_218 = arith.constant 0 : index
    %156 = vector.load %arg1[%c0_215, %c3_216, %c1_217, %c0_218] : memref<1x6x6x128xbf16, #tpu.memory_space<vmem>>, vector<1x1x3x128xbf16>
    %157 = vector.shape_cast %156 : vector<1x1x3x128xbf16> to vector<3x128xbf16>
    %158 = arith.extf %157 : vector<3x128xbf16> to vector<3x128xf32>
    %c0_219 = arith.constant 0 : index
    %c1664 = arith.constant 1664 : index
    %159 = vector.load %arg5[%c0_219, %c1664] : memref<9x2048xf32, #tpu.memory_space<vmem>>, vector<3x128xf32>
    tpu.vector_store %arg5[%c0_219, %c1664], %158 {strides = array<i32>} : memref<9x2048xf32, #tpu.memory_space<vmem>>, vector<3x128xf32>,
    %c0_220 = arith.constant 0 : index
    %c4_221 = arith.constant 4 : index
    %c1_222 = arith.constant 1 : index
    %c0_223 = arith.constant 0 : index
    %160 = vector.load %arg1[%c0_220, %c4_221, %c1_222, %c0_223] : memref<1x6x6x128xbf16, #tpu.memory_space<vmem>>, vector<1x1x3x128xbf16>
    %161 = vector.shape_cast %160 : vector<1x1x3x128xbf16> to vector<3x128xbf16>
    %162 = arith.extf %161 : vector<3x128xbf16> to vector<3x128xf32>
    %c3_224 = arith.constant 3 : index
    %c1664_225 = arith.constant 1664 : index
    %163 = vector.load %arg5[%c3_224, %c1664_225] : memref<9x2048xf32, #tpu.memory_space<vmem>>, vector<3x128xf32>
    tpu.vector_store %arg5[%c3_224, %c1664_225], %162 {strides = array<i32>} : memref<9x2048xf32, #tpu.memory_space<vmem>>, vector<3x128xf32>,
    %c0_226 = arith.constant 0 : index
    %c5_227 = arith.constant 5 : index
    %c1_228 = arith.constant 1 : index
    %c0_229 = arith.constant 0 : index
    %164 = vector.load %arg1[%c0_226, %c5_227, %c1_228, %c0_229] : memref<1x6x6x128xbf16, #tpu.memory_space<vmem>>, vector<1x1x3x128xbf16>
    %165 = vector.shape_cast %164 : vector<1x1x3x128xbf16> to vector<3x128xbf16>
    %166 = arith.extf %165 : vector<3x128xbf16> to vector<3x128xf32>
    %c6_230 = arith.constant 6 : index
    %c1664_231 = arith.constant 1664 : index
    %167 = vector.load %arg5[%c6_230, %c1664_231] : memref<9x2048xf32, #tpu.memory_space<vmem>>, vector<3x128xf32>
    tpu.vector_store %arg5[%c6_230, %c1664_231], %166 {strides = array<i32>} : memref<9x2048xf32, #tpu.memory_space<vmem>>, vector<3x128xf32>,
    %c0_232 = arith.constant 0 : index
    %c3_233 = arith.constant 3 : index
    %c2_234 = arith.constant 2 : index
    %c0_235 = arith.constant 0 : index
    %168 = vector.load %arg1[%c0_232, %c3_233, %c2_234, %c0_235] : memref<1x6x6x128xbf16, #tpu.memory_space<vmem>>, vector<1x1x3x128xbf16>
    %169 = vector.shape_cast %168 : vector<1x1x3x128xbf16> to vector<3x128xbf16>
    %170 = arith.extf %169 : vector<3x128xbf16> to vector<3x128xf32>
    %c0_236 = arith.constant 0 : index
    %c1792 = arith.constant 1792 : index
    %171 = vector.load %arg5[%c0_236, %c1792] : memref<9x2048xf32, #tpu.memory_space<vmem>>, vector<3x128xf32>
    tpu.vector_store %arg5[%c0_236, %c1792], %170 {strides = array<i32>} : memref<9x2048xf32, #tpu.memory_space<vmem>>, vector<3x128xf32>,
    %c0_237 = arith.constant 0 : index
    %c4_238 = arith.constant 4 : index
    %c2_239 = arith.constant 2 : index
    %c0_240 = arith.constant 0 : index
    %172 = vector.load %arg1[%c0_237, %c4_238, %c2_239, %c0_240] : memref<1x6x6x128xbf16, #tpu.memory_space<vmem>>, vector<1x1x3x128xbf16>
    %173 = vector.shape_cast %172 : vector<1x1x3x128xbf16> to vector<3x128xbf16>
    %174 = arith.extf %173 : vector<3x128xbf16> to vector<3x128xf32>
    %c3_241 = arith.constant 3 : index
    %c1792_242 = arith.constant 1792 : index
    %175 = vector.load %arg5[%c3_241, %c1792_242] : memref<9x2048xf32, #tpu.memory_space<vmem>>, vector<3x128xf32>
    tpu.vector_store %arg5[%c3_241, %c1792_242], %174 {strides = array<i32>} : memref<9x2048xf32, #tpu.memory_space<vmem>>, vector<3x128xf32>,
    %c0_243 = arith.constant 0 : index
    %c5_244 = arith.constant 5 : index
    %c2_245 = arith.constant 2 : index
    %c0_246 = arith.constant 0 : index
    %176 = vector.load %arg1[%c0_243, %c5_244, %c2_245, %c0_246] : memref<1x6x6x128xbf16, #tpu.memory_space<vmem>>, vector<1x1x3x128xbf16>
    %177 = vector.shape_cast %176 : vector<1x1x3x128xbf16> to vector<3x128xbf16>
    %178 = arith.extf %177 : vector<3x128xbf16> to vector<3x128xf32>
    %c6_247 = arith.constant 6 : index
    %c1792_248 = arith.constant 1792 : index
    %179 = vector.load %arg5[%c6_247, %c1792_248] : memref<9x2048xf32, #tpu.memory_space<vmem>>, vector<3x128xf32>
    tpu.vector_store %arg5[%c6_247, %c1792_248], %178 {strides = array<i32>} : memref<9x2048xf32, #tpu.memory_space<vmem>>, vector<3x128xf32>,
    %c0_249 = arith.constant 0 : index
    %c3_250 = arith.constant 3 : index
    %c3_251 = arith.constant 3 : index
    %c0_252 = arith.constant 0 : index
    %180 = vector.load %arg1[%c0_249, %c3_250, %c3_251, %c0_252] : memref<1x6x6x128xbf16, #tpu.memory_space<vmem>>, vector<1x1x3x128xbf16>
    %181 = vector.shape_cast %180 : vector<1x1x3x128xbf16> to vector<3x128xbf16>
    %182 = arith.extf %181 : vector<3x128xbf16> to vector<3x128xf32>
    %c0_253 = arith.constant 0 : index
    %c1920 = arith.constant 1920 : index
    %183 = vector.load %arg5[%c0_253, %c1920] : memref<9x2048xf32, #tpu.memory_space<vmem>>, vector<3x128xf32>
    tpu.vector_store %arg5[%c0_253, %c1920], %182 {strides = array<i32>} : memref<9x2048xf32, #tpu.memory_space<vmem>>, vector<3x128xf32>,
    %c0_254 = arith.constant 0 : index
    %c4_255 = arith.constant 4 : index
    %c3_256 = arith.constant 3 : index
    %c0_257 = arith.constant 0 : index
    %184 = vector.load %arg1[%c0_254, %c4_255, %c3_256, %c0_257] : memref<1x6x6x128xbf16, #tpu.memory_space<vmem>>, vector<1x1x3x128xbf16>
    %185 = vector.shape_cast %184 : vector<1x1x3x128xbf16> to vector<3x128xbf16>
    %186 = arith.extf %185 : vector<3x128xbf16> to vector<3x128xf32>
    %c3_258 = arith.constant 3 : index
    %c1920_259 = arith.constant 1920 : index
    %187 = vector.load %arg5[%c3_258, %c1920_259] : memref<9x2048xf32, #tpu.memory_space<vmem>>, vector<3x128xf32>
    tpu.vector_store %arg5[%c3_258, %c1920_259], %186 {strides = array<i32>} : memref<9x2048xf32, #tpu.memory_space<vmem>>, vector<3x128xf32>,
    %c0_260 = arith.constant 0 : index
    %c5_261 = arith.constant 5 : index
    %c3_262 = arith.constant 3 : index
    %c0_263 = arith.constant 0 : index
    %188 = vector.load %arg1[%c0_260, %c5_261, %c3_262, %c0_263] : memref<1x6x6x128xbf16, #tpu.memory_space<vmem>>, vector<1x1x3x128xbf16>
    %189 = vector.shape_cast %188 : vector<1x1x3x128xbf16> to vector<3x128xbf16>
    %190 = arith.extf %189 : vector<3x128xbf16> to vector<3x128xf32>
    %c6_264 = arith.constant 6 : index
    %c1920_265 = arith.constant 1920 : index
    %191 = vector.load %arg5[%c6_264, %c1920_265] : memref<9x2048xf32, #tpu.memory_space<vmem>>, vector<3x128xf32>
    tpu.vector_store %arg5[%c6_264, %c1920_265], %190 {strides = array<i32>} : memref<9x2048xf32, #tpu.memory_space<vmem>>, vector<3x128xf32>,
    %c0_266 = arith.constant 0 : index
    %c0_267 = arith.constant 0 : index
    %192 = vector.load %arg5[%c0_266, %c0_267] : memref<9x2048xf32, #tpu.memory_space<vmem>>, vector<9x2048xf32>
    %193 = arith.truncf %192 : vector<9x2048xf32> to vector<9x2048xbf16>
    %c0_268 = arith.constant 0 : index
    %c0_269 = arith.constant 0 : index
    %194 = vector.load %arg2[%c0_268, %c0_269] : memref<2048x128xbf16, #tpu.memory_space<vmem>>, vector<2048x128xbf16>
    %cst = arith.constant dense<0.000000e+00> : vector<9x128xf32>
    %195 = tpu.matmul %193, %194, %cst {dimension_numbers = #tpu.dot_dimension_numbers<[1], [0], [0], [1], [0, 0, 1, 1], [], []>} : vector<9x2048xbf16>, vector<2048x128xbf16>, vector<9x128xf32> -> vector<9x128xf32>
    %c0_270 = arith.constant 0 : index
    %c0_271 = arith.constant 0 : index
    %196 = vector.load %arg3[%c0_270, %c0_271] : memref<1x128xf32, #tpu.memory_space<vmem>>, vector<1x128xf32>
    %197 = vector.broadcast %196 : vector<1x128xf32> to vector<9x128xf32>
    %198 = arith.addf %195, %197 : vector<9x128xf32>
    %cst_272 = arith.constant 0.000000e+00 : f32
    %199 = vector.broadcast %cst_272 : f32 to vector<9x128xf32>
    %200 = arith.cmpf oge, %198, %199 : vector<9x128xf32>
    %cst_273 = arith.constant 2.000000e-01 : f32
    %201 = vector.broadcast %cst_273 : f32 to vector<9x128xf32>
    %202 = arith.mulf %201, %198 : vector<9x128xf32>
    %203 = arith.select %200, %198, %202 : vector<9x128xi1>, vector<9x128xf32>
    %204 = arith.truncf %203 : vector<9x128xf32> to vector<9x128xbf16>
    %c0_274 = arith.constant 0 : index
    %c0_275 = arith.constant 0 : index
    %c0_276 = arith.constant 0 : index
    %205 = vector.load %arg4[%c0_274, %c0_275, %c0_276] : memref<1x9x128xbf16, #tpu.memory_space<vmem>>, vector<1x9x128xbf16>
    %206 = vector.shape_cast %205 : vector<1x9x128xbf16> to vector<9x128xbf16>
    %207 = vector.shape_cast %204 : vector<9x128xbf16> to vector<1x9x128xbf16>
    tpu.vector_store %arg4[%c0_274, %c0_275, %c0_276], %207 {strides = array<i32>} : memref<1x9x128xbf16, #tpu.memory_space<vmem>>, vector<1x9x128xbf16>,
    return
  }
  func.func @transform_0(%arg0: i32) -> (i32, i32, i32, i32) {
    %c0_i32 = arith.constant 0 : i32
    %c0_i32_0 = arith.constant 0 : i32
    %c0_i32_1 = arith.constant 0 : i32
    %c0_i32_2 = arith.constant 0 : i32
    return %arg0, %c0_i32, %c0_i32_0, %c0_i32_1 : i32, i32, i32, i32
  }
  func.func @transform_1(%arg0: i32) -> (i32, i32) {
    %c0_i32 = arith.constant 0 : i32
    %c0_i32_0 = arith.constant 0 : i32
    %c0_i32_1 = arith.constant 0 : i32
    return %c0_i32, %c0_i32_0 : i32, i32
  }
  func.func @transform_2(%arg0: i32) -> (i32, i32) {
    %c0_i32 = arith.constant 0 : i32
    %c0_i32_0 = arith.constant 0 : i32
    %c0_i32_1 = arith.constant 0 : i32
    return %c0_i32, %c0_i32_0 : i32, i32
  }
  func.func @transform_3(%arg0: i32) -> (i32, i32, i32) {
    %c0_i32 = arith.constant 0 : i32
    %c0_i32_0 = arith.constant 0 : i32
    %c0_i32_1 = arith.constant 0 : i32
    return %arg0, %c0_i32, %c0_i32_0 : i32, i32, i32
  }
}

module attributes {stable_mosaic.version = 11 : i64} {
  func.func @_fused_conv_kernel(%arg0: i32, %arg1: memref<1x5x5x128xbf16, #tpu.memory_space<vmem>>, %arg2: memref<2048x128xbf16, #tpu.memory_space<vmem>>, %arg3: memref<1x128xf32, #tpu.memory_space<vmem>>, %arg4: memref<1x4x128xf32, #tpu.memory_space<vmem>>, %arg5: memref<4x2048xf32, #tpu.memory_space<vmem>>) attributes {dimension_semantics = [#tpu.dimension_semantics<parallel>], iteration_bounds = array<i64: 2>, scalar_prefetch = 0 : i64, scratch_operands = 1 : i64, tpu.core_type = #tpu.core_type<tc>, window_params = [{transform_indices = @transform_0, window_bounds = array<i64: 1, 5, 5, 128>}, {pipeline_mode = #tpu.pipeline_mode<synchronous>, transform_indices = @transform_1, window_bounds = array<i64: 2048, 128>}, {pipeline_mode = #tpu.pipeline_mode<synchronous>, transform_indices = @transform_2, window_bounds = array<i64: 1, 128>}, {transform_indices = @transform_3, window_bounds = array<i64: 1, 4, 128>}]} {
    %c0 = arith.constant 0 : index
    %c0_0 = arith.constant 0 : index
    %c0_1 = arith.constant 0 : index
    %c0_2 = arith.constant 0 : index
    %0 = vector.load %arg1[%c0, %c0_0, %c0_1, %c0_2] : memref<1x5x5x128xbf16, #tpu.memory_space<vmem>>, vector<1x1x2x128xbf16>
    %1 = vector.shape_cast %0 : vector<1x1x2x128xbf16> to vector<2x128xbf16>
    %2 = arith.extf %1 : vector<2x128xbf16> to vector<2x128xf32>
    %c0_3 = arith.constant 0 : index
    %c0_4 = arith.constant 0 : index
    %3 = vector.load %arg5[%c0_3, %c0_4] : memref<4x2048xf32, #tpu.memory_space<vmem>>, vector<2x128xf32>
    tpu.vector_store %arg5[%c0_3, %c0_4], %2 {strides = array<i32>} : memref<4x2048xf32, #tpu.memory_space<vmem>>, vector<2x128xf32>,
    %c0_5 = arith.constant 0 : index
    %c1 = arith.constant 1 : index
    %c0_6 = arith.constant 0 : index
    %c0_7 = arith.constant 0 : index
    %4 = vector.load %arg1[%c0_5, %c1, %c0_6, %c0_7] : memref<1x5x5x128xbf16, #tpu.memory_space<vmem>>, vector<1x1x2x128xbf16>
    %5 = vector.shape_cast %4 : vector<1x1x2x128xbf16> to vector<2x128xbf16>
    %6 = arith.extf %5 : vector<2x128xbf16> to vector<2x128xf32>
    %c2 = arith.constant 2 : index
    %c0_8 = arith.constant 0 : index
    %7 = vector.load %arg5[%c2, %c0_8] : memref<4x2048xf32, #tpu.memory_space<vmem>>, vector<2x128xf32>
    tpu.vector_store %arg5[%c2, %c0_8], %6 {strides = array<i32>} : memref<4x2048xf32, #tpu.memory_space<vmem>>, vector<2x128xf32>,
    %c0_9 = arith.constant 0 : index
    %c0_10 = arith.constant 0 : index
    %c1_11 = arith.constant 1 : index
    %c0_12 = arith.constant 0 : index
    %8 = vector.load %arg1[%c0_9, %c0_10, %c1_11, %c0_12] : memref<1x5x5x128xbf16, #tpu.memory_space<vmem>>, vector<1x1x2x128xbf16>
    %9 = vector.shape_cast %8 : vector<1x1x2x128xbf16> to vector<2x128xbf16>
    %10 = arith.extf %9 : vector<2x128xbf16> to vector<2x128xf32>
    %c0_13 = arith.constant 0 : index
    %c128 = arith.constant 128 : index
    %11 = vector.load %arg5[%c0_13, %c128] : memref<4x2048xf32, #tpu.memory_space<vmem>>, vector<2x128xf32>
    tpu.vector_store %arg5[%c0_13, %c128], %10 {strides = array<i32>} : memref<4x2048xf32, #tpu.memory_space<vmem>>, vector<2x128xf32>,
    %c0_14 = arith.constant 0 : index
    %c1_15 = arith.constant 1 : index
    %c1_16 = arith.constant 1 : index
    %c0_17 = arith.constant 0 : index
    %12 = vector.load %arg1[%c0_14, %c1_15, %c1_16, %c0_17] : memref<1x5x5x128xbf16, #tpu.memory_space<vmem>>, vector<1x1x2x128xbf16>
    %13 = vector.shape_cast %12 : vector<1x1x2x128xbf16> to vector<2x128xbf16>
    %14 = arith.extf %13 : vector<2x128xbf16> to vector<2x128xf32>
    %c2_18 = arith.constant 2 : index
    %c128_19 = arith.constant 128 : index
    %15 = vector.load %arg5[%c2_18, %c128_19] : memref<4x2048xf32, #tpu.memory_space<vmem>>, vector<2x128xf32>
    tpu.vector_store %arg5[%c2_18, %c128_19], %14 {strides = array<i32>} : memref<4x2048xf32, #tpu.memory_space<vmem>>, vector<2x128xf32>,
    %c0_20 = arith.constant 0 : index
    %c0_21 = arith.constant 0 : index
    %c2_22 = arith.constant 2 : index
    %c0_23 = arith.constant 0 : index
    %16 = vector.load %arg1[%c0_20, %c0_21, %c2_22, %c0_23] : memref<1x5x5x128xbf16, #tpu.memory_space<vmem>>, vector<1x1x2x128xbf16>
    %17 = vector.shape_cast %16 : vector<1x1x2x128xbf16> to vector<2x128xbf16>
    %18 = arith.extf %17 : vector<2x128xbf16> to vector<2x128xf32>
    %c0_24 = arith.constant 0 : index
    %c256 = arith.constant 256 : index
    %19 = vector.load %arg5[%c0_24, %c256] : memref<4x2048xf32, #tpu.memory_space<vmem>>, vector<2x128xf32>
    tpu.vector_store %arg5[%c0_24, %c256], %18 {strides = array<i32>} : memref<4x2048xf32, #tpu.memory_space<vmem>>, vector<2x128xf32>,
    %c0_25 = arith.constant 0 : index
    %c1_26 = arith.constant 1 : index
    %c2_27 = arith.constant 2 : index
    %c0_28 = arith.constant 0 : index
    %20 = vector.load %arg1[%c0_25, %c1_26, %c2_27, %c0_28] : memref<1x5x5x128xbf16, #tpu.memory_space<vmem>>, vector<1x1x2x128xbf16>
    %21 = vector.shape_cast %20 : vector<1x1x2x128xbf16> to vector<2x128xbf16>
    %22 = arith.extf %21 : vector<2x128xbf16> to vector<2x128xf32>
    %c2_29 = arith.constant 2 : index
    %c256_30 = arith.constant 256 : index
    %23 = vector.load %arg5[%c2_29, %c256_30] : memref<4x2048xf32, #tpu.memory_space<vmem>>, vector<2x128xf32>
    tpu.vector_store %arg5[%c2_29, %c256_30], %22 {strides = array<i32>} : memref<4x2048xf32, #tpu.memory_space<vmem>>, vector<2x128xf32>,
    %c0_31 = arith.constant 0 : index
    %c0_32 = arith.constant 0 : index
    %c3 = arith.constant 3 : index
    %c0_33 = arith.constant 0 : index
    %24 = vector.load %arg1[%c0_31, %c0_32, %c3, %c0_33] : memref<1x5x5x128xbf16, #tpu.memory_space<vmem>>, vector<1x1x2x128xbf16>
    %25 = vector.shape_cast %24 : vector<1x1x2x128xbf16> to vector<2x128xbf16>
    %26 = arith.extf %25 : vector<2x128xbf16> to vector<2x128xf32>
    %c0_34 = arith.constant 0 : index
    %c384 = arith.constant 384 : index
    %27 = vector.load %arg5[%c0_34, %c384] : memref<4x2048xf32, #tpu.memory_space<vmem>>, vector<2x128xf32>
    tpu.vector_store %arg5[%c0_34, %c384], %26 {strides = array<i32>} : memref<4x2048xf32, #tpu.memory_space<vmem>>, vector<2x128xf32>,
    %c0_35 = arith.constant 0 : index
    %c1_36 = arith.constant 1 : index
    %c3_37 = arith.constant 3 : index
    %c0_38 = arith.constant 0 : index
    %28 = vector.load %arg1[%c0_35, %c1_36, %c3_37, %c0_38] : memref<1x5x5x128xbf16, #tpu.memory_space<vmem>>, vector<1x1x2x128xbf16>
    %29 = vector.shape_cast %28 : vector<1x1x2x128xbf16> to vector<2x128xbf16>
    %30 = arith.extf %29 : vector<2x128xbf16> to vector<2x128xf32>
    %c2_39 = arith.constant 2 : index
    %c384_40 = arith.constant 384 : index
    %31 = vector.load %arg5[%c2_39, %c384_40] : memref<4x2048xf32, #tpu.memory_space<vmem>>, vector<2x128xf32>
    tpu.vector_store %arg5[%c2_39, %c384_40], %30 {strides = array<i32>} : memref<4x2048xf32, #tpu.memory_space<vmem>>, vector<2x128xf32>,
    %c0_41 = arith.constant 0 : index
    %c1_42 = arith.constant 1 : index
    %c0_43 = arith.constant 0 : index
    %c0_44 = arith.constant 0 : index
    %32 = vector.load %arg1[%c0_41, %c1_42, %c0_43, %c0_44] : memref<1x5x5x128xbf16, #tpu.memory_space<vmem>>, vector<1x1x2x128xbf16>
    %33 = vector.shape_cast %32 : vector<1x1x2x128xbf16> to vector<2x128xbf16>
    %34 = arith.extf %33 : vector<2x128xbf16> to vector<2x128xf32>
    %c0_45 = arith.constant 0 : index
    %c512 = arith.constant 512 : index
    %35 = vector.load %arg5[%c0_45, %c512] : memref<4x2048xf32, #tpu.memory_space<vmem>>, vector<2x128xf32>
    tpu.vector_store %arg5[%c0_45, %c512], %34 {strides = array<i32>} : memref<4x2048xf32, #tpu.memory_space<vmem>>, vector<2x128xf32>,
    %c0_46 = arith.constant 0 : index
    %c2_47 = arith.constant 2 : index
    %c0_48 = arith.constant 0 : index
    %c0_49 = arith.constant 0 : index
    %36 = vector.load %arg1[%c0_46, %c2_47, %c0_48, %c0_49] : memref<1x5x5x128xbf16, #tpu.memory_space<vmem>>, vector<1x1x2x128xbf16>
    %37 = vector.shape_cast %36 : vector<1x1x2x128xbf16> to vector<2x128xbf16>
    %38 = arith.extf %37 : vector<2x128xbf16> to vector<2x128xf32>
    %c2_50 = arith.constant 2 : index
    %c512_51 = arith.constant 512 : index
    %39 = vector.load %arg5[%c2_50, %c512_51] : memref<4x2048xf32, #tpu.memory_space<vmem>>, vector<2x128xf32>
    tpu.vector_store %arg5[%c2_50, %c512_51], %38 {strides = array<i32>} : memref<4x2048xf32, #tpu.memory_space<vmem>>, vector<2x128xf32>,
    %c0_52 = arith.constant 0 : index
    %c1_53 = arith.constant 1 : index
    %c1_54 = arith.constant 1 : index
    %c0_55 = arith.constant 0 : index
    %40 = vector.load %arg1[%c0_52, %c1_53, %c1_54, %c0_55] : memref<1x5x5x128xbf16, #tpu.memory_space<vmem>>, vector<1x1x2x128xbf16>
    %41 = vector.shape_cast %40 : vector<1x1x2x128xbf16> to vector<2x128xbf16>
    %42 = arith.extf %41 : vector<2x128xbf16> to vector<2x128xf32>
    %c0_56 = arith.constant 0 : index
    %c640 = arith.constant 640 : index
    %43 = vector.load %arg5[%c0_56, %c640] : memref<4x2048xf32, #tpu.memory_space<vmem>>, vector<2x128xf32>
    tpu.vector_store %arg5[%c0_56, %c640], %42 {strides = array<i32>} : memref<4x2048xf32, #tpu.memory_space<vmem>>, vector<2x128xf32>,
    %c0_57 = arith.constant 0 : index
    %c2_58 = arith.constant 2 : index
    %c1_59 = arith.constant 1 : index
    %c0_60 = arith.constant 0 : index
    %44 = vector.load %arg1[%c0_57, %c2_58, %c1_59, %c0_60] : memref<1x5x5x128xbf16, #tpu.memory_space<vmem>>, vector<1x1x2x128xbf16>
    %45 = vector.shape_cast %44 : vector<1x1x2x128xbf16> to vector<2x128xbf16>
    %46 = arith.extf %45 : vector<2x128xbf16> to vector<2x128xf32>
    %c2_61 = arith.constant 2 : index
    %c640_62 = arith.constant 640 : index
    %47 = vector.load %arg5[%c2_61, %c640_62] : memref<4x2048xf32, #tpu.memory_space<vmem>>, vector<2x128xf32>
    tpu.vector_store %arg5[%c2_61, %c640_62], %46 {strides = array<i32>} : memref<4x2048xf32, #tpu.memory_space<vmem>>, vector<2x128xf32>,
    %c0_63 = arith.constant 0 : index
    %c1_64 = arith.constant 1 : index
    %c2_65 = arith.constant 2 : index
    %c0_66 = arith.constant 0 : index
    %48 = vector.load %arg1[%c0_63, %c1_64, %c2_65, %c0_66] : memref<1x5x5x128xbf16, #tpu.memory_space<vmem>>, vector<1x1x2x128xbf16>
    %49 = vector.shape_cast %48 : vector<1x1x2x128xbf16> to vector<2x128xbf16>
    %50 = arith.extf %49 : vector<2x128xbf16> to vector<2x128xf32>
    %c0_67 = arith.constant 0 : index
    %c768 = arith.constant 768 : index
    %51 = vector.load %arg5[%c0_67, %c768] : memref<4x2048xf32, #tpu.memory_space<vmem>>, vector<2x128xf32>
    tpu.vector_store %arg5[%c0_67, %c768], %50 {strides = array<i32>} : memref<4x2048xf32, #tpu.memory_space<vmem>>, vector<2x128xf32>,
    %c0_68 = arith.constant 0 : index
    %c2_69 = arith.constant 2 : index
    %c2_70 = arith.constant 2 : index
    %c0_71 = arith.constant 0 : index
    %52 = vector.load %arg1[%c0_68, %c2_69, %c2_70, %c0_71] : memref<1x5x5x128xbf16, #tpu.memory_space<vmem>>, vector<1x1x2x128xbf16>
    %53 = vector.shape_cast %52 : vector<1x1x2x128xbf16> to vector<2x128xbf16>
    %54 = arith.extf %53 : vector<2x128xbf16> to vector<2x128xf32>
    %c2_72 = arith.constant 2 : index
    %c768_73 = arith.constant 768 : index
    %55 = vector.load %arg5[%c2_72, %c768_73] : memref<4x2048xf32, #tpu.memory_space<vmem>>, vector<2x128xf32>
    tpu.vector_store %arg5[%c2_72, %c768_73], %54 {strides = array<i32>} : memref<4x2048xf32, #tpu.memory_space<vmem>>, vector<2x128xf32>,
    %c0_74 = arith.constant 0 : index
    %c1_75 = arith.constant 1 : index
    %c3_76 = arith.constant 3 : index
    %c0_77 = arith.constant 0 : index
    %56 = vector.load %arg1[%c0_74, %c1_75, %c3_76, %c0_77] : memref<1x5x5x128xbf16, #tpu.memory_space<vmem>>, vector<1x1x2x128xbf16>
    %57 = vector.shape_cast %56 : vector<1x1x2x128xbf16> to vector<2x128xbf16>
    %58 = arith.extf %57 : vector<2x128xbf16> to vector<2x128xf32>
    %c0_78 = arith.constant 0 : index
    %c896 = arith.constant 896 : index
    %59 = vector.load %arg5[%c0_78, %c896] : memref<4x2048xf32, #tpu.memory_space<vmem>>, vector<2x128xf32>
    tpu.vector_store %arg5[%c0_78, %c896], %58 {strides = array<i32>} : memref<4x2048xf32, #tpu.memory_space<vmem>>, vector<2x128xf32>,
    %c0_79 = arith.constant 0 : index
    %c2_80 = arith.constant 2 : index
    %c3_81 = arith.constant 3 : index
    %c0_82 = arith.constant 0 : index
    %60 = vector.load %arg1[%c0_79, %c2_80, %c3_81, %c0_82] : memref<1x5x5x128xbf16, #tpu.memory_space<vmem>>, vector<1x1x2x128xbf16>
    %61 = vector.shape_cast %60 : vector<1x1x2x128xbf16> to vector<2x128xbf16>
    %62 = arith.extf %61 : vector<2x128xbf16> to vector<2x128xf32>
    %c2_83 = arith.constant 2 : index
    %c896_84 = arith.constant 896 : index
    %63 = vector.load %arg5[%c2_83, %c896_84] : memref<4x2048xf32, #tpu.memory_space<vmem>>, vector<2x128xf32>
    tpu.vector_store %arg5[%c2_83, %c896_84], %62 {strides = array<i32>} : memref<4x2048xf32, #tpu.memory_space<vmem>>, vector<2x128xf32>,
    %c0_85 = arith.constant 0 : index
    %c2_86 = arith.constant 2 : index
    %c0_87 = arith.constant 0 : index
    %c0_88 = arith.constant 0 : index
    %64 = vector.load %arg1[%c0_85, %c2_86, %c0_87, %c0_88] : memref<1x5x5x128xbf16, #tpu.memory_space<vmem>>, vector<1x1x2x128xbf16>
    %65 = vector.shape_cast %64 : vector<1x1x2x128xbf16> to vector<2x128xbf16>
    %66 = arith.extf %65 : vector<2x128xbf16> to vector<2x128xf32>
    %c0_89 = arith.constant 0 : index
    %c1024 = arith.constant 1024 : index
    %67 = vector.load %arg5[%c0_89, %c1024] : memref<4x2048xf32, #tpu.memory_space<vmem>>, vector<2x128xf32>
    tpu.vector_store %arg5[%c0_89, %c1024], %66 {strides = array<i32>} : memref<4x2048xf32, #tpu.memory_space<vmem>>, vector<2x128xf32>,
    %c0_90 = arith.constant 0 : index
    %c3_91 = arith.constant 3 : index
    %c0_92 = arith.constant 0 : index
    %c0_93 = arith.constant 0 : index
    %68 = vector.load %arg1[%c0_90, %c3_91, %c0_92, %c0_93] : memref<1x5x5x128xbf16, #tpu.memory_space<vmem>>, vector<1x1x2x128xbf16>
    %69 = vector.shape_cast %68 : vector<1x1x2x128xbf16> to vector<2x128xbf16>
    %70 = arith.extf %69 : vector<2x128xbf16> to vector<2x128xf32>
    %c2_94 = arith.constant 2 : index
    %c1024_95 = arith.constant 1024 : index
    %71 = vector.load %arg5[%c2_94, %c1024_95] : memref<4x2048xf32, #tpu.memory_space<vmem>>, vector<2x128xf32>
    tpu.vector_store %arg5[%c2_94, %c1024_95], %70 {strides = array<i32>} : memref<4x2048xf32, #tpu.memory_space<vmem>>, vector<2x128xf32>,
    %c0_96 = arith.constant 0 : index
    %c2_97 = arith.constant 2 : index
    %c1_98 = arith.constant 1 : index
    %c0_99 = arith.constant 0 : index
    %72 = vector.load %arg1[%c0_96, %c2_97, %c1_98, %c0_99] : memref<1x5x5x128xbf16, #tpu.memory_space<vmem>>, vector<1x1x2x128xbf16>
    %73 = vector.shape_cast %72 : vector<1x1x2x128xbf16> to vector<2x128xbf16>
    %74 = arith.extf %73 : vector<2x128xbf16> to vector<2x128xf32>
    %c0_100 = arith.constant 0 : index
    %c1152 = arith.constant 1152 : index
    %75 = vector.load %arg5[%c0_100, %c1152] : memref<4x2048xf32, #tpu.memory_space<vmem>>, vector<2x128xf32>
    tpu.vector_store %arg5[%c0_100, %c1152], %74 {strides = array<i32>} : memref<4x2048xf32, #tpu.memory_space<vmem>>, vector<2x128xf32>,
    %c0_101 = arith.constant 0 : index
    %c3_102 = arith.constant 3 : index
    %c1_103 = arith.constant 1 : index
    %c0_104 = arith.constant 0 : index
    %76 = vector.load %arg1[%c0_101, %c3_102, %c1_103, %c0_104] : memref<1x5x5x128xbf16, #tpu.memory_space<vmem>>, vector<1x1x2x128xbf16>
    %77 = vector.shape_cast %76 : vector<1x1x2x128xbf16> to vector<2x128xbf16>
    %78 = arith.extf %77 : vector<2x128xbf16> to vector<2x128xf32>
    %c2_105 = arith.constant 2 : index
    %c1152_106 = arith.constant 1152 : index
    %79 = vector.load %arg5[%c2_105, %c1152_106] : memref<4x2048xf32, #tpu.memory_space<vmem>>, vector<2x128xf32>
    tpu.vector_store %arg5[%c2_105, %c1152_106], %78 {strides = array<i32>} : memref<4x2048xf32, #tpu.memory_space<vmem>>, vector<2x128xf32>,
    %c0_107 = arith.constant 0 : index
    %c2_108 = arith.constant 2 : index
    %c2_109 = arith.constant 2 : index
    %c0_110 = arith.constant 0 : index
    %80 = vector.load %arg1[%c0_107, %c2_108, %c2_109, %c0_110] : memref<1x5x5x128xbf16, #tpu.memory_space<vmem>>, vector<1x1x2x128xbf16>
    %81 = vector.shape_cast %80 : vector<1x1x2x128xbf16> to vector<2x128xbf16>
    %82 = arith.extf %81 : vector<2x128xbf16> to vector<2x128xf32>
    %c0_111 = arith.constant 0 : index
    %c1280 = arith.constant 1280 : index
    %83 = vector.load %arg5[%c0_111, %c1280] : memref<4x2048xf32, #tpu.memory_space<vmem>>, vector<2x128xf32>
    tpu.vector_store %arg5[%c0_111, %c1280], %82 {strides = array<i32>} : memref<4x2048xf32, #tpu.memory_space<vmem>>, vector<2x128xf32>,
    %c0_112 = arith.constant 0 : index
    %c3_113 = arith.constant 3 : index
    %c2_114 = arith.constant 2 : index
    %c0_115 = arith.constant 0 : index
    %84 = vector.load %arg1[%c0_112, %c3_113, %c2_114, %c0_115] : memref<1x5x5x128xbf16, #tpu.memory_space<vmem>>, vector<1x1x2x128xbf16>
    %85 = vector.shape_cast %84 : vector<1x1x2x128xbf16> to vector<2x128xbf16>
    %86 = arith.extf %85 : vector<2x128xbf16> to vector<2x128xf32>
    %c2_116 = arith.constant 2 : index
    %c1280_117 = arith.constant 1280 : index
    %87 = vector.load %arg5[%c2_116, %c1280_117] : memref<4x2048xf32, #tpu.memory_space<vmem>>, vector<2x128xf32>
    tpu.vector_store %arg5[%c2_116, %c1280_117], %86 {strides = array<i32>} : memref<4x2048xf32, #tpu.memory_space<vmem>>, vector<2x128xf32>,
    %c0_118 = arith.constant 0 : index
    %c2_119 = arith.constant 2 : index
    %c3_120 = arith.constant 3 : index
    %c0_121 = arith.constant 0 : index
    %88 = vector.load %arg1[%c0_118, %c2_119, %c3_120, %c0_121] : memref<1x5x5x128xbf16, #tpu.memory_space<vmem>>, vector<1x1x2x128xbf16>
    %89 = vector.shape_cast %88 : vector<1x1x2x128xbf16> to vector<2x128xbf16>
    %90 = arith.extf %89 : vector<2x128xbf16> to vector<2x128xf32>
    %c0_122 = arith.constant 0 : index
    %c1408 = arith.constant 1408 : index
    %91 = vector.load %arg5[%c0_122, %c1408] : memref<4x2048xf32, #tpu.memory_space<vmem>>, vector<2x128xf32>
    tpu.vector_store %arg5[%c0_122, %c1408], %90 {strides = array<i32>} : memref<4x2048xf32, #tpu.memory_space<vmem>>, vector<2x128xf32>,
    %c0_123 = arith.constant 0 : index
    %c3_124 = arith.constant 3 : index
    %c3_125 = arith.constant 3 : index
    %c0_126 = arith.constant 0 : index
    %92 = vector.load %arg1[%c0_123, %c3_124, %c3_125, %c0_126] : memref<1x5x5x128xbf16, #tpu.memory_space<vmem>>, vector<1x1x2x128xbf16>
    %93 = vector.shape_cast %92 : vector<1x1x2x128xbf16> to vector<2x128xbf16>
    %94 = arith.extf %93 : vector<2x128xbf16> to vector<2x128xf32>
    %c2_127 = arith.constant 2 : index
    %c1408_128 = arith.constant 1408 : index
    %95 = vector.load %arg5[%c2_127, %c1408_128] : memref<4x2048xf32, #tpu.memory_space<vmem>>, vector<2x128xf32>
    tpu.vector_store %arg5[%c2_127, %c1408_128], %94 {strides = array<i32>} : memref<4x2048xf32, #tpu.memory_space<vmem>>, vector<2x128xf32>,
    %c0_129 = arith.constant 0 : index
    %c3_130 = arith.constant 3 : index
    %c0_131 = arith.constant 0 : index
    %c0_132 = arith.constant 0 : index
    %96 = vector.load %arg1[%c0_129, %c3_130, %c0_131, %c0_132] : memref<1x5x5x128xbf16, #tpu.memory_space<vmem>>, vector<1x1x2x128xbf16>
    %97 = vector.shape_cast %96 : vector<1x1x2x128xbf16> to vector<2x128xbf16>
    %98 = arith.extf %97 : vector<2x128xbf16> to vector<2x128xf32>
    %c0_133 = arith.constant 0 : index
    %c1536 = arith.constant 1536 : index
    %99 = vector.load %arg5[%c0_133, %c1536] : memref<4x2048xf32, #tpu.memory_space<vmem>>, vector<2x128xf32>
    tpu.vector_store %arg5[%c0_133, %c1536], %98 {strides = array<i32>} : memref<4x2048xf32, #tpu.memory_space<vmem>>, vector<2x128xf32>,
    %c0_134 = arith.constant 0 : index
    %c4 = arith.constant 4 : index
    %c0_135 = arith.constant 0 : index
    %c0_136 = arith.constant 0 : index
    %100 = vector.load %arg1[%c0_134, %c4, %c0_135, %c0_136] : memref<1x5x5x128xbf16, #tpu.memory_space<vmem>>, vector<1x1x2x128xbf16>
    %101 = vector.shape_cast %100 : vector<1x1x2x128xbf16> to vector<2x128xbf16>
    %102 = arith.extf %101 : vector<2x128xbf16> to vector<2x128xf32>
    %c2_137 = arith.constant 2 : index
    %c1536_138 = arith.constant 1536 : index
    %103 = vector.load %arg5[%c2_137, %c1536_138] : memref<4x2048xf32, #tpu.memory_space<vmem>>, vector<2x128xf32>
    tpu.vector_store %arg5[%c2_137, %c1536_138], %102 {strides = array<i32>} : memref<4x2048xf32, #tpu.memory_space<vmem>>, vector<2x128xf32>,
    %c0_139 = arith.constant 0 : index
    %c3_140 = arith.constant 3 : index
    %c1_141 = arith.constant 1 : index
    %c0_142 = arith.constant 0 : index
    %104 = vector.load %arg1[%c0_139, %c3_140, %c1_141, %c0_142] : memref<1x5x5x128xbf16, #tpu.memory_space<vmem>>, vector<1x1x2x128xbf16>
    %105 = vector.shape_cast %104 : vector<1x1x2x128xbf16> to vector<2x128xbf16>
    %106 = arith.extf %105 : vector<2x128xbf16> to vector<2x128xf32>
    %c0_143 = arith.constant 0 : index
    %c1664 = arith.constant 1664 : index
    %107 = vector.load %arg5[%c0_143, %c1664] : memref<4x2048xf32, #tpu.memory_space<vmem>>, vector<2x128xf32>
    tpu.vector_store %arg5[%c0_143, %c1664], %106 {strides = array<i32>} : memref<4x2048xf32, #tpu.memory_space<vmem>>, vector<2x128xf32>,
    %c0_144 = arith.constant 0 : index
    %c4_145 = arith.constant 4 : index
    %c1_146 = arith.constant 1 : index
    %c0_147 = arith.constant 0 : index
    %108 = vector.load %arg1[%c0_144, %c4_145, %c1_146, %c0_147] : memref<1x5x5x128xbf16, #tpu.memory_space<vmem>>, vector<1x1x2x128xbf16>
    %109 = vector.shape_cast %108 : vector<1x1x2x128xbf16> to vector<2x128xbf16>
    %110 = arith.extf %109 : vector<2x128xbf16> to vector<2x128xf32>
    %c2_148 = arith.constant 2 : index
    %c1664_149 = arith.constant 1664 : index
    %111 = vector.load %arg5[%c2_148, %c1664_149] : memref<4x2048xf32, #tpu.memory_space<vmem>>, vector<2x128xf32>
    tpu.vector_store %arg5[%c2_148, %c1664_149], %110 {strides = array<i32>} : memref<4x2048xf32, #tpu.memory_space<vmem>>, vector<2x128xf32>,
    %c0_150 = arith.constant 0 : index
    %c3_151 = arith.constant 3 : index
    %c2_152 = arith.constant 2 : index
    %c0_153 = arith.constant 0 : index
    %112 = vector.load %arg1[%c0_150, %c3_151, %c2_152, %c0_153] : memref<1x5x5x128xbf16, #tpu.memory_space<vmem>>, vector<1x1x2x128xbf16>
    %113 = vector.shape_cast %112 : vector<1x1x2x128xbf16> to vector<2x128xbf16>
    %114 = arith.extf %113 : vector<2x128xbf16> to vector<2x128xf32>
    %c0_154 = arith.constant 0 : index
    %c1792 = arith.constant 1792 : index
    %115 = vector.load %arg5[%c0_154, %c1792] : memref<4x2048xf32, #tpu.memory_space<vmem>>, vector<2x128xf32>
    tpu.vector_store %arg5[%c0_154, %c1792], %114 {strides = array<i32>} : memref<4x2048xf32, #tpu.memory_space<vmem>>, vector<2x128xf32>,
    %c0_155 = arith.constant 0 : index
    %c4_156 = arith.constant 4 : index
    %c2_157 = arith.constant 2 : index
    %c0_158 = arith.constant 0 : index
    %116 = vector.load %arg1[%c0_155, %c4_156, %c2_157, %c0_158] : memref<1x5x5x128xbf16, #tpu.memory_space<vmem>>, vector<1x1x2x128xbf16>
    %117 = vector.shape_cast %116 : vector<1x1x2x128xbf16> to vector<2x128xbf16>
    %118 = arith.extf %117 : vector<2x128xbf16> to vector<2x128xf32>
    %c2_159 = arith.constant 2 : index
    %c1792_160 = arith.constant 1792 : index
    %119 = vector.load %arg5[%c2_159, %c1792_160] : memref<4x2048xf32, #tpu.memory_space<vmem>>, vector<2x128xf32>
    tpu.vector_store %arg5[%c2_159, %c1792_160], %118 {strides = array<i32>} : memref<4x2048xf32, #tpu.memory_space<vmem>>, vector<2x128xf32>,
    %c0_161 = arith.constant 0 : index
    %c3_162 = arith.constant 3 : index
    %c3_163 = arith.constant 3 : index
    %c0_164 = arith.constant 0 : index
    %120 = vector.load %arg1[%c0_161, %c3_162, %c3_163, %c0_164] : memref<1x5x5x128xbf16, #tpu.memory_space<vmem>>, vector<1x1x2x128xbf16>
    %121 = vector.shape_cast %120 : vector<1x1x2x128xbf16> to vector<2x128xbf16>
    %122 = arith.extf %121 : vector<2x128xbf16> to vector<2x128xf32>
    %c0_165 = arith.constant 0 : index
    %c1920 = arith.constant 1920 : index
    %123 = vector.load %arg5[%c0_165, %c1920] : memref<4x2048xf32, #tpu.memory_space<vmem>>, vector<2x128xf32>
    tpu.vector_store %arg5[%c0_165, %c1920], %122 {strides = array<i32>} : memref<4x2048xf32, #tpu.memory_space<vmem>>, vector<2x128xf32>,
    %c0_166 = arith.constant 0 : index
    %c4_167 = arith.constant 4 : index
    %c3_168 = arith.constant 3 : index
    %c0_169 = arith.constant 0 : index
    %124 = vector.load %arg1[%c0_166, %c4_167, %c3_168, %c0_169] : memref<1x5x5x128xbf16, #tpu.memory_space<vmem>>, vector<1x1x2x128xbf16>
    %125 = vector.shape_cast %124 : vector<1x1x2x128xbf16> to vector<2x128xbf16>
    %126 = arith.extf %125 : vector<2x128xbf16> to vector<2x128xf32>
    %c2_170 = arith.constant 2 : index
    %c1920_171 = arith.constant 1920 : index
    %127 = vector.load %arg5[%c2_170, %c1920_171] : memref<4x2048xf32, #tpu.memory_space<vmem>>, vector<2x128xf32>
    tpu.vector_store %arg5[%c2_170, %c1920_171], %126 {strides = array<i32>} : memref<4x2048xf32, #tpu.memory_space<vmem>>, vector<2x128xf32>,
    %c0_172 = arith.constant 0 : index
    %c0_173 = arith.constant 0 : index
    %128 = vector.load %arg5[%c0_172, %c0_173] : memref<4x2048xf32, #tpu.memory_space<vmem>>, vector<4x2048xf32>
    %129 = arith.truncf %128 : vector<4x2048xf32> to vector<4x2048xbf16>
    %c0_174 = arith.constant 0 : index
    %c0_175 = arith.constant 0 : index
    %130 = vector.load %arg2[%c0_174, %c0_175] : memref<2048x128xbf16, #tpu.memory_space<vmem>>, vector<2048x128xbf16>
    %cst = arith.constant dense<0.000000e+00> : vector<4x128xf32>
    %131 = tpu.matmul %129, %130, %cst {dimension_numbers = #tpu.dot_dimension_numbers<[1], [0], [0], [1], [0, 0, 1, 1], [], []>} : vector<4x2048xbf16>, vector<2048x128xbf16>, vector<4x128xf32> -> vector<4x128xf32>
    %c0_176 = arith.constant 0 : index
    %c0_177 = arith.constant 0 : index
    %132 = vector.load %arg3[%c0_176, %c0_177] : memref<1x128xf32, #tpu.memory_space<vmem>>, vector<1x128xf32>
    %133 = vector.broadcast %132 : vector<1x128xf32> to vector<4x128xf32>
    %134 = arith.addf %131, %133 : vector<4x128xf32>
    %c0_178 = arith.constant 0 : index
    %c0_179 = arith.constant 0 : index
    %c0_180 = arith.constant 0 : index
    %135 = vector.load %arg4[%c0_178, %c0_179, %c0_180] : memref<1x4x128xf32, #tpu.memory_space<vmem>>, vector<1x4x128xf32>
    %136 = vector.shape_cast %135 : vector<1x4x128xf32> to vector<4x128xf32>
    %137 = vector.shape_cast %134 : vector<4x128xf32> to vector<1x4x128xf32>
    tpu.vector_store %arg4[%c0_178, %c0_179, %c0_180], %137 {strides = array<i32>} : memref<1x4x128xf32, #tpu.memory_space<vmem>>, vector<1x4x128xf32>,
    return
  }
  func.func @transform_0(%arg0: i32) -> (i32, i32, i32, i32) {
    %c0_i32 = arith.constant 0 : i32
    %c0_i32_0 = arith.constant 0 : i32
    %c0_i32_1 = arith.constant 0 : i32
    %c0_i32_2 = arith.constant 0 : i32
    return %arg0, %c0_i32, %c0_i32_0, %c0_i32_1 : i32, i32, i32, i32
  }
  func.func @transform_1(%arg0: i32) -> (i32, i32) {
    %c0_i32 = arith.constant 0 : i32
    %c0_i32_0 = arith.constant 0 : i32
    %c0_i32_1 = arith.constant 0 : i32
    return %c0_i32, %c0_i32_0 : i32, i32
  }
  func.func @transform_2(%arg0: i32) -> (i32, i32) {
    %c0_i32 = arith.constant 0 : i32
    %c0_i32_0 = arith.constant 0 : i32
    %c0_i32_1 = arith.constant 0 : i32
    return %c0_i32, %c0_i32_0 : i32, i32
  }
  func.func @transform_3(%arg0: i32) -> (i32, i32, i32) {
    %c0_i32 = arith.constant 0 : i32
    %c0_i32_0 = arith.constant 0 : i32
    %c0_i32_1 = arith.constant 0 : i32
    return %arg0, %c0_i32, %c0_i32_0 : i32, i32, i32
  }
}

</mosaic_0001>

<bundles_post_ra>
// kernel: nlayer_discriminator_forward.5
= control target key start
LH: loop header
LB: loop body
LE: loop exit
PB: predicated region body
PF: predicated region fallthrough
CT: control target
= control target key end

     0   :  { %s2985_s12 = smov 0   ;;  %s3637_s0 = inlined_call_operand.vmem [shape: bf16[2,17,17,16], index: 0, kind: input, shape index: {}]   ;;  %s3638_s1 = inlined_call_operand.vmem [shape: bf16[512,128], index: 1, kind: input, shape index: {}]   ;;  %s3639_s2 = inlined_call_operand.vmem [shape: f32[1,128], index: 2, kind: input, shape index: {}]   ;;  %s3640_s3 = inlined_call_operand.vmem [shape: bf16[2,256,128], index: 3, kind: output, shape index: {}]  }
   0x1 LB: > { %s2174_s13 = sadd.s32 4294967295, %s2962_s12   ;;  %p2178_p0 = scmp.ge.s32.totalorder %s2962_s12, 1  ;;  %s2962_s12 = sphi %s2985_s12, %s13_s12  }
   0x2   : > { %p137_p1 = scmp.lt.s32.totalorder %s2962_s12, 3 }
   0x4   : > { %p138_p2 = pnand %p2178_p0, %p137_p1 }
   0x5   : > { %v2924_v0 = vld [vmem:[%s3638_s1 + $0x40] sm:$0xff] (!%p138_p2)   ;;  %v2964_v3 = vmov (!%p138_p2), 0.0   ;;  %v2928_v5 = vld [vmem:[%s3638_s1 + $0x48] sm:$0xff] (!%p138_p2)   ;;  %v2932_v9 = vld [vmem:[%s3638_s1 + $0x50] sm:$0xff] (!%p138_p2)   ;;  %p161_p3 = scmp.lt.s32.totalorder (!%p138_p2), %s2174_s13, 1  ;;  %vm304_vm0 = vcmask (!%p138_p2), 130048  }
   0x6   : > { %141 = sbr.rel (%p138_p2) target bundleno = 431 (0x1af), region = 32  ;;  %v2999_v1 = vld [vmem:[%s3638_s1 + $0xc0] sm:$0xff] (!%p138_p2)   ;;  %2690 = vmatprep.subr.bf16.mxu0 (!%p138_p2), %v2924_v0  ;;  %173 = vst [vmem:[#allocation2 + $0x8] sm:$0xff] (!%p138_p2), %v2964_v3  ;;  %177 = vst [vmem:[#allocation2 + $0x28] sm:$0xff] (!%p138_p2), %v2964_v3  ;;  %v2929_v6 = vld [vmem:[%s3638_s1 + $0xc8] sm:$0xff] (!%p138_p2)   ;;  %vm421_vm1 = vcmask (!%p138_p2), 1046528  }
   0x7   : > { %v3004_v2 = vld [vmem:[%s3638_s1] sm:$0xff] (!%p138_p2)   ;;  %172 = vst [vmem:[#allocation2] sm:$0xff] (!%p138_p2), %v2964_v3  ;;  %174 = vst [vmem:[#allocation2 + $0x10] sm:$0xff] (!%p138_p2), %v2964_v3  ;;  %2802 = vmatprep.subr.bf16.mxu1 (!%p138_p2), %v2999_v1  ;;  %v2930_v7 = vld [vmem:[%s3638_s1 + $0x8] sm:$0xff] (!%p138_p2)  }
   0x8   : > { %175 = vst [vmem:[#allocation2 + $0x18] sm:$0xff] (!%p138_p2), %v2964_v3  ;;  %176 = vst [vmem:[#allocation2 + $0x20] sm:$0xff] (!%p138_p2), %v2964_v3  ;;  %v2927_v4 = vld [vmem:[%s3638_s1 + $0x80] sm:$0xff] (!%p138_p2)   ;;  %2691 = vmatpush3.bf16.msra.mxu0 (!%p138_p2), %v3004_v2  ;;  %v2931_v8 = vld [vmem:[%s3638_s1 + $0x88] sm:$0xff] (!%p138_p2)  }
   0x9   : > { %178 = vst [vmem:[#allocation2 + $0x30] sm:$0xff] (!%p138_p2), %v2964_v3  ;;  %179 = vst [vmem:[#allocation2 + $0x38] sm:$0xff] (!%p138_p2), %v2964_v3  ;;  %2803 = vmatpush3.bf16.msra.mxu1 (!%p138_p2), %v2927_v4  ;;  %2692 = vmatprep.subr.bf16.mxu0 (!%p138_p2), %v2928_v5  ;;  %v2933_v10 = vld [vmem:[%s3638_s1 + $0xd0] sm:$0xff] (!%p138_p2)   ;;  %v2936_v13 = vld [vmem:[%s3638_s1 + $0x58] sm:$0xff] (!%p138_p2)  }
   0xa   : > { %180 = vst [vmem:[#allocation2 + $0x40] sm:$0xff] (!%p138_p2), %v2964_v3  ;;  %181 = vst [vmem:[#allocation2 + $0x48] sm:$0xff] (!%p138_p2), %v2964_v3  ;;  %2804 = vmatprep.subr.bf16.mxu1 (!%p138_p2), %v2929_v6  ;;  %v2934_v11 = vld [vmem:[%s3638_s1 + $0x10] sm:$0xff] (!%p138_p2)   ;;  %v2937_v14 = vld [vmem:[%s3638_s1 + $0xd8] sm:$0xff] (!%p138_p2)  }
   0xb   : > { %182 = vst [vmem:[#allocation2 + $0x50] sm:$0xff] (!%p138_p2), %v2964_v3  ;;  %183 = vst [vmem:[#allocation2 + $0x58] sm:$0xff] (!%p138_p2), %v2964_v3  ;;  %v2935_v12 = vld [vmem:[%s3638_s1 + $0x90] sm:$0xff] (!%p138_p2)   ;;  %v2938_v15 = vld [vmem:[%s3638_s1 + $0x18] sm:$0xff] (!%p138_p2)  }
   0xc   : > { %184 = vst [vmem:[#allocation2 + $0x60] sm:$0xff] (!%p138_p2), %v2964_v3  ;;  %185 = vst [vmem:[#allocation2 + $0x68] sm:$0xff] (!%p138_p2), %v2964_v3  ;;  %2693 = vmatpush3.bf16.msra.mxu0 (!%p138_p2), %v2930_v7  ;;  %v2939_v16 = vld [vmem:[%s3638_s1 + $0x98] sm:$0xff] (!%p138_p2)   ;;  %v2940_v17 = vld [vmem:[%s3638_s1 + $0x60] sm:$0xff] (!%p138_p2)  }
   0xd   : > { %186 = vst [vmem:[#allocation2 + $0x70] sm:$0xff] %v2964_v3  ;;  %187 = vst [vmem:[#allocation2 + $0x78] sm:$0xff] %v2964_v3  ;;  %2805 = vmatpush3.bf16.msra.mxu1 %v2931_v8  ;;  %2694 = vmatprep.subr.bf16.mxu0 %v2932_v9  ;;  %v2941_v18 = vld [vmem:[%s3638_s1 + $0xe0] sm:$0xff]   ;;  %v2944_v21 = vld [vmem:[%s3638_s1 + $0x68] sm:$0xff]   ;;  %s3642_s13 = smov (!%p161_p3, %s2174_s13), 1 }
   0xe   : > { %188 = vst [vmem:[#allocation2 + $0x80] sm:$0xff] %v2964_v3  ;;  %189 = vst [vmem:[#allocation2 + $0x88] sm:$0xff] %v2964_v3  ;;  %2806 = vmatprep.subr.bf16.mxu1 %v2933_v10  ;;  %v2942_v19 = vld [vmem:[%s3638_s1 + $0x20] sm:$0xff]   ;;  %v2945_v22 = vld [vmem:[%s3638_s1 + $0xe8] sm:$0xff]   ;;  %s2914_s16 = smul.u32 204, %s3642_s13  ;;  %s2404_s7 = sshll.u32 %s3642_s13, 7 }
   0xf   : > { %190 = vst [vmem:[#allocation2 + $0x90] sm:$0xff] %v2964_v3  ;;  %191 = vst [vmem:[#allocation2 + $0x98] sm:$0xff] %v2964_v3  ;;  %v2943_v20 = vld [vmem:[%s3638_s1 + $0xa0] sm:$0xff]   ;;  %v2946_v23 = vld [vmem:[%s3638_s1 + $0x28] sm:$0xff]   ;;  %s3586_s10 = scalar_lea.vmem %s3640_s3, %s2404_s7 }
  0x10   : > { %192 = vst [vmem:[#allocation2 + $0xa0] sm:$0xff] %v2964_v3  ;;  %193 = vst [vmem:[#allocation2 + $0xa8] sm:$0xff] %v2964_v3  ;;  %2695 = vmatpush3.bf16.msra.mxu0 %v2934_v11  ;;  %v2947_v24 = vld [vmem:[%s3638_s1 + $0xa8] sm:$0xff]   ;;  %v2948_v25 = vld [vmem:[%s3638_s1 + $0x70] sm:$0xff]   ;;  %s3227_s27 = scalar_lea.vmem %s3637_s0, %s2914_s16 }
  0x11   : > { %194 = vst [vmem:[#allocation2 + $0xb0] sm:$0xff] %v2964_v3  ;;  %195 = vst [vmem:[#allocation2 + $0xb8] sm:$0xff] %v2964_v3  ;;  %2807 = vmatpush3.bf16.msra.mxu1 %v2935_v12  ;;  %2696 = vmatprep.subr.bf16.mxu0 %v2936_v13  ;;  %v2949_v26 = vld [vmem:[%s3638_s1 + $0xf0] sm:$0xff]   ;;  %v2952_v29 = vld [vmem:[%s3638_s1 + $0x78] sm:$0xff]  }
  0x12   : > { %196 = vst [vmem:[#allocation2 + $0xc0] sm:$0xff] %v2964_v3  ;;  %197 = vst [vmem:[#allocation2 + $0xc8] sm:$0xff] %v2964_v3  ;;  %2808 = vmatprep.subr.bf16.mxu1 %v2937_v14  ;;  %v2950_v27 = vld [vmem:[%s3638_s1 + $0x30] sm:$0xff]   ;;  %v2953_v30 = vld [vmem:[%s3638_s1 + $0xf8] sm:$0xff]  }
  0x13   : > { %198 = vst [vmem:[#allocation2 + $0xd0] sm:$0xff] %v2964_v3  ;;  %199 = vst [vmem:[#allocation2 + $0xd8] sm:$0xff] %v2964_v3  ;;  %v2951_v28 = vld [vmem:[%s3638_s1 + $0xb0] sm:$0xff]   ;;  %v2954_v31 = vld [vmem:[%s3638_s1 + $0x38] sm:$0xff]  }
  0x14   : > { %200 = vst [vmem:[#allocation2 + $0xe0] sm:$0xff] %v2964_v3  ;;  %201 = vst [vmem:[#allocation2 + $0xe8] sm:$0xff] %v2964_v3  ;;  %2697 = vmatpush3.bf16.msra.mxu0 %v2938_v15  ;;  %v2955_v32 = vld [vmem:[%s3638_s1 + $0xb8] sm:$0xff]   ;;  %v2470_v33 = vld [vmem:[%s3227_s27] sm:$0xff]  }
  0x15   : > { %202 = vst [vmem:[#allocation2 + $0xf0] sm:$0xff] %v2964_v3  ;;  %203 = vst [vmem:[#allocation2 + $0xf8] sm:$0xff] %v2964_v3  ;;  %2809 = vmatpush3.bf16.msra.mxu1 %v2939_v16  ;;  %2698 = vmatprep.subr.bf16.mxu0 %v2940_v17  ;;  %v414_v34 = vld [vmem:[%s3227_s27 + $0x8] sm:$0x1]  ;;  %v2289_v35 = vld [vmem:[%s3227_s27 + $0xc] sm:$0xff]   ;;  %v2471_v36 = vunpack.c.l.bf16 %v2470_v33  ;;  %v2472_v37 = vunpack.c.h.bf16 %v2470_v33 }
  0x16   : > { %204 = vst [vmem:[#allocation2 + $0x100] sm:$0xff] %v2964_v3  ;;  %205 = vst [vmem:[#allocation2 + $0x108] sm:$0xff] %v2964_v3  ;;  %2810 = vmatprep.subr.bf16.mxu1 %v2941_v18  ;;  %v417_v38 = vunpack.c.l.bf16 %v414_v34  ;;  %v2291_v39 = vld [vmem:[%s3227_s27 + $0x14] sm:$0x1]  ;;  %v801_v40 = vunpack.c.l.bf16 %v2289_v35  ;;  %v2257_v41 = vld [vmem:[%s3227_s27 + $0xc] sm:$0xff]   ;;  %v802_v43 = vunpack.c.h.bf16 %v2289_v35 }
  0x17   : > { %206 = vst [vmem:[#allocation2 + $0x110] sm:$0xff] %v2964_v3  ;;  %207 = vst [vmem:[#allocation2 + $0x118] sm:$0xff] %v2964_v3  ;;  %v2212_v42 = vld [vmem:[%s3227_s27 + $0xc] sm:$0xff]   ;;  %v803_v44 = vunpack.c.l.bf16 %v2291_v39  ;;  %v703_v45 = vunpack.c.l.bf16 %v2257_v41  ;;  %v704_v46 = vunpack.c.h.bf16 %v2257_v41  ;;  %v2214_v47 = vld [vmem:[%s3227_s27 + $0x14] sm:$0x1]  ;;  %v422_v49 = vrot.slane %v2471_v36, 1 }
  0x18   : > { %208 = vst [vmem:[#allocation2 + $0x120] sm:$0xff] %v2964_v3  ;;  %209 = vst [vmem:[#allocation2 + $0x128] sm:$0xff] %v2964_v3  ;;  %2699 = vmatpush3.bf16.msra.mxu0 %v2942_v19  ;;  %v2667_v48 = vld [vmem:[%s3227_s27 + $0x18] sm:$0xff]   ;;  %v423_v50 = vrot.slane %v2472_v37, 1  ;;  %v425_v51 = vrot.slane %v417_v38, 1  ;;  %v807_v52 = vrot.slane %v801_v40, 1  ;;  %v434_v55 = vunpack.c.l.bf16 %v2212_v42 }
  0x19   : > { %210 = vst [vmem:[#allocation2 + $0x130] sm:$0xff] %v2964_v3  ;;  %211 = vst [vmem:[#allocation2 + $0x138] sm:$0xff] %v2964_v3  ;;  %2811 = vmatpush3.bf16.msra.mxu1 %v2943_v20  ;;  %2700 = vmatprep.subr.bf16.mxu0 %v2944_v21  ;;  %v808_v53 = vrot.slane %v802_v43, 1  ;;  %v810_v54 = vrot.slane %v803_v44, 1  ;;  %v435_v56 = vunpack.c.h.bf16 %v2212_v42  ;;  %v2294_v57 = vld [vmem:[%s3227_s27 + $0x20] sm:$0x1]  ;;  %v436_v60 = vunpack.c.l.bf16 %v2214_v47 }
  0x1a   : > { %212 = vst [vmem:[#allocation2 + $0x140] sm:$0xff] %v2964_v3  ;;  %213 = vst [vmem:[#allocation2 + $0x148] sm:$0xff] %v2964_v3  ;;  %2812 = vmatprep.subr.bf16.mxu1 %v2945_v22  ;;  %v424_v58 = vsel %vm421_vm1, %v422_v49, %v423_v50  ;;  %v426_v59 = vsel %vm421_vm1, %v423_v50, %v425_v51  ;;  %v2535_v61 = vunpack.c.l.bf16 %v2667_v48  ;;  %v2182_v62 = vld [vmem:[%s3227_s27 + $0xc] sm:$0xff]   ;;  %v2217_v63 = vld [vmem:[%s3227_s27 + $0x20] sm:$0x1]  ;;  %v440_v2 = vrot.slane %v434_v55, 1 }
  0x1b   : > { %214 = vst [vmem:[#allocation2 + $0x150] sm:$0xff] %v2964_v3  ;;  %215 = vst [vmem:[#allocation2 + $0x158] sm:$0xff] %v2964_v3  ;;  %v809_v0 = vsel %vm421_vm1, %v807_v52, %v808_v53  ;;  %v811_v1 = vsel %vm421_vm1, %v808_v53, %v810_v54  ;;  %v2295_v4 = vld [vmem:[%s3227_s27 + $0x24] sm:$0xff]   ;;  %v443_v5 = vrot.slane %v436_v60, 1  ;;  %v2536_v6 = vunpack.c.h.bf16 %v2667_v48  ;;  %v2297_v9 = vld [vmem:[%s3227_s27 + $0x2c] sm:$0x1] }
  0x1c   : > { %216 = vst [vmem:[#allocation2 + $0x160] sm:$0xff] %v2964_v3  ;;  %217 = vst [vmem:[#allocation2 + $0x168] sm:$0xff] %v2964_v3  ;;  %2701 = vmatpush3.bf16.msra.mxu0 %v2946_v23  ;;  %v821_v7 = vunpack.c.l.bf16 %v2294_v57  ;;  %v825_v8 = vrot.slane %v2535_v61, 1  ;;  %v2261_v10 = vld [vmem:[%s3227_s27 + $0x24] sm:$0xff]   ;;  %v310_v12 = vunpack.c.l.bf16 %v2182_v62  ;;  %v311_v13 = vunpack.c.h.bf16 %v2182_v62  ;;  %v2668_v33 = vld [vmem:[%s3227_s27 + $0x30] sm:$0xff]  }
  0x1d   : > { %218 = vst [vmem:[#allocation2 + $0x170] sm:$0xff] %v2964_v3  ;;  %219 = vst [vmem:[#allocation2 + $0x178] sm:$0xff] %v2964_v3  ;;  %2813 = vmatpush3.bf16.msra.mxu1 %v2947_v24  ;;  %2702 = vmatprep.subr.bf16.mxu0 %v2948_v25  ;;  %v454_v14 = vunpack.c.l.bf16 %v2217_v63  ;;  %v826_v16 = vrot.slane %v2536_v6, 1  ;;  %v837_v18 = vunpack.c.l.bf16 %v2295_v4  ;;  %v2218_v19 = vld [vmem:[%s3227_s27 + $0x24] sm:$0xff]   ;;  %v838_v23 = vunpack.c.h.bf16 %v2295_v4  ;;  %v2300_v38 = vld [vmem:[%s3227_s27 + $0x38] sm:$0x1] }
  0x1e   : > { %220 = vst [vmem:[#allocation2 + $0x180] sm:$0xff] %v2964_v3  ;;  %221 = vst [vmem:[#allocation2 + $0x188] sm:$0xff] %v2964_v3  ;;  %2814 = vmatprep.subr.bf16.mxu1 %v2949_v26  ;;  %v828_v17 = vrot.slane %v821_v7, 1  ;;  %v839_v24 = vunpack.c.l.bf16 %v2297_v9  ;;  %v715_v25 = vunpack.c.l.bf16 %v2261_v10  ;;  %v2220_v26 = vld [vmem:[%s3227_s27 + $0x2c] sm:$0x1]  ;;  %v716_v41 = vunpack.c.h.bf16 %v2261_v10 }
  0x1f   : > { %222 = vst [vmem:[#allocation2 + $0x190] sm:$0xff] %v2964_v3  ;;  %223 = vst [vmem:[#allocation2 + $0x198] sm:$0xff] %v2964_v3  ;;  %v461_v22 = vrot.slane %v454_v14, 1  ;;  %v470_v42 = vunpack.c.l.bf16 %v2218_v19  ;;  %v471_v43 = vunpack.c.h.bf16 %v2218_v19  ;;  %v472_v44 = vunpack.c.l.bf16 %v2220_v26  ;;  %v2223_v53 = vld [vmem:[%s3227_s27 + $0x38] sm:$0x1] }
  0x20   : > { %224 = vst [vmem:[#allocation2 + $0x1a0] sm:$0xff] %v2964_v3  ;;  %225 = vst [vmem:[#allocation2 + $0x1a8] sm:$0xff] %v2964_v3  ;;  %2703 = vmatpush3.bf16.msra.mxu0 %v2950_v27  ;;  %v2539_v52 = vunpack.c.l.bf16 %v2668_v33  ;;  %v2540_v62 = vunpack.c.h.bf16 %v2668_v33  ;;  %v857_v63 = vunpack.c.l.bf16 %v2300_v38  ;;  %v2306_v38 = vld [vmem:[%s3227_s27 + $0x50] sm:$0x1] }
  0x21   : > { %226 = vst [vmem:[#allocation2 + $0x1b0] sm:$0xff] %v2964_v3  ;;  %227 = vst [vmem:[#allocation2 + $0x1b8] sm:$0xff] %v2964_v3  ;;  %2815 = vmatpush3.bf16.msra.mxu1 %v2951_v28  ;;  %2704 = vmatprep.subr.bf16.mxu0 %v2952_v29  ;;  %v462_v35 = vsel %vm421_vm1, %v826_v16, %v461_v22  ;;  %v476_v55 = vrot.slane %v470_v42, 1  ;;  %v479_v57 = vrot.slane %v472_v44, 1 }
  0x22   : > { %228 = vst [vmem:[#allocation2 + $0x1c0] sm:$0xff] %v2964_v3  ;;  %229 = vst [vmem:[#allocation2 + $0x1c8] sm:$0xff] %v2964_v3  ;;  %2816 = vmatprep.subr.bf16.mxu1 %v2953_v30  ;;  %v827_v30 = vsel %vm421_vm1, %v825_v8, %v826_v16 }
  0x23   : > { %230 = vst [vmem:[#allocation2 + $0x1d0] sm:$0xff] %v2964_v3  ;;  %231 = vst [vmem:[#allocation2 + $0x1d8] sm:$0xff] %v2964_v3 }
  0x24   : > { %232 = vst [vmem:[#allocation2 + $0x1e0] sm:$0xff] %v2964_v3  ;;  %233 = vst [vmem:[#allocation2 + $0x1e8] sm:$0xff] %v2964_v3  ;;  %2705 = vmatpush3.bf16.msra.mxu0 %v2954_v31  ;;  %v829_v31 = vsel %vm421_vm1, %v826_v16, %v828_v17  ;;  %v864_v17 = vrot.slane %v857_v63, 1  ;;  %v2307_v63 = vld [vmem:[%s3227_s27 + $0x54] sm:$0xff]  }
  0x25   : > { %234 = vst [vmem:[#allocation2 + $0x1f0] sm:$0xff] %v2964_v3  ;;  %235 = vst [vmem:[#allocation2 + $0x1f8] sm:$0xff] %v2964_v3  ;;  %2817 = vmatpush3.bf16.msra.mxu1 %v2955_v32  ;;  %v843_v32 = vrot.slane %v837_v18, 1  ;;  %v490_v18 = vunpack.c.l.bf16 %v2223_v53 }
  0x26   : > { %236 = vst [vmem:[#allocation2 + $0x200] sm:$0xff] %v2964_v3  ;;  %237 = vst [vmem:[#allocation2 + $0x208] sm:$0xff] %v2964_v3 }
  0x27   : > { %238 = vst [vmem:[#allocation2 + $0x210] sm:$0xff] %v2964_v3  ;;  %239 = vst [vmem:[#allocation2 + $0x218] sm:$0xff] %v2964_v3 }
  0x28   : > { %240 = vst [vmem:[#allocation2 + $0x220] sm:$0xff] %v2964_v3  ;;  %241 = vst [vmem:[#allocation2 + $0x228] sm:$0xff] %v2964_v3 }
  0x29   : > { %242 = vst [vmem:[#allocation2 + $0x230] sm:$0xff] %v2964_v3  ;;  %243 = vst [vmem:[#allocation2 + $0x238] sm:$0xff] %v2964_v3 }
  0x2a   : > { %244 = vst [vmem:[#allocation2 + $0x240] sm:$0xff] %v2964_v3  ;;  %245 = vst [vmem:[#allocation2 + $0x248] sm:$0xff] %v2964_v3 }
  0x2b   : > { %246 = vst [vmem:[#allocation2 + $0x250] sm:$0xff] %v2964_v3  ;;  %247 = vst [vmem:[#allocation2 + $0x258] sm:$0xff] %v2964_v3 }
  0x2c   : > { %248 = vst [vmem:[#allocation2 + $0x260] sm:$0xff] %v2964_v3  ;;  %249 = vst [vmem:[#allocation2 + $0x268] sm:$0xff] %v2964_v3 }
  0x2d   : > { %250 = vst [vmem:[#allocation2 + $0x270] sm:$0xff] %v2964_v3  ;;  %251 = vst [vmem:[#allocation2 + $0x278] sm:$0xff] %v2964_v3 }
  0x2e   : > { %252 = vst [vmem:[#allocation2 + $0x280] sm:$0xff] %v2964_v3  ;;  %253 = vst [vmem:[#allocation2 + $0x288] sm:$0xff] %v2964_v3 }
  0x2f   : > { %254 = vst [vmem:[#allocation2 + $0x290] sm:$0xff] %v2964_v3  ;;  %255 = vst [vmem:[#allocation2 + $0x298] sm:$0xff] %v2964_v3 }
  0x30   : > { %256 = vst [vmem:[#allocation2 + $0x2a0] sm:$0xff] %v2964_v3  ;;  %257 = vst [vmem:[#allocation2 + $0x2a8] sm:$0xff] %v2964_v3 }
  0x31   : > { %258 = vst [vmem:[#allocation2 + $0x2b0] sm:$0xff] %v2964_v3  ;;  %259 = vst [vmem:[#allocation2 + $0x2b8] sm:$0xff] %v2964_v3 }
  0x32   : > { %260 = vst [vmem:[#allocation2 + $0x2c0] sm:$0xff] %v2964_v3  ;;  %261 = vst [vmem:[#allocation2 + $0x2c8] sm:$0xff] %v2964_v3 }
  0x33   : > { %262 = vst [vmem:[#allocation2 + $0x2d0] sm:$0xff] %v2964_v3  ;;  %263 = vst [vmem:[#allocation2 + $0x2d8] sm:$0xff] %v2964_v3 }
  0x34   : > { %264 = vst [vmem:[#allocation2 + $0x2e0] sm:$0xff] %v2964_v3  ;;  %265 = vst [vmem:[#allocation2 + $0x2e8] sm:$0xff] %v2964_v3 }
  0x35   : > { %266 = vst [vmem:[#allocation2 + $0x2f0] sm:$0xff] %v2964_v3  ;;  %267 = vst [vmem:[#allocation2 + $0x2f8] sm:$0xff] %v2964_v3 }
  0x36   : > { %268 = vst [vmem:[#allocation2 + $0x300] sm:$0xff] %v2964_v3  ;;  %269 = vst [vmem:[#allocation2 + $0x308] sm:$0xff] %v2964_v3 }
  0x37   : > { %270 = vst [vmem:[#allocation2 + $0x310] sm:$0xff] %v2964_v3  ;;  %271 = vst [vmem:[#allocation2 + $0x318] sm:$0xff] %v2964_v3 }
  0x38   : > { %272 = vst [vmem:[#allocation2 + $0x320] sm:$0xff] %v2964_v3  ;;  %273 = vst [vmem:[#allocation2 + $0x328] sm:$0xff] %v2964_v3 }
  0x39   : > { %274 = vst [vmem:[#allocation2 + $0x330] sm:$0xff] %v2964_v3  ;;  %275 = vst [vmem:[#allocation2 + $0x338] sm:$0xff] %v2964_v3 }
  0x3a   : > { %276 = vst [vmem:[#allocation2 + $0x340] sm:$0xff] %v2964_v3  ;;  %277 = vst [vmem:[#allocation2 + $0x348] sm:$0xff] %v2964_v3 }
  0x3b   : > { %278 = vst [vmem:[#allocation2 + $0x350] sm:$0xff] %v2964_v3  ;;  %279 = vst [vmem:[#allocation2 + $0x358] sm:$0xff] %v2964_v3 }
  0x3c   : > { %280 = vst [vmem:[#allocation2 + $0x360] sm:$0xff] %v2964_v3  ;;  %281 = vst [vmem:[#allocation2 + $0x368] sm:$0xff] %v2964_v3 }
  0x3d   : > { %282 = vst [vmem:[#allocation2 + $0x370] sm:$0xff] %v2964_v3  ;;  %283 = vst [vmem:[#allocation2 + $0x378] sm:$0xff] %v2964_v3 }
  0x3e   : > { %284 = vst [vmem:[#allocation2 + $0x380] sm:$0xff] %v2964_v3  ;;  %285 = vst [vmem:[#allocation2 + $0x388] sm:$0xff] %v2964_v3 }
  0x3f   : > { %286 = vst [vmem:[#allocation2 + $0x390] sm:$0xff] %v2964_v3  ;;  %287 = vst [vmem:[#allocation2 + $0x398] sm:$0xff] %v2964_v3 }
  0x40   : > { %288 = vst [vmem:[#allocation2 + $0x3a0] sm:$0xff] %v2964_v3  ;;  %289 = vst [vmem:[#allocation2 + $0x3a8] sm:$0xff] %v2964_v3 }
  0x41   : > { %290 = vst [vmem:[#allocation2 + $0x3b0] sm:$0xff] %v2964_v3  ;;  %291 = vst [vmem:[#allocation2 + $0x3b8] sm:$0xff] %v2964_v3 }
  0x42   : > { %292 = vst [vmem:[#allocation2 + $0x3c0] sm:$0xff] %v2964_v3  ;;  %293 = vst [vmem:[#allocation2 + $0x3c8] sm:$0xff] %v2964_v3 }
  0x43   : > { %294 = vst [vmem:[#allocation2 + $0x3d0] sm:$0xff] %v2964_v3  ;;  %295 = vst [vmem:[#allocation2 + $0x3d8] sm:$0xff] %v2964_v3 }
  0x44   : > { %296 = vst [vmem:[#allocation2 + $0x3e0] sm:$0xff] %v2964_v3  ;;  %297 = vst [vmem:[#allocation2 + $0x3e8] sm:$0xff] %v2964_v3 }
  0x45   : > { %298 = vst [vmem:[#allocation2 + $0x3f0] sm:$0xff] %v2964_v3  ;;  %299 = vst [vmem:[#allocation2 + $0x3f8] sm:$0xff] %v2964_v3  ;;  %v441_v3 = vrot.slane %v435_v56, 1  ;;  %v477_v56 = vrot.slane %v471_v43, 1  ;;  %v2190_v43 = vld [vmem:[%s3227_s27 + $0x3c] sm:$0xff]  }
  0x46   : > { %305 = vst.msk [vmem:[#allocation2] sm:$0xff] %vm304_vm0, %v2471_v36  ;;  %306 = vst.msk [vmem:[#allocation2 + $0x20] sm:$0xff] %vm304_vm0, %v2472_v37  ;;  %v844_v36 = vrot.slane %v838_v23, 1  ;;  %v846_v37 = vrot.slane %v839_v24, 1 }
  0x47   : > { %705 = vst.msk [vmem:[#allocation2 + $0x10] sm:$0xff] %vm304_vm0, %v703_v45  ;;  %706 = vst.msk [vmem:[#allocation2 + $0x30] sm:$0xff] %vm304_vm0, %v704_v46  ;;  %v442_v11 = vsel %vm421_vm1, %v440_v2, %v441_v3  ;;  %v444_v15 = vsel %vm421_vm1, %v441_v3, %v443_v5  ;;  %v2186_v45 = vld [vmem:[%s3227_s27 + $0x24] sm:$0xff]   ;;  %v478_v7 = vsel %vm421_vm1, %v476_v55, %v477_v56 }
  0x48   : > { %429 = vst.msk [vmem:[#allocation2 + $0x8] sm:$0xff] %vm304_vm0, %v424_v58  ;;  %430 = vst.msk [vmem:[#allocation2 + $0x28] sm:$0xff] %vm304_vm0, %v426_v59  ;;  %v845_v50 = vsel %vm421_vm1, %v843_v32, %v844_v36  ;;  %v847_v51 = vsel %vm421_vm1, %v844_v36, %v846_v37  ;;  %v2301_v58 = vld [vmem:[%s3227_s27 + $0x3c] sm:$0xff]   ;;  %v2303_v2 = vld [vmem:[%s3227_s27 + $0x44] sm:$0x1]  ;;  %v325_v8 = vunpack.c.h.bf16 %v2186_v45 }
  0x49   : > { %814 = vst.msk [vmem:[#allocation2 + $0x18] sm:$0xff] %vm304_vm0, %v809_v0  ;;  %815 = vst.msk [vmem:[#allocation2 + $0x38] sm:$0xff] %vm304_vm0, %v811_v1  ;;  %v3294_v59 = vld [vmem:[%s3227_s27 + $0x3c] sm:$0xff]   ;;  %v861_v0 = vrot.slane %v2539_v52, 1  ;;  %v324_v1 = vunpack.c.l.bf16 %v2186_v45  ;;  %v873_v19 = vunpack.c.l.bf16 %v2301_v58  ;;  %v875_v24 = vunpack.c.l.bf16 %v2303_v2 }
  0x4a   : > { %711 = vst.msk [vmem:[#allocation2 + $0x50] sm:$0xff] %vm304_vm0, %v2535_v61  ;;  %319 = vst.msk [vmem:[#allocation2 + $0x80] sm:$0xff] %vm304_vm0, %v2535_v61  ;;  %v728_v36 = vunpack.c.h.bf16 %v3294_v59 }
  0x4b   : > { %447 = vst.msk [vmem:[#allocation2 + $0x48] sm:$0xff] %vm304_vm0, %v442_v11  ;;  %712 = vst.msk [vmem:[#allocation2 + $0x70] sm:$0xff] %vm304_vm0, %v2536_v6  ;;  %v480_v11 = vsel %vm421_vm1, %v477_v56, %v479_v57  ;;  %v893_v56 = vunpack.c.l.bf16 %v2306_v38  ;;  %v2229_v57 = vld [vmem:[%s3227_s27 + $0x50] sm:$0x1] }
  0x4c   : > { %320 = vst.msk [vmem:[#allocation2 + $0xa0] sm:$0xff] %vm304_vm0, %v2536_v6  ;;  %448 = vst.msk [vmem:[#allocation2 + $0x68] sm:$0xff] %vm304_vm0, %v444_v15 }
  0x4d   : > { %v1086_v20 = vld [vmem:[#allocation2] sm:$0xff]  ;;  %312 = vst.msk [vmem:[#allocation2 + $0x40] sm:$0xff] %vm304_vm0, %v310_v12  ;;  %313 = vst.msk [vmem:[#allocation2 + $0x60] sm:$0xff] %vm304_vm0, %v311_v13  ;;  %v862_v12 = vrot.slane %v2540_v62, 1 }
  0x4e   : > { %v1090_v21 = vld [vmem:[#allocation2 + $0x20] sm:$0xff]  ;;  %v1088_v28 = vld [vmem:[#allocation2 + $0x10] sm:$0xff]  ;;  %832 = vst.msk [vmem:[#allocation2 + $0x58] sm:$0xff] %vm304_vm0, %v827_v30  ;;  %833 = vst.msk [vmem:[#allocation2 + $0x78] sm:$0xff] %vm304_vm0, %v829_v31 }
  0x4f   : > { %v1214_v27 = vpack.c.bf16 %v1090_v21, %v1086_v20  ;;  %v1092_v29 = vld [vmem:[#allocation2 + $0x30] sm:$0xff]  ;;  %465 = vst.msk [vmem:[#allocation2 + $0x88] sm:$0xff] %vm304_vm0, %v827_v30  ;;  %717 = vst.msk [vmem:[#allocation2 + $0x90] sm:$0xff] %vm304_vm0, %v715_v25  ;;  %v1087_v39 = vld [vmem:[#allocation2 + $0x8] sm:$0xff]  ;;  %v874_v20 = vunpack.c.h.bf16 %v2301_v58  ;;  %v863_v23 = vsel %vm421_vm1, %v861_v0, %v862_v12  ;;  %v727_v25 = vunpack.c.l.bf16 %v3294_v59 }
  0x50   : > { %v1216_v34 = vpack.c.bf16 %v1092_v29, %v1088_v28  ;;  %v1091_v40 = vld [vmem:[#allocation2 + $0x28] sm:$0xff]  ;;  %466 = vst.msk [vmem:[#allocation2 + $0xa8] sm:$0xff] %vm304_vm0, %v462_v35  ;;  %v1089_v47 = vld [vmem:[#allocation2 + $0x18] sm:$0xff]  ;;  %850 = vst.msk [vmem:[#allocation2 + $0x98] sm:$0xff] %vm304_vm0, %v845_v50  ;;  %v497_v28 = vrot.slane %v490_v18, 1  ;;  %v879_v29 = vrot.slane %v873_v19, 1 }
  0x51   : > { %v1215_v46 = vpack.c.bf16 %v1091_v40, %v1087_v39  ;;  %v1093_v48 = vld [vmem:[#allocation2 + $0x38] sm:$0xff]  ;;  %v3284_v49 = vld [vmem:[#allocation2 + $0x50] sm:$0xff]  ;;  %851 = vst.msk [vmem:[#allocation2 + $0xb8] sm:$0xff] %vm304_vm0, %v847_v51  ;;  %718 = vst.msk [vmem:[#allocation2 + $0xb0] sm:$0xff] %vm304_vm0, %v716_v41  ;;  %v882_v35 = vrot.slane %v875_v24, 1 }
  0x52   : > { %v1217_v54 = vpack.c.bf16 %v1093_v48, %v1089_v47  ;;  %v1095_v60 = vld [vmem:[#allocation2 + $0x48] sm:$0xff]  ;;  %v3296_v61 = vld [vmem:[#allocation2 + $0x70] sm:$0xff]  ;;  %723 = vst.msk [vmem:[#allocation2 + $0xd0] sm:$0xff] %vm304_vm0, %v2539_v52  ;;  %333 = vst.msk [vmem:[#allocation2 + $0x100] sm:$0xff] %vm304_vm0, %v2539_v52  ;;  %v498_v41 = vsel %vm421_vm1, %v862_v12, %v497_v28 }
  0x53   : > { %1573 = vmatprep.mubr.bf16.mxu0 %v1215_v46  ;;  %v1099_v3 = vld [vmem:[#allocation2 + $0x68] sm:$0xff]  ;;  %v1220_v6 = vpack.c.bf16 %v3296_v61, %v3284_v49  ;;  %483 = vst.msk [vmem:[#allocation2 + $0xc8] sm:$0xff] %vm304_vm0, %v478_v7  ;;  %326 = vst.msk [vmem:[#allocation2 + $0xc0] sm:$0xff] %vm304_vm0, %v324_v1  ;;  %v2224_v13 = vld [vmem:[%s3227_s27 + $0x3c] sm:$0xff]  }
  0x54   : > { %1734 = vmatprep.mubr.bf16.mxu1 %v1217_v54  ;;  %1574 = vmatmul.mubr.bf16.vlgmr.msra.gmra.mrb[0].mxu0 %v1214_v27  ;;  %v1094_v4 = vld [vmem:[#allocation2 + $0x40] sm:$0xff]  ;;  %v1219_v9 = vpack.c.bf16 %v1099_v3, %v1095_v60  ;;  %724 = vst.msk [vmem:[#allocation2 + $0xf0] sm:$0xff] %vm304_vm0, %v2540_v62  ;;  %334 = vst.msk [vmem:[#allocation2 + $0x120] sm:$0xff] %vm304_vm0, %v2540_v62  ;;  %v865_v27 = vsel %vm421_vm1, %v862_v12, %v864_v17  ;;  %v2669_v31 = vld [vmem:[%s3227_s27 + $0x48] sm:$0xff]   ;;  %v506_v37 = vunpack.c.l.bf16 %v2224_v13 }
  0x55   : > { %v1098_v5 = vld [vmem:[#allocation2 + $0x60] sm:$0xff]  ;;  %1735 = vmatmul.mubr.bf16.vlgmr.msra.gmra.mrb[0].mxu1 %v1216_v34  ;;  %v1097_v14 = vld [vmem:[#allocation2 + $0x58] sm:$0xff]  ;;  %484 = vst.msk [vmem:[#allocation2 + $0xe8] sm:$0xff] %vm304_vm0, %v480_v11  ;;  %327 = vst.msk [vmem:[#allocation2 + $0xe0] sm:$0xff] %vm304_vm0, %v325_v8  ;;  %v880_v34 = vrot.slane %v874_v20, 1  ;;  %v507_v42 = vunpack.c.h.bf16 %v2224_v13  ;;  %v2543_v54 = vunpack.c.l.bf16 %v2669_v31  ;;  %v2544_v55 = vunpack.c.h.bf16 %v2669_v31 }
  0x56   : > { %v1218_v10 = vpack.c.bf16 %v1098_v5, %v1094_v4  ;;  %v1101_v15 = vld [vmem:[#allocation2 + $0x78] sm:$0xff]  ;;  %v1103_v16 = vld [vmem:[#allocation2 + $0x88] sm:$0xff]  ;;  %1581 = vmatprep.mubr.bf16.mxu0 %v1219_v9  ;;  %868 = vst.msk [vmem:[#allocation2 + $0xd8] sm:$0xff] %vm304_vm0, %v863_v23  ;;  %501 = vst.msk [vmem:[#allocation2 + $0x108] sm:$0xff] %vm304_vm0, %v863_v23  ;;  %v512_v51 = vrot.slane %v506_v37, 1  ;;  %v338_v60 = vunpack.c.l.bf16 %v2190_v43  ;;  %v339_v62 = vunpack.c.h.bf16 %v2190_v43 }
  0x57   : > { %v1221_v21 = vpack.c.bf16 %v1101_v15, %v1097_v14  ;;  %v1107_v22 = vld [vmem:[#allocation2 + $0xa8] sm:$0xff]  ;;  %v2226_v30 = vld [vmem:[%s3227_s27 + $0x44] sm:$0x1]  ;;  %v1105_v32 = vld [vmem:[#allocation2 + $0x98] sm:$0xff]  ;;  %869 = vst.msk [vmem:[#allocation2 + $0xf8] sm:$0xff] %vm304_vm0, %v865_v27  ;;  %v881_v47 = vsel %vm421_vm1, %v879_v29, %v880_v34  ;;  %v883_v48 = vsel %vm421_vm1, %v880_v34, %v882_v35  ;;  %v513_v53 = vrot.slane %v507_v42, 1 }
  0x58   : > { %v1223_v26 = vpack.c.bf16 %v1107_v22, %v1103_v16  ;;  %v1109_v33 = vld [vmem:[#allocation2 + $0xb8] sm:$0xff]  ;;  %729 = vst.msk [vmem:[#allocation2 + $0x110] sm:$0xff] %vm304_vm0, %v727_v25  ;;  %v3323_v40 = vld [vmem:[#allocation2 + $0x80] sm:$0xff]  ;;  %v3329_v45 = vld [vmem:[#allocation2 + $0x90] sm:$0xff]  ;;  %v508_v50 = vunpack.c.l.bf16 %v2226_v30  ;;  %v898_v7 = vrot.slane %v2544_v55, 1  ;;  %v900_v8 = vrot.slane %v893_v56, 1 }
  0x59   : > { %1742 = vmatprep.mubr.bf16.mxu1 %v1221_v21  ;;  %v1225_v39 = vpack.c.bf16 %v1109_v33, %v1105_v32  ;;  %v3327_v44 = vld [vmem:[#allocation2 + $0xa0] sm:$0xff]  ;;  %v3331_v46 = vld [vmem:[#allocation2 + $0xb0] sm:$0xff]  ;;  %502 = vst.msk [vmem:[#allocation2 + $0x128] sm:$0xff] %vm304_vm0, %v498_v41  ;;  %730 = vst.msk [vmem:[#allocation2 + $0x130] sm:$0xff] %vm304_vm0, %v728_v36  ;;  %v514_v49 = vsel %vm421_vm1, %v512_v51, %v513_v53  ;;  %v909_v11 = vunpack.c.l.bf16 %v2307_v63  ;;  %v910_v12 = vunpack.c.h.bf16 %v2307_v63 }
  0x5a   : > { %v3337_v52 = vld [vmem:[#allocation2 + $0xc8] sm:$0xff]  ;;  %886 = vst.msk [vmem:[#allocation2 + $0x118] sm:$0xff] %vm304_vm0, %v881_v47  ;;  %887 = vst.msk [vmem:[#allocation2 + $0x138] sm:$0xff] %vm304_vm0, %v883_v48  ;;  %v515_v59 = vrot.slane %v508_v50, 1  ;;  %v2309_v0 = vld [vmem:[%s3227_s27 + $0x5c] sm:$0x1]  ;;  %v1222_v1 = vpack.c.bf16 %v3327_v44, %v3323_v40  ;;  %v1224_v2 = vpack.c.bf16 %v3331_v46, %v3329_v45  ;;  %v901_v17 = vsel %vm421_vm1, %v898_v7, %v900_v8 }
  0x5b   : > { %735 = vst.msk [vmem:[#allocation2 + $0x150] sm:$0xff] %vm304_vm0, %v2543_v54  ;;  %736 = vst.msk [vmem:[#allocation2 + $0x170] sm:$0xff] %vm304_vm0, %v2544_v55  ;;  %v2269_v61 = vld [vmem:[%s3227_s27 + $0x54] sm:$0xff]   ;;  %v911_v13 = vunpack.c.l.bf16 %v2309_v0  ;;  %v2232_v19 = vld [vmem:[%s3227_s27 + $0x5c] sm:$0x1]  ;;  %v915_v21 = vrot.slane %v909_v11, 1 }
  0x5c   : > { %1582 = vmatmul.mubr.bf16.gmra.mrb[4].mxu0 %v1218_v10  ;;  %v1115_v58 = vld [vmem:[#allocation2 + $0xe8] sm:$0xff]  ;;  %347 = vst.msk [vmem:[#allocation2 + $0x180] sm:$0xff] %vm304_vm0, %v2543_v54  ;;  %348 = vst.msk [vmem:[#allocation2 + $0x1a0] sm:$0xff] %vm304_vm0, %v2544_v55  ;;  %v516_v5 = vsel %vm421_vm1, %v513_v53, %v515_v59  ;;  %v526_v10 = vunpack.c.l.bf16 %v2229_v57  ;;  %v2230_v14 = vld [vmem:[%s3227_s27 + $0x54] sm:$0xff]   ;;  %v739_v18 = vunpack.c.l.bf16 %v2269_v61  ;;  %v916_v22 = vrot.slane %v910_v12, 1 }
  0x5d   : > { %1743 = vmatmul.mubr.bf16.gmra.mrb[4].mxu1 %v1220_v6  ;;  %1589 = vmatprep.mubr.bf16.mxu0 %v1223_v26  ;;  %v1227_v3 = vpack.c.bf16 %v1115_v58, %v3337_v52  ;;  %v1113_v4 = vld [vmem:[#allocation2 + $0xd8] sm:$0xff]  ;;  %519 = vst.msk [vmem:[#allocation2 + $0x148] sm:$0xff] %vm304_vm0, %v514_v49  ;;  %v897_v6 = vrot.slane %v2543_v54, 1  ;;  %340 = vst.msk [vmem:[#allocation2 + $0x140] sm:$0xff] %vm304_vm0, %v338_v60  ;;  %v918_v23 = vrot.slane %v911_v13, 1  ;;  %v2670_v24 = vld [vmem:[%s3227_s27 + $0x60] sm:$0xff]   ;;  %v740_v25 = vunpack.c.h.bf16 %v2269_v61 }
  0x5e   : > { %1750 = vmatprep.mubr.bf16.mxu1 %v1225_v39  ;;  %341 = vst.msk [vmem:[#allocation2 + $0x160] sm:$0xff] %vm304_vm0, %v339_v62  ;;  %v1117_v9 = vld [vmem:[#allocation2 + $0xf8] sm:$0xff]  ;;  %520 = vst.msk [vmem:[#allocation2 + $0x168] sm:$0xff] %vm304_vm0, %v516_v5  ;;  %v533_v20 = vrot.slane %v526_v10, 1  ;;  %v542_v26 = vunpack.c.l.bf16 %v2230_v14  ;;  %v2312_v27 = vld [vmem:[%s3227_s27 + $0x68] sm:$0x1]  ;;  %v917_v33 = vsel %vm421_vm1, %v915_v21, %v916_v22  ;;  %v543_v38 = vunpack.c.h.bf16 %v2230_v14 }
  0x5f   : > { %v1229_v15 = vpack.c.bf16 %v1117_v9, %v1113_v4  ;;  %v899_v16 = vsel %vm421_vm1, %v897_v6, %v898_v7  ;;  %905 = vst.msk [vmem:[#allocation2 + $0x178] sm:$0xff] %vm304_vm0, %v901_v17  ;;  %741 = vst.msk [vmem:[#allocation2 + $0x190] sm:$0xff] %vm304_vm0, %v739_v18  ;;  %v2194_v28 = vld [vmem:[%s3227_s27 + $0x54] sm:$0xff]   ;;  %v3374_v29 = vld [vmem:[#allocation2 + $0xc0] sm:$0xff]  ;;  %v919_v34 = vsel %vm421_vm1, %v916_v22, %v918_v23  ;;  %v544_v39 = vunpack.c.l.bf16 %v2232_v19 }
  0x60   : > { %904 = vst.msk [vmem:[#allocation2 + $0x158] sm:$0xff] %vm304_vm0, %v899_v16  ;;  %537 = vst.msk [vmem:[#allocation2 + $0x188] sm:$0xff] %vm304_vm0, %v899_v16  ;;  %v3376_v30 = vld [vmem:[#allocation2 + $0xd0] sm:$0xff]  ;;  %v534_v32 = vsel %vm421_vm1, %v898_v7, %v533_v20  ;;  %v1114_v35 = vld [vmem:[#allocation2 + $0xe0] sm:$0xff]  ;;  %v548_v40 = vrot.slane %v542_v26, 1  ;;  %v2547_v41 = vunpack.c.l.bf16 %v2670_v24  ;;  %v2548_v42 = vunpack.c.h.bf16 %v2670_v24 }
  0x61   : > { %v3378_v31 = vld [vmem:[#allocation2 + $0xf0] sm:$0xff]  ;;  %v3383_v36 = vld [vmem:[#allocation2 + $0x108] sm:$0xff]  ;;  %538 = vst.msk [vmem:[#allocation2 + $0x1a8] sm:$0xff] %vm304_vm0, %v534_v32  ;;  %922 = vst.msk [vmem:[#allocation2 + $0x198] sm:$0xff] %vm304_vm0, %v917_v33  ;;  %v929_v43 = vunpack.c.l.bf16 %v2312_v27  ;;  %v352_v44 = vunpack.c.l.bf16 %v2194_v28  ;;  %v549_v50 = vrot.slane %v543_v38, 1  ;;  %v551_v51 = vrot.slane %v544_v39, 1 }
  0x62   : > { %v1123_v37 = vld [vmem:[#allocation2 + $0x128] sm:$0xff]  ;;  %923 = vst.msk [vmem:[#allocation2 + $0x1b8] sm:$0xff] %vm304_vm0, %v919_v34  ;;  %742 = vst.msk [vmem:[#allocation2 + $0x1b0] sm:$0xff] %vm304_vm0, %v740_v25  ;;  %v1228_v46 = vpack.c.bf16 %v3378_v31, %v3376_v30  ;;  %v1121_v47 = vld [vmem:[#allocation2 + $0x118] sm:$0xff]  ;;  %v933_v52 = vrot.slane %v2547_v41, 1  ;;  %v1226_v54 = vpack.c.bf16 %v1114_v35, %v3374_v29  ;;  %v934_v56 = vrot.slane %v2548_v42, 1 }
  0x63   : > { %v2235_v45 = vld [vmem:[%s3227_s27 + $0x68] sm:$0x1]  ;;  %v1125_v48 = vld [vmem:[#allocation2 + $0x138] sm:$0xff]  ;;  %747 = vst.msk [vmem:[#allocation2 + $0x1d0] sm:$0xff] %vm304_vm0, %v2547_v41  ;;  %v2313_v53 = vld [vmem:[%s3227_s27 + $0x6c] sm:$0xff]   ;;  %v1231_v55 = vpack.c.bf16 %v1123_v37, %v3383_v36  ;;  %v936_v57 = vrot.slane %v929_v43, 1  ;;  %v550_v60 = vsel %vm421_vm1, %v548_v40, %v549_v50  ;;  %v552_v62 = vsel %vm421_vm1, %v549_v50, %v551_v51 }
  0x64   : > { %1590 = vmatmul.mubr.bf16.gmra.mrb[8].mxu0 %v1222_v1  ;;  %361 = vst.msk [vmem:[#allocation2 + $0x200] sm:$0xff] %vm304_vm0, %v2547_v41  ;;  %354 = vst.msk [vmem:[#allocation2 + $0x1c0] sm:$0xff] %vm304_vm0, %v352_v44  ;;  %v2315_v58 = vld [vmem:[%s3227_s27 + $0x74] sm:$0x1]  ;;  %v2273_v59 = vld [vmem:[%s3227_s27 + $0x6c] sm:$0xff]   ;;  %v353_v63 = vunpack.c.h.bf16 %v2194_v28  ;;  %v562_v0 = vunpack.c.l.bf16 %v2235_v45  ;;  %v945_v61 = vunpack.c.l.bf16 %v2313_v53  ;;  %v946_v7 = vunpack.c.h.bf16 %v2313_v53 }
  0x65   : > { %1751 = vmatmul.mubr.bf16.gmra.mrb[8].mxu1 %v1224_v2  ;;  %1597 = vmatprep.mubr.bf16.mxu0 %v1227_v3  ;;  %748 = vst.msk [vmem:[#allocation2 + $0x1f0] sm:$0xff] %vm304_vm0, %v2548_v42  ;;  %362 = vst.msk [vmem:[#allocation2 + $0x220] sm:$0xff] %vm304_vm0, %v2548_v42  ;;  %v2236_v1 = vld [vmem:[%s3227_s27 + $0x6c] sm:$0xff]   ;;  %v1233_v2 = vpack.c.bf16 %v1125_v48, %v1121_v47  ;;  %v935_v3 = vsel %vm421_vm1, %v933_v52, %v934_v56  ;;  %v3409_v4 = vld [vmem:[#allocation2 + $0x100] sm:$0xff]  ;;  %v947_v8 = vunpack.c.l.bf16 %v2315_v58 }
  0x66   : > { %1758 = vmatprep.mubr.bf16.mxu1 %v1229_v15  ;;  %555 = vst.msk [vmem:[#allocation2 + $0x1c8] sm:$0xff] %vm304_vm0, %v550_v60  ;;  %556 = vst.msk [vmem:[#allocation2 + $0x1e8] sm:$0xff] %vm304_vm0, %v552_v62  ;;  %v937_v49 = vsel %vm421_vm1, %v934_v56, %v936_v57  ;;  %v3411_v5 = vld [vmem:[#allocation2 + $0x120] sm:$0xff]  ;;  %v569_v6 = vrot.slane %v562_v0, 1  ;;  %v751_v9 = vunpack.c.l.bf16 %v2273_v59  ;;  %v2238_v10 = vld [vmem:[%s3227_s27 + $0x74] sm:$0x1]  ;;  %v752_v13 = vunpack.c.h.bf16 %v2273_v59 }
  0x67   : > { %940 = vst.msk [vmem:[#allocation2 + $0x1d8] sm:$0xff] %vm304_vm0, %v935_v3  ;;  %941 = vst.msk [vmem:[#allocation2 + $0x1f8] sm:$0xff] %vm304_vm0, %v937_v49  ;;  %v3418_v11 = vld [vmem:[#allocation2 + $0x110] sm:$0xff]  ;;  %v951_v12 = vrot.slane %v945_v61, 1  ;;  %v578_v14 = vunpack.c.l.bf16 %v2236_v1  ;;  %v579_v15 = vunpack.c.h.bf16 %v2236_v1  ;;  %v2671_v16 = vld [vmem:[%s3227_s27 + $0x78] sm:$0xff]   ;;  %v952_v21 = vrot.slane %v946_v7, 1 }
  0x68   : > { %355 = vst.msk [vmem:[#allocation2 + $0x1e0] sm:$0xff] %vm304_vm0, %v353_v63  ;;  %573 = vst.msk [vmem:[#allocation2 + $0x208] sm:$0xff] %vm304_vm0, %v935_v3  ;;  %v1124_v17 = vld [vmem:[#allocation2 + $0x130] sm:$0xff]  ;;  %v1127_v18 = vld [vmem:[#allocation2 + $0x148] sm:$0xff]  ;;  %v570_v20 = vsel %vm421_vm1, %v934_v56, %v569_v6  ;;  %v1230_v22 = vpack.c.bf16 %v3411_v5, %v3409_v4  ;;  %v954_v23 = vrot.slane %v947_v8, 1  ;;  %v580_v24 = vunpack.c.l.bf16 %v2238_v10 }
  0x69   : > { %v1131_v19 = vld [vmem:[#allocation2 + $0x168] sm:$0xff]  ;;  %753 = vst.msk [vmem:[#allocation2 + $0x210] sm:$0xff] %vm304_vm0, %v751_v9  ;;  %574 = vst.msk [vmem:[#allocation2 + $0x228] sm:$0xff] %vm304_vm0, %v570_v20  ;;  %v584_v25 = vrot.slane %v578_v14, 1  ;;  %v2318_v26 = vld [vmem:[%s3227_s27 + $0x80] sm:$0x1]  ;;  %v953_v29 = vsel %vm421_vm1, %v951_v12, %v952_v21  ;;  %v2551_v31 = vunpack.c.l.bf16 %v2671_v16  ;;  %v2552_v32 = vunpack.c.h.bf16 %v2671_v16 }
  0x6a   : > { %754 = vst.msk [vmem:[#allocation2 + $0x230] sm:$0xff] %vm304_vm0, %v752_v13  ;;  %v1129_v27 = vld [vmem:[#allocation2 + $0x158] sm:$0xff]  ;;  %v585_v30 = vrot.slane %v579_v15, 1  ;;  %v2198_v33 = vld [vmem:[%s3227_s27 + $0x6c] sm:$0xff]   ;;  %v1232_v34 = vpack.c.bf16 %v1124_v17, %v3418_v11  ;;  %v1235_v35 = vpack.c.bf16 %v1131_v19, %v1127_v18  ;;  %v955_v36 = vsel %vm421_vm1, %v952_v21, %v954_v23  ;;  %958 = vst.msk [vmem:[#allocation2 + $0x218] sm:$0xff] %vm304_vm0, %v953_v29 }
  0x6b   : > { %v1133_v28 = vld [vmem:[#allocation2 + $0x178] sm:$0xff]  ;;  %v587_v37 = vrot.slane %v580_v24, 1  ;;  %v2241_v38 = vld [vmem:[%s3227_s27 + $0x80] sm:$0x1]  ;;  %959 = vst.msk [vmem:[#allocation2 + $0x238] sm:$0xff] %vm304_vm0, %v955_v36  ;;  %v965_v40 = vunpack.c.l.bf16 %v2318_v26  ;;  %v969_v41 = vrot.slane %v2551_v31, 1  ;;  %v366_v47 = vunpack.c.l.bf16 %v2198_v33 }
  0x6c   : > { %1598 = vmatmul.mubr.bf16.gmra.mrb[12].mxu0 %v1226_v54  ;;  %v586_v39 = vsel %vm421_vm1, %v584_v25, %v585_v30  ;;  %v970_v42 = vrot.slane %v2552_v32, 1  ;;  %759 = vst.msk [vmem:[#allocation2 + $0x250] sm:$0xff] %vm304_vm0, %v2551_v31  ;;  %760 = vst.msk [vmem:[#allocation2 + $0x270] sm:$0xff] %vm304_vm0, %v2552_v32  ;;  %v2319_v43 = vld [vmem:[%s3227_s27 + $0x84] sm:$0xff]   ;;  %v2321_v44 = vld [vmem:[%s3227_s27 + $0x8c] sm:$0x1]  ;;  %v1237_v45 = vpack.c.bf16 %v1133_v28, %v1129_v27  ;;  %v367_v48 = vunpack.c.h.bf16 %v2198_v33 }
  0x6d   : > { %1759 = vmatmul.mubr.bf16.gmra.mrb[12].mxu1 %v1228_v46  ;;  %1605 = vmatprep.mubr.bf16.mxu0 %v1231_v55  ;;  %375 = vst.msk [vmem:[#allocation2 + $0x280] sm:$0xff] %vm304_vm0, %v2551_v31  ;;  %376 = vst.msk [vmem:[#allocation2 + $0x2a0] sm:$0xff] %vm304_vm0, %v2552_v32  ;;  %v588_v46 = vsel %vm421_vm1, %v585_v30, %v587_v37  ;;  %v2277_v50 = vld [vmem:[%s3227_s27 + $0x84] sm:$0xff]   ;;  %v972_v55 = vrot.slane %v965_v40, 1  ;;  %v598_v56 = vunpack.c.l.bf16 %v2241_v38  ;;  %v981_v57 = vunpack.c.l.bf16 %v2319_v43  ;;  %v2244_v60 = vld [vmem:[%s3227_s27 + $0x8c] sm:$0x1] }
  0x6e   : > { %1766 = vmatprep.mubr.bf16.mxu1 %v1233_v2  ;;  %591 = vst.msk [vmem:[#allocation2 + $0x248] sm:$0xff] %vm304_vm0, %v586_v39  ;;  %v2242_v51 = vld [vmem:[%s3227_s27 + $0x84] sm:$0xff]   ;;  %592 = vst.msk [vmem:[#allocation2 + $0x268] sm:$0xff] %vm304_vm0, %v588_v46  ;;  %v971_v54 = vsel %vm421_vm1, %v969_v41, %v970_v42  ;;  %v982_v58 = vunpack.c.h.bf16 %v2319_v43  ;;  %v983_v59 = vunpack.c.l.bf16 %v2321_v44  ;;  %v1128_v62 = vld [vmem:[#allocation2 + $0x150] sm:$0xff]  ;;  %v763_v0 = vunpack.c.l.bf16 %v2277_v50 }
  0x6f   : > { %v3446_v52 = vld [vmem:[#allocation2 + $0x140] sm:$0xff]  ;;  %976 = vst.msk [vmem:[#allocation2 + $0x258] sm:$0xff] %vm304_vm0, %v971_v54  ;;  %368 = vst.msk [vmem:[#allocation2 + $0x240] sm:$0xff] %vm304_vm0, %v366_v47  ;;  %v973_v63 = vsel %vm421_vm1, %v970_v42, %v972_v55  ;;  %v764_v1 = vunpack.c.h.bf16 %v2277_v50  ;;  %v614_v2 = vunpack.c.l.bf16 %v2242_v51  ;;  %v2672_v3 = vld [vmem:[%s3227_s27 + $0x90] sm:$0xff]   ;;  %v605_v6 = vrot.slane %v598_v56, 1 }
  0x70   : > { %v3448_v53 = vld [vmem:[#allocation2 + $0x160] sm:$0xff]  ;;  %369 = vst.msk [vmem:[#allocation2 + $0x260] sm:$0xff] %vm304_vm0, %v367_v48  ;;  %609 = vst.msk [vmem:[#allocation2 + $0x288] sm:$0xff] %vm304_vm0, %v971_v54  ;;  %v1132_v61 = vld [vmem:[#allocation2 + $0x170] sm:$0xff]  ;;  %v987_v7 = vrot.slane %v981_v57, 1  ;;  %v988_v10 = vrot.slane %v982_v58, 1  ;;  %v615_v12 = vunpack.c.h.bf16 %v2242_v51  ;;  %v616_v13 = vunpack.c.l.bf16 %v2244_v60 }
  0x71   : > { %v1234_v49 = vpack.c.bf16 %v3448_v53, %v3446_v52  ;;  %v1135_v4 = vld [vmem:[#allocation2 + $0x188] sm:$0xff]  ;;  %977 = vst.msk [vmem:[#allocation2 + $0x278] sm:$0xff] %vm304_vm0, %v973_v63  ;;  %v1137_v8 = vld [vmem:[#allocation2 + $0x198] sm:$0xff]  ;;  %v990_v11 = vrot.slane %v983_v59, 1  ;;  %765 = vst.msk [vmem:[#allocation2 + $0x290] sm:$0xff] %vm304_vm0, %v763_v0  ;;  %v606_v15 = vsel %vm421_vm1, %v970_v42, %v605_v6  ;;  %v620_v16 = vrot.slane %v614_v2, 1 }
  0x72   : > { %v1139_v5 = vld [vmem:[#allocation2 + $0x1a8] sm:$0xff]  ;;  %v1141_v9 = vld [vmem:[#allocation2 + $0x1b8] sm:$0xff]  ;;  %766 = vst.msk [vmem:[#allocation2 + $0x2b0] sm:$0xff] %vm304_vm0, %v764_v1  ;;  %v2555_v17 = vunpack.c.l.bf16 %v2672_v3  ;;  %v2556_v18 = vunpack.c.h.bf16 %v2672_v3  ;;  %v1236_v20 = vpack.c.bf16 %v1132_v61, %v1128_v62  ;;  %610 = vst.msk [vmem:[#allocation2 + $0x2a8] sm:$0xff] %vm304_vm0, %v606_v15  ;;  %v621_v25 = vrot.slane %v615_v12, 1 }
  0x73   : > { %v2324_v14 = vld [vmem:[%s3227_s27 + $0x98] sm:$0x1]  ;;  %v2202_v19 = vld [vmem:[%s3227_s27 + $0x84] sm:$0xff]   ;;  %v1239_v21 = vpack.c.bf16 %v1139_v5, %v1135_v4  ;;  %v991_v23 = vsel %vm421_vm1, %v988_v10, %v990_v11  ;;  %v1241_v24 = vpack.c.bf16 %v1141_v9, %v1137_v8  ;;  %v623_v26 = vrot.slane %v616_v13, 1  ;;  %v2325_v29 = vld [vmem:[%s3227_s27 + $0x9c] sm:$0xff]  }
  0x74   : > { %1606 = vmatmul.mubr.bf16.gmra.mrb[16].mxu0 %v1230_v22  ;;  %v989_v22 = vsel %vm421_vm1, %v987_v7, %v988_v10  ;;  %995 = vst.msk [vmem:[#allocation2 + $0x2b8] sm:$0xff] %vm304_vm0, %v991_v23  ;;  %v1001_v27 = vunpack.c.l.bf16 %v2324_v14  ;;  %771 = vst.msk [vmem:[#allocation2 + $0x2d0] sm:$0xff] %vm304_vm0, %v2555_v17  ;;  %v2247_v28 = vld [vmem:[%s3227_s27 + $0x98] sm:$0x1]  ;;  %v3478_v30 = vld [vmem:[#allocation2 + $0x180] sm:$0xff]  ;;  %v1005_v32 = vrot.slane %v2555_v17, 1  ;;  %v622_v38 = vsel %vm421_vm1, %v620_v16, %v621_v25 }
  0x75   : > { %1767 = vmatmul.mubr.bf16.gmra.mrb[16].mxu1 %v1232_v34  ;;  %1613 = vmatprep.mubr.bf16.mxu0 %v1235_v35  ;;  %994 = vst.msk [vmem:[#allocation2 + $0x298] sm:$0xff] %vm304_vm0, %v989_v22  ;;  %772 = vst.msk [vmem:[#allocation2 + $0x2f0] sm:$0xff] %vm304_vm0, %v2556_v18  ;;  %v3480_v31 = vld [vmem:[#allocation2 + $0x1a0] sm:$0xff]  ;;  %v1006_v33 = vrot.slane %v2556_v18, 1  ;;  %v380_v34 = vunpack.c.l.bf16 %v2202_v19  ;;  %v3483_v36 = vld [vmem:[#allocation2 + $0x190] sm:$0xff]  ;;  %v624_v39 = vsel %vm421_vm1, %v621_v25, %v623_v26  ;;  %v381_v43 = vunpack.c.h.bf16 %v2202_v19 }
  0x76   : > { %1774 = vmatprep.mubr.bf16.mxu1 %v1237_v45  ;;  %389 = vst.msk [vmem:[#allocation2 + $0x300] sm:$0xff] %vm304_vm0, %v2555_v17  ;;  %390 = vst.msk [vmem:[#allocation2 + $0x320] sm:$0xff] %vm304_vm0, %v2556_v18  ;;  %v2327_v35 = vld [vmem:[%s3227_s27 + $0xa4] sm:$0x1]  ;;  %v3485_v37 = vld [vmem:[#allocation2 + $0x1b0] sm:$0xff]  ;;  %v1008_v40 = vrot.slane %v1001_v27, 1  ;;  %v634_v44 = vunpack.c.l.bf16 %v2247_v28  ;;  %v1017_v45 = vunpack.c.l.bf16 %v2325_v29  ;;  %v1238_v47 = vpack.c.bf16 %v3480_v31, %v3478_v30 }
  0x77   : > { %v2281_v41 = vld [vmem:[%s3227_s27 + $0x9c] sm:$0xff]   ;;  %627 = vst.msk [vmem:[#allocation2 + $0x2c8] sm:$0xff] %vm304_vm0, %v622_v38  ;;  %628 = vst.msk [vmem:[#allocation2 + $0x2e8] sm:$0xff] %vm304_vm0, %v624_v39  ;;  %v1007_v42 = vsel %vm421_vm1, %v1005_v32, %v1006_v33  ;;  %v1143_v48 = vld [vmem:[#allocation2 + $0x1c8] sm:$0xff]  ;;  %v1018_v52 = vunpack.c.h.bf16 %v2325_v29  ;;  %v1019_v53 = vunpack.c.l.bf16 %v2327_v35  ;;  %v1240_v55 = vpack.c.bf16 %v3485_v37, %v3483_v36 }
  0x78   : > { %382 = vst.msk [vmem:[#allocation2 + $0x2c0] sm:$0xff] %vm304_vm0, %v380_v34  ;;  %v2248_v46 = vld [vmem:[%s3227_s27 + $0x9c] sm:$0xff]   ;;  %v1147_v50 = vld [vmem:[#allocation2 + $0x1e8] sm:$0xff]  ;;  %v1009_v51 = vsel %vm421_vm1, %v1006_v33, %v1008_v40  ;;  %1012 = vst.msk [vmem:[#allocation2 + $0x2d8] sm:$0xff] %vm304_vm0, %v1007_v42  ;;  %v641_v58 = vrot.slane %v634_v44, 1  ;;  %v1023_v59 = vrot.slane %v1017_v45, 1  ;;  %v775_v60 = vunpack.c.l.bf16 %v2281_v41 }
  0x79   : > { %645 = vst.msk [vmem:[#allocation2 + $0x308] sm:$0xff] %vm304_vm0, %v1007_v42  ;;  %v2250_v54 = vld [vmem:[%s3227_s27 + $0xa4] sm:$0x1]  ;;  %v1145_v56 = vld [vmem:[#allocation2 + $0x1d8] sm:$0xff]  ;;  %1013 = vst.msk [vmem:[#allocation2 + $0x2f8] sm:$0xff] %vm304_vm0, %v1009_v51  ;;  %v1024_v62 = vrot.slane %v1018_v52, 1  ;;  %v776_v0 = vunpack.c.h.bf16 %v2281_v41  ;;  %v650_v1 = vunpack.c.l.bf16 %v2248_v46  ;;  %v1243_v2 = vpack.c.bf16 %v1147_v50, %v1143_v48 }
  0x7a   : > { %v1149_v57 = vld [vmem:[#allocation2 + $0x1f8] sm:$0xff]  ;;  %383 = vst.msk [vmem:[#allocation2 + $0x2e0] sm:$0xff] %vm304_vm0, %v381_v43  ;;  %v1026_v63 = vrot.slane %v1019_v53, 1  ;;  %v642_v3 = vsel %vm421_vm1, %v1006_v33, %v641_v58  ;;  %777 = vst.msk [vmem:[#allocation2 + $0x310] sm:$0xff] %vm304_vm0, %v775_v60  ;;  %v652_v61 = vunpack.c.l.bf16 %v2250_v54  ;;  %v2673_v4 = vld [vmem:[%s3227_s27 + $0xa8] sm:$0xff]  }
  0x7b   : > { %v2330_v5 = vld [vmem:[%s3227_s27 + $0xb0] sm:$0x1]  ;;  %v2206_v6 = vld [vmem:[%s3227_s27 + $0x9c] sm:$0xff]   ;;  %v1245_v7 = vpack.c.bf16 %v1149_v57, %v1145_v56  ;;  %646 = vst.msk [vmem:[#allocation2 + $0x328] sm:$0xff] %vm304_vm0, %v642_v3  ;;  %v1025_v10 = vsel %vm421_vm1, %v1023_v59, %v1024_v62  ;;  %778 = vst.msk [vmem:[#allocation2 + $0x330] sm:$0xff] %vm304_vm0, %v776_v0  ;;  %v656_v12 = vrot.slane %v650_v1, 1  ;;  %v2560_v22 = vunpack.c.h.bf16 %v2673_v4 }
  0x7c   : > { %1614 = vmatmul.mubr.bf16.gmra.mrb[20].mxu0 %v1234_v49  ;;  %v651_v49 = vunpack.c.h.bf16 %v2248_v46  ;;  %v3510_v8 = vld [vmem:[#allocation2 + $0x1d0] sm:$0xff]  ;;  %v1027_v11 = vsel %vm421_vm1, %v1024_v62, %v1026_v63  ;;  %v3518_v13 = vld [vmem:[#allocation2 + $0x1c0] sm:$0xff]  ;;  %1030 = vst.msk [vmem:[#allocation2 + $0x318] sm:$0xff] %vm304_vm0, %v1025_v10  ;;  %v659_v15 = vrot.slane %v652_v61, 1  ;;  %v3524_v19 = vld [vmem:[#allocation2 + $0x208] sm:$0xff]  ;;  %v1037_v23 = vunpack.c.l.bf16 %v2330_v5 }
  0x7d   : > { %1775 = vmatmul.mubr.bf16.gmra.mrb[20].mxu1 %v1236_v20  ;;  %1621 = vmatprep.mubr.bf16.mxu0 %v1239_v21  ;;  %v3512_v9 = vld [vmem:[#allocation2 + $0x1f0] sm:$0xff]  ;;  %1031 = vst.msk [vmem:[#allocation2 + $0x338] sm:$0xff] %vm304_vm0, %v1027_v11  ;;  %v1146_v18 = vld [vmem:[#allocation2 + $0x1e0] sm:$0xff]  ;;  %v3526_v20 = vld [vmem:[#allocation2 + $0x228] sm:$0xff]  ;;  %v2559_v21 = vunpack.c.l.bf16 %v2673_v4  ;;  %v395_v28 = vunpack.c.h.bf16 %v2206_v6  ;;  %v1042_v31 = vrot.slane %v2560_v22, 1 }
  0x7e   : > { %1782 = vmatprep.mubr.bf16.mxu1 %v1241_v24  ;;  %v657_v14 = vrot.slane %v651_v49, 1  ;;  %v2253_v16 = vld [vmem:[%s3227_s27 + $0xb0] sm:$0x1]  ;;  %v2331_v17 = vld [vmem:[%s3227_s27 + $0xb4] sm:$0xff]   ;;  %v394_v24 = vunpack.c.l.bf16 %v2206_v6  ;;  %v1244_v25 = vpack.c.bf16 %v3512_v9, %v3510_v8  ;;  %v2333_v29 = vld [vmem:[%s3227_s27 + $0xbc] sm:$0x1]  ;;  %v1242_v35 = vpack.c.bf16 %v1146_v18, %v3518_v13 }
  0x7f   : > { %v1041_v30 = vrot.slane %v2559_v21, 1  ;;  %v1044_v32 = vrot.slane %v1037_v23, 1  ;;  %783 = vst.msk [vmem:[#allocation2 + $0x350] sm:$0xff] %vm304_vm0, %v2559_v21  ;;  %784 = vst.msk [vmem:[#allocation2 + $0x370] sm:$0xff] %vm304_vm0, %v2560_v22  ;;  %v670_v33 = vunpack.c.l.bf16 %v2253_v16  ;;  %v2285_v34 = vld [vmem:[%s3227_s27 + $0xb4] sm:$0xff]   ;;  %v1247_v36 = vpack.c.bf16 %v3526_v20, %v3524_v19  ;;  %v2674_v52 = vld [vmem:[%s3227_s27 + $0xc0] sm:$0xff]  }
  0x80   : > { %v658_v26 = vsel %vm421_vm1, %v656_v12, %v657_v14  ;;  %v660_v27 = vsel %vm421_vm1, %v657_v14, %v659_v15  ;;  %396 = vst.msk [vmem:[#allocation2 + $0x340] sm:$0xff] %vm304_vm0, %v394_v24  ;;  %403 = vst.msk [vmem:[#allocation2 + $0x380] sm:$0xff] %vm304_vm0, %v2559_v21  ;;  %v1153_v37 = vld [vmem:[#allocation2 + $0x218] sm:$0xff]  ;;  %v1053_v39 = vunpack.c.l.bf16 %v2331_v17  ;;  %v1054_v40 = vunpack.c.h.bf16 %v2331_v17  ;;  %v2336_v56 = vld [vmem:[%s3227_s27 + $0xc8] sm:$0x1] }
  0x81   : > { %663 = vst.msk [vmem:[#allocation2 + $0x348] sm:$0xff] %vm304_vm0, %v658_v26  ;;  %664 = vst.msk [vmem:[#allocation2 + $0x368] sm:$0xff] %vm304_vm0, %v660_v27  ;;  %v1157_v38 = vld [vmem:[#allocation2 + $0x238] sm:$0xff]  ;;  %v1043_v41 = vsel %vm421_vm1, %v1041_v30, %v1042_v31  ;;  %v1045_v42 = vsel %vm421_vm1, %v1042_v31, %v1044_v32  ;;  %v677_v43 = vrot.slane %v670_v33, 1  ;;  %v1055_v44 = vunpack.c.l.bf16 %v2333_v29  ;;  %v1154_v3 = vld [vmem:[#allocation2 + $0x220] sm:$0xff] }
  0x82   : > { %404 = vst.msk [vmem:[#allocation2 + $0x3a0] sm:$0xff] %vm304_vm0, %v2560_v22  ;;  %397 = vst.msk [vmem:[#allocation2 + $0x360] sm:$0xff] %vm304_vm0, %v395_v28  ;;  %v2254_v45 = vld [vmem:[%s3227_s27 + $0xb4] sm:$0xff]   ;;  %v1059_v46 = vrot.slane %v1053_v39, 1  ;;  %v787_v48 = vunpack.c.l.bf16 %v2285_v34  ;;  %v788_v50 = vunpack.c.h.bf16 %v2285_v34  ;;  %v2256_v51 = vld [vmem:[%s3227_s27 + $0xbc] sm:$0x1]  ;;  %v1249_v53 = vpack.c.bf16 %v1157_v38, %v1153_v37 }
  0x83   : > { %1048 = vst.msk [vmem:[#allocation2 + $0x358] sm:$0xff] %vm304_vm0, %v1043_v41  ;;  %1049 = vst.msk [vmem:[#allocation2 + $0x378] sm:$0xff] %vm304_vm0, %v1045_v42  ;;  %v678_v54 = vsel %vm421_vm1, %v1042_v31, %v677_v43  ;;  %v2210_v57 = vld [vmem:[%s3227_s27 + $0xb4] sm:$0xff]   ;;  %v686_v59 = vunpack.c.l.bf16 %v2254_v45  ;;  %v687_v60 = vunpack.c.h.bf16 %v2254_v45  ;;  %v688_v63 = vunpack.c.l.bf16 %v2256_v51  ;;  %v1159_v8 = vld [vmem:[#allocation2 + $0x248] sm:$0xff] }
  0x84   : > { %1622 = vmatmul.mubr.bf16.gmra.mrb[24].mxu0 %v1238_v47  ;;  %681 = vst.msk [vmem:[#allocation2 + $0x388] sm:$0xff] %vm304_vm0, %v1043_v41  ;;  %v1060_v47 = vrot.slane %v1054_v40, 1  ;;  %682 = vst.msk [vmem:[#allocation2 + $0x3a8] sm:$0xff] %vm304_vm0, %v678_v54  ;;  %v2563_v0 = vunpack.c.l.bf16 %v2674_v52  ;;  %v2564_v1 = vunpack.c.h.bf16 %v2674_v52  ;;  %v1152_v49 = vld [vmem:[#allocation2 + $0x210] sm:$0xff]  ;;  %v1073_v5 = vunpack.c.l.bf16 %v2336_v56  ;;  %v1163_v9 = vld [vmem:[#allocation2 + $0x268] sm:$0xff] }
  0x85   : > { %1783 = vmatmul.mubr.bf16.gmra.mrb[24].mxu1 %v1240_v55  ;;  %1629 = vmatprep.mubr.bf16.mxu0 %v1243_v2  ;;  %v1062_v55 = vrot.slane %v1055_v44, 1  ;;  %789 = vst.msk [vmem:[#allocation2 + $0x390] sm:$0xff] %vm304_vm0, %v787_v48  ;;  %790 = vst.msk [vmem:[#allocation2 + $0x3b0] sm:$0xff] %vm304_vm0, %v788_v50  ;;  %v1150_v2 = vld [vmem:[#allocation2 + $0x200] sm:$0xff]  ;;  %v692_v61 = vrot.slane %v686_v59, 1  ;;  %v693_v4 = vrot.slane %v687_v60, 1  ;;  %v408_v6 = vunpack.c.l.bf16 %v2210_v57 }
  0x86   : > { %1790 = vmatprep.mubr.bf16.mxu1 %v1245_v7  ;;  %v1061_v58 = vsel %vm421_vm1, %v1059_v46, %v1060_v47  ;;  %v1156_v7 = vld [vmem:[#allocation2 + $0x230] sm:$0xff]  ;;  %v695_v10 = vrot.slane %v688_v63, 1  ;;  %v1077_v11 = vrot.slane %v2563_v0, 1  ;;  %v1078_v12 = vrot.slane %v2564_v1, 1  ;;  %796 = vst.msk [vmem:[#allocation2 + $0x3d0] sm:$0xff] %vm304_vm0, %v2563_v0  ;;  %797 = vst.msk [vmem:[#allocation2 + $0x3f0] sm:$0xff] %vm304_vm0, %v2564_v1 }
  0x87   : > { %v1063_v62 = vsel %vm421_vm1, %v1060_v47, %v1062_v55  ;;  %1066 = vst.msk [vmem:[#allocation2 + $0x398] sm:$0xff] %vm304_vm0, %v1061_v58  ;;  %v1161_v13 = vld [vmem:[#allocation2 + $0x258] sm:$0xff]  ;;  %v694_v15 = vsel %vm421_vm1, %v692_v61, %v693_v4  ;;  %v1080_v16 = vrot.slane %v1073_v5, 1  ;;  %410 = vst.msk [vmem:[#allocation2 + $0x3c0] sm:$0xff] %vm304_vm0, %v408_v6  ;;  %v1246_v17 = vpack.c.bf16 %v1154_v3, %v1150_v2  ;;  %v1162_v26 = vld [vmem:[#allocation2 + $0x260] sm:$0xff] }
  0x88   : > { %1067 = vst.msk [vmem:[#allocation2 + $0x3b8] sm:$0xff] %vm304_vm0, %v1063_v62  ;;  %v1165_v14 = vld [vmem:[#allocation2 + $0x278] sm:$0xff]  ;;  %v696_v18 = vsel %vm421_vm1, %v693_v4, %v695_v10  ;;  %699 = vst.msk [vmem:[#allocation2 + $0x3c8] sm:$0xff] %vm304_vm0, %v694_v15  ;;  %v1079_v19 = vsel %vm421_vm1, %v1077_v11, %v1078_v12  ;;  %v409_v20 = vunpack.c.h.bf16 %v2210_v57  ;;  %v1248_v21 = vpack.c.bf16 %v1156_v7, %v1152_v49  ;;  %v1160_v27 = vld [vmem:[#allocation2 + $0x250] sm:$0xff] }
  0x89   : > { %v1251_v22 = vpack.c.bf16 %v1163_v9, %v1159_v8  ;;  %700 = vst.msk [vmem:[#allocation2 + $0x3e8] sm:$0xff] %vm304_vm0, %v696_v18  ;;  %v1081_v23 = vsel %vm421_vm1, %v1078_v12, %v1080_v16  ;;  %1084 = vst.msk [vmem:[#allocation2 + $0x3d8] sm:$0xff] %vm304_vm0, %v1079_v19  ;;  %v1253_v24 = vpack.c.bf16 %v1165_v14, %v1161_v13  ;;  %v1164_v28 = vld [vmem:[#allocation2 + $0x270] sm:$0xff]  ;;  %v1167_v29 = vld [vmem:[#allocation2 + $0x288] sm:$0xff] }
  0x8a   : > { %1085 = vst.msk [vmem:[#allocation2 + $0x3f8] sm:$0xff] %vm304_vm0, %v1081_v23  ;;  %411 = vst.msk [vmem:[#allocation2 + $0x3e0] sm:$0xff] %vm304_vm0, %v409_v20  ;;  %v1171_v30 = vld [vmem:[#allocation2 + $0x2a8] sm:$0xff]  ;;  %v1169_v31 = vld [vmem:[#allocation2 + $0x298] sm:$0xff]  ;;  %v1252_v34 = vpack.c.bf16 %v1164_v28, %v1160_v27 }
  0x8b   : > { %v1173_v32 = vld [vmem:[#allocation2 + $0x2b8] sm:$0xff]  ;;  %v1166_v37 = vld [vmem:[#allocation2 + $0x280] sm:$0xff]  ;;  %v1168_v39 = vld [vmem:[#allocation2 + $0x290] sm:$0xff] }
  0x8c   : > { %1630 = vmatmul.mubr.bf16.gmra.mrb[28].mxu0 %v1242_v35  ;;  %v1255_v35 = vpack.c.bf16 %v1171_v30, %v1167_v29  ;;  %v1170_v38 = vld [vmem:[#allocation2 + $0x2a0] sm:$0xff]  ;;  %v1172_v40 = vld [vmem:[#allocation2 + $0x2b0] sm:$0xff]  ;;  %v1175_v41 = vld [vmem:[#allocation2 + $0x2c8] sm:$0xff] }
  0x8d   : > { %1791 = vmatmul.mubr.bf16.gmra.mrb[28].mxu1 %v1244_v25  ;;  %1637 = vmatprep.mubr.bf16.mxu0 %v1247_v36  ;;  %v1158_v25 = vld [vmem:[#allocation2 + $0x240] sm:$0xff]  ;;  %v1257_v36 = vpack.c.bf16 %v1173_v32, %v1169_v31  ;;  %v1179_v42 = vld [vmem:[#allocation2 + $0x2e8] sm:$0xff]  ;;  %v1177_v43 = vld [vmem:[#allocation2 + $0x2d8] sm:$0xff]  ;;  %v1254_v45 = vpack.c.bf16 %v1170_v38, %v1166_v37  ;;  %v1256_v46 = vpack.c.bf16 %v1172_v40, %v1168_v39 }
  0x8e   : > { %1798 = vmatprep.mubr.bf16.mxu1 %v1249_v53  ;;  %v1250_v33 = vpack.c.bf16 %v1162_v26, %v1158_v25  ;;  %v1181_v44 = vld [vmem:[#allocation2 + $0x2f8] sm:$0xff]  ;;  %v1259_v47 = vpack.c.bf16 %v1179_v42, %v1175_v41  ;;  %v1174_v50 = vld [vmem:[#allocation2 + $0x2c0] sm:$0xff]  ;;  %v1176_v52 = vld [vmem:[#allocation2 + $0x2d0] sm:$0xff] }
  0x8f   : > { %v1261_v48 = vpack.c.bf16 %v1181_v44, %v1177_v43  ;;  %v1178_v51 = vld [vmem:[#allocation2 + $0x2e0] sm:$0xff]  ;;  %v1180_v53 = vld [vmem:[#allocation2 + $0x2f0] sm:$0xff]  ;;  %v1183_v54 = vld [vmem:[#allocation2 + $0x308] sm:$0xff] }
  0x90   : > { %v1187_v55 = vld [vmem:[#allocation2 + $0x328] sm:$0xff]  ;;  %v1185_v56 = vld [vmem:[#allocation2 + $0x318] sm:$0xff]  ;;  %v1258_v58 = vpack.c.bf16 %v1178_v51, %v1174_v50  ;;  %v1260_v59 = vpack.c.bf16 %v1180_v53, %v1176_v52  ;;  %v1182_v63 = vld [vmem:[#allocation2 + $0x300] sm:$0xff] }
  0x91   : > { %v1189_v57 = vld [vmem:[#allocation2 + $0x338] sm:$0xff]  ;;  %v1263_v60 = vpack.c.bf16 %v1187_v55, %v1183_v54  ;;  %v1186_v0 = vld [vmem:[#allocation2 + $0x320] sm:$0xff]  ;;  %v1184_v1 = vld [vmem:[#allocation2 + $0x310] sm:$0xff] }
  0x92   : > { %v1265_v62 = vpack.c.bf16 %v1189_v57, %v1185_v56  ;;  %v1188_v2 = vld [vmem:[#allocation2 + $0x330] sm:$0xff]  ;;  %v1191_v3 = vld [vmem:[#allocation2 + $0x348] sm:$0xff]  ;;  %v1193_v61 = vld [vmem:[#allocation2 + $0x358] sm:$0xff]  ;;  %v1262_v5 = vpack.c.bf16 %v1186_v0, %v1182_v63 }
  0x93   : > { %v1195_v49 = vld [vmem:[#allocation2 + $0x368] sm:$0xff]  ;;  %v1197_v4 = vld [vmem:[#allocation2 + $0x378] sm:$0xff]  ;;  %v1264_v6 = vpack.c.bf16 %v1188_v2, %v1184_v1  ;;  %v1190_v9 = vld [vmem:[#allocation2 + $0x340] sm:$0xff] }
  0x94   : > { %1638 = vmatmul.mubr.bf16.gmra.mrb[32].mxu0 %v1246_v17  ;;  %v1267_v7 = vpack.c.bf16 %v1195_v49, %v1191_v3  ;;  %v1269_v8 = vpack.c.bf16 %v1197_v4, %v1193_v61  ;;  %v1194_v10 = vld [vmem:[#allocation2 + $0x360] sm:$0xff]  ;;  %v1192_v11 = vld [vmem:[#allocation2 + $0x350] sm:$0xff]  ;;  %v1199_v13 = vld [vmem:[#allocation2 + $0x388] sm:$0xff] }
  0x95   : > { %1799 = vmatmul.mubr.bf16.gmra.mrb[32].mxu1 %v1248_v21  ;;  %1645 = vmatprep.mubr.bf16.mxu0 %v1251_v22  ;;  %v1196_v12 = vld [vmem:[#allocation2 + $0x370] sm:$0xff]  ;;  %v1203_v14 = vld [vmem:[#allocation2 + $0x3a8] sm:$0xff]  ;;  %v1201_v15 = vld [vmem:[#allocation2 + $0x398] sm:$0xff]  ;;  %v1266_v17 = vpack.c.bf16 %v1194_v10, %v1190_v9 }
  0x96   : > { %1806 = vmatprep.mubr.bf16.mxu1 %v1253_v24  ;;  %v1205_v16 = vld [vmem:[#allocation2 + $0x3b8] sm:$0xff]  ;;  %v1268_v18 = vpack.c.bf16 %v1196_v12, %v1192_v11  ;;  %v1271_v19 = vpack.c.bf16 %v1203_v14, %v1199_v13  ;;  %v1198_v21 = vld [vmem:[#allocation2 + $0x380] sm:$0xff]  ;;  %v1200_v23 = vld [vmem:[#allocation2 + $0x390] sm:$0xff] }
  0x97   : > { %v1273_v20 = vpack.c.bf16 %v1205_v16, %v1201_v15  ;;  %v1202_v22 = vld [vmem:[#allocation2 + $0x3a0] sm:$0xff]  ;;  %v1204_v24 = vld [vmem:[#allocation2 + $0x3b0] sm:$0xff]  ;;  %v1207_v25 = vld [vmem:[#allocation2 + $0x3c8] sm:$0xff] }
  0x98   : > { %v1211_v26 = vld [vmem:[#allocation2 + $0x3e8] sm:$0xff]  ;;  %v1209_v27 = vld [vmem:[#allocation2 + $0x3d8] sm:$0xff]  ;;  %v1270_v29 = vpack.c.bf16 %v1202_v22, %v1198_v21  ;;  %v1272_v30 = vpack.c.bf16 %v1204_v24, %v1200_v23  ;;  %v3578_v41 = vld [vmem:[%s3639_s2] ss:$0 sm:$0xff] }
  0x99   : > { %v1213_v28 = vld [vmem:[#allocation2 + $0x3f8] sm:$0xff]  ;;  %v1275_v31 = vpack.c.bf16 %v1211_v26, %v1207_v25 }
  0x9a   : > { %v1277_v32 = vpack.c.bf16 %v1213_v28, %v1209_v27 }
  0x9c   : > { %1646 = vmatmul.mubr.bf16.gmra.mrb[36].mxu0 %v1250_v33  ;;  %v1206_v33 = vld [vmem:[#allocation2 + $0x3c0] sm:$0xff] }
  0x9d   : > { %1807 = vmatmul.mubr.bf16.gmra.mrb[36].mxu1 %v1252_v34  ;;  %1653 = vmatprep.mubr.bf16.mxu0 %v1255_v35  ;;  %v1210_v34 = vld [vmem:[#allocation2 + $0x3e0] sm:$0xff]  ;;  %v1208_v35 = vld [vmem:[#allocation2 + $0x3d0] sm:$0xff] }
  0x9e   : > { %1814 = vmatprep.mubr.bf16.mxu1 %v1257_v36  ;;  %v1212_v36 = vld [vmem:[#allocation2 + $0x3f0] sm:$0xff]  ;;  %v1274_v37 = vpack.c.bf16 %v1210_v34, %v1206_v33 }
  0x9f   : > { %v1276_v38 = vpack.c.bf16 %v1212_v36, %v1208_v35 }
  0xa4   : > { %1654 = vmatmul.mubr.bf16.gmra.mrb[40].mxu0 %v1254_v45 }
  0xa5   : > { %1815 = vmatmul.mubr.bf16.gmra.mrb[40].mxu1 %v1256_v46  ;;  %1661 = vmatprep.mubr.bf16.mxu0 %v1259_v47 }
  0xa6   : > { %1822 = vmatprep.mubr.bf16.mxu1 %v1261_v48 }
  0xac   : > { %1662 = vmatmul.mubr.bf16.gmra.mrb[44].mxu0 %v1258_v58 }
  0xad   : > { %1823 = vmatmul.mubr.bf16.gmra.mrb[44].mxu1 %v1260_v59  ;;  %1669 = vmatprep.mubr.bf16.mxu0 %v1263_v60 }
  0xae   : > { %1830 = vmatprep.mubr.bf16.mxu1 %v1265_v62 }
  0xb4   : > { %1670 = vmatmul.mubr.bf16.gmra.mrb[48].mxu0 %v1262_v5 }
  0xb5   : > { %1831 = vmatmul.mubr.bf16.gmra.mrb[48].mxu1 %v1264_v6  ;;  %1677 = vmatprep.mubr.bf16.mxu0 %v1267_v7 }
  0xb6   : > { %1838 = vmatprep.mubr.bf16.mxu1 %v1269_v8 }
  0xbc   : > { %1678 = vmatmul.mubr.bf16.gmra.mrb[52].mxu0 %v1266_v17 }
  0xbd   : > { %1839 = vmatmul.mubr.bf16.gmra.mrb[52].mxu1 %v1268_v18  ;;  %1685 = vmatprep.mubr.bf16.mxu0 %v1271_v19 }
  0xbe   : > { %1846 = vmatprep.mubr.bf16.mxu1 %v1273_v20 }
  0xc4   : > { %1686 = vmatmul.mubr.bf16.gmra.mrb[56].mxu0 %v1270_v29 }
  0xc5   : > { %1847 = vmatmul.mubr.bf16.gmra.mrb[56].mxu1 %v1272_v30  ;;  %1693 = vmatprep.mubr.bf16.mxu0 %v1275_v31 }
  0xc6   : > { %1854 = vmatprep.mubr.bf16.mxu1 %v1277_v32 }
  0xcc   : > { %1694 = vmatmul.mubr.bf16.gmra.mrb[60].mxu0 %v1274_v37 }
  0xcd   : > { %1855 = vmatmul.mubr.bf16.gmra.mrb[60].mxu1 %v1276_v38 }
 0x127   : > { %v2706_v39 = vpop.f32.mrb[0].mxu0 }
 0x128   : > { %v2818_v40 = vpop.f32.mrb[0].mxu1  ;;  %v2707_v42 = vpop.f32.mrb[1].mxu0 }
 0x129   : > { %v2708_v43 = vadd.f32 %v2707_v42, %v2706_v39  ;;  %v2819_v44 = vpop.f32.mrb[1].mxu1  ;;  %v2709_v45 = vpop.f32.mrb[2].mxu0 }
 0x12a   : > { %v2820_v46 = vadd.f32 %v2819_v44, %v2818_v40  ;;  %v2821_v47 = vpop.f32.mrb[2].mxu1  ;;  %v2710_v48 = vpop.f32.mrb[3].mxu0 }
 0x12b   : > { %v1576_v50 = vadd.f32 %v2708_v43, %v3578_v41  ;;  %v2711_v51 = vadd.f32 %v2710_v48, %v2709_v45  ;;  %v2822_v52 = vpop.f32.mrb[3].mxu1 }
 0x12c   : > { %v2823_v53 = vadd.f32 %v2822_v52, %v2821_v47 }
 0x12d   : > { %v1737_v54 = vadd.f32 %v2820_v46, %v1576_v50  ;;  %v1579_v55 = vadd.f32 %v2711_v51, %v3578_v41 }
 0x12f   : > { %v1895_v56 = vmul.f32 0.2, %v1737_v54  ;;  %v1740_v57 = vadd.f32 %v2823_v53, %v1579_v55  ;;  %v2712_v58 = vpop.f32.mrb[4].mxu0  ;;  %vm1863_vm2 = vcmp.ge.f32.partialorder %v1737_v54, 0.0 }
 0x130   : > { %v2824_v59 = vpop.f32.mrb[4].mxu1  ;;  %v2713_v60 = vpop.f32.mrb[5].mxu0 }
 0x131   : > { %vm1864_vm3 = vcmp.ge.f32.partialorder %v1740_v57, 0.0  ;;  %v1896_v62 = vmul.f32 0.2, %v1740_v57  ;;  %v2714_v63 = vadd.f32 %v2713_v60, %v2712_v58  ;;  %v2825_v0 = vpop.f32.mrb[5].mxu1  ;;  %v2715_v1 = vpop.f32.mrb[6].mxu0  ;;  %v1927_v61 = vsel %vm1863_vm2, %v1737_v54, %v1895_v56 }
 0x132   : > { %v2826_v2 = vadd.f32 %v2825_v0, %v2824_v59  ;;  %v2827_v3 = vpop.f32.mrb[6].mxu1  ;;  %v2716_v49 = vpop.f32.mrb[7].mxu0 }
 0x133   : > { %v1928_v4 = vsel %vm1864_vm3, %v1740_v57, %v1896_v62  ;;  %v1584_v5 = vadd.f32 %v2714_v63, %v3578_v41  ;;  %v2717_v6 = vadd.f32 %v2716_v49, %v2715_v1  ;;  %v2828_v7 = vpop.f32.mrb[7].mxu1 }
 0x134   : > { %v2568_v8 = vpack.c.bf16 %v1928_v4, %v1927_v61  ;;  %v2829_v9 = vadd.f32 %v2828_v7, %v2827_v3 }
 0x135   : > { %v1745_v10 = vadd.f32 %v2826_v2, %v1584_v5  ;;  %v1587_v11 = vadd.f32 %v2717_v6, %v3578_v41 }
 0x136   : > { %2569 = vst [vmem:[%s3586_s10] sm:$0xff] %v2568_v8  }
 0x137   : > { %v1897_v12 = vmul.f32 0.2, %v1745_v10  ;;  %v1748_v13 = vadd.f32 %v2829_v9, %v1587_v11  ;;  %v2718_v14 = vpop.f32.mrb[8].mxu0  ;;  %vm1865_vm4 = vcmp.ge.f32.partialorder %v1745_v10, 0.0 }
 0x138   : > { %v2830_v15 = vpop.f32.mrb[8].mxu1  ;;  %v2719_v16 = vpop.f32.mrb[9].mxu0 }
 0x139   : > { %vm1866_vm5 = vcmp.ge.f32.partialorder %v1748_v13, 0.0  ;;  %v1898_v17 = vmul.f32 0.2, %v1748_v13  ;;  %v2720_v18 = vadd.f32 %v2719_v16, %v2718_v14  ;;  %v2831_v19 = vpop.f32.mrb[9].mxu1  ;;  %v2721_v20 = vpop.f32.mrb[10].mxu0  ;;  %v1929_v24 = vsel %vm1865_vm4, %v1745_v10, %v1897_v12 }
 0x13a   : > { %v2832_v21 = vadd.f32 %v2831_v19, %v2830_v15  ;;  %v2833_v22 = vpop.f32.mrb[10].mxu1  ;;  %v2722_v23 = vpop.f32.mrb[11].mxu0 }
 0x13b   : > { %v1930_v25 = vsel %vm1866_vm5, %v1748_v13, %v1898_v17  ;;  %v1592_v26 = vadd.f32 %v2720_v18, %v3578_v41  ;;  %v2723_v27 = vadd.f32 %v2722_v23, %v2721_v20  ;;  %v2834_v28 = vpop.f32.mrb[11].mxu1 }
 0x13c   : > { %v2573_v29 = vpack.c.bf16 %v1930_v25, %v1929_v24  ;;  %v2835_v30 = vadd.f32 %v2834_v28, %v2833_v22 }
 0x13d   : > { %v1753_v31 = vadd.f32 %v2832_v21, %v1592_v26  ;;  %v1595_v32 = vadd.f32 %v2723_v27, %v3578_v41 }
 0x13e   : > { %2675 = vst [vmem:[%s3586_s10 + $0x8] sm:$0xff] %v2573_v29  }
 0x13f   : > { %v1899_v33 = vmul.f32 0.2, %v1753_v31  ;;  %v1756_v34 = vadd.f32 %v2835_v30, %v1595_v32  ;;  %v2724_v35 = vpop.f32.mrb[12].mxu0  ;;  %vm1867_vm6 = vcmp.ge.f32.partialorder %v1753_v31, 0.0 }
 0x140   : > { %v2836_v36 = vpop.f32.mrb[12].mxu1  ;;  %v2725_v37 = vpop.f32.mrb[13].mxu0 }
 0x141   : > { %vm1868_vm7 = vcmp.ge.f32.partialorder %v1756_v34, 0.0  ;;  %v1900_v38 = vmul.f32 0.2, %v1756_v34  ;;  %v2726_v39 = vadd.f32 %v2725_v37, %v2724_v35  ;;  %v2837_v40 = vpop.f32.mrb[13].mxu1  ;;  %v2727_v42 = vpop.f32.mrb[14].mxu0  ;;  %v1931_v46 = vsel %vm1867_vm6, %v1753_v31, %v1899_v33 }
 0x142   : > { %v2838_v43 = vadd.f32 %v2837_v40, %v2836_v36  ;;  %v2839_v44 = vpop.f32.mrb[14].mxu1  ;;  %v2728_v45 = vpop.f32.mrb[15].mxu0 }
 0x143   : > { %v1932_v47 = vsel %vm1868_vm7, %v1756_v34, %v1900_v38  ;;  %v1600_v48 = vadd.f32 %v2726_v39, %v3578_v41  ;;  %v2729_v50 = vadd.f32 %v2728_v45, %v2727_v42  ;;  %v2840_v51 = vpop.f32.mrb[15].mxu1 }
 0x144   : > { %v2578_v52 = vpack.c.bf16 %v1932_v47, %v1931_v46  ;;  %v2841_v53 = vadd.f32 %v2840_v51, %v2839_v44 }
 0x145   : > { %v1761_v54 = vadd.f32 %v2838_v43, %v1600_v48  ;;  %v1603_v55 = vadd.f32 %v2729_v50, %v3578_v41 }
 0x146   : > { %2676 = vst [vmem:[%s3586_s10 + $0x10] sm:$0xff] %v2578_v52  }
 0x147   : > { %v1901_v56 = vmul.f32 0.2, %v1761_v54  ;;  %v1764_v57 = vadd.f32 %v2841_v53, %v1603_v55  ;;  %v2730_v58 = vpop.f32.mrb[16].mxu0  ;;  %vm1869_vm8 = vcmp.ge.f32.partialorder %v1761_v54, 0.0 }
 0x148   : > { %v2842_v59 = vpop.f32.mrb[16].mxu1  ;;  %v2731_v60 = vpop.f32.mrb[17].mxu0 }
 0x149   : > { %vm1870_vm9 = vcmp.ge.f32.partialorder %v1764_v57, 0.0  ;;  %v1902_v62 = vmul.f32 0.2, %v1764_v57  ;;  %v2732_v63 = vadd.f32 %v2731_v60, %v2730_v58  ;;  %v2843_v0 = vpop.f32.mrb[17].mxu1  ;;  %v2733_v1 = vpop.f32.mrb[18].mxu0  ;;  %v1933_v61 = vsel %vm1869_vm8, %v1761_v54, %v1901_v56 }
 0x14a   : > { %v2844_v2 = vadd.f32 %v2843_v0, %v2842_v59  ;;  %v2845_v3 = vpop.f32.mrb[18].mxu1  ;;  %v2734_v49 = vpop.f32.mrb[19].mxu0 }
 0x14b   : > { %v1934_v4 = vsel %vm1870_vm9, %v1764_v57, %v1902_v62  ;;  %v1608_v5 = vadd.f32 %v2732_v63, %v3578_v41  ;;  %v2735_v6 = vadd.f32 %v2734_v49, %v2733_v1  ;;  %v2846_v7 = vpop.f32.mrb[19].mxu1 }
 0x14c   : > { %v2583_v8 = vpack.c.bf16 %v1934_v4, %v1933_v61  ;;  %v2847_v9 = vadd.f32 %v2846_v7, %v2845_v3 }
 0x14d   : > { %v1769_v10 = vadd.f32 %v2844_v2, %v1608_v5  ;;  %v1611_v11 = vadd.f32 %v2735_v6, %v3578_v41 }
 0x14e   : > { %2677 = vst [vmem:[%s3586_s10 + $0x18] sm:$0xff] %v2583_v8  }
 0x14f   : > { %v1903_v12 = vmul.f32 0.2, %v1769_v10  ;;  %v1772_v13 = vadd.f32 %v2847_v9, %v1611_v11  ;;  %v2736_v14 = vpop.f32.mrb[20].mxu0  ;;  %vm1871_vm10 = vcmp.ge.f32.partialorder %v1769_v10, 0.0 }
 0x150   : > { %v2848_v15 = vpop.f32.mrb[20].mxu1  ;;  %v2737_v16 = vpop.f32.mrb[21].mxu0 }
 0x151   : > { %vm1872_vm11 = vcmp.ge.f32.partialorder %v1772_v13, 0.0  ;;  %v1904_v17 = vmul.f32 0.2, %v1772_v13  ;;  %v2738_v18 = vadd.f32 %v2737_v16, %v2736_v14  ;;  %v2849_v19 = vpop.f32.mrb[21].mxu1  ;;  %v2739_v20 = vpop.f32.mrb[22].mxu0  ;;  %v1935_v24 = vsel %vm1871_vm10, %v1769_v10, %v1903_v12 }
 0x152   : > { %v2850_v21 = vadd.f32 %v2849_v19, %v2848_v15  ;;  %v2851_v22 = vpop.f32.mrb[22].mxu1  ;;  %v2740_v23 = vpop.f32.mrb[23].mxu0 }
 0x153   : > { %v1936_v25 = vsel %vm1872_vm11, %v1772_v13, %v1904_v17  ;;  %v1616_v26 = vadd.f32 %v2738_v18, %v3578_v41  ;;  %v2741_v27 = vadd.f32 %v2740_v23, %v2739_v20  ;;  %v2852_v28 = vpop.f32.mrb[23].mxu1 }
 0x154   : > { %v2588_v29 = vpack.c.bf16 %v1936_v25, %v1935_v24  ;;  %v2853_v30 = vadd.f32 %v2852_v28, %v2851_v22 }
 0x155   : > { %v1777_v31 = vadd.f32 %v2850_v21, %v1616_v26  ;;  %v1619_v32 = vadd.f32 %v2741_v27, %v3578_v41 }
 0x156   : > { %2678 = vst [vmem:[%s3586_s10 + $0x20] sm:$0xff] %v2588_v29  }
 0x157   : > { %v1905_v33 = vmul.f32 0.2, %v1777_v31  ;;  %v1780_v34 = vadd.f32 %v2853_v30, %v1619_v32  ;;  %v2742_v35 = vpop.f32.mrb[24].mxu0  ;;  %vm1873_vm12 = vcmp.ge.f32.partialorder %v1777_v31, 0.0 }
 0x158   : > { %v2854_v36 = vpop.f32.mrb[24].mxu1  ;;  %v2743_v37 = vpop.f32.mrb[25].mxu0 }
 0x159   : > { %vm1874_vm13 = vcmp.ge.f32.partialorder %v1780_v34, 0.0  ;;  %v1906_v38 = vmul.f32 0.2, %v1780_v34  ;;  %v2744_v39 = vadd.f32 %v2743_v37, %v2742_v35  ;;  %v2855_v40 = vpop.f32.mrb[25].mxu1  ;;  %v2745_v42 = vpop.f32.mrb[26].mxu0  ;;  %v1937_v46 = vsel %vm1873_vm12, %v1777_v31, %v1905_v33 }
 0x15a   : > { %v2856_v43 = vadd.f32 %v2855_v40, %v2854_v36  ;;  %v2857_v44 = vpop.f32.mrb[26].mxu1  ;;  %v2746_v45 = vpop.f32.mrb[27].mxu0 }
 0x15b   : > { %v1938_v47 = vsel %vm1874_vm13, %v1780_v34, %v1906_v38  ;;  %v1624_v48 = vadd.f32 %v2744_v39, %v3578_v41  ;;  %v2747_v50 = vadd.f32 %v2746_v45, %v2745_v42  ;;  %v2858_v51 = vpop.f32.mrb[27].mxu1 }
 0x15c   : > { %v2593_v52 = vpack.c.bf16 %v1938_v47, %v1937_v46  ;;  %v2859_v53 = vadd.f32 %v2858_v51, %v2857_v44 }
 0x15d   : > { %v1785_v54 = vadd.f32 %v2856_v43, %v1624_v48  ;;  %v1627_v55 = vadd.f32 %v2747_v50, %v3578_v41 }
 0x15e   : > { %2679 = vst [vmem:[%s3586_s10 + $0x28] sm:$0xff] %v2593_v52  }
 0x15f   : > { %v1907_v56 = vmul.f32 0.2, %v1785_v54  ;;  %v1788_v57 = vadd.f32 %v2859_v53, %v1627_v55  ;;  %v2748_v58 = vpop.f32.mrb[28].mxu0  ;;  %vm1875_vm14 = vcmp.ge.f32.partialorder %v1785_v54, 0.0 }
 0x160   : > { %v2860_v59 = vpop.f32.mrb[28].mxu1  ;;  %v2749_v60 = vpop.f32.mrb[29].mxu0 }
 0x161   : > { %vm1876_vm15 = vcmp.ge.f32.partialorder %v1788_v57, 0.0  ;;  %v1908_v62 = vmul.f32 0.2, %v1788_v57  ;;  %v2750_v63 = vadd.f32 %v2749_v60, %v2748_v58  ;;  %v2861_v0 = vpop.f32.mrb[29].mxu1  ;;  %v2751_v1 = vpop.f32.mrb[30].mxu0  ;;  %v1939_v61 = vsel %vm1875_vm14, %v1785_v54, %v1907_v56 }
 0x162   : > { %v2862_v2 = vadd.f32 %v2861_v0, %v2860_v59  ;;  %v2863_v3 = vpop.f32.mrb[30].mxu1  ;;  %v2752_v49 = vpop.f32.mrb[31].mxu0 }
 0x163   : > { %v1940_v4 = vsel %vm1876_vm15, %v1788_v57, %v1908_v62  ;;  %v1632_v5 = vadd.f32 %v2750_v63, %v3578_v41  ;;  %v2753_v6 = vadd.f32 %v2752_v49, %v2751_v1  ;;  %v2864_v7 = vpop.f32.mrb[31].mxu1 }
 0x164   : > { %v2598_v8 = vpack.c.bf16 %v1940_v4, %v1939_v61  ;;  %v2865_v9 = vadd.f32 %v2864_v7, %v2863_v3 }
 0x165   : > { %v1793_v10 = vadd.f32 %v2862_v2, %v1632_v5  ;;  %v1635_v11 = vadd.f32 %v2753_v6, %v3578_v41 }
 0x166   : > { %2680 = vst [vmem:[%s3586_s10 + $0x30] sm:$0xff] %v2598_v8  }
 0x167   : > { %v1909_v12 = vmul.f32 0.2, %v1793_v10  ;;  %v1796_v13 = vadd.f32 %v2865_v9, %v1635_v11  ;;  %v2754_v14 = vpop.f32.mrb[32].mxu0  ;;  %vm1877_vm0 = vcmp.ge.f32.partialorder %v1793_v10, 0.0 }
 0x168   : > { %v2866_v15 = vpop.f32.mrb[32].mxu1  ;;  %v2755_v16 = vpop.f32.mrb[33].mxu0 }
 0x169   : > { %vm1878_vm1 = vcmp.ge.f32.partialorder %v1796_v13, 0.0  ;;  %v1910_v17 = vmul.f32 0.2, %v1796_v13  ;;  %v2756_v18 = vadd.f32 %v2755_v16, %v2754_v14  ;;  %v2867_v19 = vpop.f32.mrb[33].mxu1  ;;  %v2757_v20 = vpop.f32.mrb[34].mxu0  ;;  %v1941_v24 = vsel %vm1877_vm0, %v1793_v10, %v1909_v12 }
 0x16a   : > { %v2868_v21 = vadd.f32 %v2867_v19, %v2866_v15  ;;  %v2869_v22 = vpop.f32.mrb[34].mxu1  ;;  %v2758_v23 = vpop.f32.mrb[35].mxu0 }
 0x16b   : > { %v1942_v25 = vsel %vm1878_vm1, %v1796_v13, %v1910_v17  ;;  %v1640_v26 = vadd.f32 %v2756_v18, %v3578_v41  ;;  %v2759_v27 = vadd.f32 %v2758_v23, %v2757_v20  ;;  %v2870_v28 = vpop.f32.mrb[35].mxu1 }
 0x16c   : > { %v2603_v29 = vpack.c.bf16 %v1942_v25, %v1941_v24  ;;  %v2871_v30 = vadd.f32 %v2870_v28, %v2869_v22 }
 0x16d   : > { %v1801_v31 = vadd.f32 %v2868_v21, %v1640_v26  ;;  %v1643_v32 = vadd.f32 %v2759_v27, %v3578_v41 }
 0x16e   : > { %2681 = vst [vmem:[%s3586_s10 + $0x38] sm:$0xff] %v2603_v29  }
 0x16f   : > { %v1911_v33 = vmul.f32 0.2, %v1801_v31  ;;  %v1804_v34 = vadd.f32 %v2871_v30, %v1643_v32  ;;  %v2760_v35 = vpop.f32.mrb[36].mxu0  ;;  %vm1879_vm2 = vcmp.ge.f32.partialorder %v1801_v31, 0.0 }
 0x170   : > { %v2872_v36 = vpop.f32.mrb[36].mxu1  ;;  %v2761_v37 = vpop.f32.mrb[37].mxu0 }
 0x171   : > { %vm1880_vm3 = vcmp.ge.f32.partialorder %v1804_v34, 0.0  ;;  %v1912_v38 = vmul.f32 0.2, %v1804_v34  ;;  %v2762_v39 = vadd.f32 %v2761_v37, %v2760_v35  ;;  %v2873_v40 = vpop.f32.mrb[37].mxu1  ;;  %v2763_v42 = vpop.f32.mrb[38].mxu0  ;;  %v1943_v46 = vsel %vm1879_vm2, %v1801_v31, %v1911_v33 }
 0x172   : > { %v2874_v43 = vadd.f32 %v2873_v40, %v2872_v36  ;;  %v2875_v44 = vpop.f32.mrb[38].mxu1  ;;  %v2764_v45 = vpop.f32.mrb[39].mxu0 }
 0x173   : > { %v1944_v47 = vsel %vm1880_vm3, %v1804_v34, %v1912_v38  ;;  %v1648_v48 = vadd.f32 %v2762_v39, %v3578_v41  ;;  %v2765_v50 = vadd.f32 %v2764_v45, %v2763_v42  ;;  %v2876_v51 = vpop.f32.mrb[39].mxu1 }
 0x174   : > { %v2608_v52 = vpack.c.bf16 %v1944_v47, %v1943_v46  ;;  %v2877_v53 = vadd.f32 %v2876_v51, %v2875_v44 }
 0x175   : > { %v1809_v54 = vadd.f32 %v2874_v43, %v1648_v48  ;;  %v1651_v55 = vadd.f32 %v2765_v50, %v3578_v41 }
 0x176   : > { %2682 = vst [vmem:[%s3586_s10 + $0x40] sm:$0xff] %v2608_v52  }
 0x177   : > { %v1913_v56 = vmul.f32 0.2, %v1809_v54  ;;  %v1812_v57 = vadd.f32 %v2877_v53, %v1651_v55  ;;  %v2766_v58 = vpop.f32.mrb[40].mxu0  ;;  %vm1881_vm4 = vcmp.ge.f32.partialorder %v1809_v54, 0.0 }
 0x178   : > { %v2878_v59 = vpop.f32.mrb[40].mxu1  ;;  %v2767_v60 = vpop.f32.mrb[41].mxu0 }
 0x179   : > { %vm1882_vm5 = vcmp.ge.f32.partialorder %v1812_v57, 0.0  ;;  %v1914_v62 = vmul.f32 0.2, %v1812_v57  ;;  %v2768_v63 = vadd.f32 %v2767_v60, %v2766_v58  ;;  %v2879_v0 = vpop.f32.mrb[41].mxu1  ;;  %v2769_v1 = vpop.f32.mrb[42].mxu0  ;;  %v1945_v61 = vsel %vm1881_vm4, %v1809_v54, %v1913_v56 }
 0x17a   : > { %v2880_v2 = vadd.f32 %v2879_v0, %v2878_v59  ;;  %v2881_v3 = vpop.f32.mrb[42].mxu1  ;;  %v2770_v49 = vpop.f32.mrb[43].mxu0 }
 0x17b   : > { %v1946_v4 = vsel %vm1882_vm5, %v1812_v57, %v1914_v62  ;;  %v1656_v5 = vadd.f32 %v2768_v63, %v3578_v41  ;;  %v2771_v6 = vadd.f32 %v2770_v49, %v2769_v1  ;;  %v2882_v7 = vpop.f32.mrb[43].mxu1 }
 0x17c   : > { %v2613_v8 = vpack.c.bf16 %v1946_v4, %v1945_v61  ;;  %v2883_v9 = vadd.f32 %v2882_v7, %v2881_v3 }
 0x17d   : > { %v1817_v10 = vadd.f32 %v2880_v2, %v1656_v5  ;;  %v1659_v11 = vadd.f32 %v2771_v6, %v3578_v41 }
 0x17e   : > { %2683 = vst [vmem:[%s3586_s10 + $0x48] sm:$0xff] %v2613_v8  }
 0x17f   : > { %v1915_v12 = vmul.f32 0.2, %v1817_v10  ;;  %v1820_v13 = vadd.f32 %v2883_v9, %v1659_v11  ;;  %v2772_v14 = vpop.f32.mrb[44].mxu0  ;;  %vm1883_vm6 = vcmp.ge.f32.partialorder %v1817_v10, 0.0 }
 0x180   : > { %v2884_v15 = vpop.f32.mrb[44].mxu1  ;;  %v2773_v16 = vpop.f32.mrb[45].mxu0 }
 0x181   : > { %vm1884_vm7 = vcmp.ge.f32.partialorder %v1820_v13, 0.0  ;;  %v1916_v17 = vmul.f32 0.2, %v1820_v13  ;;  %v2774_v18 = vadd.f32 %v2773_v16, %v2772_v14  ;;  %v2885_v19 = vpop.f32.mrb[45].mxu1  ;;  %v2775_v20 = vpop.f32.mrb[46].mxu0  ;;  %v1947_v24 = vsel %vm1883_vm6, %v1817_v10, %v1915_v12 }
 0x182   : > { %v2886_v21 = vadd.f32 %v2885_v19, %v2884_v15  ;;  %v2887_v22 = vpop.f32.mrb[46].mxu1  ;;  %v2776_v23 = vpop.f32.mrb[47].mxu0 }
 0x183   : > { %v1948_v25 = vsel %vm1884_vm7, %v1820_v13, %v1916_v17  ;;  %v1664_v26 = vadd.f32 %v2774_v18, %v3578_v41  ;;  %v2777_v27 = vadd.f32 %v2776_v23, %v2775_v20  ;;  %v2888_v28 = vpop.f32.mrb[47].mxu1 }
 0x184   : > { %v2618_v29 = vpack.c.bf16 %v1948_v25, %v1947_v24  ;;  %v2889_v30 = vadd.f32 %v2888_v28, %v2887_v22 }
 0x185   : > { %v1825_v31 = vadd.f32 %v2886_v21, %v1664_v26  ;;  %v1667_v32 = vadd.f32 %v2777_v27, %v3578_v41 }
 0x186   : > { %2684 = vst [vmem:[%s3586_s10 + $0x50] sm:$0xff] %v2618_v29  }
 0x187   : > { %v1917_v33 = vmul.f32 0.2, %v1825_v31  ;;  %v1828_v34 = vadd.f32 %v2889_v30, %v1667_v32  ;;  %v2778_v35 = vpop.f32.mrb[48].mxu0  ;;  %vm1885_vm8 = vcmp.ge.f32.partialorder %v1825_v31, 0.0 }
 0x188   : > { %v2890_v36 = vpop.f32.mrb[48].mxu1  ;;  %v2779_v37 = vpop.f32.mrb[49].mxu0 }
 0x189   : > { %vm1886_vm9 = vcmp.ge.f32.partialorder %v1828_v34, 0.0  ;;  %v1918_v38 = vmul.f32 0.2, %v1828_v34  ;;  %v2780_v39 = vadd.f32 %v2779_v37, %v2778_v35  ;;  %v2891_v40 = vpop.f32.mrb[49].mxu1  ;;  %v2781_v42 = vpop.f32.mrb[50].mxu0  ;;  %v1949_v46 = vsel %vm1885_vm8, %v1825_v31, %v1917_v33 }
 0x18a   : > { %v2892_v43 = vadd.f32 %v2891_v40, %v2890_v36  ;;  %v2893_v44 = vpop.f32.mrb[50].mxu1  ;;  %v2782_v45 = vpop.f32.mrb[51].mxu0 }
 0x18b   : > { %v1950_v47 = vsel %vm1886_vm9, %v1828_v34, %v1918_v38  ;;  %v1672_v48 = vadd.f32 %v2780_v39, %v3578_v41  ;;  %v2783_v50 = vadd.f32 %v2782_v45, %v2781_v42  ;;  %v2894_v51 = vpop.f32.mrb[51].mxu1 }
 0x18c   : > { %v2623_v52 = vpack.c.bf16 %v1950_v47, %v1949_v46  ;;  %v2895_v53 = vadd.f32 %v2894_v51, %v2893_v44 }
 0x18d   : > { %v1833_v54 = vadd.f32 %v2892_v43, %v1672_v48  ;;  %v1675_v55 = vadd.f32 %v2783_v50, %v3578_v41 }
 0x18e   : > { %2685 = vst [vmem:[%s3586_s10 + $0x58] sm:$0xff] %v2623_v52  }
 0x18f   : > { %v1919_v56 = vmul.f32 0.2, %v1833_v54  ;;  %v1836_v57 = vadd.f32 %v2895_v53, %v1675_v55  ;;  %v2784_v58 = vpop.f32.mrb[52].mxu0  ;;  %vm1887_vm10 = vcmp.ge.f32.partialorder %v1833_v54, 0.0 }
 0x190   : > { %v2896_v59 = vpop.f32.mrb[52].mxu1  ;;  %v2785_v60 = vpop.f32.mrb[53].mxu0 }
 0x191   : > { %vm1888_vm11 = vcmp.ge.f32.partialorder %v1836_v57, 0.0  ;;  %v1920_v62 = vmul.f32 0.2, %v1836_v57  ;;  %v2786_v63 = vadd.f32 %v2785_v60, %v2784_v58  ;;  %v2897_v0 = vpop.f32.mrb[53].mxu1  ;;  %v2787_v1 = vpop.f32.mrb[54].mxu0  ;;  %v1951_v61 = vsel %vm1887_vm10, %v1833_v54, %v1919_v56 }
 0x192   : > { %v2898_v2 = vadd.f32 %v2897_v0, %v2896_v59  ;;  %v2899_v3 = vpop.f32.mrb[54].mxu1  ;;  %v2788_v49 = vpop.f32.mrb[55].mxu0 }
 0x193   : > { %v1952_v4 = vsel %vm1888_vm11, %v1836_v57, %v1920_v62  ;;  %v1680_v5 = vadd.f32 %v2786_v63, %v3578_v41  ;;  %v2789_v6 = vadd.f32 %v2788_v49, %v2787_v1  ;;  %v2900_v7 = vpop.f32.mrb[55].mxu1 }
 0x194   : > { %v2628_v8 = vpack.c.bf16 %v1952_v4, %v1951_v61  ;;  %v2901_v9 = vadd.f32 %v2900_v7, %v2899_v3 }
 0x195   : > { %v1841_v10 = vadd.f32 %v2898_v2, %v1680_v5  ;;  %v1683_v11 = vadd.f32 %v2789_v6, %v3578_v41 }
 0x196   : > { %2686 = vst [vmem:[%s3586_s10 + $0x60] sm:$0xff] %v2628_v8  }
 0x197   : > { %v1921_v12 = vmul.f32 0.2, %v1841_v10  ;;  %v1844_v13 = vadd.f32 %v2901_v9, %v1683_v11  ;;  %v2790_v14 = vpop.f32.mrb[56].mxu0  ;;  %vm1889_vm12 = vcmp.ge.f32.partialorder %v1841_v10, 0.0 }
 0x198   : > { %v2902_v15 = vpop.f32.mrb[56].mxu1  ;;  %v2791_v16 = vpop.f32.mrb[57].mxu0 }
 0x199   : > { %vm1890_vm13 = vcmp.ge.f32.partialorder %v1844_v13, 0.0  ;;  %v1922_v17 = vmul.f32 0.2, %v1844_v13  ;;  %v2792_v18 = vadd.f32 %v2791_v16, %v2790_v14  ;;  %v2903_v19 = vpop.f32.mrb[57].mxu1  ;;  %v2793_v20 = vpop.f32.mrb[58].mxu0  ;;  %v1953_v24 = vsel %vm1889_vm12, %v1841_v10, %v1921_v12 }
 0x19a   : > { %v2904_v21 = vadd.f32 %v2903_v19, %v2902_v15  ;;  %v2905_v22 = vpop.f32.mrb[58].mxu1  ;;  %v2794_v23 = vpop.f32.mrb[59].mxu0 }
 0x19b   : > { %v1954_v25 = vsel %vm1890_vm13, %v1844_v13, %v1922_v17  ;;  %v1688_v26 = vadd.f32 %v2792_v18, %v3578_v41  ;;  %v2795_v27 = vadd.f32 %v2794_v23, %v2793_v20  ;;  %v2906_v28 = vpop.f32.mrb[59].mxu1 }
 0x19c   : > { %v2633_v29 = vpack.c.bf16 %v1954_v25, %v1953_v24  ;;  %v2907_v30 = vadd.f32 %v2906_v28, %v2905_v22 }
 0x19d   : > { %v1849_v31 = vadd.f32 %v2904_v21, %v1688_v26  ;;  %v1691_v32 = vadd.f32 %v2795_v27, %v3578_v41 }
 0x19e   : > { %2687 = vst [vmem:[%s3586_s10 + $0x68] sm:$0xff] %v2633_v29  }
 0x19f   : > { %v1923_v33 = vmul.f32 0.2, %v1849_v31  ;;  %v1852_v34 = vadd.f32 %v2907_v30, %v1691_v32  ;;  %v2796_v35 = vpop.f32.mrb[60].mxu0  ;;  %vm1891_vm14 = vcmp.ge.f32.partialorder %v1849_v31, 0.0 }
 0x1a0   : > { %v2908_v36 = vpop.f32.mrb[60].mxu1  ;;  %v2797_v37 = vpop.f32.mrb[61].mxu0 }
 0x1a1   : > { %vm1892_vm15 = vcmp.ge.f32.partialorder %v1852_v34, 0.0  ;;  %v1924_v38 = vmul.f32 0.2, %v1852_v34  ;;  %v2798_v39 = vadd.f32 %v2797_v37, %v2796_v35  ;;  %v2909_v40 = vpop.f32.mrb[61].mxu1  ;;  %v2799_v42 = vpop.f32.mrb[62].mxu0  ;;  %v1955_v46 = vsel %vm1891_vm14, %v1849_v31, %v1923_v33 }
 0x1a2   : > { %v2910_v43 = vadd.f32 %v2909_v40, %v2908_v36  ;;  %v2911_v44 = vpop.f32.mrb[62].mxu1  ;;  %v2800_v45 = vpop.f32.mrb[63].mxu0 }
 0x1a3   : > { %v1956_v47 = vsel %vm1892_vm15, %v1852_v34, %v1924_v38  ;;  %v1696_v48 = vadd.f32 %v2798_v39, %v3578_v41  ;;  %v2801_v50 = vadd.f32 %v2800_v45, %v2799_v42  ;;  %v2912_v51 = vpop.f32.mrb[63].mxu1 }
 0x1a4   : > { %v2638_v52 = vpack.c.bf16 %v1956_v47, %v1955_v46  ;;  %v2913_v53 = vadd.f32 %v2912_v51, %v2911_v44 }
 0x1a5   : > { %v1857_v54 = vadd.f32 %v2910_v43, %v1696_v48  ;;  %v1699_v55 = vadd.f32 %v2801_v50, %v3578_v41 }
 0x1a6   : > { %2688 = vst [vmem:[%s3586_s10 + $0x70] sm:$0xff] %v2638_v52  }
 0x1a7   : > { %v1925_v56 = vmul.f32 0.2, %v1857_v54  ;;  %v1860_v57 = vadd.f32 %v2913_v53, %v1699_v55  ;;  %vm1893_vm0 = vcmp.ge.f32.partialorder %v1857_v54, 0.0 }
 0x1a9   : > { %vm1894_vm1 = vcmp.ge.f32.partialorder %v1860_v57, 0.0  ;;  %v1926_v58 = vmul.f32 0.2, %v1860_v57  ;;  %v1957_v59 = vsel %vm1893_vm0, %v1857_v54, %v1925_v56 }
 0x1ab   : > { %v1958_v60 = vsel %vm1894_vm1, %v1860_v57, %v1926_v58 }
 0x1ac   : > { %v2643_v62 = vpack.c.bf16 %v1958_v60, %v1957_v59 }
 0x1ae   : > { %2689 = vst [vmem:[%s3586_s10 + $0x78] sm:$0xff] %v2643_v62  }
 0x1af PF: > { %s13_s12 = sadd.s32 1, %s2962_s12  }
 0x1b0   : > { %p10_p4 = scmp.ge.s32.totalorder %s13_s12, 4  }
 0x1b2   :  { %12 = sbr.rel (!%p10_p4) target bundleno = 1 (0x1), region = 78 }

// kernel: nlayer_discriminator_forward.6
= control target key start
LH: loop header
LB: loop body
LE: loop exit
PB: predicated region body
PF: predicated region fallthrough
CT: control target
= control target key end

     0   :  { %s3629_s12 = smov 0   ;;  %s4500_s0 = inlined_call_operand.vmem [shape: bf16[2,9,9,512], index: 0, kind: input, shape index: {}]   ;;  %s4501_s1 = inlined_call_operand.vmem [shape: bf16[2048,128], index: 1, kind: input, shape index: {}]   ;;  %s4502_s2 = inlined_call_operand.vmem [shape: f32[1,128], index: 2, kind: input, shape index: {}]   ;;  %s4503_s3 = inlined_call_operand.vmem [shape: bf16[2,64,128], index: 3, kind: output, shape index: {}]  }
   0x1 LB: > { %s2843_s13 = sadd.s32 4294967295, %s3607_s12   ;;  %p2847_p0 = scmp.ge.s32.totalorder %s3607_s12, 1  ;;  %s3607_s12 = sphi %s3629_s12, %s13_s12  }
   0x2   : > { %p137_p1 = scmp.lt.s32.totalorder %s3607_s12, 3 }
   0x4   : > { %p138_p2 = pnand %p2847_p0, %p137_p1 }
   0x5   : > { %v3473_v0 = vld [vmem:[%s4501_s1 + $0x40] sm:$0xff] (!%p138_p2)   ;;  %v3477_v4 = vld [vmem:[%s4501_s1 + $0x48] sm:$0xff] (!%p138_p2)   ;;  %v3481_v8 = vld [vmem:[%s4501_s1 + $0x50] sm:$0xff] (!%p138_p2)   ;;  %p161_p3 = scmp.lt.s32.totalorder (!%p138_p2), %s2843_s13, 1  ;;  %vm279_vm0 = vcmask (!%p138_p2), 1046528  }
   0x6   : > { %141 = sbr.rel (%p138_p2) target bundleno = 386 (0x182), region = 32  ;;  %v3474_v1 = vld [vmem:[%s4501_s1 + $0xc0] sm:$0xff] (!%p138_p2)   ;;  %3144 = vmatprep.subr.bf16.mxu0 (!%p138_p2), %v3473_v0  ;;  %v3478_v5 = vld [vmem:[%s4501_s1 + $0xc8] sm:$0xff] (!%p138_p2)   ;;  %v3482_v9 = vld [vmem:[%s4501_s1 + $0xd0] sm:$0xff] (!%p138_p2)  }
   0x7   : > { %v3475_v2 = vld [vmem:[%s4501_s1] sm:$0xff] (!%p138_p2)   ;;  %3184 = vmatprep.subr.bf16.mxu1 (!%p138_p2), %v3474_v1  ;;  %v3479_v6 = vld [vmem:[%s4501_s1 + $0x8] sm:$0xff] (!%p138_p2)   ;;  %v3483_v10 = vld [vmem:[%s4501_s1 + $0x10] sm:$0xff] (!%p138_p2)  }
   0x8   : > { %v3476_v3 = vld [vmem:[%s4501_s1 + $0x80] sm:$0xff] (!%p138_p2)   ;;  %3145 = vmatpush3.bf16.msra.mxu0 (!%p138_p2), %v3475_v2  ;;  %v3480_v7 = vld [vmem:[%s4501_s1 + $0x88] sm:$0xff] (!%p138_p2)   ;;  %v3484_v11 = vld [vmem:[%s4501_s1 + $0x90] sm:$0xff] (!%p138_p2)  }
   0x9   : > { %3185 = vmatpush3.bf16.msra.mxu1 (!%p138_p2), %v3476_v3  ;;  %3146 = vmatprep.subr.bf16.mxu0 (!%p138_p2), %v3477_v4  ;;  %v3485_v12 = vld [vmem:[%s4501_s1 + $0x58] sm:$0xff] (!%p138_p2)   ;;  %v3489_v16 = vld [vmem:[%s4501_s1 + $0x60] sm:$0xff] (!%p138_p2)   ;;  %v3493_v20 = vld [vmem:[%s4501_s1 + $0x68] sm:$0xff] (!%p138_p2)  }
   0xa   : > { %3186 = vmatprep.subr.bf16.mxu1 (!%p138_p2), %v3478_v5  ;;  %v3486_v13 = vld [vmem:[%s4501_s1 + $0xd8] sm:$0xff] (!%p138_p2)   ;;  %v3490_v17 = vld [vmem:[%s4501_s1 + $0xe0] sm:$0xff] (!%p138_p2)   ;;  %v3494_v21 = vld [vmem:[%s4501_s1 + $0xe8] sm:$0xff] (!%p138_p2)  }
   0xb   : > { %v3487_v14 = vld [vmem:[%s4501_s1 + $0x18] sm:$0xff] (!%p138_p2)   ;;  %v3491_v18 = vld [vmem:[%s4501_s1 + $0x20] sm:$0xff] (!%p138_p2)   ;;  %v3495_v22 = vld [vmem:[%s4501_s1 + $0x28] sm:$0xff] (!%p138_p2)  }
   0xc   : > { %3147 = vmatpush3.bf16.msra.mxu0 (!%p138_p2), %v3479_v6  ;;  %v3488_v15 = vld [vmem:[%s4501_s1 + $0x98] sm:$0xff] (!%p138_p2)   ;;  %v3492_v19 = vld [vmem:[%s4501_s1 + $0xa0] sm:$0xff] (!%p138_p2)   ;;  %v3496_v23 = vld [vmem:[%s4501_s1 + $0xa8] sm:$0xff] (!%p138_p2)  }
   0xd   : > { %3187 = vmatpush3.bf16.msra.mxu1 %v3480_v7  ;;  %3148 = vmatprep.subr.bf16.mxu0 %v3481_v8  ;;  %s4505_s13 = smov (!%p161_p3, %s2843_s13), 1  ;;  %v3497_v24 = vld [vmem:[%s4501_s1 + $0x70] sm:$0xff]   ;;  %v3501_v28 = vld [vmem:[%s4501_s1 + $0x78] sm:$0xff]   ;;  %v3505_v40 = vld [vmem:[%s4501_s1 + $0x140] sm:$0xff]  }
   0xe   : > { %3188 = vmatprep.subr.bf16.mxu1 %v3482_v9  ;;  %v3498_v25 = vld [vmem:[%s4501_s1 + $0xf0] sm:$0xff]   ;;  %s3464_s16 = smul.u32 288, %s4505_s13  ;;  %v3502_v29 = vld [vmem:[%s4501_s1 + $0xf8] sm:$0xff]   ;;  %v3506_v41 = vld [vmem:[%s4501_s1 + $0x1c0] sm:$0xff]   ;;  %s3080_s6 = sshll.u32 %s4505_s13, 5 }
   0xf   : > { %v3499_v26 = vld [vmem:[%s4501_s1 + $0x30] sm:$0xff]   ;;  %v3503_v30 = vld [vmem:[%s4501_s1 + $0x38] sm:$0xff]   ;;  %v3507_v42 = vld [vmem:[%s4501_s1 + $0x100] sm:$0xff]   ;;  %s4485_s9 = scalar_lea.vmem %s4503_s3, %s3080_s6 }
  0x10   : > { %3149 = vmatpush3.bf16.msra.mxu0 %v3483_v10  ;;  %v3500_v27 = vld [vmem:[%s4501_s1 + $0xb0] sm:$0xff]   ;;  %s3737_s27 = scalar_lea.vmem %s4500_s0, %s3464_s16  ;;  %v3504_v31 = vld [vmem:[%s4501_s1 + $0xb8] sm:$0xff]   ;;  %v3508_v43 = vld [vmem:[%s4501_s1 + $0x180] sm:$0xff]  }
  0x11   : > { %3189 = vmatpush3.bf16.msra.mxu1 %v3484_v11  ;;  %3150 = vmatprep.subr.bf16.mxu0 %v3485_v12  ;;  %v3746_v32 = vld [vmem:[%s3737_s27] sm:$0xff]  ;;  %v3752_v34 = vld [vmem:[%s3737_s27 + $0x8] sm:$0xff]  ;;  %v3513_v56 = vld [vmem:[%s4501_s1 + $0x150] sm:$0xff]  }
  0x12   : > { %3190 = vmatprep.subr.bf16.mxu1 %v3486_v13  ;;  %v3749_v33 = vld [vmem:[%s3737_s27 + $0x20] sm:$0xff]  ;;  %v3759_v37 = vld [vmem:[%s3737_s27 + $0x28] sm:$0xff]  ;;  %v3514_v57 = vld [vmem:[%s4501_s1 + $0x1d0] sm:$0xff]   ;;  %v263_v61 = vunpack.c.l.bf16 %v3746_v32  ;;  %v264_v62 = vunpack.c.h.bf16 %v3746_v32  ;;  %v265_v10 = vunpack.c.l.bf16 %v3752_v34  ;;  %v266_v11 = vunpack.c.h.bf16 %v3752_v34 }
  0x13   : > { %v3112_v35 = vcombine.low %v3746_v32, %v3749_v33  ;;  %v3113_v36 = vcombine.high %v3746_v32, %v3749_v33  ;;  %v3114_v38 = vcombine.low %v3752_v34, %v3759_v37  ;;  %v3115_v39 = vcombine.high %v3752_v34, %v3759_v37  ;;  %v3509_v44 = vld [vmem:[%s4501_s1 + $0x148] sm:$0xff]   ;;  %v3790_v48 = vld [vmem:[%s3737_s27 + $0x40] sm:$0xff]  ;;  %v3515_v58 = vld [vmem:[%s4501_s1 + $0x110] sm:$0xff]  }
  0x14   : > { %3151 = vmatpush3.bf16.msra.mxu0 %v3487_v14  ;;  %v3510_v45 = vld [vmem:[%s4501_s1 + $0x1c8] sm:$0xff]   ;;  %v3793_v49 = vld [vmem:[%s3737_s27 + $0x60] sm:$0xff]  ;;  %v3516_v59 = vld [vmem:[%s4501_s1 + $0x190] sm:$0xff]   ;;  %v304_v1 = vunpack.c.l.bf16 %v3749_v33  ;;  %v305_v4 = vunpack.c.h.bf16 %v3749_v33  ;;  %v3849_v8 = vrot.slane %v263_v61, 1  ;;  %v3851_v9 = vrot.slane %v264_v62, 1 }
  0x15   : > { %3191 = vmatpush3.bf16.msra.mxu1 %v3488_v15  ;;  %3152 = vmatprep.subr.bf16.mxu0 %v3489_v16  ;;  %v3511_v46 = vld [vmem:[%s4501_s1 + $0x108] sm:$0xff]   ;;  %v3121_v50 = vcombine.high %v3790_v48, %v3793_v49  ;;  %v3120_v53 = vcombine.low %v3790_v48, %v3793_v49  ;;  %v3517_v60 = vld [vmem:[%s4501_s1 + $0x158] sm:$0xff]   ;;  %v3837_v3 = vld [vmem:[%s3737_s27 + $0x80] sm:$0xff]  ;;  %v344_v33 = vunpack.c.l.bf16 %v3790_v48 }
  0x16   : > { %3192 = vmatprep.subr.bf16.mxu1 %v3490_v17  ;;  %2236 = vmatprep.mubr.bf16.mxu0 %v3113_v36  ;;  %v3512_v47 = vld [vmem:[%s4501_s1 + $0x188] sm:$0xff]   ;;  %v3518_v63 = vld [vmem:[%s4501_s1 + $0x1d8] sm:$0xff]   ;;  %v3841_v5 = vld [vmem:[%s3737_s27 + $0xa0] sm:$0xff]  ;;  %v384_v36 = vunpack.c.l.bf16 %v3793_v49 }
  0x17   : > { %2301 = vmatprep.mubr.bf16.mxu1 %v3115_v39  ;;  %v3798_v51 = vld [vmem:[%s3737_s27 + $0x48] sm:$0xff]  ;;  %v3519_v0 = vld [vmem:[%s4501_s1 + $0x118] sm:$0xff]   ;;  %v3129_v12 = vcombine.high %v3837_v3, %v3841_v5  ;;  %v3128_v14 = vcombine.low %v3837_v3, %v3841_v5  ;;  %v3521_v16 = vld [vmem:[%s4501_s1 + $0x160] sm:$0xff]   ;;  %v465_v61 = vunpack.c.h.bf16 %v3841_v5 }
  0x18   : > { %3153 = vmatpush3.bf16.msra.mxu0 %v3491_v18  ;;  %v3801_v52 = vld [vmem:[%s3737_s27 + $0x68] sm:$0xff]  ;;  %v3520_v2 = vld [vmem:[%s4501_s1 + $0x198] sm:$0xff]   ;;  %v3522_v17 = vld [vmem:[%s4501_s1 + $0x1e0] sm:$0xff]   ;;  %v3869_v18 = vrot.slane %v304_v1, 1  ;;  %v346_v39 = vunpack.c.l.bf16 %v3798_v51 }
  0x19   : > { %3193 = vmatpush3.bf16.msra.mxu1 %v3492_v19  ;;  %3154 = vmatprep.subr.bf16.mxu0 %v3493_v20  ;;  %v3123_v54 = vcombine.high %v3798_v51, %v3801_v52  ;;  %v3122_v55 = vcombine.low %v3798_v51, %v3801_v52  ;;  %v3844_v6 = vld [vmem:[%s3737_s27 + $0x88] sm:$0xff]  ;;  %v306_v19 = vunpack.c.l.bf16 %v3759_v37  ;;  %v3523_v20 = vld [vmem:[%s4501_s1 + $0x120] sm:$0xff]   ;;  %v3531_v62 = vld [vmem:[%s4501_s1 + $0x130] sm:$0xff]  }
  0x1a   : > { %3194 = vmatprep.subr.bf16.mxu1 %v3494_v21  ;;  %v3847_v7 = vld [vmem:[%s3737_s27 + $0xa8] sm:$0xff]  ;;  %v3875_v21 = vrot.slane %v305_v4, 1  ;;  %v3532_v1 = vld [vmem:[%s4501_s1 + $0x1b0] sm:$0xff]  }
  0x1b   : > { %v3131_v13 = vcombine.high %v3844_v6, %v3847_v7  ;;  %v3130_v15 = vcombine.low %v3844_v6, %v3847_v7  ;;  %v3895_v32 = vrot.slane %v306_v19, 1  ;;  %v3527_v34 = vld [vmem:[%s4501_s1 + $0x128] sm:$0xff]   ;;  %v467_v4 = vunpack.c.h.bf16 %v3847_v7  ;;  %v261_v19 = vld [vmem:[%s3737_s27 + $0x10] sm:$0x11] }
  0x1c   : > { %3155 = vmatpush3.bf16.msra.mxu0 %v3495_v22  ;;  %v307_v22 = vunpack.c.h.bf16 %v3759_v37  ;;  %v3528_v37 = vld [vmem:[%s4501_s1 + $0x1a8] sm:$0xff]  }
  0x1d   : > { %3195 = vmatpush3.bf16.msra.mxu1 %v3496_v23  ;;  %3156 = vmatprep.subr.bf16.mxu0 %v3497_v24  ;;  %v3524_v23 = vld [vmem:[%s4501_s1 + $0x1a0] sm:$0xff]   ;;  %v3881_v24 = vrot.slane %v265_v10, 1  ;;  %v3533_v10 = vld [vmem:[%s4501_s1 + $0x178] sm:$0xff]  }
  0x1e   : > { %3196 = vmatprep.subr.bf16.mxu1 %v3498_v25  ;;  %v345_v25 = vunpack.c.h.bf16 %v3790_v48 }
  0x20   : > { %3157 = vmatpush3.bf16.msra.mxu0 %v3499_v26  ;;  %v3525_v26 = vld [vmem:[%s4501_s1 + $0x168] sm:$0xff]  }
  0x21   : > { %3197 = vmatpush3.bf16.msra.mxu1 %v3500_v27  ;;  %3158 = vmatprep.subr.bf16.mxu0 %v3501_v28  ;;  %v3887_v27 = vrot.slane %v266_v11, 1  ;;  %v385_v28 = vunpack.c.h.bf16 %v3793_v49  ;;  %v3929_v49 = vld [vmem:[%s3737_s27 + $0xe8] sm:$0xff] }
  0x22   : > { %3198 = vmatprep.subr.bf16.mxu1 %v3502_v29  ;;  %v347_v29 = vunpack.c.h.bf16 %v3798_v51 }
  0x24   : > { %3159 = vmatpush3.bf16.msra.mxu0 %v3503_v30  ;;  %v387_v30 = vunpack.c.h.bf16 %v3801_v52 }
  0x25   : > { %3199 = vmatpush3.bf16.msra.mxu1 %v3504_v31  ;;  %3224 = vmatprep.subr.bf16.mxu0 %v3505_v40  ;;  %v3526_v31 = vld [vmem:[%s4501_s1 + $0x1e8] sm:$0xff]   ;;  %v3911_v40 = vld [vmem:[%s3737_s27 + $0xc0] sm:$0xff] }
  0x26   : > { %3264 = vmatprep.subr.bf16.mxu1 %v3506_v41  ;;  %v3914_v41 = vld [vmem:[%s3737_s27 + $0xe0] sm:$0xff] }
  0x27   : > { %2237 = vmatmul.mubr.bf16.vlgmr.msra.gmra.mrb[0].mxu0 %v3112_v35  ;;  %v3901_v35 = vrot.slane %v307_v22, 1  ;;  %v3985_v22 = vrot.slane %v467_v4, 1 }
  0x28   : > { %2302 = vmatmul.mubr.bf16.vlgmr.msra.gmra.mrb[0].mxu1 %v3114_v38  ;;  %3225 = vmatpush3.bf16.msra.mxu0 %v3507_v42  ;;  %v3907_v38 = vrot.slane %v345_v25, 1  ;;  %v3917_v42 = vld [vmem:[%s3737_s27 + $0xc8] sm:$0xff]  ;;  %v466_v25 = vunpack.c.l.bf16 %v3847_v7 }
  0x29   : > { %3265 = vmatpush3.bf16.msra.mxu1 %v3508_v43  ;;  %3226 = vmatprep.subr.bf16.mxu0 %v3509_v44  ;;  %v3919_v43 = vrot.slane %v385_v28, 1  ;;  %v3921_v44 = vrot.slane %v347_v29, 1  ;;  %v267_v28 = vunpack.c.l.bf16 %v261_v19  ;;  %v268_v29 = vunpack.c.h.bf16 %v261_v19 }
  0x2a   : > { %3266 = vmatprep.subr.bf16.mxu1 %v3510_v45  ;;  %2244 = vmatprep.mubr.bf16.mxu0 %v3121_v50  ;;  %v3923_v45 = vrot.slane %v387_v30, 1  ;;  %v3136_v50 = vcombine.low %v3911_v40, %v3914_v41 }
  0x2b   : > { %2309 = vmatprep.mubr.bf16.mxu1 %v3123_v54  ;;  %v425_v54 = vunpack.c.h.bf16 %v3837_v3  ;;  %v284_v7 = vrot.slane %v268_v29, 1  ;;  %v2871_v29 = vld [vmem:[%s3737_s27 + $0x50] sm:$0x11] }
  0x2c   : > { %3227 = vmatpush3.bf16.msra.mxu0 %v3511_v46  ;;  %v386_v46 = vunpack.c.l.bf16 %v3801_v52  ;;  %v3138_v52 = vcombine.low %v3917_v42, %v3929_v49 }
  0x2d   : > { %3267 = vmatpush3.bf16.msra.mxu1 %v3512_v47  ;;  %3228 = vmatprep.subr.bf16.mxu0 %v3513_v56  ;;  %v3137_v47 = vcombine.high %v3911_v40, %v3914_v41  ;;  %v3529_v56 = vld [vmem:[%s4501_s1 + $0x170] sm:$0xff]  }
  0x2e   : > { %3268 = vmatprep.subr.bf16.mxu1 %v3514_v57  ;;  %v3943_v57 = vrot.slane %v384_v36, 1 }
  0x2f   : > { %2245 = vmatmul.mubr.bf16.gmra.mrb[4].mxu0 %v3120_v53  ;;  %v3933_v53 = vrot.slane %v344_v33, 1  ;;  %v2868_v33 = vld [vmem:[%s3737_s27 + $0x38] sm:$0x11] }
  0x30   : > { %2310 = vmatmul.mubr.bf16.gmra.mrb[4].mxu1 %v3122_v55  ;;  %3229 = vmatpush3.bf16.msra.mxu0 %v3515_v58  ;;  %v3139_v55 = vcombine.high %v3917_v42, %v3929_v49  ;;  %v424_v58 = vunpack.c.l.bf16 %v3837_v3 }
  0x31   : > { %3269 = vmatpush3.bf16.msra.mxu1 %v3516_v59  ;;  %3230 = vmatprep.subr.bf16.mxu0 %v3517_v60  ;;  %v3530_v59 = vld [vmem:[%s4501_s1 + $0x1f0] sm:$0xff]   ;;  %v3949_v60 = vrot.slane %v346_v39, 1  ;;  %v311_v39 = vunpack.c.h.bf16 %v2868_v33 }
  0x32   : > { %3270 = vmatprep.subr.bf16.mxu1 %v3518_v63  ;;  %2252 = vmatprep.mubr.bf16.mxu0 %v3129_v12  ;;  %v3955_v63 = vrot.slane %v386_v46, 1  ;;  %v3967_v11 = vrot.slane %v424_v58, 1  ;;  %v3534_v12 = vld [vmem:[%s4501_s1 + $0x1f8] sm:$0xff]   ;;  %v3537_v46 = vld [vmem:[%s4501_s1 + $0x240] sm:$0xff]  }
  0x33   : > { %2317 = vmatprep.mubr.bf16.mxu1 %v3131_v13  ;;  %v3972_v13 = vrot.slane %v465_v61, 1  ;;  %v330_v58 = vrot.slane %v311_v39, 1  ;;  %v3539_v61 = vld [vmem:[%s4501_s1 + $0x200] sm:$0xff]  }
  0x34   : > { %3231 = vmatpush3.bf16.msra.mxu0 %v3519_v0  ;;  %v427_v0 = vunpack.c.h.bf16 %v3844_v6 }
  0x35   : > { %3271 = vmatpush3.bf16.msra.mxu1 %v3520_v2  ;;  %3232 = vmatprep.subr.bf16.mxu0 %v3521_v16  ;;  %v3961_v2 = vrot.slane %v425_v54, 1  ;;  %v464_v16 = vunpack.c.l.bf16 %v3841_v5 }
  0x36   : > { %3272 = vmatprep.subr.bf16.mxu1 %v3522_v17  ;;  %v3536_v17 = vld [vmem:[%s4501_s1 + $0x1b8] sm:$0xff]  }
  0x37   : > { %2253 = vmatmul.mubr.bf16.gmra.mrb[8].mxu0 %v3128_v14  ;;  %v3535_v14 = vld [vmem:[%s4501_s1 + $0x138] sm:$0xff]   ;;  %v4023_v19 = vrot.slane %v464_v16, 1  ;;  %v3544_v16 = vld [vmem:[%s4501_s1 + $0x288] sm:$0xff]  }
  0x38   : > { %2318 = vmatmul.mubr.bf16.gmra.mrb[8].mxu1 %v3130_v15  ;;  %3233 = vmatpush3.bf16.msra.mxu0 %v3523_v20  ;;  %v3977_v15 = vrot.slane %v427_v0, 1  ;;  %v2867_v20 = vld [vmem:[%s3737_s27 + $0x30] sm:$0x11] }
  0x39   : > { %3273 = vmatpush3.bf16.msra.mxu1 %v3524_v23  ;;  %3234 = vmatprep.subr.bf16.mxu0 %v3525_v26  ;;  %v426_v23 = vunpack.c.l.bf16 %v3844_v6  ;;  %v505_v26 = vunpack.c.h.bf16 %v3911_v40  ;;  %v308_v30 = vunpack.c.l.bf16 %v2867_v20  ;;  %v309_v5 = vunpack.c.h.bf16 %v2867_v20  ;;  %v3542_v20 = vld [vmem:[%s4501_s1 + $0x2c8] sm:$0xff]  }
  0x3a   : > { %3274 = vmatprep.subr.bf16.mxu1 %v3526_v31  ;;  %2260 = vmatprep.mubr.bf16.mxu0 %v3137_v47  ;;  %v262_v31 = vld [vmem:[%s3737_s27 + $0x18] sm:$0x11]  ;;  %v281_v47 = vrot.slane %v267_v28, 1 }
  0x3b   : > { %2325 = vmatprep.mubr.bf16.mxu1 %v3139_v55  ;;  %v270_v36 = vunpack.c.h.bf16 %v262_v31  ;;  %v324_v54 = vrot.slane %v309_v5, 1  ;;  %v4028_v28 = vrot.slane %v426_v23, 1  ;;  %v545_v23 = vunpack.c.h.bf16 %v3914_v41 }
  0x3c   : > { %3235 = vmatpush3.bf16.msra.mxu0 %v3527_v34  ;;  %v269_v34 = vunpack.c.l.bf16 %v262_v31  ;;  %v349_v5 = vunpack.c.h.bf16 %v2871_v29  ;;  %v2875_v31 = vld [vmem:[%s3737_s27 + $0x70] sm:$0x11] }
  0x3d   : > { %3275 = vmatpush3.bf16.msra.mxu1 %v3528_v37  ;;  %3236 = vmatprep.subr.bf16.mxu0 %v3529_v56  ;;  %v310_v37 = vunpack.c.l.bf16 %v2868_v33  ;;  %v325_v0 = vsel %vm279_vm0, %v3875_v21, %v324_v54  ;;  %v2872_v33 = vld [vmem:[%s3737_s27 + $0x58] sm:$0x11]  ;;  %v389_v39 = vunpack.c.h.bf16 %v2875_v31 }
  0x3e   : > { %3276 = vmatprep.subr.bf16.mxu1 %v3530_v59  ;;  %v287_v55 = vrot.slane %v269_v34, 1  ;;  %v3538_v59 = vld [vmem:[%s4501_s1 + $0x2c0] sm:$0xff]   ;;  %v2876_v34 = vld [vmem:[%s3737_s27 + $0x78] sm:$0x11] }
  0x3f   : > { %2261 = vmatmul.mubr.bf16.gmra.mrb[12].mxu0 %v3136_v50  ;;  %v321_v50 = vrot.slane %v308_v30, 1  ;;  %v327_v56 = vrot.slane %v310_v37, 1  ;;  %v4039_v30 = vrot.slane %v505_v26, 1  ;;  %v547_v37 = vunpack.c.h.bf16 %v3929_v49  ;;  %v3545_v26 = vld [vmem:[%s4501_s1 + $0x250] sm:$0xff]  }
  0x40   : > { %2326 = vmatmul.mubr.bf16.gmra.mrb[12].mxu1 %v3138_v52  ;;  %3237 = vmatpush3.bf16.msra.mxu0 %v3531_v62  ;;  %v290_v52 = vrot.slane %v270_v36, 1  ;;  %v285_v62 = vsel %vm279_vm0, %v3851_v9, %v284_v7  ;;  %v3540_v9 = vld [vmem:[%s4501_s1 + $0x280] sm:$0xff]   ;;  %v348_v36 = vunpack.c.l.bf16 %v2871_v29  ;;  %v388_v7 = vunpack.c.l.bf16 %v2875_v31  ;;  %v2883_v29 = vld [vmem:[%s3737_s27 + $0xb0] sm:$0x11] }
  0x41   : > { %3277 = vmatpush3.bf16.msra.mxu1 %v3532_v1  ;;  %3238 = vmatprep.subr.bf16.mxu0 %v3533_v10  ;;  %v282_v1 = vsel %vm279_vm0, %v3849_v8, %v281_v47  ;;  %v322_v4 = vsel %vm279_vm0, %v3869_v18, %v321_v50  ;;  %v1114_v10 = vpack.c.bf16 %v325_v0, %v285_v62  ;;  %v391_v47 = vunpack.c.h.bf16 %v2876_v34  ;;  %v3546_v62 = vld [vmem:[%s4501_s1 + $0x2d0] sm:$0xff]  }
  0x42   : > { %3278 = vmatprep.subr.bf16.mxu1 %v3534_v12  ;;  %v291_v12 = vsel %vm279_vm0, %v3887_v27, %v290_v52  ;;  %v288_v8 = vsel %vm279_vm0, %v3881_v24, %v287_v55  ;;  %v328_v18 = vsel %vm279_vm0, %v3895_v32, %v327_v56  ;;  %v3541_v27 = vld [vmem:[%s4501_s1 + $0x248] sm:$0xff]   ;;  %v4033_v32 = vrot.slane %v466_v25, 1  ;;  %v3547_v0 = vld [vmem:[%s4501_s1 + $0x210] sm:$0xff]  }
  0x43   : > { %2366 = vmatprep.mubr.bf16.mxu0 %v1114_v10  ;;  %v3543_v24 = vld [vmem:[%s4501_s1 + $0x208] sm:$0xff]   ;;  %v507_v25 = vunpack.c.h.bf16 %v3917_v42  ;;  %v364_v50 = vrot.slane %v349_v5, 1  ;;  %v361_v54 = vrot.slane %v348_v36, 1  ;;  %v350_v55 = vunpack.c.l.bf16 %v2872_v33 }
  0x44   : > { %3239 = vmatpush3.bf16.msra.mxu0 %v3535_v14  ;;  %v331_v14 = vsel %vm279_vm0, %v3901_v35, %v330_v58  ;;  %v1115_v35 = vpack.c.bf16 %v328_v18, %v288_v8  ;;  %v390_v52 = vunpack.c.l.bf16 %v2876_v34  ;;  %v404_v56 = vrot.slane %v389_v39, 1 }
  0x45   : > { %3279 = vmatpush3.bf16.msra.mxu1 %v3536_v17  ;;  %3304 = vmatprep.subr.bf16.mxu0 %v3537_v46  ;;  %v1113_v17 = vpack.c.bf16 %v322_v4, %v282_v1  ;;  %v1116_v21 = vpack.c.bf16 %v331_v14, %v291_v12  ;;  %v351_v46 = vunpack.c.h.bf16 %v2872_v33  ;;  %v365_v1 = vsel %vm279_vm0, %v3907_v38, %v364_v50  ;;  %v3548_v38 = vld [vmem:[%s4501_s1 + $0x290] sm:$0xff]  }
  0x46   : > { %3344 = vmatprep.subr.bf16.mxu1 %v3538_v59  ;;  %v410_v59 = vrot.slane %v391_v47, 1  ;;  %v362_v4 = vsel %vm279_vm0, %v3933_v53, %v361_v54  ;;  %v367_v10 = vrot.slane %v350_v55, 1  ;;  %v407_v12 = vrot.slane %v390_v52, 1  ;;  %v3553_v54 = vld [vmem:[%s4501_s1 + $0x260] sm:$0xff]  }
  0x47   : > { %2431 = vmatprep.mubr.bf16.mxu1 %v1116_v21  ;;  %2367 = vmatmul.mubr.bf16.vlgmr.msra.gmra.mrb[16].mxu0 %v1113_v17  ;;  %v370_v58 = vrot.slane %v351_v46, 1  ;;  %v405_v14 = vsel %vm279_vm0, %v3919_v43, %v404_v56  ;;  %v504_v5 = vunpack.c.l.bf16 %v3911_v40  ;;  %v544_v31 = vunpack.c.l.bf16 %v3914_v41  ;;  %v3554_v56 = vld [vmem:[%s4501_s1 + $0x2e0] sm:$0xff]  }
  0x48   : > { %2432 = vmatmul.mubr.bf16.vlgmr.msra.gmra.mrb[16].mxu1 %v1115_v35  ;;  %3305 = vmatpush3.bf16.msra.mxu0 %v3539_v61  ;;  %v401_v61 = vrot.slane %v388_v7, 1  ;;  %v1130_v53 = vpack.c.bf16 %v405_v14, %v365_v1  ;;  %v368_v43 = vsel %vm279_vm0, %v3949_v60, %v367_v10  ;;  %v3551_v35 = vld [vmem:[%s4501_s1 + $0x218] sm:$0xff]   ;;  %v506_v33 = vunpack.c.l.bf16 %v3917_v42 }
  0x49   : > { %3345 = vmatpush3.bf16.msra.mxu1 %v3540_v9  ;;  %3306 = vmatprep.subr.bf16.mxu0 %v3541_v27  ;;  %v371_v17 = vsel %vm279_vm0, %v3921_v44, %v370_v58  ;;  %v411_v9 = vsel %vm279_vm0, %v3923_v45, %v410_v59  ;;  %v3549_v44 = vld [vmem:[%s4501_s1 + $0x258] sm:$0xff]   ;;  %v408_v45 = vsel %vm279_vm0, %v3955_v63, %v407_v12  ;;  %v4081_v27 = vrot.slane %v545_v23, 1  ;;  %v3555_v58 = vld [vmem:[%s4501_s1 + $0x220] sm:$0xff]  }
  0x4a   : > { %3346 = vmatprep.subr.bf16.mxu1 %v3542_v20  ;;  %v402_v21 = vsel %vm279_vm0, %v3943_v57, %v401_v61  ;;  %v1132_v8 = vpack.c.bf16 %v411_v9, %v371_v17  ;;  %v3550_v57 = vld [vmem:[%s4501_s1 + $0x2d8] sm:$0xff]   ;;  %2374 = vmatprep.mubr.bf16.mxu0 %v1130_v53  ;;  %v1131_v60 = vpack.c.bf16 %v408_v45, %v368_v43  ;;  %v4086_v20 = vrot.slane %v507_v25, 1  ;;  %v2887_v43 = vld [vmem:[%s3737_s27 + $0xd0] sm:$0x11] }
  0x4b   : > { %v1129_v18 = vpack.c.bf16 %v402_v21, %v362_v4  ;;  %v3552_v63 = vld [vmem:[%s4501_s1 + $0x298] sm:$0xff]   ;;  %v546_v34 = vunpack.c.l.bf16 %v3929_v49  ;;  %v469_v25 = vunpack.c.h.bf16 %v2883_v29  ;;  %v468_v7 = vunpack.c.l.bf16 %v2883_v29 }
  0x4c   : > { %3307 = vmatpush3.bf16.msra.mxu0 %v3543_v24  ;;  %2439 = vmatprep.mubr.bf16.mxu1 %v1132_v8  ;;  %v4091_v24 = vrot.slane %v547_v37, 1  ;;  %v2880_v23 = vld [vmem:[%s3737_s27 + $0x98] sm:$0x11]  ;;  %v560_v53 = vrot.slane %v544_v31, 1  ;;  %v526_v8 = vrot.slane %v506_v33, 1 }
  0x4d   : > { %3347 = vmatpush3.bf16.msra.mxu1 %v3544_v16  ;;  %3308 = vmatprep.subr.bf16.mxu0 %v3545_v26  ;;  %v2879_v16 = vld [vmem:[%s3737_s27 + $0x90] sm:$0x11]  ;;  %v431_v39 = vunpack.c.h.bf16 %v2880_v23  ;;  %v2884_v37 = vld [vmem:[%s3737_s27 + $0xb8] sm:$0x11]  ;;  %v430_v26 = vunpack.c.l.bf16 %v2880_v23  ;;  %v484_v55 = vrot.slane %v469_v25, 1  ;;  %v481_v61 = vrot.slane %v468_v7, 1 }
  0x4e   : > { %3348 = vmatprep.subr.bf16.mxu1 %v3546_v62  ;;  %v429_v36 = vunpack.c.h.bf16 %v2879_v16  ;;  %v428_v46 = vunpack.c.l.bf16 %v2879_v16  ;;  %v471_v47 = vunpack.c.h.bf16 %v2884_v37  ;;  %v470_v50 = vunpack.c.l.bf16 %v2884_v37 }
  0x4f   : > { %2375 = vmatmul.mubr.bf16.gmra.mrb[20].mxu0 %v1129_v18  ;;  %v450_v52 = vrot.slane %v431_v39, 1  ;;  %v447_v62 = vrot.slane %v430_v26, 1  ;;  %v485_v4 = vsel %vm279_vm0, %v3972_v13, %v484_v55  ;;  %v482_v9 = vsel %vm279_vm0, %v4023_v19, %v481_v61  ;;  %v3556_v13 = vld [vmem:[%s4501_s1 + $0x2a0] sm:$0xff]   ;;  %v3560_v18 = vld [vmem:[%s4501_s1 + $0x2a8] sm:$0xff]  }
  0x50   : > { %3309 = vmatpush3.bf16.msra.mxu0 %v3547_v0  ;;  %2440 = vmatmul.mubr.bf16.gmra.mrb[20].mxu1 %v1131_v60  ;;  %v444_v41 = vrot.slane %v429_v36, 1  ;;  %v441_v49 = vrot.slane %v428_v46, 1  ;;  %v490_v59 = vrot.slane %v471_v47, 1  ;;  %v487_v0 = vrot.slane %v470_v50, 1  ;;  %v3561_v36 = vld [vmem:[%s4501_s1 + $0x270] sm:$0xff]  }
  0x51   : > { %3349 = vmatpush3.bf16.msra.mxu1 %v3548_v38  ;;  %3310 = vmatprep.subr.bf16.mxu0 %v3549_v44  ;;  %v451_v10 = vsel %vm279_vm0, %v3977_v15, %v450_v52  ;;  %v520_v19 = vrot.slane %v504_v5, 1  ;;  %v2891_v44 = vld [vmem:[%s3737_s27 + $0xf0] sm:$0x11]  ;;  %v566_v45 = vrot.slane %v546_v34, 1  ;;  %v508_v16 = vunpack.c.l.bf16 %v2887_v43 }
  0x52   : > { %3350 = vmatprep.subr.bf16.mxu1 %v3550_v57  ;;  %v445_v1 = vsel %vm279_vm0, %v3961_v2, %v444_v41  ;;  %v442_v12 = vsel %vm279_vm0, %v3967_v11, %v441_v49  ;;  %v491_v17 = vsel %vm279_vm0, %v3985_v22, %v490_v59  ;;  %v448_v2 = vsel %vm279_vm0, %v4028_v28, %v447_v62  ;;  %v3557_v22 = vld [vmem:[%s4501_s1 + $0x268] sm:$0xff]   ;;  %v3562_v50 = vld [vmem:[%s4501_s1 + $0x2f0] sm:$0xff]  }
  0x53   : > { %v1146_v14 = vpack.c.bf16 %v485_v4, %v445_v1  ;;  %v1148_v15 = vpack.c.bf16 %v491_v17, %v451_v10  ;;  %v1145_v21 = vpack.c.bf16 %v482_v9, %v442_v12  ;;  %v488_v11 = vsel %vm279_vm0, %v4033_v32, %v487_v0  ;;  %v3558_v28 = vld [vmem:[%s4501_s1 + $0x2e8] sm:$0xff]   ;;  %v3566_v1 = vld [vmem:[%s4501_s1 + $0x2f8] sm:$0xff]   ;;  %v4182_v12 = vld [vmem:[%s3737_s27 + $0x20] sm:$0xff] }
  0x54   : > { %3311 = vmatpush3.bf16.msra.mxu0 %v3551_v35  ;;  %v1147_v38 = vpack.c.bf16 %v488_v11, %v448_v2  ;;  %v3559_v32 = vld [vmem:[%s4501_s1 + $0x228] sm:$0xff]   ;;  %v509_v57 = vunpack.c.h.bf16 %v2887_v43  ;;  %v549_v60 = vunpack.c.h.bf16 %v2891_v44  ;;  %v2888_v35 = vld [vmem:[%s3737_s27 + $0xd8] sm:$0x11]  ;;  %v548_v29 = vunpack.c.l.bf16 %v2891_v44  ;;  %v3569_v2 = vld [vmem:[%s4501_s1 + $0x340] sm:$0xff]  }
  0x55   : > { %3351 = vmatpush3.bf16.msra.mxu1 %v3552_v63  ;;  %3312 = vmatprep.subr.bf16.mxu0 %v3553_v54  ;;  %v2892_v63 = vld [vmem:[%s3737_s27 + $0xf8] sm:$0x11]  ;;  %v511_v23 = vunpack.c.h.bf16 %v2888_v35  ;;  %v510_v31 = vunpack.c.l.bf16 %v2888_v35  ;;  %v521_v34 = vrot.slane %v508_v16, 1  ;;  %v3563_v54 = vld [vmem:[%s4501_s1 + $0x230] sm:$0xff]   ;;  %v4187_v17 = vld [vmem:[%s3737_s27 + $0x28] sm:$0xff]  ;;  %v666_v16 = vunpack.c.h.bf16 %v4182_v12 }
  0x56   : > { %3352 = vmatprep.subr.bf16.mxu1 %v3554_v56  ;;  %2382 = vmatprep.mubr.bf16.mxu0 %v1146_v14  ;;  %v551_v5 = vunpack.c.h.bf16 %v2892_v63  ;;  %v550_v33 = vunpack.c.l.bf16 %v2892_v63  ;;  %v524_v25 = vrot.slane %v509_v57, 1  ;;  %v564_v39 = vrot.slane %v549_v60, 1  ;;  %v3567_v4 = vld [vmem:[%s4501_s1 + $0x238] sm:$0xff]   ;;  %v3571_v11 = vld [vmem:[%s4501_s1 + $0x300] sm:$0xff]   ;;  %v3578_v44 = vld [vmem:[%s4501_s1 + $0x3d0] sm:$0xff]  }
  0x57   : > { %2447 = vmatprep.mubr.bf16.mxu1 %v1148_v15  ;;  %2383 = vmatmul.mubr.bf16.gmra.mrb[24].mxu0 %v1145_v21  ;;  %v561_v37 = vrot.slane %v548_v29, 1  ;;  %v530_v46 = vrot.slane %v511_v23, 1  ;;  %v527_v7 = vrot.slane %v510_v31, 1  ;;  %v522_v52 = vsel %vm279_vm0, %v520_v19, %v521_v34  ;;  %v3568_v10 = vld [vmem:[%s4501_s1 + $0x2b8] sm:$0xff]   ;;  %v3570_v15 = vld [vmem:[%s4501_s1 + $0x3c0] sm:$0xff]   ;;  %v3575_v19 = vld [vmem:[%s4501_s1 + $0x308] sm:$0xff]  }
  0x58   : > { %3313 = vmatpush3.bf16.msra.mxu0 %v3555_v58  ;;  %2448 = vmatmul.mubr.bf16.gmra.mrb[24].mxu1 %v1147_v38  ;;  %v570_v47 = vrot.slane %v551_v5, 1  ;;  %v567_v26 = vrot.slane %v550_v33, 1  ;;  %v525_v41 = vsel %vm279_vm0, %v4039_v30, %v524_v25  ;;  %v565_v55 = vsel %vm279_vm0, %v4081_v27, %v564_v39  ;;  %v3564_v30 = vld [vmem:[%s4501_s1 + $0x2b0] sm:$0xff]   ;;  %v3576_v38 = vld [vmem:[%s4501_s1 + $0x388] sm:$0xff]   ;;  %v3582_v35 = vld [vmem:[%s4501_s1 + $0x3d8] sm:$0xff]  }
  0x59   : > { %3353 = vmatpush3.bf16.msra.mxu1 %v3556_v13  ;;  %3314 = vmatprep.subr.bf16.mxu0 %v3557_v22  ;;  %v562_v49 = vsel %vm279_vm0, %v560_v53, %v561_v37  ;;  %v1162_v56 = vpack.c.bf16 %v565_v55, %v525_v41  ;;  %v531_v58 = vsel %vm279_vm0, %v4086_v20, %v530_v46  ;;  %v3565_v20 = vld [vmem:[%s4501_s1 + $0x278] sm:$0xff]   ;;  %v3573_v22 = vld [vmem:[%s4501_s1 + $0x348] sm:$0xff]   ;;  %v3579_v57 = vld [vmem:[%s4501_s1 + $0x310] sm:$0xff]   ;;  %v667_v23 = vunpack.c.l.bf16 %v4187_v17 }
  0x5a   : > { %3354 = vmatprep.subr.bf16.mxu1 %v3558_v28  ;;  %v571_v59 = vsel %vm279_vm0, %v4091_v24, %v570_v47  ;;  %v1161_v61 = vpack.c.bf16 %v562_v49, %v522_v52  ;;  %v528_v27 = vsel %vm279_vm0, %v526_v8, %v527_v7  ;;  %v568_v0 = vsel %vm279_vm0, %v566_v45, %v567_v26  ;;  %v4220_v28 = vld [vmem:[%s3737_s27 + $0x60] sm:$0xff]  ;;  %v4223_v53 = vld [vmem:[%s3737_s27 + $0x68] sm:$0xff]  ;;  %v3580_v60 = vld [vmem:[%s4501_s1 + $0x390] sm:$0xff]  }
  0x5b   : > { %v1164_v62 = vpack.c.bf16 %v571_v59, %v531_v58  ;;  %2390 = vmatprep.mubr.bf16.mxu0 %v1162_v56  ;;  %v1163_v24 = vpack.c.bf16 %v568_v0, %v528_v27  ;;  %v3117_v14 = vcombine.high %v4182_v12, %v3790_v48  ;;  %v3119_v9 = vcombine.high %v4187_v17, %v3798_v51  ;;  %v3583_v63 = vld [vmem:[%s4501_s1 + $0x318] sm:$0xff]   ;;  %v2901_v5 = vld [vmem:[%s3737_s27 + $0xa0] sm:$0xff]  ;;  %v2902_v31 = vld [vmem:[%s3737_s27 + $0xa8] sm:$0xff] }
  0x5c   : > { %3315 = vmatpush3.bf16.msra.mxu0 %v3559_v32  ;;  %v3116_v13 = vcombine.low %v4182_v12, %v3790_v48  ;;  %v3118_v21 = vcombine.low %v4187_v17, %v3798_v51  ;;  %v3572_v48 = vld [vmem:[%s4501_s1 + $0x380] sm:$0xff]   ;;  %v3574_v51 = vld [vmem:[%s4501_s1 + $0x3c8] sm:$0xff]   ;;  %v3125_v32 = vcombine.high %v4220_v28, %v3837_v3  ;;  %v3127_v8 = vcombine.high %v4223_v53, %v3844_v6  ;;  %v3584_v29 = vld [vmem:[%s4501_s1 + $0x398] sm:$0xff]  }
  0x5d   : > { %3355 = vmatpush3.bf16.msra.mxu1 %v3560_v18  ;;  %3316 = vmatprep.subr.bf16.mxu0 %v3561_v36  ;;  %v3577_v18 = vld [vmem:[%s4501_s1 + $0x350] sm:$0xff]   ;;  %v3124_v43 = vcombine.low %v4220_v28, %v3837_v3  ;;  %v3126_v45 = vcombine.low %v4223_v53, %v3844_v6  ;;  %v3581_v3 = vld [vmem:[%s4501_s1 + $0x358] sm:$0xff]   ;;  %v665_v6 = vunpack.c.l.bf16 %v4182_v12  ;;  %v668_v36 = vunpack.c.h.bf16 %v4187_v17  ;;  %v3585_v37 = vld [vmem:[%s4501_s1 + $0x360] sm:$0xff]  }
  0x5e   : > { %3356 = vmatprep.subr.bf16.mxu1 %v3562_v50  ;;  %2455 = vmatprep.mubr.bf16.mxu1 %v1164_v62  ;;  %v3133_v25 = vcombine.high %v2901_v5, %v3911_v40  ;;  %v3135_v39 = vcombine.high %v2902_v31, %v3917_v42  ;;  %v3132_v34 = vcombine.low %v2901_v5, %v3911_v40  ;;  %v746_v46 = vunpack.c.h.bf16 %v4220_v28  ;;  %v3586_v7 = vld [vmem:[%s4501_s1 + $0x3e0] sm:$0xff]   ;;  %v3589_v56 = vld [vmem:[%s4501_s1 + $0x368] sm:$0xff]  }
  0x5f   : > { %2391 = vmatmul.mubr.bf16.gmra.mrb[28].mxu0 %v1161_v61  ;;  %v4262_v33 = vrot.slane %v665_v6, 1  ;;  %v3134_v47 = vcombine.low %v2902_v31, %v3917_v42  ;;  %v4276_v26 = vrot.slane %v666_v16, 1  ;;  %v748_v50 = vunpack.c.h.bf16 %v4223_v53  ;;  %v3587_v40 = vld [vmem:[%s4501_s1 + $0x320] sm:$0xff]   ;;  %v3591_v27 = vld [vmem:[%s4501_s1 + $0x328] sm:$0xff]   ;;  %v3598_v6 = vld [vmem:[%s4501_s1 + $0x3f8] sm:$0xff]  }
  0x60   : > { %3317 = vmatpush3.bf16.msra.mxu0 %v3563_v54  ;;  %2456 = vmatmul.mubr.bf16.gmra.mrb[28].mxu1 %v1163_v24  ;;  %v4282_v54 = vrot.slane %v667_v23, 1  ;;  %v745_v41 = vunpack.c.l.bf16 %v4220_v28  ;;  %v3588_v42 = vld [vmem:[%s4501_s1 + $0x3a0] sm:$0xff]   ;;  %v4288_v55 = vrot.slane %v668_v36, 1  ;;  %v747_v52 = vunpack.c.l.bf16 %v4223_v53  ;;  %v3592_v24 = vld [vmem:[%s4501_s1 + $0x3a8] sm:$0xff]   ;;  %v2915_v36 = vld [vmem:[%s3737_s27 + $0x50] sm:$0x11] }
  0x61   : > { %3357 = vmatpush3.bf16.msra.mxu1 %v3564_v30  ;;  %3318 = vmatprep.subr.bf16.mxu0 %v3565_v20  ;;  %v826_v49 = vunpack.c.h.bf16 %v2901_v5  ;;  %v4294_v58 = vrot.slane %v746_v46, 1  ;;  %v828_v59 = vunpack.c.h.bf16 %v2902_v31  ;;  %v825_v61 = vunpack.c.l.bf16 %v2901_v5  ;;  %v3590_v30 = vld [vmem:[%s4501_s1 + $0x3e8] sm:$0xff]   ;;  %v2907_v12 = vld [vmem:[%s3737_s27 + $0x100] sm:$0xff]  ;;  %v2911_v5 = vld [vmem:[%s3737_s27 + $0x30] sm:$0x11] }
  0x62   : > { %3358 = vmatprep.subr.bf16.mxu1 %v3566_v1  ;;  %2496 = vmatprep.mubr.bf16.mxu0 %v3117_v14  ;;  %v4299_v62 = vrot.slane %v748_v50, 1  ;;  %v4304_v0 = vrot.slane %v745_v41, 1  ;;  %v827_v20 = vunpack.c.l.bf16 %v2902_v31  ;;  %v2905_v1 = vld [vmem:[%s3737_s27 + $0xe0] sm:$0xff]  ;;  %v2906_v14 = vld [vmem:[%s3737_s27 + $0xe8] sm:$0xff]  ;;  %v946_v28 = vunpack.c.h.bf16 %v2907_v12 }
  0x63   : > { %2561 = vmatprep.mubr.bf16.mxu1 %v3119_v9  ;;  %v4317_v17 = vld [vmem:[%s3737_s27 + $0x108] sm:$0xff]  ;;  %v4319_v9 = vrot.slane %v828_v59, 1  ;;  %v908_v53 = vunpack.c.h.bf16 %v2906_v14  ;;  %v2913_v31 = vld [vmem:[%s3737_s27 + $0x40] sm:$0xff]  ;;  %v709_v50 = vunpack.c.l.bf16 %v2915_v36 }
  0x64   : > { %3319 = vmatpush3.bf16.msra.mxu0 %v3567_v4  ;;  %v4310_v4 = vrot.slane %v747_v52, 1  ;;  %v705_v46 = vunpack.c.l.bf16 %v2913_v31  ;;  %v2914_v52 = vld [vmem:[%s3737_s27 + $0x48] sm:$0xff] }
  0x65   : > { %3359 = vmatpush3.bf16.msra.mxu1 %v3568_v10  ;;  %3384 = vmatprep.subr.bf16.mxu0 %v3569_v2  ;;  %v4312_v10 = vrot.slane %v826_v49, 1  ;;  %v4321_v2 = vrot.slane %v825_v61, 1  ;;  %v2916_v49 = vld [vmem:[%s3737_s27 + $0x58] sm:$0x11] }
  0x66   : > { %3424 = vmatprep.subr.bf16.mxu1 %v3570_v15  ;;  %v905_v15 = vunpack.c.l.bf16 %v2905_v1  ;;  %v721_v61 = vrot.slane %v705_v46, 1 }
  0x67   : > { %2497 = vmatmul.mubr.bf16.vlgmr.msra.gmra.mrb[32].mxu0 %v3116_v13  ;;  %v906_v13 = vunpack.c.h.bf16 %v2905_v1 }
  0x68   : > { %2562 = vmatmul.mubr.bf16.vlgmr.msra.gmra.mrb[32].mxu1 %v3118_v21  ;;  %3385 = vmatpush3.bf16.msra.mxu0 %v3571_v11  ;;  %v3141_v21 = vcombine.high %v2905_v1, %v2907_v12  ;;  %v3143_v11 = vcombine.high %v2906_v14, %v4317_v17 }
  0x69   : > { %3425 = vmatpush3.bf16.msra.mxu1 %v3572_v48  ;;  %3386 = vmatprep.subr.bf16.mxu0 %v3573_v22  ;;  %v3140_v48 = vcombine.low %v2905_v1, %v2907_v12  ;;  %v3142_v22 = vcombine.low %v2906_v14, %v4317_v17 }
  0x6a   : > { %3426 = vmatprep.subr.bf16.mxu1 %v3574_v51  ;;  %2504 = vmatprep.mubr.bf16.mxu0 %v3125_v32  ;;  %v3593_v51 = vld [vmem:[%s4501_s1 + $0x370] sm:$0xff]  }
  0x6b   : > { %2569 = vmatprep.mubr.bf16.mxu1 %v3127_v8  ;;  %v3595_v32 = vld [vmem:[%s4501_s1 + $0x330] sm:$0xff]   ;;  %v4336_v8 = vrot.slane %v906_v13, 1  ;;  %v708_v13 = vunpack.c.h.bf16 %v2914_v52 }
  0x6c   : > { %3387 = vmatpush3.bf16.msra.mxu0 %v3575_v19  ;;  %v3594_v19 = vld [vmem:[%s4501_s1 + $0x3f0] sm:$0xff]  }
  0x6d   : > { %3427 = vmatpush3.bf16.msra.mxu1 %v3576_v38  ;;  %3388 = vmatprep.subr.bf16.mxu0 %v3577_v18  ;;  %v4331_v38 = vrot.slane %v827_v20, 1  ;;  %v948_v18 = vunpack.c.h.bf16 %v4317_v17 }
  0x6e   : > { %3428 = vmatprep.subr.bf16.mxu1 %v3578_v44  ;;  %v4342_v44 = vrot.slane %v905_v15, 1  ;;  %v711_v15 = vunpack.c.l.bf16 %v2916_v49 }
  0x6f   : > { %2505 = vmatmul.mubr.bf16.gmra.mrb[36].mxu0 %v3124_v43  ;;  %v3596_v43 = vld [vmem:[%s4501_s1 + $0x3b0] sm:$0xff]   ;;  %v4357_v16 = vrot.slane %v948_v18, 1  ;;  %v730_v18 = vrot.slane %v708_v13, 1 }
  0x70   : > { %2570 = vmatmul.mubr.bf16.gmra.mrb[36].mxu1 %v3126_v45  ;;  %3389 = vmatpush3.bf16.msra.mxu0 %v3579_v57  ;;  %v945_v45 = vunpack.c.l.bf16 %v2907_v12  ;;  %v3597_v57 = vld [vmem:[%s4501_s1 + $0x378] sm:$0xff]  }
  0x71   : > { %3429 = vmatpush3.bf16.msra.mxu1 %v3580_v60  ;;  %3390 = vmatprep.subr.bf16.mxu0 %v3581_v3  ;;  %v4347_v60 = vrot.slane %v946_v28, 1  ;;  %v907_v3 = vunpack.c.l.bf16 %v2906_v14  ;;  %v707_v14 = vunpack.c.l.bf16 %v2914_v52  ;;  %v2923_v28 = vld [vmem:[%s3737_s27 + $0x90] sm:$0x11] }
  0x72   : > { %3430 = vmatprep.subr.bf16.mxu1 %v3582_v35  ;;  %2512 = vmatprep.mubr.bf16.mxu0 %v3133_v25  ;;  %v4352_v35 = vrot.slane %v908_v53, 1  ;;  %v4362_v23 = vrot.slane %v945_v45, 1 }
  0x73   : > { %2577 = vmatprep.mubr.bf16.mxu1 %v3135_v39  ;;  %v4367_v25 = vrot.slane %v907_v3, 1  ;;  %v947_v39 = vunpack.c.l.bf16 %v4317_v17 }
  0x74   : > { %3391 = vmatpush3.bf16.msra.mxu0 %v3583_v63  ;;  %v3599_v63 = vld [vmem:[%s4501_s1 + $0x338] sm:$0xff]  }
  0x75   : > { %3431 = vmatpush3.bf16.msra.mxu1 %v3584_v29  ;;  %3392 = vmatprep.subr.bf16.mxu0 %v3585_v37  ;;  %v3600_v29 = vld [vmem:[%s4501_s1 + $0x3b8] sm:$0xff]   ;;  %v670_v37 = vunpack.c.h.bf16 %v2911_v5 }
  0x76   : > { %3432 = vmatprep.subr.bf16.mxu1 %v3586_v7  ;;  %v2912_v7 = vld [vmem:[%s3737_s27 + $0x38] sm:$0x11] }
  0x77   : > { %2513 = vmatmul.mubr.bf16.gmra.mrb[40].mxu0 %v3132_v34  ;;  %v669_v34 = vunpack.c.l.bf16 %v2911_v5  ;;  %v671_v41 = vunpack.c.l.bf16 %v2912_v7  ;;  %v685_v59 = vrot.slane %v670_v37, 1  ;;  %v790_v5 = vunpack.c.h.bf16 %v2923_v28 }
  0x78   : > { %2578 = vmatmul.mubr.bf16.gmra.mrb[40].mxu1 %v3134_v47  ;;  %3393 = vmatpush3.bf16.msra.mxu0 %v3587_v40  ;;  %v706_v47 = vunpack.c.h.bf16 %v2913_v31  ;;  %v710_v40 = vunpack.c.h.bf16 %v2915_v36  ;;  %v2924_v31 = vld [vmem:[%s3737_s27 + $0x98] sm:$0x11] }
  0x79   : > { %3433 = vmatpush3.bf16.msra.mxu1 %v3588_v42  ;;  %3394 = vmatprep.subr.bf16.mxu0 %v3589_v56  ;;  %v672_v42 = vunpack.c.h.bf16 %v2912_v7  ;;  %v682_v56 = vrot.slane %v669_v34, 1  ;;  %v686_v12 = vsel %vm279_vm0, %v4276_v26, %v685_v59  ;;  %v728_v26 = vrot.slane %v711_v15, 1  ;;  %v2929_v15 = vld [vmem:[%s3737_s27 + $0xc0] sm:$0xff] }
  0x7a   : > { %3434 = vmatprep.subr.bf16.mxu1 %v3590_v30  ;;  %2520 = vmatprep.mubr.bf16.mxu0 %v3141_v21  ;;  %v724_v30 = vrot.slane %v706_v47, 1  ;;  %v725_v20 = vrot.slane %v710_v40, 1  ;;  %v2919_v21 = vld [vmem:[%s3737_s27 + $0x70] sm:$0x11] }
  0x7b   : > { %2585 = vmatprep.mubr.bf16.mxu1 %v3143_v11  ;;  %v691_v1 = vrot.slane %v672_v42, 1  ;;  %v792_v42 = vunpack.c.h.bf16 %v2924_v31  ;;  %v749_v52 = vunpack.c.l.bf16 %v2919_v21 }
  0x7c   : > { %3395 = vmatpush3.bf16.msra.mxu0 %v3591_v27  ;;  %v722_v27 = vrot.slane %v709_v50, 1  ;;  %v726_v11 = vsel %vm279_vm0, %v724_v30, %v725_v20  ;;  %v805_v50 = vrot.slane %v790_v5, 1  ;;  %v2927_v30 = vld [vmem:[%s3737_s27 + $0xb0] sm:$0x11] }
  0x7d   : > { %3435 = vmatpush3.bf16.msra.mxu1 %v3592_v24  ;;  %3396 = vmatprep.subr.bf16.mxu0 %v3593_v51  ;;  %v688_v24 = vrot.slane %v671_v41, 1  ;;  %v683_v51 = vsel %vm279_vm0, %v4262_v33, %v682_v56  ;;  %v1122_v53 = vpack.c.bf16 %v726_v11, %v686_v12 }
  0x7e   : > { %3436 = vmatprep.subr.bf16.mxu1 %v3594_v19  ;;  %v2921_v19 = vld [vmem:[%s3737_s27 + $0x80] sm:$0xff] }
  0x7f   : > { %2521 = vmatmul.mubr.bf16.gmra.mrb[44].mxu0 %v3140_v48  ;;  %v692_v48 = vsel %vm279_vm0, %v4288_v55, %v691_v1  ;;  %v689_v3 = vsel %vm279_vm0, %v4282_v54, %v688_v24  ;;  %v2922_v55 = vld [vmem:[%s3737_s27 + $0x88] sm:$0xff]  ;;  %v785_v59 = vunpack.c.l.bf16 %v2921_v19  ;;  %v762_v24 = vrot.slane %v749_v52, 1  ;;  %v2939_v52 = vld [vmem:[%s3737_s27 + $0x110] sm:$0x11] }
  0x80   : > { %2586 = vmatmul.mubr.bf16.gmra.mrb[44].mxu1 %v3142_v22  ;;  %3397 = vmatpush3.bf16.msra.mxu0 %v3595_v32  ;;  %v712_v22 = vunpack.c.h.bf16 %v2916_v49  ;;  %v727_v32 = vrot.slane %v707_v14, 1  ;;  %v788_v54 = vunpack.c.h.bf16 %v2922_v55  ;;  %v787_v13 = vunpack.c.l.bf16 %v2922_v55 }
  0x81   : > { %3437 = vmatpush3.bf16.msra.mxu1 %v3596_v43  ;;  %3398 = vmatprep.subr.bf16.mxu0 %v3597_v57  ;;  %v2920_v43 = vld [vmem:[%s3737_s27 + $0x78] sm:$0x11]  ;;  %v723_v57 = vsel %vm279_vm0, %v721_v61, %v722_v27  ;;  %v789_v61 = vunpack.c.l.bf16 %v2923_v28  ;;  %v801_v1 = vrot.slane %v785_v59, 1  ;;  %v763_v11 = vsel %vm279_vm0, %v4304_v0, %v762_v24  ;;  %v2930_v28 = vld [vmem:[%s3737_s27 + $0xc8] sm:$0xff] }
  0x82   : > { %3438 = vmatprep.subr.bf16.mxu1 %v3598_v6  ;;  %v731_v45 = vrot.slane %v712_v22, 1  ;;  %v750_v6 = vunpack.c.h.bf16 %v2919_v21  ;;  %2626 = vmatprep.mubr.bf16.mxu0 %v1122_v53  ;;  %v729_v33 = vsel %vm279_vm0, %v727_v32, %v728_v26  ;;  %v752_v46 = vunpack.c.h.bf16 %v2920_v43 }
  0x83   : > { %v1123_v34 = vpack.c.bf16 %v729_v33, %v689_v3  ;;  %v810_v56 = vrot.slane %v788_v54, 1  ;;  %v802_v12 = vrot.slane %v789_v61, 1  ;;  %v751_v14 = vunpack.c.l.bf16 %v2920_v43 }
  0x84   : > { %3399 = vmatpush3.bf16.msra.mxu0 %v3599_v63  ;;  %v1121_v63 = vpack.c.bf16 %v723_v57, %v683_v51  ;;  %v732_v36 = vsel %vm279_vm0, %v730_v18, %v731_v45  ;;  %v765_v37 = vrot.slane %v750_v6, 1  ;;  %v771_v41 = vrot.slane %v752_v46, 1  ;;  %v2931_v51 = vld [vmem:[%s3737_s27 + $0xd0] sm:$0x11]  ;;  %v2932_v18 = vld [vmem:[%s3737_s27 + $0xd8] sm:$0x11] }
  0x85   : > { %3439 = vmatpush3.bf16.msra.mxu1 %v3600_v29  ;;  %v786_v29 = vunpack.c.h.bf16 %v2921_v19  ;;  %v1124_v47 = vpack.c.bf16 %v732_v36, %v692_v48  ;;  %v791_v48 = vunpack.c.l.bf16 %v2924_v31  ;;  %v830_v22 = vunpack.c.h.bf16 %v2927_v30  ;;  %v2928_v19 = vld [vmem:[%s3737_s27 + $0xb8] sm:$0x11] }
  0x86   : > { %v766_v40 = vsel %vm279_vm0, %v4294_v58, %v765_v37  ;;  %v772_v20 = vsel %vm279_vm0, %v4299_v62, %v771_v41  ;;  %v811_v58 = vrot.slane %v792_v42, 1  ;;  %v803_v53 = vsel %vm279_vm0, %v801_v1, %v802_v12  ;;  %v2935_v42 = vld [vmem:[%s3737_s27 + $0xf0] sm:$0x11]  ;;  %v2940_v1 = vld [vmem:[%s3737_s27 + $0x118] sm:$0x11] }
  0x87   : > { %2627 = vmatmul.mubr.bf16.vlgmr.msra.gmra.mrb[48].mxu0 %v1121_v63  ;;  %v804_v7 = vrot.slane %v786_v29, 1  ;;  %2691 = vmatprep.mubr.bf16.mxu1 %v1124_v47  ;;  %v768_v32 = vrot.slane %v751_v14, 1  ;;  %v807_v26 = vrot.slane %v787_v13, 1  ;;  %v1137_v43 = vpack.c.bf16 %v803_v53, %v763_v11 }
  0x88   : > { %2692 = vmatmul.mubr.bf16.vlgmr.msra.gmra.mrb[48].mxu1 %v1123_v34  ;;  %v812_v21 = vsel %vm279_vm0, %v810_v56, %v811_v58  ;;  %v808_v45 = vrot.slane %v791_v48, 1  ;;  %v845_v57 = vrot.slane %v830_v22, 1  ;;  %v866_v3 = vunpack.c.h.bf16 %v2929_v15 }
  0x89   : > { %v806_v49 = vsel %vm279_vm0, %v804_v7, %v805_v50  ;;  %v1140_v62 = vpack.c.bf16 %v812_v21, %v772_v20  ;;  %v769_v6 = vsel %vm279_vm0, %v4310_v4, %v768_v32  ;;  %v870_v0 = vunpack.c.h.bf16 %v2931_v51 }
  0x8a   : > { %v1138_v27 = vpack.c.bf16 %v806_v49, %v766_v40  ;;  %v832_v55 = vunpack.c.h.bf16 %v2928_v19  ;;  %v868_v63 = vunpack.c.h.bf16 %v2930_v28  ;;  %v809_v33 = vsel %vm279_vm0, %v807_v26, %v808_v45 }
  0x8b   : > { %2699 = vmatprep.mubr.bf16.mxu1 %v1140_v62  ;;  %v846_v29 = vsel %vm279_vm0, %v4312_v10, %v845_v57  ;;  %v884_v5 = vrot.slane %v866_v3, 1  ;;  %v872_v31 = vunpack.c.h.bf16 %v2932_v18  ;;  %v1139_v36 = vpack.c.bf16 %v809_v33, %v769_v6 }
  0x8c   : > { %2634 = vmatprep.mubr.bf16.mxu0 %v1138_v27  ;;  %v885_v34 = vrot.slane %v870_v0, 1  ;;  %v851_v37 = vrot.slane %v832_v55, 1  ;;  %v890_v46 = vrot.slane %v868_v63, 1  ;;  %v829_v4 = vunpack.c.l.bf16 %v2927_v30  ;;  %v2936_v27 = vld [vmem:[%s3737_s27 + $0xf8] sm:$0x11] }
  0x8d   : > { %v891_v47 = vrot.slane %v872_v31, 1  ;;  %v865_v7 = vunpack.c.l.bf16 %v2929_v15  ;;  %v869_v50 = vunpack.c.l.bf16 %v2931_v51  ;;  %v831_v40 = vunpack.c.l.bf16 %v2928_v19 }
  0x8e   : > { %v886_v54 = vsel %vm279_vm0, %v884_v5, %v885_v34  ;;  %v852_v10 = vsel %vm279_vm0, %v4319_v9, %v851_v37  ;;  %v867_v41 = vunpack.c.l.bf16 %v2930_v28  ;;  %v842_v59 = vrot.slane %v829_v4, 1 }
  0x8f   : > { %2635 = vmatmul.mubr.bf16.gmra.mrb[52].mxu0 %v1137_v43  ;;  %v1154_v49 = vpack.c.bf16 %v886_v54, %v846_v29  ;;  %v892_v56 = vsel %vm279_vm0, %v890_v46, %v891_v47  ;;  %v881_v61 = vrot.slane %v865_v7, 1  ;;  %v882_v20 = vrot.slane %v869_v50, 1 }
  0x90   : > { %2700 = vmatmul.mubr.bf16.gmra.mrb[52].mxu1 %v1139_v36  ;;  %v1156_v30 = vpack.c.bf16 %v892_v56, %v852_v10  ;;  %v848_v58 = vrot.slane %v831_v40, 1  ;;  %v871_v24 = vunpack.c.l.bf16 %v2932_v18  ;;  %v843_v12 = vsel %vm279_vm0, %v4321_v2, %v842_v59 }
  0x91   : > { %2642 = vmatprep.mubr.bf16.mxu0 %v1154_v49  ;;  %v887_v9 = vrot.slane %v867_v41, 1  ;;  %v910_v14 = vunpack.c.h.bf16 %v2935_v42  ;;  %v950_v13 = vunpack.c.h.bf16 %v2939_v52  ;;  %v883_v15 = vsel %vm279_vm0, %v881_v61, %v882_v20 }
  0x92   : > { %2707 = vmatprep.mubr.bf16.mxu1 %v1156_v30  ;;  %v849_v21 = vsel %vm279_vm0, %v4331_v38, %v848_v58  ;;  %v888_v11 = vrot.slane %v871_v24, 1  ;;  %v912_v48 = vunpack.c.h.bf16 %v2936_v27  ;;  %v1153_v22 = vpack.c.bf16 %v883_v15, %v843_v12 }
  0x93   : > { %v925_v51 = vrot.slane %v910_v14, 1  ;;  %v965_v19 = vrot.slane %v950_v13, 1  ;;  %v952_v28 = vunpack.c.h.bf16 %v2940_v1  ;;  %v909_v32 = vunpack.c.l.bf16 %v2935_v42 }
  0x94   : > { %v889_v62 = vsel %vm279_vm0, %v887_v9, %v888_v11  ;;  %v931_v53 = vrot.slane %v912_v48, 1  ;;  %v949_v2 = vunpack.c.l.bf16 %v2939_v52  ;;  %v911_v55 = vunpack.c.l.bf16 %v2936_v27 }
  0x95   : > { %v1155_v26 = vpack.c.bf16 %v889_v62, %v849_v21  ;;  %v926_v18 = vsel %vm279_vm0, %v4336_v8, %v925_v51  ;;  %v966_v43 = vsel %vm279_vm0, %v4347_v60, %v965_v19  ;;  %v971_v38 = vrot.slane %v952_v28, 1 }
  0x96   : > { %v1170_v45 = vpack.c.bf16 %v966_v43, %v926_v18  ;;  %v932_v57 = vsel %vm279_vm0, %v4352_v35, %v931_v53  ;;  %v922_v3 = vrot.slane %v909_v32, 1  ;;  %v962_v6 = vrot.slane %v949_v2, 1 }
  0x97   : > { %2643 = vmatmul.mubr.bf16.gmra.mrb[56].mxu0 %v1153_v22  ;;  %v972_v0 = vsel %vm279_vm0, %v4357_v16, %v971_v38  ;;  %v951_v63 = vunpack.c.l.bf16 %v2940_v1  ;;  %v967_v33 = vrot.slane %v947_v39, 1  ;;  %v928_v5 = vrot.slane %v911_v55, 1 }
  0x98   : > { %2708 = vmatmul.mubr.bf16.gmra.mrb[56].mxu1 %v1155_v26  ;;  %2650 = vmatprep.mubr.bf16.mxu0 %v1170_v45  ;;  %v1172_v8 = vpack.c.bf16 %v972_v0, %v932_v57  ;;  %v923_v60 = vsel %vm279_vm0, %v4342_v44, %v922_v3  ;;  %v963_v29 = vsel %vm279_vm0, %v4362_v23, %v962_v6  ;;  %v2941_v44 = vld [vmem:[%s4502_s2] ss:$0 sm:$0xff] }
  0x99   : > { %v1169_v35 = vpack.c.bf16 %v963_v29, %v923_v60  ;;  %v968_v31 = vrot.slane %v951_v63, 1  ;;  %v929_v16 = vsel %vm279_vm0, %v4367_v25, %v928_v5 }
  0x9a   : > { %2715 = vmatprep.mubr.bf16.mxu1 %v1172_v8 }
  0x9b   : > { %v969_v36 = vsel %vm279_vm0, %v967_v33, %v968_v31 }
  0x9c   : > { %v1171_v34 = vpack.c.bf16 %v969_v36, %v929_v16 }
  0x9f   : > { %2651 = vmatmul.mubr.bf16.gmra.mrb[60].mxu0 %v1169_v35 }
  0xa0   : > { %2716 = vmatmul.mubr.bf16.gmra.mrb[60].mxu1 %v1171_v34 }
  0xfa   : > { %v3160_v17 = vpop.f32.mrb[0].mxu0 }
  0xfb   : > { %v3200_v39 = vpop.f32.mrb[0].mxu1  ;;  %v3161_v37 = vpop.f32.mrb[1].mxu0 }
  0xfc   : > { %v3162_v23 = vadd.f32 %v3161_v37, %v3160_v17  ;;  %v3201_v46 = vpop.f32.mrb[1].mxu1  ;;  %v3163_v47 = vpop.f32.mrb[2].mxu0 }
  0xfd   : > { %v3202_v4 = vadd.f32 %v3201_v46, %v3200_v39  ;;  %v3203_v7 = vpop.f32.mrb[2].mxu1  ;;  %v3164_v50 = vpop.f32.mrb[3].mxu0 }
  0xfe   : > { %v2239_v54 = vadd.f32 %v3162_v23, %v2941_v44  ;;  %v3165_v25 = vadd.f32 %v3164_v50, %v3163_v47  ;;  %v3204_v10 = vpop.f32.mrb[3].mxu1 }
  0xff   : > { %v3205_v40 = vadd.f32 %v3204_v10, %v3203_v7 }
 0x100   : > { %v2304_v41 = vadd.f32 %v3202_v4, %v2239_v54  ;;  %v2242_v42 = vadd.f32 %v3165_v25, %v2941_v44 }
 0x102   : > { %v4445_v52 = vadd.f32 %v3205_v40, %v2242_v42  ;;  %v3166_v49 = vpop.f32.mrb[4].mxu0 }
 0x103   : > { %v3206_v56 = vpop.f32.mrb[4].mxu1  ;;  %v3167_v59 = vpop.f32.mrb[5].mxu0 }
 0x104   : > { %v3168_v61 = vadd.f32 %v3167_v59, %v3166_v49  ;;  %v3207_v27 = vpop.f32.mrb[5].mxu1  ;;  %v3169_v30 = vpop.f32.mrb[6].mxu0 }
 0x105   : > { %v3208_v20 = vadd.f32 %v3207_v27, %v3206_v56  ;;  %v3209_v58 = vpop.f32.mrb[6].mxu1  ;;  %v3170_v24 = vpop.f32.mrb[7].mxu0 }
 0x106   : > { %v2247_v1 = vadd.f32 %v3168_v61, %v2941_v44  ;;  %v3171_v12 = vadd.f32 %v3170_v24, %v3169_v30  ;;  %v3210_v9 = vpop.f32.mrb[7].mxu1 }
 0x107   : > { %v3211_v14 = vadd.f32 %v3210_v9, %v3209_v58 }
 0x108   : > { %v2312_v13 = vadd.f32 %v3208_v20, %v2247_v1  ;;  %v2250_v15 = vadd.f32 %v3171_v12, %v2941_v44 }
 0x10a   : > { %v4447_v21 = vadd.f32 %v3211_v14, %v2250_v15  ;;  %v3172_v11 = vpop.f32.mrb[8].mxu0 }
 0x10b   : > { %v3212_v48 = vpop.f32.mrb[8].mxu1  ;;  %v3173_v22 = vpop.f32.mrb[9].mxu0 }
 0x10c   : > { %v3213_v51 = vpop.f32.mrb[9].mxu1  ;;  %v3174_v19 = vadd.f32 %v3173_v22, %v3172_v11  ;;  %v3175_v62 = vpop.f32.mrb[10].mxu0 }
 0x10d   : > { %v3214_v28 = vadd.f32 %v3213_v51, %v3212_v48  ;;  %v3215_v53 = vpop.f32.mrb[10].mxu1  ;;  %v3176_v32 = vpop.f32.mrb[11].mxu0 }
 0x10e   : > { %v3216_v2 = vpop.f32.mrb[11].mxu1  ;;  %v2255_v26 = vadd.f32 %v3174_v19, %v2941_v44  ;;  %v3177_v18 = vadd.f32 %v3176_v32, %v3175_v62 }
 0x10f   : > { %v3217_v43 = vadd.f32 %v3216_v2, %v3215_v53 }
 0x110   : > { %v2320_v38 = vadd.f32 %v3214_v28, %v2255_v26  ;;  %v2258_v45 = vadd.f32 %v3177_v18, %v2941_v44 }
 0x112   : > { %v4449_v57 = vadd.f32 %v3217_v43, %v2258_v45  ;;  %v3178_v3 = vpop.f32.mrb[12].mxu0 }
 0x113   : > { %v3218_v6 = vpop.f32.mrb[12].mxu1  ;;  %v3179_v0 = vpop.f32.mrb[13].mxu0 }
 0x114   : > { %v3180_v55 = vadd.f32 %v3179_v0, %v3178_v3  ;;  %v3219_v63 = vpop.f32.mrb[13].mxu1  ;;  %v3181_v33 = vpop.f32.mrb[14].mxu0 }
 0x115   : > { %v3220_v8 = vadd.f32 %v3219_v63, %v3218_v6  ;;  %v3221_v60 = vpop.f32.mrb[14].mxu1  ;;  %v3182_v29 = vpop.f32.mrb[15].mxu0 }
 0x116   : > { %v2263_v35 = vadd.f32 %v3180_v55, %v2941_v44  ;;  %v3183_v5 = vadd.f32 %v3182_v29, %v3181_v33  ;;  %v3222_v31 = vpop.f32.mrb[15].mxu1 }
 0x117   : > { %v3223_v16 = vadd.f32 %v3222_v31, %v3221_v60 }
 0x118   : > { %v2328_v36 = vadd.f32 %v3220_v8, %v2263_v35  ;;  %v2266_v34 = vadd.f32 %v3183_v5, %v2941_v44 }
 0x11a   : > { %v4451_v17 = vadd.f32 %v3223_v16, %v2266_v34  ;;  %v3240_v39 = vpop.f32.mrb[16].mxu0 }
 0x11b   : > { %v3280_v37 = vpop.f32.mrb[16].mxu1  ;;  %v3241_v23 = vpop.f32.mrb[17].mxu0 }
 0x11c   : > { %v3242_v46 = vadd.f32 %v3241_v23, %v3240_v39  ;;  %v3281_v47 = vpop.f32.mrb[17].mxu1  ;;  %v3243_v4 = vpop.f32.mrb[18].mxu0 }
 0x11d   : > { %v3282_v7 = vadd.f32 %v3281_v47, %v3280_v37  ;;  %v3283_v50 = vpop.f32.mrb[18].mxu1  ;;  %v3244_v54 = vpop.f32.mrb[19].mxu0 }
 0x11e   : > { %v2369_v25 = vadd.f32 %v3242_v46, %v2304_v41  ;;  %v3245_v10 = vadd.f32 %v3244_v54, %v3243_v4  ;;  %v3284_v40 = vpop.f32.mrb[19].mxu1 }
 0x11f   : > { %v3285_v42 = vadd.f32 %v3284_v40, %v3283_v50 }
 0x120   : > { %v2434_v49 = vadd.f32 %v3282_v7, %v2369_v25  ;;  %v2372_v56 = vadd.f32 %v3245_v10, %v4445_v52 }
 0x122   : > { %v4454_v59 = vadd.f32 %v3285_v42, %v2372_v56  ;;  %v3246_v44 = vpop.f32.mrb[20].mxu0 }
 0x123   : > { %v3286_v61 = vpop.f32.mrb[20].mxu1  ;;  %v3247_v27 = vpop.f32.mrb[21].mxu0 }
 0x124   : > { %v3248_v30 = vadd.f32 %v3247_v27, %v3246_v44  ;;  %v3287_v20 = vpop.f32.mrb[21].mxu1  ;;  %v3249_v58 = vpop.f32.mrb[22].mxu0 }
 0x125   : > { %v3288_v24 = vadd.f32 %v3287_v20, %v3286_v61  ;;  %v3289_v1 = vpop.f32.mrb[22].mxu1  ;;  %v3250_v12 = vpop.f32.mrb[23].mxu0 }
 0x126   : > { %v2377_v9 = vadd.f32 %v3248_v30, %v2312_v13  ;;  %v3251_v14 = vadd.f32 %v3250_v12, %v3249_v58  ;;  %v3290_v41 = vpop.f32.mrb[23].mxu1 }
 0x127   : > { %v3291_v15 = vadd.f32 %v3290_v41, %v3289_v1 }
 0x128   : > { %v2442_v11 = vadd.f32 %v3288_v24, %v2377_v9  ;;  %v2380_v48 = vadd.f32 %v3251_v14, %v4447_v21 }
 0x12a   : > { %v4457_v22 = vadd.f32 %v3291_v15, %v2380_v48  ;;  %v3252_v52 = vpop.f32.mrb[24].mxu0 }
 0x12b   : > { %v3292_v51 = vpop.f32.mrb[24].mxu1  ;;  %v3253_v19 = vpop.f32.mrb[25].mxu0 }
 0x12c   : > { %v3254_v28 = vadd.f32 %v3253_v19, %v3252_v52  ;;  %v3293_v62 = vpop.f32.mrb[25].mxu1  ;;  %v3255_v53 = vpop.f32.mrb[26].mxu0 }
 0x12d   : > { %v3294_v32 = vadd.f32 %v3293_v62, %v3292_v51  ;;  %v3295_v2 = vpop.f32.mrb[26].mxu1  ;;  %v3256_v26 = vpop.f32.mrb[27].mxu0 }
 0x12e   : > { %v2385_v18 = vadd.f32 %v3254_v28, %v2320_v38  ;;  %v3257_v43 = vadd.f32 %v3256_v26, %v3255_v53  ;;  %v3296_v13 = vpop.f32.mrb[27].mxu1 }
 0x12f   : > { %v3297_v45 = vadd.f32 %v3296_v13, %v3295_v2 }
 0x130   : > { %v2450_v3 = vadd.f32 %v3294_v32, %v2385_v18  ;;  %v2388_v6 = vadd.f32 %v3257_v43, %v4449_v57 }
 0x132   : > { %v4460_v0 = vadd.f32 %v3297_v45, %v2388_v6  ;;  %v3258_v21 = vpop.f32.mrb[28].mxu0 }
 0x133   : > { %v3298_v55 = vpop.f32.mrb[28].mxu1  ;;  %v3259_v63 = vpop.f32.mrb[29].mxu0 }
 0x134   : > { %v3260_v33 = vadd.f32 %v3259_v63, %v3258_v21  ;;  %v3299_v8 = vpop.f32.mrb[29].mxu1  ;;  %v3261_v60 = vpop.f32.mrb[30].mxu0 }
 0x135   : > { %v3300_v29 = vadd.f32 %v3299_v8, %v3298_v55  ;;  %v3301_v35 = vpop.f32.mrb[30].mxu1  ;;  %v3262_v5 = vpop.f32.mrb[31].mxu0 }
 0x136   : > { %v2393_v31 = vadd.f32 %v3260_v33, %v2328_v36  ;;  %v3263_v16 = vadd.f32 %v3262_v5, %v3261_v60  ;;  %v3302_v38 = vpop.f32.mrb[31].mxu1 }
 0x137   : > { %v3303_v34 = vadd.f32 %v3302_v38, %v3301_v35 }
 0x138   : > { %v2458_v39 = vadd.f32 %v3300_v29, %v2393_v31  ;;  %v2396_v37 = vadd.f32 %v3263_v16, %v4451_v17 }
 0x13a   : > { %v4463_v23 = vadd.f32 %v3303_v34, %v2396_v37  ;;  %v3320_v57 = vpop.f32.mrb[32].mxu0 }
 0x13b   : > { %v3360_v46 = vpop.f32.mrb[32].mxu1  ;;  %v3321_v47 = vpop.f32.mrb[33].mxu0 }
 0x13c   : > { %v3322_v4 = vadd.f32 %v3321_v47, %v3320_v57  ;;  %v3361_v7 = vpop.f32.mrb[33].mxu1  ;;  %v3323_v50 = vpop.f32.mrb[34].mxu0 }
 0x13d   : > { %v3362_v54 = vadd.f32 %v3361_v7, %v3360_v46  ;;  %v3363_v25 = vpop.f32.mrb[34].mxu1  ;;  %v3324_v10 = vpop.f32.mrb[35].mxu0 }
 0x13e   : > { %v2499_v40 = vadd.f32 %v3322_v4, %v2434_v49  ;;  %v3325_v42 = vadd.f32 %v3324_v10, %v3323_v50  ;;  %v3364_v36 = vpop.f32.mrb[35].mxu1 }
 0x13f   : > { %v3365_v56 = vadd.f32 %v3364_v36, %v3363_v25 }
 0x140   : > { %v2564_v44 = vadd.f32 %v3362_v54, %v2499_v40  ;;  %v2502_v61 = vadd.f32 %v3325_v42, %v4454_v59 }
 0x142   : > { %v2567_v27 = vadd.f32 %v3365_v56, %v2502_v61  ;;  %v3326_v17 = vpop.f32.mrb[36].mxu0 }
 0x143   : > { %v3366_v30 = vpop.f32.mrb[36].mxu1  ;;  %v3327_v20 = vpop.f32.mrb[37].mxu0 }
 0x144   : > { %v3328_v58 = vadd.f32 %v3327_v20, %v3326_v17  ;;  %v3367_v24 = vpop.f32.mrb[37].mxu1  ;;  %v3329_v1 = vpop.f32.mrb[38].mxu0 }
 0x145   : > { %v3368_v12 = vadd.f32 %v3367_v24, %v3366_v30  ;;  %v3369_v9 = vpop.f32.mrb[38].mxu1  ;;  %v3330_v14 = vpop.f32.mrb[39].mxu0 }
 0x146   : > { %v2507_v41 = vadd.f32 %v3328_v58, %v2442_v11  ;;  %v3331_v15 = vadd.f32 %v3330_v14, %v3329_v1  ;;  %v3370_v48 = vpop.f32.mrb[39].mxu1 }
 0x147   : > { %v3371_v49 = vadd.f32 %v3370_v48, %v3369_v9 }
 0x148   : > { %v4466_v52 = vadd.f32 %v3368_v12, %v2507_v41  ;;  %v2510_v51 = vadd.f32 %v3331_v15, %v4457_v22 }
 0x14a   : > { %v4469_v19 = vadd.f32 %v3371_v49, %v2510_v51  ;;  %v3332_v59 = vpop.f32.mrb[40].mxu0 }
 0x14b   : > { %v3372_v28 = vpop.f32.mrb[40].mxu1  ;;  %v3333_v62 = vpop.f32.mrb[41].mxu0 }
 0x14c   : > { %v3334_v53 = vadd.f32 %v3333_v62, %v3332_v59  ;;  %v3373_v32 = vpop.f32.mrb[41].mxu1  ;;  %v3335_v2 = vpop.f32.mrb[42].mxu0 }
 0x14d   : > { %v3374_v26 = vadd.f32 %v3373_v32, %v3372_v28  ;;  %v3375_v18 = vpop.f32.mrb[42].mxu1  ;;  %v3336_v43 = vpop.f32.mrb[43].mxu0 }
 0x14e   : > { %v2515_v13 = vadd.f32 %v3334_v53, %v2450_v3  ;;  %v3337_v11 = vadd.f32 %v3336_v43, %v3335_v2  ;;  %v3376_v45 = vpop.f32.mrb[43].mxu1 }
 0x14f   : > { %v3377_v6 = vadd.f32 %v3376_v45, %v3375_v18 }
 0x150   : > { %v4471_v21 = vadd.f32 %v3374_v26, %v2515_v13  ;;  %v2518_v55 = vadd.f32 %v3337_v11, %v4460_v0 }
 0x152   : > { %v4474_v22 = vadd.f32 %v3377_v6, %v2518_v55  ;;  %v3338_v63 = vpop.f32.mrb[44].mxu0 }
 0x153   : > { %v3378_v33 = vpop.f32.mrb[44].mxu1  ;;  %v3339_v8 = vpop.f32.mrb[45].mxu0 }
 0x154   : > { %v3340_v60 = vadd.f32 %v3339_v8, %v3338_v63  ;;  %v3379_v29 = vpop.f32.mrb[45].mxu1  ;;  %v3341_v35 = vpop.f32.mrb[46].mxu0 }
 0x155   : > { %v3380_v5 = vadd.f32 %v3379_v29, %v3378_v33  ;;  %v3381_v31 = vpop.f32.mrb[46].mxu1  ;;  %v3342_v16 = vpop.f32.mrb[47].mxu0 }
 0x156   : > { %v2523_v38 = vadd.f32 %v3340_v60, %v2458_v39  ;;  %v3343_v3 = vadd.f32 %v3342_v16, %v3341_v35  ;;  %v3382_v34 = vpop.f32.mrb[47].mxu1 }
 0x157   : > { %v3383_v37 = vadd.f32 %v3382_v34, %v3381_v31 }
 0x158   : > { %v4476_v57 = vadd.f32 %v3380_v5, %v2523_v38  ;;  %v2526_v46 = vadd.f32 %v3343_v3, %v4463_v23 }
 0x15a   : > { %v4479_v0 = vadd.f32 %v3383_v37, %v2526_v46  ;;  %v3400_v47 = vpop.f32.mrb[48].mxu0 }
 0x15b   : > { %v3401_v4 = vpop.f32.mrb[49].mxu0  ;;  %v3440_v54 = vpop.f32.mrb[48].mxu1 }
 0x15c   : > { %v3402_v7 = vadd.f32 %v3401_v4, %v3400_v47  ;;  %v3403_v50 = vpop.f32.mrb[50].mxu0  ;;  %v3441_v40 = vpop.f32.mrb[49].mxu1 }
 0x15d   : > { %v3404_v25 = vpop.f32.mrb[51].mxu0  ;;  %v3442_v39 = vadd.f32 %v3441_v40, %v3440_v54  ;;  %v3443_v36 = vpop.f32.mrb[50].mxu1 }
 0x15e   : > { %v2629_v10 = vadd.f32 %v3402_v7, %v2564_v44  ;;  %v3405_v42 = vadd.f32 %v3404_v25, %v3403_v50  ;;  %v3444_v61 = vpop.f32.mrb[51].mxu1 }
 0x15f   : > { %v3445_v30 = vadd.f32 %v3444_v61, %v3443_v36 }
 0x160   : > { %v2632_v56 = vadd.f32 %v3405_v42, %v2567_v27  ;;  %v2694_v17 = vadd.f32 %v3442_v39, %v2629_v10 }
 0x162   : > { %v2732_v20 = vmul.f32 0.2, %v2694_v17  ;;  %v2697_v23 = vadd.f32 %v3445_v30, %v2632_v56  ;;  %v3406_v58 = vpop.f32.mrb[52].mxu0  ;;  %vm2724_vm1 = vcmp.ge.f32.partialorder %v2694_v17, 0.0 }
 0x163   : > { %v3407_v24 = vpop.f32.mrb[53].mxu0  ;;  %v3446_v14 = vpop.f32.mrb[52].mxu1 }
 0x164   : > { %vm2725_vm2 = vcmp.ge.f32.partialorder %v2697_v23, 0.0  ;;  %v2733_v1 = vmul.f32 0.2, %v2697_v23  ;;  %v3408_v12 = vadd.f32 %v3407_v24, %v3406_v58  ;;  %v3409_v9 = vpop.f32.mrb[54].mxu0  ;;  %v2740_v41 = vsel %vm2724_vm1, %v2694_v17, %v2732_v20  ;;  %v3447_v48 = vpop.f32.mrb[53].mxu1 }
 0x165   : > { %v3410_v44 = vpop.f32.mrb[55].mxu0  ;;  %v3448_v59 = vadd.f32 %v3447_v48, %v3446_v14  ;;  %v3449_v28 = vpop.f32.mrb[54].mxu1 }
 0x166   : > { %v2741_v27 = vsel %vm2725_vm2, %v2697_v23, %v2733_v1  ;;  %v2637_v15 = vadd.f32 %v3408_v12, %v4466_v52  ;;  %v3411_v49 = vadd.f32 %v3410_v44, %v3409_v9  ;;  %v3450_v53 = vpop.f32.mrb[55].mxu1 }
 0x167   : > { %v3092_v51 = vpack.c.bf16 %v2741_v27, %v2740_v41  ;;  %v3451_v2 = vadd.f32 %v3450_v53, %v3449_v28 }
 0x168   : > { %v2640_v62 = vadd.f32 %v3411_v49, %v4469_v19  ;;  %v2702_v32 = vadd.f32 %v3448_v59, %v2637_v15 }
 0x169   : > { %3093 = vst [vmem:[%s4485_s9] sm:$0xff] %v3092_v51  }
 0x16a   : > { %v2734_v26 = vmul.f32 0.2, %v2702_v32  ;;  %v2705_v18 = vadd.f32 %v3451_v2, %v2640_v62  ;;  %vm2726_vm3 = vcmp.ge.f32.partialorder %v2702_v32, 0.0  ;;  %v3412_v43 = vpop.f32.mrb[56].mxu0 }
 0x16b   : > { %v3413_v11 = vpop.f32.mrb[57].mxu0  ;;  %v3452_v52 = vpop.f32.mrb[56].mxu1 }
 0x16c   : > { %vm2727_vm4 = vcmp.ge.f32.partialorder %v2705_v18, 0.0  ;;  %v2735_v13 = vmul.f32 0.2, %v2705_v18  ;;  %v3414_v45 = vadd.f32 %v3413_v11, %v3412_v43  ;;  %v3415_v6 = vpop.f32.mrb[58].mxu0  ;;  %v2742_v55 = vsel %vm2726_vm3, %v2702_v32, %v2734_v26  ;;  %v3453_v33 = vpop.f32.mrb[57].mxu1 }
 0x16d   : > { %v3416_v8 = vpop.f32.mrb[59].mxu0  ;;  %v3454_v29 = vadd.f32 %v3453_v33, %v3452_v52  ;;  %v3455_v35 = vpop.f32.mrb[58].mxu1 }
 0x16e   : > { %v2743_v63 = vsel %vm2727_vm4, %v2705_v18, %v2735_v13  ;;  %v2645_v60 = vadd.f32 %v3414_v45, %v4471_v21  ;;  %v3417_v5 = vadd.f32 %v3416_v8, %v3415_v6  ;;  %v3456_v31 = vpop.f32.mrb[59].mxu1 }
 0x16f   : > { %v3097_v19 = vpack.c.bf16 %v2743_v63, %v2742_v55  ;;  %v3457_v3 = vadd.f32 %v3456_v31, %v3455_v35 }
 0x170   : > { %v2710_v16 = vadd.f32 %v3454_v29, %v2645_v60  ;;  %v2648_v38 = vadd.f32 %v3417_v5, %v4474_v22 }
 0x171   : > { %3109 = vst [vmem:[%s4485_s9 + $0x8] sm:$0xff] %v3097_v19  }
 0x172   : > { %vm2728_vm5 = vcmp.ge.f32.partialorder %v2710_v16, 0.0  ;;  %v2736_v34 = vmul.f32 0.2, %v2710_v16  ;;  %v2713_v37 = vadd.f32 %v3457_v3, %v2648_v38  ;;  %v3418_v46 = vpop.f32.mrb[60].mxu0 }
 0x173   : > { %v3419_v47 = vpop.f32.mrb[61].mxu0  ;;  %v3458_v7 = vpop.f32.mrb[60].mxu1 }
 0x174   : > { %vm2729_vm6 = vcmp.ge.f32.partialorder %v2713_v37, 0.0  ;;  %v2737_v4 = vmul.f32 0.2, %v2713_v37  ;;  %v3420_v50 = vadd.f32 %v3419_v47, %v3418_v46  ;;  %v3421_v21 = vpop.f32.mrb[62].mxu0  ;;  %v2744_v54 = vsel %vm2728_vm5, %v2710_v16, %v2736_v34  ;;  %v3459_v25 = vpop.f32.mrb[61].mxu1 }
 0x175   : > { %v3422_v10 = vpop.f32.mrb[63].mxu0  ;;  %v3460_v39 = vadd.f32 %v3459_v25, %v3458_v7  ;;  %v3461_v22 = vpop.f32.mrb[62].mxu1 }
 0x176   : > { %v2745_v40 = vsel %vm2729_vm6, %v2713_v37, %v2737_v4  ;;  %v2653_v42 = vadd.f32 %v3420_v50, %v4476_v57  ;;  %v3423_v36 = vadd.f32 %v3422_v10, %v3421_v21  ;;  %v3462_v61 = vpop.f32.mrb[63].mxu1 }
 0x177   : > { %v3102_v56 = vpack.c.bf16 %v2745_v40, %v2744_v54  ;;  %v3463_v20 = vadd.f32 %v3462_v61, %v3461_v22 }
 0x178   : > { %v2718_v17 = vadd.f32 %v3460_v39, %v2653_v42  ;;  %v2656_v30 = vadd.f32 %v3423_v36, %v4479_v0 }
 0x179   : > { %3110 = vst [vmem:[%s4485_s9 + $0x10] sm:$0xff] %v3102_v56  }
 0x17a   : > { %v2738_v23 = vmul.f32 0.2, %v2718_v17  ;;  %v2721_v58 = vadd.f32 %v3463_v20, %v2656_v30  ;;  %vm2730_vm7 = vcmp.ge.f32.partialorder %v2718_v17, 0.0 }
 0x17c   : > { %vm2731_vm8 = vcmp.ge.f32.partialorder %v2721_v58, 0.0  ;;  %v2739_v24 = vmul.f32 0.2, %v2721_v58  ;;  %v2746_v1 = vsel %vm2730_vm7, %v2718_v17, %v2738_v23 }
 0x17e   : > { %v2747_v12 = vsel %vm2731_vm8, %v2721_v58, %v2739_v24 }
 0x17f   : > { %v3107_v9 = vpack.c.bf16 %v2747_v12, %v2746_v1 }
 0x181   : > { %3111 = vst [vmem:[%s4485_s9 + $0x18] sm:$0xff] %v3107_v9  }
 0x182 PF: > { %s13_s12 = sadd.s32 1, %s3607_s12  }
 0x183   : > { %p10_p4 = scmp.ge.s32.totalorder %s13_s12, 4  }
 0x185   :  { %12 = sbr.rel (!%p10_p4) target bundleno = 1 (0x1), region = 70 }

// kernel: nlayer_discriminator_forward.7
= control target key start
LH: loop header
LB: loop body
LE: loop exit
PB: predicated region body
PF: predicated region fallthrough
CT: control target
= control target key end

     0   :  { %s2476_s12 = smov 0   ;;  %s2922_s0 = inlined_call_operand.vmem [shape: bf16[2,5,5,512], index: 0, kind: input, shape index: {}]   ;;  %s2923_s1 = inlined_call_operand.vmem [shape: bf16[2048,128], index: 1, kind: input, shape index: {}]   ;;  %s2924_s2 = inlined_call_operand.vmem [shape: f32[1,128], index: 2, kind: input, shape index: {}]   ;;  %s2925_s3 = inlined_call_operand.vmem [shape: bf16[2,16,128], index: 3, kind: output, shape index: {}]  }
   0x1 LB: > { %s1958_s13 = sadd.s32 4294967295, %s2454_s12   ;;  %p1962_p0 = scmp.ge.s32.totalorder %s2454_s12, 1  ;;  %s2454_s12 = sphi %s2476_s12, %s13_s12  }
   0x2   : > { %p137_p1 = scmp.lt.s32.totalorder %s2454_s12, 3 }
   0x4   : > { %p138_p2 = pnand %p1962_p0, %p137_p1 }
   0x5   : > { %v2320_v0 = vld [vmem:[%s2923_s1 + $0x40] sm:$0xff] (!%p138_p2)   ;;  %v2324_v4 = vld [vmem:[%s2923_s1 + $0x48] sm:$0xff] (!%p138_p2)   ;;  %v2328_v8 = vld [vmem:[%s2923_s1 + $0x50] sm:$0xff] (!%p138_p2)   ;;  %p161_p3 = scmp.lt.s32.totalorder (!%p138_p2), %s1958_s13, 1 }
   0x6   : > { %141 = sbr.rel (%p138_p2) target bundleno = 362 (0x16a), region = 32  ;;  %v2321_v1 = vld [vmem:[%s2923_s1 + $0xc0] sm:$0xff] (!%p138_p2)   ;;  %2135 = vmatprep.subr.bf16.mxu0 (!%p138_p2), %v2320_v0  ;;  %v2325_v5 = vld [vmem:[%s2923_s1 + $0xc8] sm:$0xff] (!%p138_p2)   ;;  %v2329_v9 = vld [vmem:[%s2923_s1 + $0xd0] sm:$0xff] (!%p138_p2)  }
   0x7   : > { %v2322_v2 = vld [vmem:[%s2923_s1] sm:$0xff] (!%p138_p2)   ;;  %2157 = vmatprep.subr.bf16.mxu1 (!%p138_p2), %v2321_v1  ;;  %v2326_v6 = vld [vmem:[%s2923_s1 + $0x8] sm:$0xff] (!%p138_p2)   ;;  %v2330_v10 = vld [vmem:[%s2923_s1 + $0x10] sm:$0xff] (!%p138_p2)  }
   0x8   : > { %v2323_v3 = vld [vmem:[%s2923_s1 + $0x80] sm:$0xff] (!%p138_p2)   ;;  %2136 = vmatpush3.bf16.msra.mxu0 (!%p138_p2), %v2322_v2  ;;  %v2327_v7 = vld [vmem:[%s2923_s1 + $0x88] sm:$0xff] (!%p138_p2)   ;;  %v2331_v11 = vld [vmem:[%s2923_s1 + $0x90] sm:$0xff] (!%p138_p2)  }
   0x9   : > { %2158 = vmatpush3.bf16.msra.mxu1 (!%p138_p2), %v2323_v3  ;;  %2137 = vmatprep.subr.bf16.mxu0 (!%p138_p2), %v2324_v4  ;;  %v2332_v12 = vld [vmem:[%s2923_s1 + $0x58] sm:$0xff] (!%p138_p2)   ;;  %v2336_v16 = vld [vmem:[%s2923_s1 + $0x60] sm:$0xff] (!%p138_p2)   ;;  %v2340_v20 = vld [vmem:[%s2923_s1 + $0x68] sm:$0xff] (!%p138_p2)  }
   0xa   : > { %2159 = vmatprep.subr.bf16.mxu1 (!%p138_p2), %v2325_v5  ;;  %v2333_v13 = vld [vmem:[%s2923_s1 + $0xd8] sm:$0xff] (!%p138_p2)   ;;  %v2337_v17 = vld [vmem:[%s2923_s1 + $0xe0] sm:$0xff] (!%p138_p2)   ;;  %v2341_v21 = vld [vmem:[%s2923_s1 + $0xe8] sm:$0xff] (!%p138_p2)  }
   0xb   : > { %v2334_v14 = vld [vmem:[%s2923_s1 + $0x18] sm:$0xff] (!%p138_p2)   ;;  %v2338_v18 = vld [vmem:[%s2923_s1 + $0x20] sm:$0xff] (!%p138_p2)   ;;  %v2342_v22 = vld [vmem:[%s2923_s1 + $0x28] sm:$0xff] (!%p138_p2)  }
   0xc   : > { %2138 = vmatpush3.bf16.msra.mxu0 (!%p138_p2), %v2326_v6  ;;  %v2335_v15 = vld [vmem:[%s2923_s1 + $0x98] sm:$0xff] (!%p138_p2)   ;;  %v2339_v19 = vld [vmem:[%s2923_s1 + $0xa0] sm:$0xff] (!%p138_p2)   ;;  %v2343_v23 = vld [vmem:[%s2923_s1 + $0xa8] sm:$0xff] (!%p138_p2)  }
   0xd   : > { %2160 = vmatpush3.bf16.msra.mxu1 %v2327_v7  ;;  %2139 = vmatprep.subr.bf16.mxu0 %v2328_v8  ;;  %s2927_s13 = smov (!%p161_p3, %s1958_s13), 1  ;;  %v2344_v24 = vld [vmem:[%s2923_s1 + $0x70] sm:$0xff]   ;;  %v2348_v28 = vld [vmem:[%s2923_s1 + $0x78] sm:$0xff]   ;;  %v2352_v52 = vld [vmem:[%s2923_s1 + $0x140] sm:$0xff]  }
   0xe   : > { %2161 = vmatprep.subr.bf16.mxu1 %v2329_v9  ;;  %v2345_v25 = vld [vmem:[%s2923_s1 + $0xf0] sm:$0xff]   ;;  %s2311_s16 = smul.u32 80, %s2927_s13  ;;  %v2349_v29 = vld [vmem:[%s2923_s1 + $0xf8] sm:$0xff]   ;;  %v2353_v53 = vld [vmem:[%s2923_s1 + $0x1c0] sm:$0xff]   ;;  %s2127_s6 = sshll.u32 %s2927_s13, 3 }
   0xf   : > { %v2346_v26 = vld [vmem:[%s2923_s1 + $0x30] sm:$0xff]   ;;  %v2350_v30 = vld [vmem:[%s2923_s1 + $0x38] sm:$0xff]   ;;  %v2354_v4 = vld [vmem:[%s2923_s1 + $0x100] sm:$0xff]   ;;  %s170_s9 = scalar_lea.vmem %s2925_s3, %s2127_s6 }
  0x10   : > { %2140 = vmatpush3.bf16.msra.mxu0 %v2330_v10  ;;  %v2347_v27 = vld [vmem:[%s2923_s1 + $0xb0] sm:$0xff]   ;;  %s2584_s27 = scalar_lea.vmem %s2922_s0, %s2311_s16  ;;  %v2351_v31 = vld [vmem:[%s2923_s1 + $0xb8] sm:$0xff]   ;;  %v2356_v9 = vld [vmem:[%s2923_s1 + $0x148] sm:$0xff]  }
  0x11   : > { %2162 = vmatpush3.bf16.msra.mxu1 %v2331_v11  ;;  %2141 = vmatprep.subr.bf16.mxu0 %v2332_v12  ;;  %v172_v32 = vld [vmem:[%s2584_s27] sm:$0x33]  ;;  %v1966_v33 = vld [vmem:[%s2584_s27 + $0x10] sm:$0x33]  ;;  %v173_v40 = vld [vmem:[%s2584_s27 + $0x8] sm:$0x33] }
  0x12   : > { %2163 = vmatprep.subr.bf16.mxu1 %v2333_v13  ;;  %v1968_v34 = vld [vmem:[%s2584_s27 + $0x20] sm:$0x33]  ;;  %v174_v35 = vunpack.c.l.bf16 %v172_v32  ;;  %v175_v36 = vunpack.c.h.bf16 %v172_v32  ;;  %v185_v37 = vunpack.c.l.bf16 %v1966_v33  ;;  %v186_v38 = vunpack.c.h.bf16 %v1966_v33  ;;  %v1970_v39 = vld [vmem:[%s2584_s27 + $0x30] sm:$0x33]  ;;  %v1967_v41 = vld [vmem:[%s2584_s27 + $0x18] sm:$0x33] }
  0x13   : > { %v208_v42 = vunpack.c.l.bf16 %v1968_v34  ;;  %v209_v43 = vunpack.c.h.bf16 %v1968_v34  ;;  %v219_v44 = vunpack.c.l.bf16 %v1970_v39  ;;  %v220_v45 = vunpack.c.h.bf16 %v1970_v39  ;;  %v1969_v46 = vld [vmem:[%s2584_s27 + $0x28] sm:$0x33]  ;;  %v1971_v47 = vld [vmem:[%s2584_s27 + $0x38] sm:$0x33]  ;;  %v2371_v32 = vld [vmem:[%s2923_s1 + $0x1a0] sm:$0xff]  }
  0x14   : > { %2142 = vmatpush3.bf16.msra.mxu0 %v2334_v14  ;;  %178 = vst [vmem:[#allocation2] sm:$0xf] %v174_v35  ;;  %179 = vst [vmem:[#allocation2 + $0x8] sm:$0xf] %v175_v36  ;;  %v193_v48 = vrot.slane %v185_v37, 4  ;;  %v194_v49 = vrot.slane %v186_v38, 4  ;;  %v176_v50 = vunpack.c.l.bf16 %v173_v40  ;;  %v177_v51 = vunpack.c.h.bf16 %v173_v40 }
  0x15   : > { %2164 = vmatpush3.bf16.msra.mxu1 %v2335_v15  ;;  %2143 = vmatprep.subr.bf16.mxu0 %v2336_v16  ;;  %212 = vst [vmem:[#allocation2 + $0x80] sm:$0xf] %v208_v42  ;;  %213 = vst [vmem:[#allocation2 + $0x88] sm:$0xf] %v209_v43  ;;  %v227_v54 = vrot.slane %v219_v44, 4  ;;  %v228_v55 = vrot.slane %v220_v45, 4  ;;  %v187_v56 = vunpack.c.l.bf16 %v1967_v41  ;;  %v188_v57 = vunpack.c.h.bf16 %v1967_v41 }
  0x16   : > { %2165 = vmatprep.subr.bf16.mxu1 %v2337_v17  ;;  %202 = vst [vmem:[#allocation2 + $0x8] sm:$0xf0] %v194_v49  ;;  %201 = vst [vmem:[#allocation2] sm:$0xf0] %v193_v48  ;;  %v210_v58 = vunpack.c.l.bf16 %v1969_v46  ;;  %v211_v59 = vunpack.c.h.bf16 %v1969_v46  ;;  %v221_v60 = vunpack.c.l.bf16 %v1971_v47  ;;  %v222_v61 = vunpack.c.h.bf16 %v1971_v47  ;;  %v2355_v14 = vld [vmem:[%s2923_s1 + $0x180] sm:$0xff]   ;;  %v2357_v17 = vld [vmem:[%s2923_s1 + $0x1c8] sm:$0xff]  }
  0x17   : > { %180 = vst [vmem:[#allocation2 + $0x10] sm:$0xf] %v176_v50  ;;  %181 = vst [vmem:[#allocation2 + $0x18] sm:$0xf] %v177_v51  ;;  %v195_v62 = vrot.slane %v187_v56, 4  ;;  %v196_v63 = vrot.slane %v188_v57, 4 }
  0x18   : > { %2144 = vmatpush3.bf16.msra.mxu0 %v2338_v18  ;;  %236 = vst [vmem:[#allocation2 + $0x88] sm:$0xf0] %v228_v55  ;;  %235 = vst [vmem:[#allocation2 + $0x80] sm:$0xf0] %v227_v54  ;;  %v229_v0 = vrot.slane %v221_v60, 4  ;;  %v230_v1 = vrot.slane %v222_v61, 4 }
  0x19   : > { %2166 = vmatpush3.bf16.msra.mxu1 %v2339_v19  ;;  %2145 = vmatprep.subr.bf16.mxu0 %v2340_v20  ;;  %214 = vst [vmem:[#allocation2 + $0x90] sm:$0xf] %v210_v58  ;;  %215 = vst [vmem:[#allocation2 + $0x98] sm:$0xf] %v211_v59  ;;  %v2358_v18 = vld [vmem:[%s2923_s1 + $0x108] sm:$0xff]   ;;  %v2360_v19 = vld [vmem:[%s2923_s1 + $0x150] sm:$0xff]  }
  0x1a   : > { %2167 = vmatprep.subr.bf16.mxu1 %v2341_v21  ;;  %204 = vst [vmem:[#allocation2 + $0x18] sm:$0xf0] %v196_v63  ;;  %203 = vst [vmem:[#allocation2 + $0x10] sm:$0xf0] %v195_v62  ;;  %v2359_v20 = vld [vmem:[%s2923_s1 + $0x188] sm:$0xff]   ;;  %v2361_v21 = vld [vmem:[%s2923_s1 + $0x1d0] sm:$0xff]  }
  0x1b   : > { %238 = vst [vmem:[#allocation2 + $0x98] sm:$0xf0] %v230_v1  ;;  %237 = vst [vmem:[#allocation2 + $0x90] sm:$0xf0] %v229_v0  ;;  %v2373_v33 = vld [vmem:[%s2923_s1 + $0x1e8] sm:$0xff]   ;;  %v2376_v36 = vld [vmem:[%s2923_s1 + $0x170] sm:$0xff]  }
  0x1c   : > { %2146 = vmatpush3.bf16.msra.mxu0 %v2342_v22  ;;  %v2362_v22 = vld [vmem:[%s2923_s1 + $0x110] sm:$0xff]   ;;  %v2374_v34 = vld [vmem:[%s2923_s1 + $0x128] sm:$0xff]   ;;  %v2380_v39 = vld [vmem:[%s2923_s1 + $0x178] sm:$0xff]  }
  0x1d   : > { %2168 = vmatpush3.bf16.msra.mxu1 %v2343_v23  ;;  %2147 = vmatprep.subr.bf16.mxu0 %v2344_v24  ;;  %v481_v2 = vld [vmem:[#allocation2 + $0x8] sm:$0xff]  ;;  %v480_v3 = vld [vmem:[#allocation2] sm:$0xff]  ;;  %v2364_v23 = vld [vmem:[%s2923_s1 + $0x158] sm:$0xff]  }
  0x1e   : > { %2169 = vmatprep.subr.bf16.mxu1 %v2345_v25  ;;  %v2363_v24 = vld [vmem:[%s2923_s1 + $0x190] sm:$0xff]   ;;  %v2365_v25 = vld [vmem:[%s2923_s1 + $0x1d8] sm:$0xff]   ;;  %v2375_v35 = vld [vmem:[%s2923_s1 + $0x1a8] sm:$0xff]  }
  0x1f   : > { %v497_v5 = vld [vmem:[#allocation2 + $0x88] sm:$0xff]  ;;  %v496_v6 = vld [vmem:[#allocation2 + $0x80] sm:$0xff]  ;;  %v2377_v37 = vld [vmem:[%s2923_s1 + $0x1f0] sm:$0xff]  }
  0x20   : > { %2148 = vmatpush3.bf16.msra.mxu0 %v2346_v26  ;;  %v513_v7 = vpack.c.bf16 %v497_v5, %v481_v2  ;;  %v512_v8 = vpack.c.bf16 %v496_v6, %v480_v3  ;;  %v2366_v26 = vld [vmem:[%s2923_s1 + $0x118] sm:$0xff]   ;;  %v2378_v38 = vld [vmem:[%s2923_s1 + $0x130] sm:$0xff]   ;;  %v239_v40 = vld [vmem:[%s2584_s27] sm:$0x77] }
  0x21   : > { %2170 = vmatpush3.bf16.msra.mxu1 %v2347_v27  ;;  %2149 = vmatprep.subr.bf16.mxu0 %v2348_v28  ;;  %v483_v10 = vld [vmem:[#allocation2 + $0x18] sm:$0xff]  ;;  %v482_v11 = vld [vmem:[#allocation2 + $0x10] sm:$0xff]  ;;  %v2368_v27 = vld [vmem:[%s2923_s1 + $0x160] sm:$0xff]   ;;  %v241_v44 = vunpack.c.l.bf16 %v239_v40  ;;  %v242_v45 = vunpack.c.h.bf16 %v239_v40 }
  0x22   : > { %2171 = vmatprep.subr.bf16.mxu1 %v2349_v29  ;;  %1591 = vmatprep.mubr.bf16.mxu0 %v513_v7  ;;  %v499_v12 = vld [vmem:[#allocation2 + $0x98] sm:$0xff]  ;;  %v498_v13 = vld [vmem:[#allocation2 + $0x90] sm:$0xff]  ;;  %v2369_v29 = vld [vmem:[%s2923_s1 + $0x1e0] sm:$0xff]  }
  0x23   : > { %v515_v15 = vpack.c.bf16 %v499_v12, %v483_v10  ;;  %v514_v16 = vpack.c.bf16 %v498_v13, %v482_v11  ;;  %v2367_v28 = vld [vmem:[%s2923_s1 + $0x198] sm:$0xff]   ;;  %v1972_v41 = vld [vmem:[%s2584_s27 + $0x10] sm:$0x77]  ;;  %v1974_v42 = vld [vmem:[%s2584_s27 + $0x20] sm:$0x77]  ;;  %v249_v58 = vrot.slane %v241_v44, 1 }
  0x24   : > { %2150 = vmatpush3.bf16.msra.mxu0 %v2350_v30  ;;  %v2370_v30 = vld [vmem:[%s2923_s1 + $0x120] sm:$0xff]   ;;  %v2379_v43 = vld [vmem:[%s2923_s1 + $0x1b0] sm:$0xff]   ;;  %v263_v46 = vunpack.c.l.bf16 %v1972_v41  ;;  %v264_v47 = vunpack.c.h.bf16 %v1972_v41  ;;  %v240_v49 = vld [vmem:[%s2584_s27 + $0x8] sm:$0x77]  ;;  %v250_v59 = vrot.slane %v242_v45, 1 }
  0x25   : > { %2172 = vmatpush3.bf16.msra.mxu1 %v2351_v31  ;;  %2179 = vmatprep.subr.bf16.mxu0 %v2352_v52  ;;  %v2372_v31 = vld [vmem:[%s2923_s1 + $0x168] sm:$0xff]   ;;  %v1976_v48 = vld [vmem:[%s2584_s27 + $0x30] sm:$0x77]  ;;  %v1973_v50 = vld [vmem:[%s2584_s27 + $0x18] sm:$0x77]  ;;  %v285_v52 = vunpack.c.l.bf16 %v1974_v42  ;;  %v244_v5 = vunpack.c.h.bf16 %v240_v49 }
  0x26   : > { %2201 = vmatprep.subr.bf16.mxu1 %v2353_v53  ;;  %1632 = vmatprep.mubr.bf16.mxu1 %v515_v15  ;;  %v2381_v51 = vld [vmem:[%s2923_s1 + $0x1f8] sm:$0xff]   ;;  %v286_v53 = vunpack.c.h.bf16 %v1974_v42  ;;  %v307_v54 = vunpack.c.l.bf16 %v1976_v48  ;;  %v308_v55 = vunpack.c.h.bf16 %v1976_v48  ;;  %v1975_v56 = vld [vmem:[%s2584_s27 + $0x28] sm:$0x77]  ;;  %v271_v60 = vrot.slane %v263_v46, 5  ;;  %v2384_v3 = vld [vmem:[%s2923_s1 + $0x240] sm:$0xff]  }
  0x27   : > { %1592 = vmatmul.mubr.bf16.vlgmr.msra.gmra.mrb[0].mxu0 %v512_v8  ;;  %v1977_v57 = vld [vmem:[%s2584_s27 + $0x38] sm:$0x77]  ;;  %v272_v61 = vrot.slane %v264_v47, 5  ;;  %v293_v63 = vrot.slane %v285_v52, 1  ;;  %258 = vst [vmem:[#allocation2 + $0x28] sm:$0xf] %v250_v59  ;;  %v265_v6 = vunpack.c.l.bf16 %v1973_v50  ;;  %v266_v7 = vunpack.c.h.bf16 %v1973_v50 }
  0x28   : > { %2180 = vmatpush3.bf16.msra.mxu0 %v2354_v4  ;;  %1633 = vmatmul.mubr.bf16.vlgmr.msra.gmra.mrb[0].mxu1 %v514_v16  ;;  %v2382_v62 = vld [vmem:[%s2923_s1 + $0x138] sm:$0xff]   ;;  %v294_v0 = vrot.slane %v286_v53, 1  ;;  %v315_v1 = vrot.slane %v307_v54, 5  ;;  %v316_v2 = vrot.slane %v308_v55, 5  ;;  %257 = vst [vmem:[#allocation2 + $0x20] sm:$0xf] %v249_v58  ;;  %v243_v4 = vunpack.c.l.bf16 %v240_v49 }
  0x29   : > { %2181 = vmatprep.subr.bf16.mxu0 %v2356_v9  ;;  %2202 = vmatpush3.bf16.msra.mxu1 %v2355_v14  ;;  %280 = vst [vmem:[#allocation2 + $0x28] sm:$0xf0] %v272_v61  ;;  %279 = vst [vmem:[#allocation2 + $0x20] sm:$0xf0] %v271_v60  ;;  %v2383_v8 = vld [vmem:[%s2923_s1 + $0x1b8] sm:$0xff]   ;;  %v287_v9 = vunpack.c.l.bf16 %v1975_v56  ;;  %v288_v10 = vunpack.c.h.bf16 %v1975_v56  ;;  %v309_v11 = vunpack.c.l.bf16 %v1977_v57  ;;  %v310_v12 = vunpack.c.h.bf16 %v1977_v57  ;;  %v2391_v40 = vld [vmem:[%s2923_s1 + $0x288] sm:$0xff]  }
  0x2a   : > { %2203 = vmatprep.subr.bf16.mxu1 %v2357_v17  ;;  %302 = vst [vmem:[#allocation2 + $0xa8] sm:$0xf] %v294_v0  ;;  %324 = vst [vmem:[#allocation2 + $0xa8] sm:$0xf0] %v316_v2  ;;  %v251_v13 = vrot.slane %v243_v4, 1  ;;  %v252_v14 = vrot.slane %v244_v5, 1 }
  0x2b   : > { %301 = vst [vmem:[#allocation2 + $0xa0] sm:$0xf] %v293_v63  ;;  %323 = vst [vmem:[#allocation2 + $0xa0] sm:$0xf0] %v315_v1  ;;  %v273_v15 = vrot.slane %v265_v6, 5  ;;  %v274_v16 = vrot.slane %v266_v7, 5 }
  0x2c   : > { %2182 = vmatpush3.bf16.msra.mxu0 %v2358_v18  ;;  %v295_v17 = vrot.slane %v287_v9, 1  ;;  %v296_v18 = vrot.slane %v288_v10, 1  ;;  %260 = vst [vmem:[#allocation2 + $0x38] sm:$0xf] %v252_v14  ;;  %259 = vst [vmem:[#allocation2 + $0x30] sm:$0xf] %v251_v13 }
  0x2d   : > { %2183 = vmatprep.subr.bf16.mxu0 %v2360_v19  ;;  %2204 = vmatpush3.bf16.msra.mxu1 %v2359_v20  ;;  %v317_v19 = vrot.slane %v309_v11, 5  ;;  %v318_v20 = vrot.slane %v310_v12, 5  ;;  %282 = vst [vmem:[#allocation2 + $0x38] sm:$0xf0] %v274_v16  ;;  %281 = vst [vmem:[#allocation2 + $0x30] sm:$0xf0] %v273_v15 }
  0x2e   : > { %2205 = vmatprep.subr.bf16.mxu1 %v2361_v21  ;;  %v2385_v21 = vld [vmem:[%s2923_s1 + $0x2c0] sm:$0xff]   ;;  %304 = vst [vmem:[#allocation2 + $0xb8] sm:$0xf] %v296_v18  ;;  %303 = vst [vmem:[#allocation2 + $0xb0] sm:$0xf] %v295_v17  ;;  %v2393_v41 = vld [vmem:[%s2923_s1 + $0x2d0] sm:$0xff]  }
  0x2f   : > { %326 = vst [vmem:[#allocation2 + $0xb8] sm:$0xf0] %v318_v20  ;;  %325 = vst [vmem:[#allocation2 + $0xb0] sm:$0xf0] %v317_v19  ;;  %v2394_v42 = vld [vmem:[%s2923_s1 + $0x210] sm:$0xff]   ;;  %v2397_v45 = vld [vmem:[%s2923_s1 + $0x2d8] sm:$0xff]  }
  0x30   : > { %2184 = vmatpush3.bf16.msra.mxu0 %v2362_v22  ;;  %v485_v22 = vld [vmem:[#allocation2 + $0x28] sm:$0xff]  ;;  %v2395_v44 = vld [vmem:[%s2923_s1 + $0x290] sm:$0xff]   ;;  %v2398_v46 = vld [vmem:[%s2923_s1 + $0x218] sm:$0xff]  }
  0x31   : > { %2185 = vmatprep.subr.bf16.mxu0 %v2364_v23  ;;  %2206 = vmatpush3.bf16.msra.mxu1 %v2363_v24  ;;  %v484_v23 = vld [vmem:[#allocation2 + $0x20] sm:$0xff]  ;;  %v501_v24 = vld [vmem:[#allocation2 + $0xa8] sm:$0xff]  ;;  %v2399_v48 = vld [vmem:[%s2923_s1 + $0x298] sm:$0xff]  }
  0x32   : > { %2207 = vmatprep.subr.bf16.mxu1 %v2365_v25  ;;  %v500_v25 = vld [vmem:[#allocation2 + $0xa0] sm:$0xff]  ;;  %v2405_v53 = vld [vmem:[%s2923_s1 + $0x2e8] sm:$0xff]   ;;  %v2408_v55 = vld [vmem:[%s2923_s1 + $0x270] sm:$0xff]  }
  0x33   : > { %v2400_v47 = vld [vmem:[%s2923_s1 + $0x260] sm:$0xff]   ;;  %v2406_v54 = vld [vmem:[%s2923_s1 + $0x228] sm:$0xff]   ;;  %v2409_v57 = vld [vmem:[%s2923_s1 + $0x2f0] sm:$0xff]  }
  0x34   : > { %2186 = vmatpush3.bf16.msra.mxu0 %v2366_v26  ;;  %v517_v26 = vpack.c.bf16 %v501_v24, %v485_v22  ;;  %v2401_v49 = vld [vmem:[%s2923_s1 + $0x2e0] sm:$0xff]   ;;  %v2407_v56 = vld [vmem:[%s2923_s1 + $0x2a8] sm:$0xff]   ;;  %v2410_v58 = vld [vmem:[%s2923_s1 + $0x230] sm:$0xff]  }
  0x35   : > { %2187 = vmatprep.subr.bf16.mxu0 %v2368_v27  ;;  %2208 = vmatpush3.bf16.msra.mxu1 %v2367_v28  ;;  %v516_v27 = vpack.c.bf16 %v500_v25, %v484_v23  ;;  %v2386_v28 = vld [vmem:[%s2923_s1 + $0x200] sm:$0xff]   ;;  %v2412_v59 = vld [vmem:[%s2923_s1 + $0x278] sm:$0xff]   ;;  %v1978_v60 = vld [vmem:[%s2584_s27 + $0x10] sm:$0x33] }
  0x36   : > { %2209 = vmatprep.subr.bf16.mxu1 %v2369_v29  ;;  %v2388_v29 = vld [vmem:[%s2923_s1 + $0x248] sm:$0xff]   ;;  %1673 = vmatprep.mubr.bf16.mxu0 %v517_v26  ;;  %v2402_v50 = vld [vmem:[%s2923_s1 + $0x220] sm:$0xff]   ;;  %v2414_v63 = vld [vmem:[%s2923_s1 + $0x238] sm:$0xff]   ;;  %v329_v0 = vunpack.c.l.bf16 %v1978_v60  ;;  %v330_v1 = vunpack.c.h.bf16 %v1978_v60 }
  0x37   : > { %v2403_v52 = vld [vmem:[%s2923_s1 + $0x2a0] sm:$0xff]   ;;  %v1982_v4 = vld [vmem:[%s2584_s27 + $0x30] sm:$0x33]  ;;  %v1979_v6 = vld [vmem:[%s2584_s27 + $0x18] sm:$0x33] }
  0x38   : > { %2188 = vmatpush3.bf16.msra.mxu0 %v2370_v30  ;;  %v487_v30 = vld [vmem:[#allocation2 + $0x38] sm:$0xff]  ;;  %v1980_v61 = vld [vmem:[%s2584_s27 + $0x20] sm:$0x33]  ;;  %v361_v7 = vunpack.c.l.bf16 %v1982_v4  ;;  %v1981_v11 = vld [vmem:[%s2584_s27 + $0x28] sm:$0x33]  ;;  %v331_v16 = vunpack.c.l.bf16 %v1979_v6  ;;  %v332_v17 = vunpack.c.h.bf16 %v1979_v6 }
  0x39   : > { %2189 = vmatprep.subr.bf16.mxu0 %v2372_v31  ;;  %2210 = vmatpush3.bf16.msra.mxu1 %v2371_v32  ;;  %v486_v31 = vld [vmem:[#allocation2 + $0x30] sm:$0xff]  ;;  %v2387_v32 = vld [vmem:[%s2923_s1 + $0x280] sm:$0xff]   ;;  %v339_v2 = vunpack.c.l.bf16 %v1980_v61  ;;  %v1983_v12 = vld [vmem:[%s2584_s27 + $0x38] sm:$0x33]  ;;  %333 = vst [vmem:[#allocation2 + $0x40] sm:$0xf] %v329_v0  ;;  %v342_v22 = vunpack.c.h.bf16 %v1981_v11 }
  0x3a   : > { %2211 = vmatprep.subr.bf16.mxu1 %v2373_v33  ;;  %v503_v33 = vld [vmem:[#allocation2 + $0xb8] sm:$0xff]  ;;  %v1984_v5 = vld [vmem:[%s2584_s27 + $0x40] sm:$0x33]  ;;  %v1985_v13 = vld [vmem:[%s2584_s27 + $0x48] sm:$0x33]  ;;  %v363_v24 = vunpack.c.l.bf16 %v1983_v12  ;;  %v364_v25 = vunpack.c.h.bf16 %v1983_v12 }
  0x3b   : > { %v372_v9 = vunpack.c.l.bf16 %v1984_v5  ;;  %v373_v10 = vunpack.c.h.bf16 %v1984_v5  ;;  %334 = vst [vmem:[#allocation2 + $0x48] sm:$0xf] %v330_v1  ;;  %v347_v14 = vrot.slane %v339_v2, 4  ;;  %v2413_v18 = vld [vmem:[%s2923_s1 + $0x2f8] sm:$0xff]   ;;  %365 = vst [vmem:[#allocation2 + $0xc0] sm:$0xf] %v361_v7  ;;  %v374_v26 = vunpack.c.l.bf16 %v1985_v13 }
  0x3c   : > { %2190 = vmatpush3.bf16.msra.mxu0 %v2374_v34  ;;  %v502_v34 = vld [vmem:[#allocation2 + $0xb0] sm:$0xff]  ;;  %v2416_v23 = vld [vmem:[%s2923_s1 + $0x340] sm:$0xff]   ;;  %335 = vst [vmem:[#allocation2 + $0x50] sm:$0xf] %v331_v16  ;;  %336 = vst [vmem:[#allocation2 + $0x58] sm:$0xf] %v332_v17 }
  0x3d   : > { %2191 = vmatprep.subr.bf16.mxu0 %v2376_v36  ;;  %2212 = vmatpush3.bf16.msra.mxu1 %v2375_v35  ;;  %v2389_v35 = vld [vmem:[%s2923_s1 + $0x2c8] sm:$0xff]   ;;  %v519_v36 = vpack.c.bf16 %v503_v33, %v487_v30  ;;  %v380_v19 = vrot.slane %v372_v9, 4  ;;  %v381_v20 = vrot.slane %v373_v10, 4  ;;  %355 = vst [vmem:[#allocation2 + $0x40] sm:$0xf0] %v347_v14  ;;  %v350_v30 = vrot.slane %v342_v22, 4 }
  0x3e   : > { %2213 = vmatprep.subr.bf16.mxu1 %v2377_v37  ;;  %v518_v37 = vpack.c.bf16 %v502_v34, %v486_v31  ;;  %367 = vst [vmem:[#allocation2 + $0xd0] sm:$0xf] %v363_v24  ;;  %368 = vst [vmem:[#allocation2 + $0xd8] sm:$0xf] %v364_v25  ;;  %v382_v31 = vrot.slane %v374_v26, 4  ;;  %v2417_v33 = vld [vmem:[%s2923_s1 + $0x3c0] sm:$0xff]  }
  0x3f   : > { %1714 = vmatprep.mubr.bf16.mxu1 %v519_v36  ;;  %389 = vst [vmem:[#allocation2 + $0xc8] sm:$0xf0] %v381_v20  ;;  %388 = vst [vmem:[#allocation2 + $0xc0] sm:$0xf0] %v380_v19  ;;  %v2431_v60 = vld [vmem:[%s2923_s1 + $0x398] sm:$0xff]   ;;  %v2435_v0 = vld [vmem:[%s2923_s1 + $0x3a0] sm:$0xff]  }
  0x40   : > { %2192 = vmatpush3.bf16.msra.mxu0 %v2378_v38  ;;  %v2390_v38 = vld [vmem:[%s2923_s1 + $0x208] sm:$0xff]   ;;  %358 = vst [vmem:[#allocation2 + $0x58] sm:$0xf0] %v350_v30  ;;  %390 = vst [vmem:[#allocation2 + $0xd0] sm:$0xf0] %v382_v31  ;;  %v2441_v5 = vld [vmem:[%s2923_s1 + $0x3f0] sm:$0xff]  }
  0x41   : > { %2193 = vmatprep.subr.bf16.mxu0 %v2380_v39  ;;  %2214 = vmatpush3.bf16.msra.mxu1 %v2379_v43  ;;  %v2392_v39 = vld [vmem:[%s2923_s1 + $0x250] sm:$0xff]   ;;  %v2396_v43 = vld [vmem:[%s2923_s1 + $0x258] sm:$0xff]   ;;  %v2437_v1 = vld [vmem:[%s2923_s1 + $0x3e8] sm:$0xff]  }
  0x42   : > { %2215 = vmatprep.subr.bf16.mxu1 %v2381_v51  ;;  %v2404_v51 = vld [vmem:[%s2923_s1 + $0x268] sm:$0xff]   ;;  %v2442_v6 = vld [vmem:[%s2923_s1 + $0x330] sm:$0xff]   ;;  %v2444_v10 = vld [vmem:[%s2923_s1 + $0x378] sm:$0xff]  }
  0x43   : > { %v2438_v2 = vld [vmem:[%s2923_s1 + $0x328] sm:$0xff]   ;;  %v1986_v7 = vld [vmem:[%s2584_s27 + $0x10] sm:$0x77]  ;;  %v1992_v16 = vld [vmem:[%s2584_s27 + $0x40] sm:$0x77] }
  0x44   : > { %2194 = vmatpush3.bf16.msra.mxu0 %v2382_v62  ;;  %v2411_v62 = vld [vmem:[%s2923_s1 + $0x2b0] sm:$0xff]   ;;  %v395_v12 = vunpack.c.h.bf16 %v1986_v7  ;;  %v460_v19 = vunpack.c.l.bf16 %v1992_v16  ;;  %v461_v20 = vunpack.c.h.bf16 %v1992_v16  ;;  %v1989_v22 = vld [vmem:[%s2584_s27 + $0x28] sm:$0x77]  ;;  %v2446_v30 = vld [vmem:[%s2923_s1 + $0x338] sm:$0xff]  }
  0x45   : > { %2223 = vmatprep.subr.bf16.mxu0 %v2384_v3  ;;  %2216 = vmatpush3.bf16.msra.mxu1 %v2383_v8  ;;  %v340_v3 = vunpack.c.h.bf16 %v1980_v61  ;;  %v362_v8 = vunpack.c.h.bf16 %v1982_v4  ;;  %v2433_v61 = vld [vmem:[%s2923_s1 + $0x3e0] sm:$0xff]   ;;  %v2439_v4 = vld [vmem:[%s2923_s1 + $0x3a8] sm:$0xff]   ;;  %v2443_v9 = vld [vmem:[%s2923_s1 + $0x3b0] sm:$0xff]  }
  0x46   : > { %2245 = vmatprep.subr.bf16.mxu1 %v2385_v21  ;;  %v341_v21 = vunpack.c.l.bf16 %v1981_v11  ;;  %v394_v11 = vunpack.c.l.bf16 %v1986_v7  ;;  %v403_v25 = vrot.slane %v395_v12, 1 }
  0x47   : > { %1674 = vmatmul.mubr.bf16.vlgmr.msra.gmra.mrb[4].mxu0 %v516_v27  ;;  %v348_v15 = vrot.slane %v340_v3, 4  ;;  %366 = vst [vmem:[#allocation2 + $0xc8] sm:$0xf] %v362_v8  ;;  %v375_v27 = vunpack.c.h.bf16 %v1985_v13  ;;  %v2440_v3 = vld [vmem:[%s2923_s1 + $0x370] sm:$0xff]   ;;  %v1988_v8 = vld [vmem:[%s2584_s27 + $0x20] sm:$0x77] }
  0x48   : > { %2224 = vmatpush3.bf16.msra.mxu0 %v2386_v28  ;;  %1715 = vmatmul.mubr.bf16.vlgmr.msra.gmra.mrb[4].mxu1 %v518_v37  ;;  %v2415_v28 = vld [vmem:[%s2923_s1 + $0x2b8] sm:$0xff]   ;;  %v504_v37 = vld [vmem:[#allocation2 + $0xc0] sm:$0xff]  ;;  %v416_v13 = vunpack.c.l.bf16 %v1988_v8  ;;  %v417_v14 = vunpack.c.h.bf16 %v1988_v8  ;;  %v402_v24 = vrot.slane %v394_v11, 1  ;;  %411 = vst [vmem:[#allocation2 + $0x68] sm:$0xf] %v403_v25 }
  0x49   : > { %2225 = vmatprep.subr.bf16.mxu0 %v2388_v29  ;;  %2246 = vmatpush3.bf16.msra.mxu1 %v2387_v32  ;;  %356 = vst [vmem:[#allocation2 + $0x48] sm:$0xf0] %v348_v15  ;;  %v349_v29 = vrot.slane %v341_v21, 4  ;;  %v383_v32 = vrot.slane %v375_v27, 4  ;;  %v1990_v15 = vld [vmem:[%s2584_s27 + $0x30] sm:$0x77] }
  0x4a   : > { %2247 = vmatprep.subr.bf16.mxu1 %v2389_v35  ;;  %v488_v35 = vld [vmem:[#allocation2 + $0x40] sm:$0xff]  ;;  %v438_v17 = vunpack.c.l.bf16 %v1990_v15  ;;  %v1987_v21 = vld [vmem:[%s2584_s27 + $0x18] sm:$0x77]  ;;  %v424_v26 = vrot.slane %v416_v13, 5  ;;  %v425_v27 = vrot.slane %v417_v14, 5 }
  0x4b   : > { %357 = vst [vmem:[#allocation2 + $0x50] sm:$0xf0] %v349_v29  ;;  %391 = vst [vmem:[#allocation2 + $0xd8] sm:$0xf0] %v383_v32  ;;  %v2445_v29 = vld [vmem:[%s2923_s1 + $0x3f8] sm:$0xff]  }
  0x4c   : > { %2226 = vmatpush3.bf16.msra.mxu0 %v2390_v38  ;;  %v2418_v38 = vld [vmem:[%s2923_s1 + $0x300] sm:$0xff]   ;;  %v446_v31 = vrot.slane %v438_v17, 1  ;;  %433 = vst [vmem:[#allocation2 + $0x68] sm:$0xf0] %v425_v27  ;;  %410 = vst [vmem:[#allocation2 + $0x60] sm:$0xf] %v402_v24 }
  0x4d   : > { %2227 = vmatprep.subr.bf16.mxu0 %v2392_v39  ;;  %2248 = vmatpush3.bf16.msra.mxu1 %v2391_v40  ;;  %v520_v40 = vpack.c.bf16 %v504_v37, %v488_v35  ;;  %432 = vst [vmem:[#allocation2 + $0x60] sm:$0xf0] %v424_v26  ;;  %v396_v35 = vunpack.c.l.bf16 %v1987_v21  ;;  %v418_v37 = vunpack.c.l.bf16 %v1989_v22 }
  0x4e   : > { %2249 = vmatprep.subr.bf16.mxu1 %v2393_v41  ;;  %v505_v36 = vld [vmem:[#allocation2 + $0xc8] sm:$0xff]  ;;  %454 = vst [vmem:[#allocation2 + $0xe0] sm:$0xf] %v446_v31 }
  0x4f   : > { %v2420_v41 = vld [vmem:[%s2923_s1 + $0x348] sm:$0xff]  }
  0x50   : > { %2228 = vmatpush3.bf16.msra.mxu0 %v2394_v42  ;;  %v489_v34 = vld [vmem:[#allocation2 + $0x48] sm:$0xff]  ;;  %v491_v42 = vld [vmem:[#allocation2 + $0x58] sm:$0xff] }
  0x51   : > { %2229 = vmatprep.subr.bf16.mxu0 %v2396_v43  ;;  %2250 = vmatpush3.bf16.msra.mxu1 %v2395_v44  ;;  %v521_v39 = vpack.c.bf16 %v505_v36, %v489_v34  ;;  %v2419_v44 = vld [vmem:[%s2923_s1 + $0x380] sm:$0xff]   ;;  %v469_v34 = vrot.slane %v461_v20, 5  ;;  %v397_v36 = vunpack.c.h.bf16 %v1987_v21 }
  0x52   : > { %2251 = vmatprep.subr.bf16.mxu1 %v2397_v45  ;;  %v490_v43 = vld [vmem:[#allocation2 + $0x50] sm:$0xff]  ;;  %v507_v45 = vld [vmem:[#allocation2 + $0xd8] sm:$0xff] }
  0x53   : > { %1755 = vmatprep.mubr.bf16.mxu0 %v521_v39  ;;  %477 = vst [vmem:[#allocation2 + $0xe8] sm:$0xf0] %v469_v34 }
  0x54   : > { %2230 = vmatpush3.bf16.msra.mxu0 %v2398_v46  ;;  %v506_v46 = vld [vmem:[#allocation2 + $0xd0] sm:$0xff] }
  0x55   : > { %2231 = vmatprep.subr.bf16.mxu0 %v2400_v47  ;;  %2252 = vmatpush3.bf16.msra.mxu1 %v2399_v48  ;;  %v523_v47 = vpack.c.bf16 %v507_v45, %v491_v42  ;;  %v522_v48 = vpack.c.bf16 %v506_v46, %v490_v43  ;;  %v2447_v43 = vld [vmem:[%s2923_s1 + $0x3b8] sm:$0xff]   ;;  %v405_v45 = vrot.slane %v397_v36, 1  ;;  %v426_v46 = vrot.slane %v418_v37, 5 }
  0x56   : > { %2253 = vmatprep.subr.bf16.mxu1 %v2401_v49  ;;  %v2421_v49 = vld [vmem:[%s2923_s1 + $0x3c8] sm:$0xff]  }
  0x57   : > { %1796 = vmatprep.mubr.bf16.mxu1 %v523_v47  ;;  %413 = vst [vmem:[#allocation2 + $0x78] sm:$0xf] %v405_v45  ;;  %434 = vst [vmem:[#allocation2 + $0x70] sm:$0xf0] %v426_v46 }
  0x58   : > { %2232 = vmatpush3.bf16.msra.mxu0 %v2402_v50  ;;  %v2422_v50 = vld [vmem:[%s2923_s1 + $0x308] sm:$0xff]  }
  0x59   : > { %2233 = vmatprep.subr.bf16.mxu0 %v2404_v51  ;;  %2254 = vmatpush3.bf16.msra.mxu1 %v2403_v52  ;;  %v2424_v51 = vld [vmem:[%s2923_s1 + $0x350] sm:$0xff]   ;;  %v2423_v52 = vld [vmem:[%s2923_s1 + $0x388] sm:$0xff]  }
  0x5a   : > { %2255 = vmatprep.subr.bf16.mxu1 %v2405_v53  ;;  %v2425_v53 = vld [vmem:[%s2923_s1 + $0x3d0] sm:$0xff]  }
  0x5c   : > { %2234 = vmatpush3.bf16.msra.mxu0 %v2406_v54  ;;  %v2426_v54 = vld [vmem:[%s2923_s1 + $0x310] sm:$0xff]  }
  0x5d   : > { %2235 = vmatprep.subr.bf16.mxu0 %v2408_v55  ;;  %2256 = vmatpush3.bf16.msra.mxu1 %v2407_v56  ;;  %v2428_v55 = vld [vmem:[%s2923_s1 + $0x358] sm:$0xff]   ;;  %v2427_v56 = vld [vmem:[%s2923_s1 + $0x390] sm:$0xff]  }
  0x5e   : > { %2257 = vmatprep.subr.bf16.mxu1 %v2409_v57  ;;  %v2429_v57 = vld [vmem:[%s2923_s1 + $0x3d8] sm:$0xff]  }
  0x60   : > { %2236 = vmatpush3.bf16.msra.mxu0 %v2410_v58  ;;  %v2430_v58 = vld [vmem:[%s2923_s1 + $0x318] sm:$0xff]  }
  0x61   : > { %2237 = vmatprep.subr.bf16.mxu0 %v2412_v59  ;;  %2258 = vmatpush3.bf16.msra.mxu1 %v2411_v62  ;;  %v2432_v59 = vld [vmem:[%s2923_s1 + $0x360] sm:$0xff]  }
  0x62   : > { %2259 = vmatprep.subr.bf16.mxu1 %v2413_v18  ;;  %v2434_v62 = vld [vmem:[%s2923_s1 + $0x320] sm:$0xff]   ;;  %v439_v18 = vunpack.c.h.bf16 %v1990_v15 }
  0x64   : > { %2238 = vmatpush3.bf16.msra.mxu0 %v2414_v63  ;;  %v2436_v63 = vld [vmem:[%s2923_s1 + $0x368] sm:$0xff]   ;;  %v447_v32 = vrot.slane %v439_v18, 1 }
  0x65   : > { %2267 = vmatprep.subr.bf16.mxu0 %v2416_v23  ;;  %2260 = vmatpush3.bf16.msra.mxu1 %v2415_v28  ;;  %v1991_v23 = vld [vmem:[%s2584_s27 + $0x38] sm:$0x77]  ;;  %v1993_v28 = vld [vmem:[%s2584_s27 + $0x48] sm:$0x77] }
  0x66   : > { %2289 = vmatprep.subr.bf16.mxu1 %v2417_v33  ;;  %v468_v33 = vrot.slane %v460_v19, 5  ;;  %455 = vst [vmem:[#allocation2 + $0xe8] sm:$0xf] %v447_v32  ;;  %v440_v39 = vunpack.c.l.bf16 %v1991_v23  ;;  %v463_v42 = vunpack.c.h.bf16 %v1993_v28 }
  0x67   : > { %1756 = vmatmul.mubr.bf16.vlgmr.msra.gmra.mrb[8].mxu0 %v520_v40  ;;  %v441_v40 = vunpack.c.h.bf16 %v1991_v23 }
  0x68   : > { %2268 = vmatpush3.bf16.msra.mxu0 %v2418_v38  ;;  %1797 = vmatmul.mubr.bf16.vlgmr.msra.gmra.mrb[8].mxu1 %v522_v48  ;;  %v419_v38 = vunpack.c.h.bf16 %v1989_v22  ;;  %476 = vst [vmem:[#allocation2 + $0xe0] sm:$0xf0] %v468_v33  ;;  %v448_v48 = vrot.slane %v440_v39, 1 }
  0x69   : > { %2269 = vmatprep.subr.bf16.mxu0 %v2420_v41  ;;  %2290 = vmatpush3.bf16.msra.mxu1 %v2419_v44  ;;  %v462_v41 = vunpack.c.l.bf16 %v1993_v28  ;;  %v404_v44 = vrot.slane %v396_v35, 1 }
  0x6a   : > { %2291 = vmatprep.subr.bf16.mxu1 %v2421_v49  ;;  %v427_v47 = vrot.slane %v419_v38, 5  ;;  %v449_v49 = vrot.slane %v441_v40, 1  ;;  %456 = vst [vmem:[#allocation2 + $0xf0] sm:$0xf] %v448_v48 }
  0x6b   : > { %412 = vst [vmem:[#allocation2 + $0x70] sm:$0xf] %v404_v44 }
  0x6c   : > { %2270 = vmatpush3.bf16.msra.mxu0 %v2422_v50  ;;  %v470_v50 = vrot.slane %v462_v41, 5  ;;  %435 = vst [vmem:[#allocation2 + $0x78] sm:$0xf0] %v427_v47  ;;  %457 = vst [vmem:[#allocation2 + $0xf8] sm:$0xf] %v449_v49 }
  0x6d   : > { %2271 = vmatprep.subr.bf16.mxu0 %v2424_v51  ;;  %2292 = vmatpush3.bf16.msra.mxu1 %v2423_v52  ;;  %v471_v51 = vrot.slane %v463_v42, 5  ;;  %v493_v52 = vld [vmem:[#allocation2 + $0x68] sm:$0xff] }
  0x6e   : > { %2293 = vmatprep.subr.bf16.mxu1 %v2425_v53  ;;  %478 = vst [vmem:[#allocation2 + $0xf0] sm:$0xf0] %v470_v50  ;;  %v492_v53 = vld [vmem:[#allocation2 + $0x60] sm:$0xff] }
  0x6f   : > { %479 = vst [vmem:[#allocation2 + $0xf8] sm:$0xf0] %v471_v51 }
  0x70   : > { %2272 = vmatpush3.bf16.msra.mxu0 %v2426_v54  ;;  %v509_v54 = vld [vmem:[#allocation2 + $0xe8] sm:$0xff] }
  0x71   : > { %2273 = vmatprep.subr.bf16.mxu0 %v2428_v55  ;;  %2294 = vmatpush3.bf16.msra.mxu1 %v2427_v56  ;;  %v508_v55 = vld [vmem:[#allocation2 + $0xe0] sm:$0xff]  ;;  %v525_v56 = vpack.c.bf16 %v509_v54, %v493_v52 }
  0x72   : > { %2295 = vmatprep.subr.bf16.mxu1 %v2429_v57  ;;  %v524_v57 = vpack.c.bf16 %v508_v55, %v492_v53 }
  0x73   : > { %1837 = vmatprep.mubr.bf16.mxu0 %v525_v56 }
  0x74   : > { %2274 = vmatpush3.bf16.msra.mxu0 %v2430_v58  ;;  %v495_v58 = vld [vmem:[#allocation2 + $0x78] sm:$0xff] }
  0x75   : > { %2275 = vmatprep.subr.bf16.mxu0 %v2432_v59  ;;  %2296 = vmatpush3.bf16.msra.mxu1 %v2431_v60  ;;  %v494_v59 = vld [vmem:[#allocation2 + $0x70] sm:$0xff] }
  0x76   : > { %2297 = vmatprep.subr.bf16.mxu1 %v2433_v61  ;;  %v511_v60 = vld [vmem:[#allocation2 + $0xf8] sm:$0xff]  ;;  %v510_v61 = vld [vmem:[#allocation2 + $0xf0] sm:$0xff] }
  0x78   : > { %2276 = vmatpush3.bf16.msra.mxu0 %v2434_v62  ;;  %v527_v62 = vpack.c.bf16 %v511_v60, %v495_v58 }
  0x79   : > { %2277 = vmatprep.subr.bf16.mxu0 %v2436_v63  ;;  %2298 = vmatpush3.bf16.msra.mxu1 %v2435_v0  ;;  %v526_v63 = vpack.c.bf16 %v510_v61, %v494_v59 }
  0x7a   : > { %2299 = vmatprep.subr.bf16.mxu1 %v2437_v1  ;;  %1878 = vmatprep.mubr.bf16.mxu1 %v527_v62  ;;  %v1994_v1 = vld [vmem:[%s2924_s2] ss:$0 sm:$0xff] }
  0x7c   : > { %2278 = vmatpush3.bf16.msra.mxu0 %v2438_v2 }
  0x7d   : > { %2279 = vmatprep.subr.bf16.mxu0 %v2440_v3  ;;  %2300 = vmatpush3.bf16.msra.mxu1 %v2439_v4 }
  0x7e   : > { %2301 = vmatprep.subr.bf16.mxu1 %v2441_v5 }
  0x80   : > { %2280 = vmatpush3.bf16.msra.mxu0 %v2442_v6 }
  0x81   : > { %2281 = vmatprep.subr.bf16.mxu0 %v2444_v10  ;;  %2302 = vmatpush3.bf16.msra.mxu1 %v2443_v9 }
  0x82   : > { %2303 = vmatprep.subr.bf16.mxu1 %v2445_v29 }
  0x84   : > { %2282 = vmatpush3.bf16.msra.mxu0 %v2446_v30 }
  0x85   : > { %2304 = vmatpush3.bf16.msra.mxu1 %v2447_v43 }
  0x87   : > { %1838 = vmatmul.mubr.bf16.vlgmr.msra.gmra.mrb[12].mxu0 %v524_v57 }
  0x88   : > { %1879 = vmatmul.mubr.bf16.vlgmr.msra.gmra.mrb[12].mxu1 %v526_v63 }
  0xfa   : > { %v2151_v0 = vpop.f32.mrb[0].mxu0 }
  0xfb   : > { %v2152_v2 = vpop.f32.mrb[1].mxu0  ;;  %v2173_v5 = vpop.f32.mrb[0].mxu1 }
  0xfc   : > { %v2153_v3 = vadd.f32 %v2152_v2, %v2151_v0  ;;  %v2154_v4 = vpop.f32.mrb[2].mxu0  ;;  %v2174_v8 = vpop.f32.mrb[1].mxu1 }
  0xfd   : > { %v2155_v6 = vpop.f32.mrb[3].mxu0  ;;  %v2175_v10 = vadd.f32 %v2174_v8, %v2173_v5  ;;  %v2176_v11 = vpop.f32.mrb[2].mxu1 }
  0xfe   : > { %v1594_v7 = vadd.f32 %v2153_v3, %v1994_v1  ;;  %v2156_v9 = vadd.f32 %v2155_v6, %v2154_v4  ;;  %v2177_v13 = vpop.f32.mrb[3].mxu1 }
  0xff   : > { %v2178_v15 = vadd.f32 %v2177_v13, %v2176_v11 }
 0x100   : > { %v1597_v12 = vadd.f32 %v2156_v9, %v1994_v1  ;;  %v1635_v14 = vadd.f32 %v2175_v10, %v1594_v7 }
 0x102   : > { %v1638_v16 = vadd.f32 %v2178_v15, %v1597_v12 }
 0x11a   : > { %v2195_v17 = vpop.f32.mrb[4].mxu0 }
 0x11b   : > { %v2196_v18 = vpop.f32.mrb[5].mxu0  ;;  %v2217_v22 = vpop.f32.mrb[4].mxu1 }
 0x11c   : > { %v2197_v19 = vadd.f32 %v2196_v18, %v2195_v17  ;;  %v2198_v20 = vpop.f32.mrb[6].mxu0  ;;  %v2218_v25 = vpop.f32.mrb[5].mxu1 }
 0x11d   : > { %v2199_v21 = vpop.f32.mrb[7].mxu0  ;;  %v2219_v26 = vadd.f32 %v2218_v25, %v2217_v22  ;;  %v2220_v27 = vpop.f32.mrb[6].mxu1 }
 0x11e   : > { %v1676_v23 = vadd.f32 %v2197_v19, %v1635_v14  ;;  %v2200_v24 = vadd.f32 %v2199_v21, %v2198_v20  ;;  %v2221_v29 = vpop.f32.mrb[7].mxu1 }
 0x11f   : > { %v2222_v31 = vadd.f32 %v2221_v29, %v2220_v27 }
 0x120   : > { %v1679_v28 = vadd.f32 %v2200_v24, %v1638_v16  ;;  %v1717_v30 = vadd.f32 %v2219_v26, %v1676_v23 }
 0x122   : > { %v1720_v32 = vadd.f32 %v2222_v31, %v1679_v28 }
 0x13a   : > { %v2239_v33 = vpop.f32.mrb[8].mxu0 }
 0x13b   : > { %v2240_v34 = vpop.f32.mrb[9].mxu0  ;;  %v2261_v37 = vpop.f32.mrb[8].mxu1 }
 0x13c   : > { %v2241_v35 = vadd.f32 %v2240_v34, %v2239_v33  ;;  %v2242_v36 = vpop.f32.mrb[10].mxu0  ;;  %v2262_v40 = vpop.f32.mrb[9].mxu1 }
 0x13d   : > { %v2243_v38 = vpop.f32.mrb[11].mxu0  ;;  %v2263_v42 = vadd.f32 %v2262_v40, %v2261_v37  ;;  %v2264_v43 = vpop.f32.mrb[10].mxu1 }
 0x13e   : > { %v1758_v39 = vadd.f32 %v2241_v35, %v1717_v30  ;;  %v2244_v41 = vadd.f32 %v2243_v38, %v2242_v36  ;;  %v2265_v45 = vpop.f32.mrb[11].mxu1 }
 0x13f   : > { %v2266_v47 = vadd.f32 %v2265_v45, %v2264_v43 }
 0x140   : > { %v1761_v44 = vadd.f32 %v2244_v41, %v1720_v32  ;;  %v1799_v46 = vadd.f32 %v2263_v42, %v1758_v39 }
 0x142   : > { %v1802_v48 = vadd.f32 %v2266_v47, %v1761_v44 }
 0x15a   : > { %v2283_v49 = vpop.f32.mrb[12].mxu0 }
 0x15b   : > { %v2284_v50 = vpop.f32.mrb[13].mxu0  ;;  %v2305_v54 = vpop.f32.mrb[12].mxu1 }
 0x15c   : > { %v2285_v51 = vadd.f32 %v2284_v50, %v2283_v49  ;;  %v2286_v52 = vpop.f32.mrb[14].mxu0  ;;  %v2306_v57 = vpop.f32.mrb[13].mxu1 }
 0x15d   : > { %v2287_v53 = vpop.f32.mrb[15].mxu0  ;;  %v2307_v58 = vadd.f32 %v2306_v57, %v2305_v54  ;;  %v2308_v59 = vpop.f32.mrb[14].mxu1 }
 0x15e   : > { %v1840_v55 = vadd.f32 %v2285_v51, %v1799_v46  ;;  %v2288_v56 = vadd.f32 %v2287_v53, %v2286_v52  ;;  %v2309_v61 = vpop.f32.mrb[15].mxu1 }
 0x15f   : > { %v2310_v63 = vadd.f32 %v2309_v61, %v2308_v59 }
 0x160   : > { %v1843_v60 = vadd.f32 %v2288_v56, %v1802_v48  ;;  %v1881_v62 = vadd.f32 %v2307_v58, %v1840_v55 }
 0x162   : > { %v1889_v0 = vmul.f32 0.2, %v1881_v62  ;;  %v1884_v1 = vadd.f32 %v2310_v63, %v1843_v60  ;;  %vm1887_vm0 = vcmp.ge.f32.partialorder %v1881_v62, 0.0 }
 0x164   : > { %vm1888_vm1 = vcmp.ge.f32.partialorder %v1884_v1, 0.0  ;;  %v1890_v2 = vmul.f32 0.2, %v1884_v1  ;;  %v1891_v3 = vsel %vm1887_vm0, %v1881_v62, %v1889_v0 }
 0x166   : > { %v1892_v4 = vsel %vm1888_vm1, %v1884_v1, %v1890_v2 }
 0x167   : > { %v2133_v5 = vpack.c.bf16 %v1892_v4, %v1891_v3 }
 0x169   : > { %2134 = vst [vmem:[%s170_s9] sm:$0xff] %v2133_v5  }
 0x16a PF: > { %s13_s12 = sadd.s32 1, %s2454_s12  }
 0x16b   : > { %p10_p4 = scmp.ge.s32.totalorder %s13_s12, 4  }
 0x16d   :  { %12 = sbr.rel (!%p10_p4) target bundleno = 1 (0x1), region = 66 }

// kernel: nlayer_discriminator_forward.8
= control target key start
LH: loop header
LB: loop body
LE: loop exit
PB: predicated region body
PF: predicated region fallthrough
CT: control target
= control target key end

     0   :  { %s2469_s12 = smov 0   ;;  %s2929_s0 = inlined_call_operand.vmem [shape: bf16[2,6,6,128], index: 0, kind: input, shape index: {}]   ;;  %s2930_s1 = inlined_call_operand.vmem [shape: bf16[2048,128], index: 1, kind: input, shape index: {}]   ;;  %s2931_s2 = inlined_call_operand.vmem [shape: f32[1,128], index: 2, kind: input, shape index: {}]   ;;  %s2932_s3 = inlined_call_operand.vmem [shape: bf16[2,9,128], index: 3, kind: output, shape index: {}]  }
   0x1 LB: > { %s1940_s13 = sadd.s32 4294967295, %s2447_s12   ;;  %p1944_p0 = scmp.ge.s32.totalorder %s2447_s12, 1  ;;  %s2447_s12 = sphi %s2469_s12, %s13_s12  }
   0x2   : > { %p137_p1 = scmp.lt.s32.totalorder %s2447_s12, 3 }
   0x4   : > { %p138_p2 = pnand %p1944_p0, %p137_p1 }
   0x5   : > { %v2313_v0 = vld [vmem:[%s2930_s1 + $0x40] sm:$0xff] (!%p138_p2)   ;;  %v2317_v4 = vld [vmem:[%s2930_s1 + $0x48] sm:$0xff] (!%p138_p2)   ;;  %v2321_v8 = vld [vmem:[%s2930_s1 + $0x50] sm:$0xff] (!%p138_p2)   ;;  %p161_p3 = scmp.lt.s32.totalorder (!%p138_p2), %s1940_s13, 1  ;;  %vm1879_vm1 = vcmask (!%p138_p2), 1040384  }
   0x6   : > { %141 = sbr.rel (%p138_p2) target bundleno = 363 (0x16b), region = 32  ;;  %v2314_v1 = vld [vmem:[%s2930_s1 + $0xc0] sm:$0xff] (!%p138_p2)   ;;  %2128 = vmatprep.subr.bf16.mxu0 (!%p138_p2), %v2313_v0  ;;  %v2318_v5 = vld [vmem:[%s2930_s1 + $0xc8] sm:$0xff] (!%p138_p2)   ;;  %v2322_v9 = vld [vmem:[%s2930_s1 + $0xd0] sm:$0xff] (!%p138_p2)   ;;  %vm1880_vm2 = vsmask.f32 (!%p138_p2), 256 }
   0x7   : > { %v2315_v2 = vld [vmem:[%s2930_s1] sm:$0xff] (!%p138_p2)   ;;  %2150 = vmatprep.subr.bf16.mxu1 (!%p138_p2), %v2314_v1  ;;  %v2319_v6 = vld [vmem:[%s2930_s1 + $0x8] sm:$0xff] (!%p138_p2)   ;;  %v2323_v10 = vld [vmem:[%s2930_s1 + $0x10] sm:$0xff] (!%p138_p2)  }
   0x8   : > { %v2316_v3 = vld [vmem:[%s2930_s1 + $0x80] sm:$0xff] (!%p138_p2)   ;;  %2129 = vmatpush3.bf16.msra.mxu0 (!%p138_p2), %v2315_v2  ;;  %v2320_v7 = vld [vmem:[%s2930_s1 + $0x88] sm:$0xff] (!%p138_p2)   ;;  %v2324_v11 = vld [vmem:[%s2930_s1 + $0x90] sm:$0xff] (!%p138_p2)  }
   0x9   : > { %2151 = vmatpush3.bf16.msra.mxu1 (!%p138_p2), %v2316_v3  ;;  %2130 = vmatprep.subr.bf16.mxu0 (!%p138_p2), %v2317_v4  ;;  %v2325_v12 = vld [vmem:[%s2930_s1 + $0x58] sm:$0xff] (!%p138_p2)   ;;  %v2329_v16 = vld [vmem:[%s2930_s1 + $0x60] sm:$0xff] (!%p138_p2)   ;;  %v2333_v20 = vld [vmem:[%s2930_s1 + $0x68] sm:$0xff] (!%p138_p2)  }
   0xa   : > { %2152 = vmatprep.subr.bf16.mxu1 (!%p138_p2), %v2318_v5  ;;  %v2326_v13 = vld [vmem:[%s2930_s1 + $0xd8] sm:$0xff] (!%p138_p2)   ;;  %v2330_v17 = vld [vmem:[%s2930_s1 + $0xe0] sm:$0xff] (!%p138_p2)   ;;  %v2334_v21 = vld [vmem:[%s2930_s1 + $0xe8] sm:$0xff] (!%p138_p2)  }
   0xb   : > { %v2327_v14 = vld [vmem:[%s2930_s1 + $0x18] sm:$0xff] (!%p138_p2)   ;;  %v2331_v18 = vld [vmem:[%s2930_s1 + $0x20] sm:$0xff] (!%p138_p2)   ;;  %v2335_v22 = vld [vmem:[%s2930_s1 + $0x28] sm:$0xff] (!%p138_p2)  }
   0xc   : > { %2131 = vmatpush3.bf16.msra.mxu0 (!%p138_p2), %v2319_v6  ;;  %v2328_v15 = vld [vmem:[%s2930_s1 + $0x98] sm:$0xff] (!%p138_p2)   ;;  %v2332_v19 = vld [vmem:[%s2930_s1 + $0xa0] sm:$0xff] (!%p138_p2)   ;;  %v2336_v23 = vld [vmem:[%s2930_s1 + $0xa8] sm:$0xff] (!%p138_p2)  }
   0xd   : > { %2153 = vmatpush3.bf16.msra.mxu1 %v2320_v7  ;;  %2132 = vmatprep.subr.bf16.mxu0 %v2321_v8  ;;  %s2934_s13 = smov (!%p161_p3, %s1940_s13), 1  ;;  %v2337_v24 = vld [vmem:[%s2930_s1 + $0x70] sm:$0xff]   ;;  %v2341_v28 = vld [vmem:[%s2930_s1 + $0x78] sm:$0xff]   ;;  %v2345_v46 = vld [vmem:[%s2930_s1 + $0x140] sm:$0xff]  }
   0xe   : > { %2154 = vmatprep.subr.bf16.mxu1 %v2322_v9  ;;  %v2338_v25 = vld [vmem:[%s2930_s1 + $0xf0] sm:$0xff]   ;;  %s2304_s16 = smul.u32 24, %s2934_s13  ;;  %v2342_v29 = vld [vmem:[%s2930_s1 + $0xf8] sm:$0xff]   ;;  %v2346_v52 = vld [vmem:[%s2930_s1 + $0x1c0] sm:$0xff]   ;;  %s2125_s6 = sshll.u32 %s2934_s13, 3 }
   0xf   : > { %v2339_v26 = vld [vmem:[%s2930_s1 + $0x30] sm:$0xff]   ;;  %v2343_v30 = vld [vmem:[%s2930_s1 + $0x38] sm:$0xff]   ;;  %s170_s9 = scalar_lea.vmem %s2932_s3, %s2125_s6  ;;  %vm1881_vm4 = vmand %vm1879_vm1, %vm1880_vm2 }
  0x10   : > { %2133 = vmatpush3.bf16.msra.mxu0 %v2323_v10  ;;  %v2340_v27 = vld [vmem:[%s2930_s1 + $0xb0] sm:$0xff]   ;;  %s2577_s27 = scalar_lea.vmem %s2929_s0, %s2304_s16  ;;  %v2344_v31 = vld [vmem:[%s2930_s1 + $0xb8] sm:$0xff]   ;;  %v2347_v10 = vld [vmem:[%s2930_s1 + $0x100] sm:$0xff]  }
  0x11   : > { %2155 = vmatpush3.bf16.msra.mxu1 %v2324_v11  ;;  %2134 = vmatprep.subr.bf16.mxu0 %v2325_v12  ;;  %v190_v32 = vld [vmem:[%s2577_s27] sm:$0x3]  ;;  %v1950_v33 = vld [vmem:[%s2577_s27 + $0x4] sm:$0x3]  ;;  %v1951_v34 = vld [vmem:[%s2577_s27 + $0x8] sm:$0x3] }
  0x12   : > { %2156 = vmatprep.subr.bf16.mxu1 %v2326_v13  ;;  %v191_v35 = vunpack.c.l.bf16 %v190_v32  ;;  %v197_v36 = vunpack.c.l.bf16 %v1950_v33  ;;  %v203_v37 = vunpack.c.l.bf16 %v1951_v34  ;;  %v228_v38 = vld [vmem:[%s2577_s27] sm:$0x6]  ;;  %v1954_v39 = vld [vmem:[%s2577_s27 + $0x4] sm:$0x6]  ;;  %v1955_v40 = vld [vmem:[%s2577_s27 + $0x8] sm:$0x6] }
  0x13   : > { %v229_v41 = vunpack.c.l.bf16 %v228_v38  ;;  %v235_v42 = vunpack.c.l.bf16 %v1954_v39  ;;  %v238_v43 = vunpack.c.l.bf16 %v1955_v40  ;;  %v172_v44 = vld [vmem:[%s2577_s27] ss:$4 sps:$2 sm:$0xf]   ;;  %v1949_v51 = vld [vmem:[%s2577_s27 + $0x8] sm:$0x3]  ;;  %v2369_v38 = vld [vmem:[%s2930_s1 + $0x170] sm:$0xff]  }
  0x14   : > { %2135 = vmatpush3.bf16.msra.mxu0 %v2327_v14  ;;  %v1948_v45 = vld [vmem:[%s2577_s27 + $0x4] sm:$0x3]  ;;  %v193_v47 = vrot.slane %v191_v35, 1  ;;  %v199_v48 = vrot.slane %v197_v36, 6  ;;  %v205_v49 = vrot.slane %v203_v37, 3  ;;  %v173_v50 = vunpack.c.l.bf16 %v172_v44  ;;  %v2365_v34 = vld [vmem:[%s2930_s1 + $0x168] sm:$0xff]  }
  0x15   : > { %2157 = vmatpush3.bf16.msra.mxu1 %v2328_v15  ;;  %2136 = vmatprep.subr.bf16.mxu0 %v2329_v16  ;;  %v231_v53 = vrot.slane %v229_v41, 3  ;;  %236 = vst [vmem:[#allocation2 + $0x18] sm:$0x38] %v235_v42  ;;  %v240_v54 = vrot.slane %v238_v43, 5  ;;  %v177_v55 = vunpack.c.l.bf16 %v1948_v45  ;;  %v184_v56 = vunpack.c.l.bf16 %v1949_v51  ;;  %v209_v57 = vld [vmem:[%s2577_s27] sm:$0x6] }
  0x16   : > { %2158 = vmatprep.subr.bf16.mxu1 %v2330_v17  ;;  %v1952_v58 = vld [vmem:[%s2577_s27 + $0x4] sm:$0x6]  ;;  %195 = vst [vmem:[#allocation2 + $0x8] sm:$0x7] %v193_v47  ;;  %201 = vst [vmem:[#allocation2 + $0x8] sm:$0x38] %v199_v48  ;;  %v210_v59 = vunpack.c.l.bf16 %v209_v57 }
  0x17   : > { %207 = vst [vmem:[#allocation2 + $0x88] ss:$-124 sps:$4 sm:$0xc1] %v205_v49   ;;  %174 = vst [vmem:[#allocation2] sm:$0x7] %v173_v50  ;;  %v216_v60 = vunpack.c.l.bf16 %v1952_v58  ;;  %v179_v62 = vrot.slane %v177_v55, 5 }
  0x18   : > { %2137 = vmatpush3.bf16.msra.mxu0 %v2331_v18  ;;  %v1953_v61 = vld [vmem:[%s2577_s27 + $0x8] sm:$0x6]  ;;  %233 = vst [vmem:[#allocation2 + $0x18] sm:$0x7] %v231_v53  ;;  %v186_v63 = vrot.slane %v184_v56, 2  ;;  %v212_v1 = vrot.slane %v210_v59, 2 }
  0x19   : > { %2159 = vmatpush3.bf16.msra.mxu1 %v2332_v19  ;;  %2138 = vmatprep.subr.bf16.mxu0 %v2333_v20  ;;  %242 = vst [vmem:[#allocation2 + $0x98] ss:$-124 sps:$4 sm:$0xc1] %v240_v54   ;;  %v222_v0 = vunpack.c.l.bf16 %v1953_v61  ;;  %v218_v2 = vrot.slane %v216_v60, 7  ;;  %246 = vst [vmem:[#allocation2 + $0x1c] sm:$0x70] %v173_v50 }
  0x1a   : > { %2160 = vmatprep.subr.bf16.mxu1 %v2334_v21  ;;  %181 = vst [vmem:[#allocation2] sm:$0x38] %v179_v62  ;;  %188 = vst [vmem:[#allocation2 + $0x80] ss:$-124 sps:$4 sm:$0xc1] %v186_v63   ;;  %v2348_v13 = vld [vmem:[%s2930_s1 + $0x180] sm:$0xff]  }
  0x1b   : > { %v224_v3 = vrot.slane %v222_v0, 4  ;;  %214 = vst [vmem:[#allocation2 + $0x10] sm:$0x7] %v212_v1  ;;  %220 = vst [vmem:[#allocation2 + $0x10] sm:$0x38] %v218_v2  ;;  %v2349_v15 = vld [vmem:[%s2930_s1 + $0x148] sm:$0xff]  }
  0x1c   : > { %2139 = vmatpush3.bf16.msra.mxu0 %v2335_v22  ;;  %v2350_v18 = vld [vmem:[%s2930_s1 + $0x1c8] sm:$0xff]   ;;  %v2353_v22 = vld [vmem:[%s2930_s1 + $0x150] sm:$0xff]   ;;  %v2363_v32 = vld [vmem:[%s2930_s1 + $0x120] sm:$0xff]  }
  0x1d   : > { %2161 = vmatpush3.bf16.msra.mxu1 %v2336_v23  ;;  %2140 = vmatprep.subr.bf16.mxu0 %v2337_v24  ;;  %226 = vst [vmem:[#allocation2 + $0x90] ss:$-124 sps:$4 sm:$0xc1] %v224_v3   ;;  %v2351_v20 = vld [vmem:[%s2930_s1 + $0x108] sm:$0xff]   ;;  %v2354_v23 = vld [vmem:[%s2930_s1 + $0x1d0] sm:$0xff]   ;;  %v2364_v33 = vld [vmem:[%s2930_s1 + $0x1a0] sm:$0xff]  }
  0x1e   : > { %2162 = vmatprep.subr.bf16.mxu1 %v2338_v25  ;;  %v458_v4 = vld [vmem:[#allocation2 + $0x8] sm:$0xff]  ;;  %v2355_v24 = vld [vmem:[%s2930_s1 + $0x110] sm:$0xff]   ;;  %v2373_v42 = vld [vmem:[%s2930_s1 + $0x178] sm:$0xff]  }
  0x1f   : > { %v474_v5 = vld [vmem:[#allocation2 + $0x88] sm:$0x1]  ;;  %v2356_v25 = vld [vmem:[%s2930_s1 + $0x190] sm:$0xff]   ;;  %v2374_v43 = vld [vmem:[%s2930_s1 + $0x1f8] sm:$0xff]  }
  0x20   : > { %2141 = vmatpush3.bf16.msra.mxu0 %v2339_v26  ;;  %v490_v6 = vpack.c.bf16 %v474_v5, %v458_v4  ;;  %v460_v7 = vld [vmem:[#allocation2 + $0x18] sm:$0xff]  ;;  %v2352_v21 = vld [vmem:[%s2930_s1 + $0x188] sm:$0xff]   ;;  %v2370_v39 = vld [vmem:[%s2930_s1 + $0x1f0] sm:$0xff]  }
  0x21   : > { %2163 = vmatpush3.bf16.msra.mxu1 %v2340_v27  ;;  %2142 = vmatprep.subr.bf16.mxu0 %v2341_v28  ;;  %v476_v8 = vld [vmem:[#allocation2 + $0x98] sm:$0x1]  ;;  %v457_v11 = vld [vmem:[#allocation2] sm:$0xff]  ;;  %v2366_v35 = vld [vmem:[%s2930_s1 + $0x1e8] sm:$0xff]  }
  0x22   : > { %2164 = vmatprep.subr.bf16.mxu1 %v2342_v29  ;;  %v492_v9 = vpack.c.bf16 %v476_v8, %v460_v7  ;;  %1568 = vmatprep.mubr.bf16.mxu0 %v490_v6  ;;  %v473_v12 = vld [vmem:[#allocation2 + $0x80] sm:$0x1]  ;;  %v2357_v26 = vld [vmem:[%s2930_s1 + $0x158] sm:$0xff]   ;;  %v2367_v36 = vld [vmem:[%s2930_s1 + $0x128] sm:$0xff]  }
  0x23   : > { %v489_v14 = vpack.c.bf16 %v473_v12, %v457_v11  ;;  %v2358_v27 = vld [vmem:[%s2930_s1 + $0x1d8] sm:$0xff]   ;;  %v2368_v37 = vld [vmem:[%s2930_s1 + $0x1a8] sm:$0xff]   ;;  %v2371_v40 = vld [vmem:[%s2930_s1 + $0x130] sm:$0xff]  }
  0x24   : > { %2143 = vmatpush3.bf16.msra.mxu0 %v2343_v30  ;;  %1609 = vmatprep.mubr.bf16.mxu1 %v492_v9  ;;  %v459_v16 = vld [vmem:[#allocation2 + $0x10] sm:$0xff]  ;;  %v2359_v28 = vld [vmem:[%s2930_s1 + $0x118] sm:$0xff]   ;;  %v2361_v30 = vld [vmem:[%s2930_s1 + $0x160] sm:$0xff]  }
  0x25   : > { %2165 = vmatpush3.bf16.msra.mxu1 %v2344_v31  ;;  %2172 = vmatprep.subr.bf16.mxu0 %v2345_v46  ;;  %v475_v17 = vld [vmem:[#allocation2 + $0x90] sm:$0x1]  ;;  %v2360_v29 = vld [vmem:[%s2930_s1 + $0x198] sm:$0xff]   ;;  %v2362_v31 = vld [vmem:[%s2930_s1 + $0x1e0] sm:$0xff]  }
  0x26   : > { %2194 = vmatprep.subr.bf16.mxu1 %v2346_v52  ;;  %v491_v19 = vpack.c.bf16 %v475_v17, %v459_v16  ;;  %v2372_v41 = vld [vmem:[%s2930_s1 + $0x1b0] sm:$0xff]   ;;  %v1959_v44 = vld [vmem:[%s2577_s27 + $0x4] sm:$0x3]  ;;  %v1960_v45 = vld [vmem:[%s2577_s27 + $0x8] sm:$0x3] }
  0x27   : > { %1569 = vmatmul.mubr.bf16.vlgmr.msra.gmra.mrb[0].mxu0 %v489_v14  ;;  %v1961_v46 = vld [vmem:[%s2577_s27 + $0xc] sm:$0x3]  ;;  %v2375_v47 = vld [vmem:[%s2930_s1 + $0x138] sm:$0xff]   ;;  %v262_v48 = vunpack.c.l.bf16 %v1959_v44  ;;  %v268_v49 = vunpack.c.l.bf16 %v1960_v45  ;;  %v1965_v51 = vld [vmem:[%s2577_s27 + $0x4] sm:$0x6] }
  0x28   : > { %2173 = vmatpush3.bf16.msra.mxu0 %v2347_v10  ;;  %1610 = vmatmul.mubr.bf16.vlgmr.msra.gmra.mrb[0].mxu1 %v491_v19  ;;  %v274_v50 = vunpack.c.l.bf16 %v1961_v46  ;;  %v1966_v52 = vld [vmem:[%s2577_s27 + $0x8] sm:$0x6]  ;;  %v1967_v53 = vld [vmem:[%s2577_s27 + $0xc] sm:$0x6]  ;;  %v300_v54 = vunpack.c.l.bf16 %v1965_v51  ;;  %v1962_v59 = vld [vmem:[%s2577_s27 + $0x4] sm:$0x6] }
  0x29   : > { %2174 = vmatprep.subr.bf16.mxu0 %v2349_v15  ;;  %2195 = vmatpush3.bf16.msra.mxu1 %v2348_v13  ;;  %v306_v55 = vunpack.c.l.bf16 %v1966_v52  ;;  %v309_v56 = vunpack.c.l.bf16 %v1967_v53  ;;  %v1957_v57 = vld [vmem:[%s2577_s27 + $0x8] sm:$0x3]  ;;  %v1958_v58 = vld [vmem:[%s2577_s27 + $0xc] sm:$0x3]  ;;  %v2376_v60 = vld [vmem:[%s2930_s1 + $0x1b8] sm:$0xff]   ;;  %v264_v61 = vrot.slane %v262_v48, 1  ;;  %v281_v6 = vunpack.c.l.bf16 %v1962_v59 }
  0x2a   : > { %2196 = vmatprep.subr.bf16.mxu1 %v2350_v18  ;;  %v270_v62 = vrot.slane %v268_v49, 6  ;;  %v276_v63 = vrot.slane %v274_v50, 3  ;;  %v248_v0 = vunpack.c.l.bf16 %v1957_v57  ;;  %v1963_v1 = vld [vmem:[%s2577_s27 + $0x8] sm:$0x6]  ;;  %v2377_v2 = vld [vmem:[%s2930_s1 + $0x240] sm:$0xff]   ;;  %v302_v3 = vrot.slane %v300_v54, 3 }
  0x2b   : > { %307 = vst [vmem:[#allocation2 + $0x38] sm:$0x38] %v306_v55  ;;  %v311_v4 = vrot.slane %v309_v56, 5  ;;  %v255_v5 = vunpack.c.l.bf16 %v1958_v58  ;;  %v1964_v7 = vld [vmem:[%s2577_s27 + $0xc] sm:$0x6]  ;;  %v287_v9 = vunpack.c.l.bf16 %v1963_v1  ;;  %v2378_v11 = vld [vmem:[%s2930_s1 + $0x2c0] sm:$0xff]  }
  0x2c   : > { %2175 = vmatpush3.bf16.msra.mxu0 %v2351_v20  ;;  %266 = vst [vmem:[#allocation2 + $0x28] sm:$0x7] %v264_v61  ;;  %272 = vst [vmem:[#allocation2 + $0x28] sm:$0x38] %v270_v62  ;;  %v250_v8 = vrot.slane %v248_v0, 5  ;;  %v293_v10 = vunpack.c.l.bf16 %v1964_v7  ;;  %v283_v13 = vrot.slane %v281_v6, 2 }
  0x2d   : > { %2176 = vmatprep.subr.bf16.mxu0 %v2353_v22  ;;  %2197 = vmatpush3.bf16.msra.mxu1 %v2352_v21  ;;  %278 = vst [vmem:[#allocation2 + $0xa8] ss:$-124 sps:$4 sm:$0xc1] %v276_v63   ;;  %304 = vst [vmem:[#allocation2 + $0x38] sm:$0x7] %v302_v3  ;;  %v257_v12 = vrot.slane %v255_v5, 2 }
  0x2e   : > { %2198 = vmatprep.subr.bf16.mxu1 %v2354_v23  ;;  %313 = vst [vmem:[#allocation2 + $0xb8] ss:$-124 sps:$4 sm:$0xc1] %v311_v4   ;;  %252 = vst [vmem:[#allocation2 + $0x20] sm:$0x38] %v250_v8  ;;  %v289_v14 = vrot.slane %v287_v9, 7 }
  0x2f   : > { %v295_v15 = vrot.slane %v293_v10, 4  ;;  %259 = vst [vmem:[#allocation2 + $0xa0] ss:$-124 sps:$4 sm:$0xc1] %v257_v12   ;;  %285 = vst [vmem:[#allocation2 + $0x30] sm:$0x7] %v283_v13 }
  0x30   : > { %2177 = vmatpush3.bf16.msra.mxu0 %v2355_v24  ;;  %291 = vst [vmem:[#allocation2 + $0x30] sm:$0x38] %v289_v14  ;;  %v2379_v21 = vld [vmem:[%s2930_s1 + $0x200] sm:$0xff]   ;;  %v2381_v24 = vld [vmem:[%s2930_s1 + $0x248] sm:$0xff]   ;;  %v2401_v50 = vld [vmem:[%s2930_s1 + $0x270] sm:$0xff]  }
  0x31   : > { %2178 = vmatprep.subr.bf16.mxu0 %v2357_v26  ;;  %2199 = vmatpush3.bf16.msra.mxu1 %v2356_v25  ;;  %297 = vst [vmem:[#allocation2 + $0xb0] ss:$-124 sps:$4 sm:$0xc1] %v295_v15   ;;  %v2380_v23 = vld [vmem:[%s2930_s1 + $0x280] sm:$0xff]   ;;  %v2397_v46 = vld [vmem:[%s2930_s1 + $0x268] sm:$0xff]   ;;  %v2402_v51 = vld [vmem:[%s2930_s1 + $0x2f0] sm:$0xff]  }
  0x32   : > { %2200 = vmatprep.subr.bf16.mxu1 %v2358_v27  ;;  %v2382_v27 = vld [vmem:[%s2930_s1 + $0x2c8] sm:$0xff]   ;;  %v2395_v44 = vld [vmem:[%s2930_s1 + $0x220] sm:$0xff]   ;;  %v2403_v52 = vld [vmem:[%s2930_s1 + $0x230] sm:$0xff]  }
  0x33   : > { %v2396_v45 = vld [vmem:[%s2930_s1 + $0x2a0] sm:$0xff]   ;;  %v2399_v48 = vld [vmem:[%s2930_s1 + $0x228] sm:$0xff]   ;;  %v2404_v53 = vld [vmem:[%s2930_s1 + $0x2b0] sm:$0xff]  }
  0x34   : > { %2179 = vmatpush3.bf16.msra.mxu0 %v2359_v28  ;;  %v462_v16 = vld [vmem:[#allocation2 + $0x28] sm:$0xff]  ;;  %v2405_v54 = vld [vmem:[%s2930_s1 + $0x278] sm:$0xff]   ;;  %v1979_v3 = vld [vmem:[%s2577_s27 + $0x10] sm:$0x6] }
  0x35   : > { %2180 = vmatprep.subr.bf16.mxu0 %v2361_v30  ;;  %2201 = vmatpush3.bf16.msra.mxu1 %v2360_v29  ;;  %v478_v17 = vld [vmem:[#allocation2 + $0xa8] sm:$0x1]  ;;  %v464_v19 = vld [vmem:[#allocation2 + $0x38] sm:$0xff]  ;;  %v1972_v57 = vld [vmem:[%s2577_s27 + $0xc] sm:$0x3]  ;;  %v380_v8 = vunpack.c.l.bf16 %v1979_v3 }
  0x36   : > { %2202 = vmatprep.subr.bf16.mxu1 %v2362_v31  ;;  %v494_v18 = vpack.c.bf16 %v478_v17, %v462_v16  ;;  %v480_v20 = vld [vmem:[#allocation2 + $0xb8] sm:$0x1]  ;;  %v461_v25 = vld [vmem:[#allocation2 + $0x20] sm:$0xff]  ;;  %v2400_v49 = vld [vmem:[%s2930_s1 + $0x2a8] sm:$0xff]   ;;  %v339_v59 = vunpack.c.l.bf16 %v1972_v57 }
  0x37   : > { %v496_v22 = vpack.c.bf16 %v480_v20, %v464_v19  ;;  %v477_v26 = vld [vmem:[#allocation2 + $0xa0] sm:$0x1]  ;;  %v2406_v55 = vld [vmem:[%s2930_s1 + $0x2f8] sm:$0xff]   ;;  %v1971_v56 = vld [vmem:[%s2577_s27 + $0x8] sm:$0x3]  ;;  %v382_v19 = vrot.slane %v380_v8, 5 }
  0x38   : > { %2181 = vmatpush3.bf16.msra.mxu0 %v2363_v32  ;;  %1650 = vmatprep.mubr.bf16.mxu0 %v494_v18  ;;  %v493_v28 = vpack.c.bf16 %v477_v26, %v461_v25  ;;  %v463_v29 = vld [vmem:[#allocation2 + $0x30] sm:$0xff]  ;;  %v2383_v32 = vld [vmem:[%s2930_s1 + $0x208] sm:$0xff]   ;;  %v333_v58 = vunpack.c.l.bf16 %v1971_v56  ;;  %v2407_v63 = vld [vmem:[%s2930_s1 + $0x238] sm:$0xff]   ;;  %v341_v7 = vrot.slane %v339_v59, 6 }
  0x39   : > { %2182 = vmatprep.subr.bf16.mxu0 %v2365_v34  ;;  %2203 = vmatpush3.bf16.msra.mxu1 %v2364_v33  ;;  %v479_v30 = vld [vmem:[#allocation2 + $0xb0] sm:$0x1]  ;;  %v2384_v33 = vld [vmem:[%s2930_s1 + $0x288] sm:$0xff]   ;;  %v2408_v5 = vld [vmem:[%s2930_s1 + $0x2b8] sm:$0xff]  }
  0x3a   : > { %2204 = vmatprep.subr.bf16.mxu1 %v2366_v35  ;;  %1691 = vmatprep.mubr.bf16.mxu1 %v496_v22  ;;  %v495_v31 = vpack.c.bf16 %v479_v30, %v463_v29  ;;  %v2385_v34 = vld [vmem:[%s2930_s1 + $0x250] sm:$0xff]   ;;  %v1977_v61 = vld [vmem:[%s2577_s27 + $0x8] sm:$0x6]  ;;  %v1978_v62 = vld [vmem:[%s2577_s27 + $0xc] sm:$0x6]  ;;  %v335_v6 = vrot.slane %v333_v58, 1 }
  0x3b   : > { %v2386_v35 = vld [vmem:[%s2930_s1 + $0x2d0] sm:$0xff]   ;;  %v371_v1 = vunpack.c.l.bf16 %v1977_v61  ;;  %v1968_v4 = vld [vmem:[%s2577_s27 + $0x8] ss:$4 sps:$2 sm:$0xf]   ;;  %v2409_v12 = vld [vmem:[%s2930_s1 + $0x340] sm:$0xff]  }
  0x3c   : > { %2183 = vmatpush3.bf16.msra.mxu0 %v2367_v36  ;;  %v2387_v36 = vld [vmem:[%s2930_s1 + $0x210] sm:$0xff]   ;;  %v316_v9 = vunpack.c.l.bf16 %v1968_v4  ;;  %v1969_v10 = vld [vmem:[%s2577_s27 + $0xc] sm:$0x3]  ;;  %v1974_v17 = vld [vmem:[%s2577_s27 + $0x8] sm:$0x6] }
  0x3d   : > { %2184 = vmatprep.subr.bf16.mxu0 %v2369_v38  ;;  %2205 = vmatpush3.bf16.msra.mxu1 %v2368_v37  ;;  %v2388_v37 = vld [vmem:[%s2930_s1 + $0x290] sm:$0xff]   ;;  %v2389_v38 = vld [vmem:[%s2930_s1 + $0x258] sm:$0xff]   ;;  %v373_v14 = vrot.slane %v371_v1, 3  ;;  %v319_v15 = vunpack.c.l.bf16 %v1969_v10  ;;  %v1975_v18 = vld [vmem:[%s2577_s27 + $0xc] sm:$0x6]  ;;  %v352_v20 = vunpack.c.l.bf16 %v1974_v17 }
  0x3e   : > { %2206 = vmatprep.subr.bf16.mxu1 %v2370_v39  ;;  %v2390_v39 = vld [vmem:[%s2930_s1 + $0x2d8] sm:$0xff]   ;;  %337 = vst [vmem:[#allocation2 + $0x48] sm:$0x7] %v335_v6  ;;  %343 = vst [vmem:[#allocation2 + $0x48] sm:$0x38] %v341_v7  ;;  %v2425_v56 = vld [vmem:[%s2930_s1 + $0x360] sm:$0xff]  }
  0x3f   : > { %317 = vst [vmem:[#allocation2 + $0x40] sm:$0x7] %v316_v9  ;;  %v1976_v22 = vld [vmem:[%s2577_s27 + $0x10] sm:$0x6]  ;;  %375 = vst [vmem:[#allocation2 + $0x58] sm:$0x7] %v373_v14 }
  0x40   : > { %2185 = vmatpush3.bf16.msra.mxu0 %v2371_v40  ;;  %v2391_v40 = vld [vmem:[%s2930_s1 + $0x218] sm:$0xff]   ;;  %v364_v26 = vunpack.c.l.bf16 %v1976_v22  ;;  %384 = vst [vmem:[#allocation2 + $0xd8] ss:$-124 sps:$4 sm:$0xc1] %v382_v19   ;;  %388 = vst [vmem:[#allocation2 + $0x5c] sm:$0x70] %v316_v9 }
  0x41   : > { %2186 = vmatprep.subr.bf16.mxu0 %v2373_v42  ;;  %2207 = vmatpush3.bf16.msra.mxu1 %v2372_v41  ;;  %v2392_v41 = vld [vmem:[%s2930_s1 + $0x298] sm:$0xff]   ;;  %v2393_v42 = vld [vmem:[%s2930_s1 + $0x260] sm:$0xff]   ;;  %v2430_v61 = vld [vmem:[%s2930_s1 + $0x3e8] sm:$0xff]  }
  0x42   : > { %2208 = vmatprep.subr.bf16.mxu1 %v2374_v43  ;;  %v2394_v43 = vld [vmem:[%s2930_s1 + $0x2e0] sm:$0xff]   ;;  %v366_v29 = vrot.slane %v364_v26, 4  ;;  %v2434_v1 = vld [vmem:[%s2930_s1 + $0x3f0] sm:$0xff]   ;;  %v2437_v4 = vld [vmem:[%s2930_s1 + $0x378] sm:$0xff]  }
  0x43   : > { %v2426_v57 = vld [vmem:[%s2930_s1 + $0x3e0] sm:$0xff]   ;;  %v2436_v3 = vld [vmem:[%s2930_s1 + $0x3b0] sm:$0xff]   ;;  %v1983_v6 = vld [vmem:[%s2577_s27 + $0xc] sm:$0x3] }
  0x44   : > { %2187 = vmatpush3.bf16.msra.mxu0 %v2375_v47  ;;  %v2398_v47 = vld [vmem:[%s2930_s1 + $0x2e8] sm:$0xff]   ;;  %368 = vst [vmem:[#allocation2 + $0xd0] ss:$-124 sps:$4 sm:$0xc1] %v366_v29   ;;  %v2427_v58 = vld [vmem:[%s2930_s1 + $0x320] sm:$0xff]   ;;  %v2439_v8 = vld [vmem:[%s2930_s1 + $0x338] sm:$0xff]   ;;  %v404_v9 = vunpack.c.l.bf16 %v1983_v6 }
  0x45   : > { %2216 = vmatprep.subr.bf16.mxu0 %v2377_v2  ;;  %2209 = vmatpush3.bf16.msra.mxu1 %v2376_v60  ;;  %v1973_v60 = vld [vmem:[%s2577_s27 + $0x10] sm:$0x3]  ;;  %v377_v2 = vunpack.c.l.bf16 %v1978_v62  ;;  %v2428_v59 = vld [vmem:[%s2930_s1 + $0x3a0] sm:$0xff]   ;;  %v2431_v62 = vld [vmem:[%s2930_s1 + $0x328] sm:$0xff]  }
  0x46   : > { %2238 = vmatprep.subr.bf16.mxu1 %v2378_v11  ;;  %v345_v0 = vunpack.c.l.bf16 %v1973_v60  ;;  %v1970_v11 = vld [vmem:[%s2577_s27 + $0x10] sm:$0x3]  ;;  %v2429_v60 = vld [vmem:[%s2930_s1 + $0x368] sm:$0xff]   ;;  %v1991_v17 = vld [vmem:[%s2577_s27 + $0x14] sm:$0x6] }
  0x47   : > { %1651 = vmatmul.mubr.bf16.vlgmr.msra.gmra.mrb[4].mxu0 %v493_v28  ;;  %378 = vst [vmem:[#allocation2 + $0x58] sm:$0x38] %v377_v2  ;;  %v326_v16 = vunpack.c.l.bf16 %v1970_v11  ;;  %v2435_v2 = vld [vmem:[%s2930_s1 + $0x330] sm:$0xff]   ;;  %v451_v22 = vunpack.c.l.bf16 %v1991_v17 }
  0x48   : > { %1692 = vmatmul.mubr.bf16.vlgmr.msra.gmra.mrb[4].mxu1 %v495_v31  ;;  %2217 = vmatpush3.bf16.msra.mxu0 %v2379_v21  ;;  %v347_v13 = vrot.slane %v345_v0, 3  ;;  %v358_v21 = vunpack.c.l.bf16 %v1975_v18  ;;  %v2433_v0 = vld [vmem:[%s2930_s1 + $0x370] sm:$0xff]  }
  0x49   : > { %2239 = vmatpush3.bf16.msra.mxu1 %v2380_v23  ;;  %2218 = vmatprep.subr.bf16.mxu0 %v2381_v24  ;;  %v2410_v23 = vld [vmem:[%s2930_s1 + $0x3c0] sm:$0xff]   ;;  %v321_v24 = vrot.slane %v319_v15, 5  ;;  %v328_v25 = vrot.slane %v326_v16, 2  ;;  %v1984_v7 = vld [vmem:[%s2577_s27 + $0x10] sm:$0x3] }
  0x4a   : > { %2240 = vmatprep.subr.bf16.mxu1 %v2382_v27  ;;  %349 = vst [vmem:[#allocation2 + $0xc8] ss:$-124 sps:$4 sm:$0xc1] %v347_v13   ;;  %v354_v27 = vrot.slane %v352_v20, 2  ;;  %v360_v28 = vrot.slane %v358_v21, 7  ;;  %v410_v10 = vunpack.c.l.bf16 %v1984_v7  ;;  %v406_v20 = vrot.slane %v404_v9, 1 }
  0x4b   : > { %323 = vst [vmem:[#allocation2 + $0x40] sm:$0x38] %v321_v24  ;;  %330 = vst [vmem:[#allocation2 + $0xc0] ss:$-124 sps:$4 sm:$0xc1] %v328_v25  }
  0x4c   : > { %2219 = vmatpush3.bf16.msra.mxu0 %v2383_v32  ;;  %356 = vst [vmem:[#allocation2 + $0x50] sm:$0x7] %v354_v27  ;;  %362 = vst [vmem:[#allocation2 + $0x50] sm:$0x38] %v360_v28  ;;  %v2411_v32 = vld [vmem:[%s2930_s1 + $0x300] sm:$0xff]   ;;  %v412_v21 = vrot.slane %v410_v10, 6 }
  0x4d   : > { %2241 = vmatpush3.bf16.msra.mxu1 %v2384_v33  ;;  %2220 = vmatprep.subr.bf16.mxu0 %v2385_v34  ;;  %v1985_v11 = vld [vmem:[%s2577_s27 + $0x14] sm:$0x3]  ;;  %v1990_v13 = vld [vmem:[%s2577_s27 + $0x10] sm:$0x6]  ;;  %v1986_v24 = vld [vmem:[%s2577_s27 + $0xc] sm:$0x6] }
  0x4e   : > { %2242 = vmatprep.subr.bf16.mxu1 %v2386_v35  ;;  %v468_v34 = vld [vmem:[#allocation2 + $0x58] sm:$0xff]  ;;  %v416_v14 = vunpack.c.l.bf16 %v1985_v11  ;;  %v448_v16 = vunpack.c.l.bf16 %v1990_v13  ;;  %v1981_v18 = vld [vmem:[%s2577_s27 + $0x10] sm:$0x3]  ;;  %v1982_v19 = vld [vmem:[%s2577_s27 + $0x14] sm:$0x3]  ;;  %v423_v29 = vunpack.c.l.bf16 %v1986_v24 }
  0x4f   : > { %v484_v35 = vld [vmem:[#allocation2 + $0xd8] sm:$0x1]  ;;  %v1987_v25 = vld [vmem:[%s2577_s27 + $0x10] sm:$0x6]  ;;  %v397_v28 = vunpack.c.l.bf16 %v1982_v19  ;;  %408 = vst [vmem:[#allocation2 + $0x68] sm:$0x7] %v406_v20 }
  0x50   : > { %2221 = vmatpush3.bf16.msra.mxu0 %v2387_v36  ;;  %v2413_v36 = vld [vmem:[%s2930_s1 + $0x348] sm:$0xff]   ;;  %v418_v26 = vrot.slane %v416_v14, 3  ;;  %449 = vst [vmem:[#allocation2 + $0x78] sm:$0x38] %v448_v16  ;;  %414 = vst [vmem:[#allocation2 + $0x68] sm:$0x38] %v412_v21 }
  0x51   : > { %2243 = vmatpush3.bf16.msra.mxu1 %v2388_v37  ;;  %2222 = vmatprep.subr.bf16.mxu0 %v2389_v38  ;;  %v466_v30 = vld [vmem:[#allocation2 + $0x48] sm:$0xff]  ;;  %v500_v37 = vpack.c.bf16 %v484_v35, %v468_v34  ;;  %v429_v34 = vunpack.c.l.bf16 %v1987_v25 }
  0x52   : > { %2244 = vmatprep.subr.bf16.mxu1 %v2390_v39  ;;  %v482_v31 = vld [vmem:[#allocation2 + $0xc8] sm:$0x1]  ;;  %v465_v38 = vld [vmem:[#allocation2 + $0x40] sm:$0xff]  ;;  %420 = vst [vmem:[#allocation2 + $0xe8] ss:$-124 sps:$4 sm:$0xc1] %v418_v26  }
  0x53   : > { %v498_v33 = vpack.c.bf16 %v482_v31, %v466_v30  ;;  %v481_v39 = vld [vmem:[#allocation2 + $0xc0] sm:$0x1]  ;;  %1773 = vmatprep.mubr.bf16.mxu1 %v500_v37  ;;  %v1988_v30 = vld [vmem:[%s2577_s27 + $0x14] sm:$0x6]  ;;  %v2440_v31 = vld [vmem:[%s2930_s1 + $0x3b8] sm:$0xff]   ;;  %v425_v37 = vrot.slane %v423_v29, 2 }
  0x54   : > { %2223 = vmatpush3.bf16.msra.mxu0 %v2391_v40  ;;  %v2412_v40 = vld [vmem:[%s2930_s1 + $0x380] sm:$0xff]   ;;  %v435_v35 = vunpack.c.l.bf16 %v1988_v30 }
  0x55   : > { %2245 = vmatpush3.bf16.msra.mxu1 %v2392_v41  ;;  %2224 = vmatprep.subr.bf16.mxu0 %v2393_v42  ;;  %v497_v41 = vpack.c.bf16 %v481_v39, %v465_v38  ;;  %v2414_v42 = vld [vmem:[%s2930_s1 + $0x3c8] sm:$0xff]   ;;  %v431_v38 = vrot.slane %v429_v34, 7  ;;  %427 = vst [vmem:[#allocation2 + $0x70] sm:$0x7] %v425_v37 }
  0x56   : > { %2246 = vmatprep.subr.bf16.mxu1 %v2394_v43  ;;  %1732 = vmatprep.mubr.bf16.mxu0 %v498_v33  ;;  %v467_v43 = vld [vmem:[#allocation2 + $0x50] sm:$0xff]  ;;  %v437_v39 = vrot.slane %v435_v35, 4 }
  0x57   : > { %433 = vst [vmem:[#allocation2 + $0x70] sm:$0x38] %v431_v38 }
  0x58   : > { %2225 = vmatpush3.bf16.msra.mxu0 %v2395_v44  ;;  %v483_v44 = vld [vmem:[#allocation2 + $0xd0] sm:$0x1]  ;;  %439 = vst [vmem:[#allocation2 + $0xf0] ss:$-124 sps:$4 sm:$0xc1] %v437_v39  }
  0x59   : > { %2247 = vmatpush3.bf16.msra.mxu1 %v2396_v45  ;;  %2226 = vmatprep.subr.bf16.mxu0 %v2397_v46  ;;  %v499_v45 = vpack.c.bf16 %v483_v44, %v467_v43  ;;  %v2415_v46 = vld [vmem:[%s2930_s1 + $0x308] sm:$0xff]  }
  0x5a   : > { %2248 = vmatprep.subr.bf16.mxu1 %v2398_v47  ;;  %v2416_v47 = vld [vmem:[%s2930_s1 + $0x388] sm:$0xff]  }
  0x5c   : > { %2227 = vmatpush3.bf16.msra.mxu0 %v2399_v48  ;;  %v2417_v48 = vld [vmem:[%s2930_s1 + $0x350] sm:$0xff]  }
  0x5d   : > { %2249 = vmatpush3.bf16.msra.mxu1 %v2400_v49  ;;  %2228 = vmatprep.subr.bf16.mxu0 %v2401_v50  ;;  %v2418_v49 = vld [vmem:[%s2930_s1 + $0x3d0] sm:$0xff]  }
  0x5e   : > { %2250 = vmatprep.subr.bf16.mxu1 %v2402_v51  ;;  %v2419_v50 = vld [vmem:[%s2930_s1 + $0x310] sm:$0xff]  }
  0x5f   : > { %v2420_v51 = vld [vmem:[%s2930_s1 + $0x390] sm:$0xff]  }
  0x60   : > { %2229 = vmatpush3.bf16.msra.mxu0 %v2403_v52  ;;  %v2421_v52 = vld [vmem:[%s2930_s1 + $0x358] sm:$0xff]  }
  0x61   : > { %2251 = vmatpush3.bf16.msra.mxu1 %v2404_v53  ;;  %2230 = vmatprep.subr.bf16.mxu0 %v2405_v54  ;;  %v2422_v53 = vld [vmem:[%s2930_s1 + $0x3d8] sm:$0xff]  }
  0x62   : > { %2252 = vmatprep.subr.bf16.mxu1 %v2406_v55  ;;  %v2423_v54 = vld [vmem:[%s2930_s1 + $0x318] sm:$0xff]  }
  0x63   : > { %v2424_v55 = vld [vmem:[%s2930_s1 + $0x398] sm:$0xff]  }
  0x64   : > { %2231 = vmatpush3.bf16.msra.mxu0 %v2407_v63  ;;  %v2432_v63 = vld [vmem:[%s2930_s1 + $0x3a8] sm:$0xff]  }
  0x65   : > { %2253 = vmatpush3.bf16.msra.mxu1 %v2408_v5  ;;  %2260 = vmatprep.subr.bf16.mxu0 %v2409_v12  ;;  %v2438_v5 = vld [vmem:[%s2930_s1 + $0x3f8] sm:$0xff]   ;;  %v1989_v12 = vld [vmem:[%s2577_s27 + $0xc] sm:$0x6] }
  0x66   : > { %2282 = vmatprep.subr.bf16.mxu1 %v2410_v23  ;;  %v442_v15 = vunpack.c.l.bf16 %v1989_v12  ;;  %v390_v23 = vunpack.c.l.bf16 %v1981_v18 }
  0x67   : > { %1733 = vmatmul.mubr.bf16.vlgmr.msra.gmra.mrb[8].mxu0 %v497_v41  ;;  %v486_v41 = vld [vmem:[#allocation2 + $0xe8] sm:$0x1] }
  0x68   : > { %2261 = vmatpush3.bf16.msra.mxu0 %v2411_v32  ;;  %1774 = vmatmul.mubr.bf16.vlgmr.msra.gmra.mrb[8].mxu1 %v499_v45  ;;  %v444_v27 = vrot.slane %v442_v15, 3  ;;  %v453_v32 = vrot.slane %v451_v22, 5  ;;  %v392_v33 = vrot.slane %v390_v23, 5 }
  0x69   : > { %2262 = vmatprep.subr.bf16.mxu0 %v2413_v36  ;;  %2283 = vmatpush3.bf16.msra.mxu1 %v2412_v40  ;;  %v399_v36 = vrot.slane %v397_v28, 2  ;;  %v470_v40 = vld [vmem:[#allocation2 + $0x68] sm:$0xff] }
  0x6a   : > { %2284 = vmatprep.subr.bf16.mxu1 %v2414_v42  ;;  %446 = vst [vmem:[#allocation2 + $0x78] sm:$0x7] %v444_v27  ;;  %455 = vst [vmem:[#allocation2 + $0xf8] ss:$-124 sps:$4 sm:$0xc1] %v453_v32   ;;  %v502_v42 = vpack.c.bf16 %v486_v41, %v470_v40 }
  0x6b   : > { %394 = vst [vmem:[#allocation2 + $0x60] sm:$0x38] %v392_v33  ;;  %401 = vst [vmem:[#allocation2 + $0xe0] ss:$-124 sps:$4 sm:$0xc1] %v399_v36  }
  0x6c   : > { %2263 = vmatpush3.bf16.msra.mxu0 %v2415_v46  ;;  %1814 = vmatprep.mubr.bf16.mxu0 %v502_v42 }
  0x6d   : > { %2264 = vmatprep.subr.bf16.mxu0 %v2417_v48  ;;  %2285 = vmatpush3.bf16.msra.mxu1 %v2416_v47 }
  0x6e   : > { %2286 = vmatprep.subr.bf16.mxu1 %v2418_v49  ;;  %v471_v49 = vld [vmem:[#allocation2 + $0x70] sm:$0xff] }
  0x70   : > { %2265 = vmatpush3.bf16.msra.mxu0 %v2419_v50  ;;  %v487_v50 = vld [vmem:[#allocation2 + $0xf0] sm:$0x1] }
  0x71   : > { %2266 = vmatprep.subr.bf16.mxu0 %v2421_v52  ;;  %2287 = vmatpush3.bf16.msra.mxu1 %v2420_v51  ;;  %v472_v43 = vld [vmem:[#allocation2 + $0x78] sm:$0xff]  ;;  %v503_v51 = vpack.c.bf16 %v487_v50, %v471_v49 }
  0x72   : > { %2288 = vmatprep.subr.bf16.mxu1 %v2422_v53  ;;  %v488_v44 = vld [vmem:[#allocation2 + $0xf8] sm:$0x1]  ;;  %v469_v46 = vld [vmem:[#allocation2 + $0x60] sm:$0xff] }
  0x73   : > { %v504_v45 = vpack.c.bf16 %v488_v44, %v472_v43  ;;  %v485_v47 = vld [vmem:[#allocation2 + $0xe0] sm:$0x1] }
  0x74   : > { %2267 = vmatpush3.bf16.msra.mxu0 %v2423_v54  ;;  %v501_v48 = vpack.c.bf16 %v485_v47, %v469_v46  ;;  %v1992_v53 = vld [vmem:[%s2931_s2] ss:$0 sm:$0xff] }
  0x75   : > { %2268 = vmatprep.subr.bf16.mxu0 %v2425_v56  ;;  %2289 = vmatpush3.bf16.msra.mxu1 %v2424_v55 }
  0x76   : > { %2290 = vmatprep.subr.bf16.mxu1 %v2426_v57  ;;  %1855 = vmatprep.mubr.bf16.mxu1 %v504_v45 }
  0x78   : > { %2269 = vmatpush3.bf16.msra.mxu0 %v2427_v58 }
  0x79   : > { %2270 = vmatprep.subr.bf16.mxu0 %v2429_v60  ;;  %2291 = vmatpush3.bf16.msra.mxu1 %v2428_v59 }
  0x7a   : > { %2292 = vmatprep.subr.bf16.mxu1 %v2430_v61 }
  0x7c   : > { %2271 = vmatpush3.bf16.msra.mxu0 %v2431_v62 }
  0x7d   : > { %2272 = vmatprep.subr.bf16.mxu0 %v2433_v0  ;;  %2293 = vmatpush3.bf16.msra.mxu1 %v2432_v63 }
  0x7e   : > { %2294 = vmatprep.subr.bf16.mxu1 %v2434_v1 }
  0x80   : > { %2273 = vmatpush3.bf16.msra.mxu0 %v2435_v2 }
  0x81   : > { %2274 = vmatprep.subr.bf16.mxu0 %v2437_v4  ;;  %2295 = vmatpush3.bf16.msra.mxu1 %v2436_v3 }
  0x82   : > { %2296 = vmatprep.subr.bf16.mxu1 %v2438_v5 }
  0x84   : > { %2275 = vmatpush3.bf16.msra.mxu0 %v2439_v8 }
  0x85   : > { %2297 = vmatpush3.bf16.msra.mxu1 %v2440_v31 }
  0x87   : > { %1815 = vmatmul.mubr.bf16.vlgmr.msra.gmra.mrb[12].mxu0 %v501_v48 }
  0x88   : > { %1856 = vmatmul.mubr.bf16.vlgmr.msra.gmra.mrb[12].mxu1 %v503_v51 }
  0xfa   : > { %v2144_v52 = vpop.f32.mrb[0].mxu0 }
  0xfb   : > { %v2145_v54 = vpop.f32.mrb[1].mxu0  ;;  %v2166_v55 = vpop.f32.mrb[0].mxu1 }
  0xfc   : > { %v2146_v56 = vadd.f32 %v2145_v54, %v2144_v52  ;;  %v2147_v57 = vpop.f32.mrb[2].mxu0  ;;  %v2167_v58 = vpop.f32.mrb[1].mxu1 }
  0xfd   : > { %v2148_v59 = vpop.f32.mrb[3].mxu0  ;;  %v2168_v61 = vadd.f32 %v2167_v58, %v2166_v55  ;;  %v2169_v62 = vpop.f32.mrb[2].mxu1 }
  0xfe   : > { %v1571_v60 = vadd.f32 %v2146_v56, %v1992_v53  ;;  %v2149_v63 = vadd.f32 %v2148_v59, %v2147_v57  ;;  %v2170_v0 = vpop.f32.mrb[3].mxu1  ;;  %v1882_v57 = vld [vmem:[%s170_s9 + $0x4] sm:$0x1] }
  0xff   : > { %v2171_v3 = vadd.f32 %v2170_v0, %v2169_v62 }
 0x100   : > { %v1612_v1 = vadd.f32 %v2168_v61, %v1571_v60  ;;  %v1574_v2 = vadd.f32 %v2149_v63, %v1992_v53 }
 0x102   : > { %v1615_v4 = vadd.f32 %v2171_v3, %v1574_v2 }
 0x11a   : > { %v2188_v5 = vpop.f32.mrb[4].mxu0 }
 0x11b   : > { %v2210_v6 = vpop.f32.mrb[4].mxu1  ;;  %v2189_v7 = vpop.f32.mrb[5].mxu0 }
 0x11c   : > { %v2190_v8 = vadd.f32 %v2189_v7, %v2188_v5  ;;  %v2211_v9 = vpop.f32.mrb[5].mxu1  ;;  %v2191_v10 = vpop.f32.mrb[6].mxu0 }
 0x11d   : > { %v2212_v11 = vadd.f32 %v2211_v9, %v2210_v6  ;;  %v2213_v12 = vpop.f32.mrb[6].mxu1  ;;  %v2192_v13 = vpop.f32.mrb[7].mxu0 }
 0x11e   : > { %v1653_v14 = vadd.f32 %v2190_v8, %v1612_v1  ;;  %v2193_v15 = vadd.f32 %v2192_v13, %v2191_v10  ;;  %v2214_v16 = vpop.f32.mrb[7].mxu1 }
 0x11f   : > { %v2215_v17 = vadd.f32 %v2214_v16, %v2213_v12 }
 0x120   : > { %v1694_v18 = vadd.f32 %v2212_v11, %v1653_v14  ;;  %v1656_v19 = vadd.f32 %v2193_v15, %v1615_v4 }
 0x122   : > { %v1697_v20 = vadd.f32 %v2215_v17, %v1656_v19 }
 0x13a   : > { %v2232_v21 = vpop.f32.mrb[8].mxu0 }
 0x13b   : > { %v2233_v22 = vpop.f32.mrb[9].mxu0  ;;  %v2254_v23 = vpop.f32.mrb[8].mxu1 }
 0x13c   : > { %v2234_v24 = vadd.f32 %v2233_v22, %v2232_v21  ;;  %v2235_v25 = vpop.f32.mrb[10].mxu0  ;;  %v2255_v26 = vpop.f32.mrb[9].mxu1 }
 0x13d   : > { %v2236_v27 = vpop.f32.mrb[11].mxu0  ;;  %v2256_v29 = vadd.f32 %v2255_v26, %v2254_v23  ;;  %v2257_v30 = vpop.f32.mrb[10].mxu1 }
 0x13e   : > { %v1735_v28 = vadd.f32 %v2234_v24, %v1694_v18  ;;  %v2237_v31 = vadd.f32 %v2236_v27, %v2235_v25  ;;  %v2258_v32 = vpop.f32.mrb[11].mxu1 }
 0x13f   : > { %v2259_v35 = vadd.f32 %v2258_v32, %v2257_v30 }
 0x140   : > { %v1776_v33 = vadd.f32 %v2256_v29, %v1735_v28  ;;  %v1738_v34 = vadd.f32 %v2237_v31, %v1697_v20 }
 0x142   : > { %v1779_v36 = vadd.f32 %v2259_v35, %v1738_v34 }
 0x15a   : > { %v2276_v37 = vpop.f32.mrb[12].mxu0 }
 0x15b   : > { %v2298_v38 = vpop.f32.mrb[12].mxu1  ;;  %v2277_v39 = vpop.f32.mrb[13].mxu0 }
 0x15c   : > { %v2278_v40 = vadd.f32 %v2277_v39, %v2276_v37  ;;  %v2299_v41 = vpop.f32.mrb[13].mxu1  ;;  %v2279_v42 = vpop.f32.mrb[14].mxu0 }
 0x15d   : > { %v2300_v43 = vadd.f32 %v2299_v41, %v2298_v38  ;;  %v2301_v44 = vpop.f32.mrb[14].mxu1  ;;  %v2280_v45 = vpop.f32.mrb[15].mxu0 }
 0x15e   : > { %v1817_v46 = vadd.f32 %v2278_v40, %v1776_v33  ;;  %v2281_v47 = vadd.f32 %v2280_v45, %v2279_v42  ;;  %v2302_v48 = vpop.f32.mrb[15].mxu1 }
 0x15f   : > { %v2303_v49 = vadd.f32 %v2302_v48, %v2301_v44 }
 0x160   : > { %v1858_v50 = vadd.f32 %v2300_v43, %v1817_v46  ;;  %v1820_v51 = vadd.f32 %v2281_v47, %v1779_v36 }
 0x162   : > { %vm1864_vm0 = vcmp.ge.f32.partialorder %v1858_v50, 0.0  ;;  %v1866_v52 = vmul.f32 0.2, %v1858_v50  ;;  %v1861_v53 = vadd.f32 %v2303_v49, %v1820_v51 }
 0x164   : > { %v1868_v54 = vsel %vm1864_vm0, %v1858_v50, %v1866_v52  ;;  %vm1865_vm3 = vcmp.ge.f32.partialorder %v1861_v53, 0.0  ;;  %v1867_v55 = vmul.f32 0.2, %v1861_v53 }
 0x165   : > { %v2126_v56 = vpack.c.bf16 %v1868_v54, %v1868_v54 }
 0x166   : > { %v1869_v58 = vsel %vm1865_vm3, %v1861_v53, %v1867_v55 }
 0x167   : > { %1878 = vst [vmem:[%s170_s9] sm:$0xf] %v2126_v56  ;;  %v2127_v59 = vpack.c.bf16 %v1869_v58, %v1869_v58 }
 0x169   : > { %v1883_v60 = vsel %vm1881_vm4, %v2127_v59, %v1882_v57 }
 0x16a   : > { %1884 = vst [vmem:[%s170_s9 + $0x4] sm:$0x1] %v1883_v60 }
 0x16b PF: > { %s13_s12 = sadd.s32 1, %s2447_s12  }
 0x16c   : > { %p10_p4 = scmp.ge.s32.totalorder %s13_s12, 4  }
 0x16e   :  { %12 = sbr.rel (!%p10_p4) target bundleno = 1 (0x1), region = 67 }

// kernel: nlayer_discriminator_forward.9
= control target key start
LH: loop header
LB: loop body
LE: loop exit
PB: predicated region body
PF: predicated region fallthrough
CT: control target
= control target key end

     0   :  { %s2372_s12 = smov 0   ;;  %s2846_s0 = inlined_call_operand.vmem [shape: bf16[2,5,5,128], index: 0, kind: input, shape index: {}]   ;;  %s2847_s1 = inlined_call_operand.vmem [shape: bf16[2048,128], index: 1, kind: input, shape index: {}]   ;;  %s2848_s2 = inlined_call_operand.vmem [shape: f32[1,128], index: 2, kind: input, shape index: {}]   ;;  %s2849_s3 = inlined_call_operand.vmem [shape: f32[2,4,128], index: 3, kind: output, shape index: {}]  }
   0x1 LB: > { %s1841_s13 = sadd.s32 4294967295, %s2350_s12   ;;  %p1845_p0 = scmp.ge.s32.totalorder %s2350_s12, 1  ;;  %s2350_s12 = sphi %s2372_s12, %s13_s12  }
   0x2   : > { %p137_p1 = scmp.lt.s32.totalorder %s2350_s12, 3 }
   0x4   : > { %p138_p2 = pnand %p1845_p0, %p137_p1 }
   0x5   : > { %v2208_v0 = vld [vmem:[%s2847_s1 + $0x40] sm:$0xff] (!%p138_p2)   ;;  %v2212_v4 = vld [vmem:[%s2847_s1 + $0x48] sm:$0xff] (!%p138_p2)   ;;  %v2216_v8 = vld [vmem:[%s2847_s1 + $0x50] sm:$0xff] (!%p138_p2)   ;;  %p160_p3 = scmp.lt.s32.totalorder (!%p138_p2), %s1841_s13, 1  ;;  %vm207_vm0 = vcmask (!%p138_p2), 1040384   ;;  %vm208_vm1 = vcmask (!%p138_p2), 1044484  }
   0x6   : > { %141 = sbr.rel (%p138_p2) target bundleno = 355 (0x163), region = 32  ;;  %v2209_v1 = vld [vmem:[%s2847_s1 + $0xc0] sm:$0xff] (!%p138_p2)   ;;  %2023 = vmatprep.subr.bf16.mxu0 (!%p138_p2), %v2208_v0  ;;  %v2213_v5 = vld [vmem:[%s2847_s1 + $0xc8] sm:$0xff] (!%p138_p2)   ;;  %v2217_v9 = vld [vmem:[%s2847_s1 + $0xd0] sm:$0xff] (!%p138_p2)   ;;  %vm220_vm2 = vcmask (!%p138_p2), 1042432   ;;  %vm221_vm3 = vcmask (!%p138_p2), 1046532  }
   0x7   : > { %v2210_v2 = vld [vmem:[%s2847_s1] sm:$0xff] (!%p138_p2)   ;;  %2045 = vmatprep.subr.bf16.mxu1 (!%p138_p2), %v2209_v1  ;;  %v2214_v6 = vld [vmem:[%s2847_s1 + $0x8] sm:$0xff] (!%p138_p2)   ;;  %v2218_v10 = vld [vmem:[%s2847_s1 + $0x10] sm:$0xff] (!%p138_p2)  }
   0x8   : > { %v2211_v3 = vld [vmem:[%s2847_s1 + $0x80] sm:$0xff] (!%p138_p2)   ;;  %2024 = vmatpush3.bf16.msra.mxu0 (!%p138_p2), %v2210_v2  ;;  %v2215_v7 = vld [vmem:[%s2847_s1 + $0x88] sm:$0xff] (!%p138_p2)   ;;  %v2219_v11 = vld [vmem:[%s2847_s1 + $0x90] sm:$0xff] (!%p138_p2)  }
   0x9   : > { %2046 = vmatpush3.bf16.msra.mxu1 (!%p138_p2), %v2211_v3  ;;  %2025 = vmatprep.subr.bf16.mxu0 (!%p138_p2), %v2212_v4  ;;  %v2220_v12 = vld [vmem:[%s2847_s1 + $0x58] sm:$0xff] (!%p138_p2)   ;;  %v2224_v16 = vld [vmem:[%s2847_s1 + $0x60] sm:$0xff] (!%p138_p2)   ;;  %v2228_v20 = vld [vmem:[%s2847_s1 + $0x68] sm:$0xff] (!%p138_p2)  }
   0xa   : > { %2047 = vmatprep.subr.bf16.mxu1 (!%p138_p2), %v2213_v5  ;;  %v2221_v13 = vld [vmem:[%s2847_s1 + $0xd8] sm:$0xff] (!%p138_p2)   ;;  %v2225_v17 = vld [vmem:[%s2847_s1 + $0xe0] sm:$0xff] (!%p138_p2)   ;;  %v2229_v21 = vld [vmem:[%s2847_s1 + $0xe8] sm:$0xff] (!%p138_p2)  }
   0xb   : > { %v2222_v14 = vld [vmem:[%s2847_s1 + $0x18] sm:$0xff] (!%p138_p2)   ;;  %v2226_v18 = vld [vmem:[%s2847_s1 + $0x20] sm:$0xff] (!%p138_p2)   ;;  %v2230_v22 = vld [vmem:[%s2847_s1 + $0x28] sm:$0xff] (!%p138_p2)  }
   0xc   : > { %2026 = vmatpush3.bf16.msra.mxu0 (!%p138_p2), %v2214_v6  ;;  %v2223_v15 = vld [vmem:[%s2847_s1 + $0x98] sm:$0xff] (!%p138_p2)   ;;  %v2227_v19 = vld [vmem:[%s2847_s1 + $0xa0] sm:$0xff] (!%p138_p2)   ;;  %v2231_v23 = vld [vmem:[%s2847_s1 + $0xa8] sm:$0xff] (!%p138_p2)  }
   0xd   : > { %2048 = vmatpush3.bf16.msra.mxu1 %v2215_v7  ;;  %2027 = vmatprep.subr.bf16.mxu0 %v2216_v8  ;;  %s2855_s13 = smov (!%p160_p3, %s1841_s13), 1  ;;  %v2232_v24 = vld [vmem:[%s2847_s1 + $0x70] sm:$0xff]   ;;  %v2236_v28 = vld [vmem:[%s2847_s1 + $0x78] sm:$0xff]   ;;  %v2242_v52 = vld [vmem:[%s2847_s1 + $0x140] sm:$0xff]  }
   0xe   : > { %2049 = vmatprep.subr.bf16.mxu1 %v2217_v9  ;;  %v2233_v25 = vld [vmem:[%s2847_s1 + $0xf0] sm:$0xff]   ;;  %s2199_s20 = smul.u32 20, %s2855_s13  ;;  %v2237_v29 = vld [vmem:[%s2847_s1 + $0xf8] sm:$0xff]   ;;  %v2243_v53 = vld [vmem:[%s2847_s1 + $0x1c0] sm:$0xff]   ;;  %s1847_s6 = sshll.u32 %s2855_s13, 2 }
   0xf   : > { %v2234_v26 = vld [vmem:[%s2847_s1 + $0x30] sm:$0xff]   ;;  %v2238_v30 = vld [vmem:[%s2847_s1 + $0x38] sm:$0xff]   ;;  %vm2504_vm4 = vmor %vm207_vm0, %vm208_vm1  ;;  %s168_s9 = scalar_lea.vmem %s2849_s3, %s1847_s6 }
  0x10   : > { %2028 = vmatpush3.bf16.msra.mxu0 %v2218_v10  ;;  %v2235_v27 = vld [vmem:[%s2847_s1 + $0xb0] sm:$0xff]   ;;  %v2239_v31 = vld [vmem:[%s2847_s1 + $0xb8] sm:$0xff]   ;;  %s2486_s4 = scalar_lea.vmem %s2846_s0, %s2199_s20  ;;  %vm2510_vm5 = vmor %vm220_vm2, %vm221_vm3 }
  0x11   : > { %2050 = vmatpush3.bf16.msra.mxu1 %v2219_v11  ;;  %2029 = vmatprep.subr.bf16.mxu0 %v2220_v12  ;;  %v170_v32 = vld [vmem:[%s2486_s4] sm:$0x1]  ;;  %v1848_v33 = vld [vmem:[%s2486_s4 + $0x4] sm:$0x1]  ;;  %v193_v39 = vld [vmem:[%s2486_s4] sm:$0x2] }
  0x12   : > { %2051 = vmatprep.subr.bf16.mxu1 %v2221_v13  ;;  %v180_v34 = vld [vmem:[%s2486_s4] sm:$0x3]  ;;  %v171_v35 = vunpack.c.l.bf16 %v170_v32  ;;  %v175_v36 = vunpack.c.l.bf16 %v1848_v33  ;;  %v1850_v38 = vld [vmem:[%s2486_s4 + $0x4] sm:$0x3]  ;;  %v194_v42 = vunpack.c.l.bf16 %v193_v39  ;;  %v2246_v5 = vld [vmem:[%s2847_s1 + $0x148] sm:$0xff]  }
  0x13   : > { %v181_v37 = vunpack.c.l.bf16 %v180_v34  ;;  %v1852_v40 = vld [vmem:[%s2486_s4 + $0x4] sm:$0x2]  ;;  %v188_v41 = vunpack.c.l.bf16 %v1850_v38  ;;  %v203_v44 = vld [vmem:[%s2486_s4] sm:$0x6]  ;;  %v2247_v10 = vld [vmem:[%s2847_s1 + $0x1c8] sm:$0xff]  }
  0x14   : > { %2030 = vmatpush3.bf16.msra.mxu0 %v2222_v14  ;;  %v201_v43 = vunpack.c.l.bf16 %v1852_v40  ;;  %v1854_v45 = vld [vmem:[%s2486_s4 + $0x4] sm:$0x6]  ;;  %172 = vst [vmem:[#allocation2] sm:$0x3] %v171_v35  ;;  %v177_v46 = vrot.slane %v175_v36, 6  ;;  %v204_v48 = vunpack.c.l.bf16 %v203_v44  ;;  %v1851_v51 = vrot.slane %v194_v42, 10 }
  0x15   : > { %2052 = vmatpush3.bf16.msra.mxu1 %v2223_v15  ;;  %2031 = vmatprep.subr.bf16.mxu0 %v2224_v16  ;;  %v1849_v47 = vrot.slane %v181_v37, 9  ;;  %v217_v49 = vunpack.c.l.bf16 %v1854_v45  ;;  %v190_v50 = vrot.slane %v188_v41, 7  ;;  %v2244_v3 = vld [vmem:[%s2847_s1 + $0x100] sm:$0xff]   ;;  %v2248_v12 = vld [vmem:[%s2847_s1 + $0x108] sm:$0xff]   ;;  %v2250_v13 = vld [vmem:[%s2847_s1 + $0x150] sm:$0xff]  }
  0x16   : > { %2053 = vmatprep.subr.bf16.mxu1 %v2225_v17  ;;  %202 = vst [vmem:[#allocation2 + $0x8] sm:$0xc] %v201_v43  ;;  %179 = vst [vmem:[#allocation2] sm:$0xc] %v177_v46  ;;  %v206_v54 = vcombine.high %v204_v48, %v204_v48  ;;  %v1853_v56 = vrot.slane %v204_v48, 11  ;;  %v2245_v8 = vld [vmem:[%s2847_s1 + $0x180] sm:$0xff]  }
  0x17   : > { %186 = vst [vmem:[#allocation2 + $0x4] sm:$0x3] %v1849_v47  ;;  %v219_v57 = vcombine.high %v217_v49, %v217_v49  ;;  %v1855_v58 = vrot.slane %v217_v49, 9  ;;  %192 = vst [vmem:[#allocation2 + $0x4] sm:$0xc] %v190_v50  ;;  %v2249_v14 = vld [vmem:[%s2847_s1 + $0x188] sm:$0xff]  }
  0x18   : > { %2032 = vmatpush3.bf16.msra.mxu0 %v2226_v18  ;;  %199 = vst [vmem:[#allocation2 + $0x8] sm:$0x3] %v1851_v51  ;;  %v212_v60 = vrot.slane %v206_v54, 7  ;;  %v2251_v15 = vld [vmem:[%s2847_s1 + $0x1d0] sm:$0xff]   ;;  %v2254_v17 = vld [vmem:[%s2847_s1 + $0x158] sm:$0xff]   ;;  %v2265_v37 = vld [vmem:[%s2847_s1 + $0x1a8] sm:$0xff]  }
  0x19   : > { %2054 = vmatpush3.bf16.msra.mxu1 %v2227_v19  ;;  %2033 = vmatprep.subr.bf16.mxu0 %v2228_v20  ;;  %v225_v61 = vrot.slane %v219_v57, 5  ;;  %v2252_v16 = vld [vmem:[%s2847_s1 + $0x110] sm:$0xff]   ;;  %v2255_v19 = vld [vmem:[%s2847_s1 + $0x1d8] sm:$0xff]   ;;  %v1858_v34 = vld [vmem:[%s2486_s4 + $0x4] sm:$0x3] }
  0x1a   : > { %2055 = vmatprep.subr.bf16.mxu1 %v2229_v21  ;;  %v213_v62 = vsel %vm2504_vm4, %v1853_v56, %v212_v60  ;;  %v2253_v18 = vld [vmem:[%s2847_s1 + $0x190] sm:$0xff]   ;;  %v2256_v20 = vld [vmem:[%s2847_s1 + $0x118] sm:$0xff]   ;;  %v2258_v21 = vld [vmem:[%s2847_s1 + $0x160] sm:$0xff]   ;;  %v240_v38 = vunpack.c.l.bf16 %v1858_v34 }
  0x1b   : > { %v226_v63 = vsel %vm2510_vm5, %v1855_v58, %v225_v61  ;;  %215 = vst [vmem:[#allocation2 + $0xc] sm:$0x3] %v213_v62  ;;  %v1860_v35 = vld [vmem:[%s2486_s4 + $0x8] sm:$0x3]  ;;  %v1861_v36 = vld [vmem:[%s2486_s4 + $0x4] sm:$0x2] }
  0x1c   : > { %2034 = vmatpush3.bf16.msra.mxu0 %v2230_v22  ;;  %228 = vst [vmem:[#allocation2 + $0xc] sm:$0xc] %v226_v63  ;;  %v2257_v22 = vld [vmem:[%s2847_s1 + $0x198] sm:$0xff]   ;;  %v247_v39 = vunpack.c.l.bf16 %v1860_v35  ;;  %v253_v40 = vunpack.c.l.bf16 %v1861_v36  ;;  %v1863_v41 = vld [vmem:[%s2486_s4 + $0x8] sm:$0x2]  ;;  %v2267_v44 = vld [vmem:[%s2847_s1 + $0x1f0] sm:$0xff]  }
  0x1d   : > { %2056 = vmatpush3.bf16.msra.mxu1 %v2231_v23  ;;  %2035 = vmatprep.subr.bf16.mxu0 %v2232_v24  ;;  %v2259_v23 = vld [vmem:[%s2847_s1 + $0x1e0] sm:$0xff]   ;;  %v1866_v43 = vld [vmem:[%s2486_s4 + $0x8] sm:$0x6]  ;;  %v2268_v45 = vld [vmem:[%s2847_s1 + $0x130] sm:$0xff]   ;;  %v260_v47 = vunpack.c.l.bf16 %v1863_v41  ;;  %v1859_v51 = vrot.slane %v240_v38, 9 }
  0x1e   : > { %2057 = vmatprep.subr.bf16.mxu1 %v2233_v25  ;;  %v388_v0 = vld [vmem:[#allocation2] sm:$0xff]  ;;  %v2262_v25 = vld [vmem:[%s2847_s1 + $0x168] sm:$0xff]   ;;  %v273_v49 = vunpack.c.l.bf16 %v1866_v43  ;;  %v2270_v50 = vld [vmem:[%s2847_s1 + $0x178] sm:$0xff]  }
  0x1f   : > { %v404_v1 = vcombine.high %v388_v0, %v388_v0  ;;  %v420_v2 = vpack.c.bf16 %v388_v0, %v388_v0  ;;  %v2260_v24 = vld [vmem:[%s2847_s1 + $0x120] sm:$0xff]   ;;  %261 = vst [vmem:[#allocation2 + $0x18] sm:$0xc] %v260_v47  ;;  %v2269_v60 = vld [vmem:[%s2847_s1 + $0x1b0] sm:$0xff]   ;;  %245 = vst [vmem:[#allocation2 + $0x14] sm:$0x3] %v1859_v51 }
  0x20   : > { %2036 = vmatpush3.bf16.msra.mxu0 %v2234_v26  ;;  %v2261_v26 = vld [vmem:[%s2847_s1 + $0x1a0] sm:$0xff]   ;;  %v275_v57 = vcombine.high %v273_v49, %v273_v49  ;;  %v1867_v58 = vrot.slane %v273_v49, 9  ;;  %v2271_v61 = vld [vmem:[%s2847_s1 + $0x1f8] sm:$0xff]   ;;  %v2298_v34 = vld [vmem:[%s2847_s1 + $0x228] sm:$0xff]  }
  0x21   : > { %2058 = vmatpush3.bf16.msra.mxu1 %v2235_v27  ;;  %2037 = vmatprep.subr.bf16.mxu0 %v2236_v28  ;;  %v421_v4 = vpack.c.bf16 %v404_v1, %v404_v1  ;;  %v2263_v27 = vld [vmem:[%s2847_s1 + $0x1e8] sm:$0xff]   ;;  %v1864_v42 = vld [vmem:[%s2486_s4 + $0x4] sm:$0x6]  ;;  %v2272_v62 = vld [vmem:[%s2847_s1 + $0x138] sm:$0xff]  }
  0x22   : > { %2059 = vmatprep.subr.bf16.mxu1 %v2237_v29  ;;  %v2264_v28 = vld [vmem:[%s2847_s1 + $0x128] sm:$0xff]   ;;  %v2266_v29 = vld [vmem:[%s2847_s1 + $0x170] sm:$0xff]   ;;  %v263_v48 = vunpack.c.l.bf16 %v1864_v42  ;;  %v278_v0 = vrot.slane %v275_v57, 5  ;;  %v2304_v57 = vld [vmem:[%s2847_s1 + $0x278] sm:$0xff]  }
  0x23   : > { %v389_v6 = vld [vmem:[#allocation2 + $0x8] sm:$0xff]  ;;  %1499 = vmatprep.mubr.bf16.mxu0 %v421_v4  ;;  %v2273_v4 = vld [vmem:[%s2847_s1 + $0x1b8] sm:$0xff]   ;;  %v2300_v35 = vld [vmem:[%s2847_s1 + $0x270] sm:$0xff]  }
  0x24   : > { %2038 = vmatpush3.bf16.msra.mxu0 %v2238_v30  ;;  %v405_v7 = vcombine.high %v389_v6, %v389_v6  ;;  %v422_v9 = vpack.c.bf16 %v389_v6, %v389_v6  ;;  %v1856_v30 = vld [vmem:[%s2486_s4 + $0x4] sm:$0x1]  ;;  %v265_v54 = vcombine.high %v263_v48, %v263_v48  ;;  %v1865_v56 = vrot.slane %v263_v48, 11  ;;  %v1868_v36 = vld [vmem:[%s2486_s4 + $0x8] sm:$0x1]  ;;  %v2302_v51 = vld [vmem:[%s2847_s1 + $0x230] sm:$0xff]  }
  0x25   : > { %2060 = vmatpush3.bf16.msra.mxu1 %v2239_v31  ;;  %2067 = vmatprep.subr.bf16.mxu0 %v2242_v52  ;;  %v1857_v31 = vld [vmem:[%s2486_s4 + $0x8] sm:$0x1]  ;;  %v230_v32 = vunpack.c.l.bf16 %v1856_v30  ;;  %v249_v52 = vrot.slane %v247_v39, 7  ;;  %v2277_v6 = vld [vmem:[%s2847_s1 + $0x2c0] sm:$0xff]   ;;  %v283_v38 = vunpack.c.l.bf16 %v1868_v36  ;;  %v1872_v41 = vld [vmem:[%s2486_s4 + $0xc] sm:$0x3] }
  0x26   : > { %2089 = vmatprep.subr.bf16.mxu1 %v2243_v53  ;;  %v423_v11 = vpack.c.bf16 %v405_v7, %v405_v7  ;;  %v234_v33 = vunpack.c.l.bf16 %v1857_v31  ;;  %v1862_v53 = vrot.slane %v253_v40, 10  ;;  %v268_v63 = vrot.slane %v265_v54, 7  ;;  %v2294_v30 = vld [vmem:[%s2847_s1 + $0x220] sm:$0xff]   ;;  %v2296_v31 = vld [vmem:[%s2847_s1 + $0x268] sm:$0xff]  }
  0x27   : > { %1500 = vmatmul.mubr.bf16.vlgmr.msra.gmra.mrb[0].mxu0 %v420_v2  ;;  %231 = vst [vmem:[#allocation2 + $0x10] sm:$0x3] %v230_v32  ;;  %251 = vst [vmem:[#allocation2 + $0x14] sm:$0xc] %v249_v52  ;;  %v279_v2 = vsel %vm2510_vm5, %v1867_v58, %v278_v0  ;;  %v2295_v32 = vld [vmem:[%s2847_s1 + $0x2a0] sm:$0xff]   ;;  %v2299_v43 = vld [vmem:[%s2847_s1 + $0x2a8] sm:$0xff]  }
  0x28   : > { %2068 = vmatpush3.bf16.msra.mxu0 %v2244_v3  ;;  %1539 = vmatprep.mubr.bf16.mxu1 %v423_v11  ;;  %v236_v46 = vrot.slane %v234_v33, 6  ;;  %258 = vst [vmem:[#allocation2 + $0x18] sm:$0x3] %v1862_v53  ;;  %v269_v1 = vsel %vm2504_vm4, %v1865_v56, %v268_v63  ;;  %v2276_v3 = vld [vmem:[%s2847_s1 + $0x240] sm:$0xff]   ;;  %281 = vst [vmem:[#allocation2 + $0x1c] sm:$0xc] %v279_v2 }
  0x29   : > { %2069 = vmatprep.subr.bf16.mxu0 %v2246_v5  ;;  %1540 = vmatmul.mubr.bf16.vlgmr.msra.gmra.mrb[0].mxu1 %v422_v9  ;;  %271 = vst [vmem:[#allocation2 + $0x1c] sm:$0x3] %v269_v1  ;;  %v2278_v9 = vld [vmem:[%s2847_s1 + $0x200] sm:$0xff]   ;;  %v2280_v11 = vld [vmem:[%s2847_s1 + $0x248] sm:$0xff]   ;;  %284 = vst [vmem:[#allocation2 + $0x20] sm:$0x3] %v283_v38 }
  0x2a   : > { %2090 = vmatpush3.bf16.msra.mxu1 %v2245_v8  ;;  %238 = vst [vmem:[#allocation2 + $0x10] sm:$0xc] %v236_v46  ;;  %v2297_v33 = vld [vmem:[%s2847_s1 + $0x2e8] sm:$0xff]   ;;  %v2303_v2 = vld [vmem:[%s2847_s1 + $0x2b0] sm:$0xff]   ;;  %v2328_v36 = vld [vmem:[%s2847_s1 + $0x320] sm:$0xff]  }
  0x2b   : > { %2091 = vmatprep.subr.bf16.mxu1 %v2247_v10  ;;  %v1870_v40 = vld [vmem:[%s2486_s4 + $0x8] sm:$0x3]  ;;  %v1875_v47 = vld [vmem:[%s2486_s4 + $0xc] sm:$0x2]  ;;  %v2329_v38 = vld [vmem:[%s2847_s1 + $0x3a0] sm:$0xff]  }
  0x2c   : > { %2070 = vmatpush3.bf16.msra.mxu0 %v2248_v12  ;;  %v1873_v42 = vld [vmem:[%s2486_s4 + $0x8] sm:$0x2]  ;;  %v1878_v49 = vld [vmem:[%s2486_s4 + $0xc] sm:$0x6]  ;;  %v313_v53 = vunpack.c.l.bf16 %v1875_v47  ;;  %v1884_v47 = vld [vmem:[%s2486_s4 + $0x10] sm:$0x3] }
  0x2d   : > { %2071 = vmatprep.subr.bf16.mxu0 %v2250_v13  ;;  %v306_v46 = vunpack.c.l.bf16 %v1873_v42  ;;  %v1876_v48 = vld [vmem:[%s2486_s4 + $0x8] sm:$0x6]  ;;  %v326_v56 = vunpack.c.l.bf16 %v1878_v49  ;;  %v1880_v42 = vld [vmem:[%s2486_s4 + $0xc] sm:$0x1] }
  0x2e   : > { %2092 = vmatpush3.bf16.msra.mxu1 %v2249_v14  ;;  %v2279_v14 = vld [vmem:[%s2847_s1 + $0x280] sm:$0xff]   ;;  %v316_v54 = vunpack.c.l.bf16 %v1876_v48  ;;  %314 = vst [vmem:[#allocation2 + $0x28] sm:$0xc] %v313_v53  ;;  %v1885_v48 = vld [vmem:[%s2486_s4 + $0xc] sm:$0x2] }
  0x2f   : > { %2093 = vmatprep.subr.bf16.mxu1 %v2251_v15  ;;  %v328_v0 = vcombine.high %v326_v56, %v326_v56  ;;  %v1879_v1 = vrot.slane %v326_v56, 9  ;;  %v1888_v53 = vld [vmem:[%s2486_s4 + $0xc] sm:$0x6] }
  0x30   : > { %2072 = vmatpush3.bf16.msra.mxu0 %v2252_v16  ;;  %v391_v12 = vld [vmem:[#allocation2 + $0x18] sm:$0xff]  ;;  %v2281_v16 = vld [vmem:[%s2847_s1 + $0x2c8] sm:$0xff]   ;;  %v1877_v63 = vrot.slane %v316_v54, 11 }
  0x31   : > { %2073 = vmatprep.subr.bf16.mxu0 %v2254_v17  ;;  %v390_v5 = vld [vmem:[#allocation2 + $0x10] sm:$0xff]  ;;  %v407_v13 = vcombine.high %v391_v12, %v391_v12  ;;  %v426_v15 = vpack.c.bf16 %v391_v12, %v391_v12  ;;  %v2311_v12 = vld [vmem:[%s2847_s1 + $0x3c0] sm:$0xff]  }
  0x32   : > { %2094 = vmatpush3.bf16.msra.mxu1 %v2253_v18  ;;  %v406_v7 = vcombine.high %v390_v5, %v390_v5  ;;  %v424_v8 = vpack.c.bf16 %v390_v5, %v390_v5  ;;  %v2282_v18 = vld [vmem:[%s2847_s1 + $0x208] sm:$0xff]  }
  0x33   : > { %2095 = vmatprep.subr.bf16.mxu1 %v2255_v19  ;;  %v427_v17 = vpack.c.bf16 %v407_v13, %v407_v13  ;;  %v2284_v19 = vld [vmem:[%s2847_s1 + $0x250] sm:$0xff]  }
  0x34   : > { %2074 = vmatpush3.bf16.msra.mxu0 %v2256_v20  ;;  %v425_v10 = vpack.c.bf16 %v406_v7, %v406_v7  ;;  %v2283_v20 = vld [vmem:[%s2847_s1 + $0x288] sm:$0xff]  }
  0x35   : > { %2075 = vmatprep.subr.bf16.mxu0 %v2258_v21  ;;  %1619 = vmatprep.mubr.bf16.mxu1 %v427_v17  ;;  %v2285_v21 = vld [vmem:[%s2847_s1 + $0x2d0] sm:$0xff]   ;;  %v2314_v17 = vld [vmem:[%s2847_s1 + $0x348] sm:$0xff]  }
  0x36   : > { %2096 = vmatpush3.bf16.msra.mxu1 %v2257_v22  ;;  %1579 = vmatprep.mubr.bf16.mxu0 %v425_v10  ;;  %v2286_v22 = vld [vmem:[%s2847_s1 + $0x210] sm:$0xff]   ;;  %v2307_v10 = vld [vmem:[%s2847_s1 + $0x2b8] sm:$0xff]  }
  0x37   : > { %2097 = vmatprep.subr.bf16.mxu1 %v2259_v23  ;;  %v2288_v23 = vld [vmem:[%s2847_s1 + $0x258] sm:$0xff]  }
  0x38   : > { %2076 = vmatpush3.bf16.msra.mxu0 %v2260_v24  ;;  %v2287_v24 = vld [vmem:[%s2847_s1 + $0x290] sm:$0xff]  }
  0x39   : > { %2077 = vmatprep.subr.bf16.mxu0 %v2262_v25  ;;  %v2289_v25 = vld [vmem:[%s2847_s1 + $0x2d8] sm:$0xff]  }
  0x3a   : > { %2098 = vmatpush3.bf16.msra.mxu1 %v2261_v26  ;;  %v2290_v26 = vld [vmem:[%s2847_s1 + $0x218] sm:$0xff]  }
  0x3b   : > { %2099 = vmatprep.subr.bf16.mxu1 %v2263_v27  ;;  %v2292_v27 = vld [vmem:[%s2847_s1 + $0x260] sm:$0xff]  }
  0x3c   : > { %2078 = vmatpush3.bf16.msra.mxu0 %v2264_v28  ;;  %v2291_v28 = vld [vmem:[%s2847_s1 + $0x298] sm:$0xff]  }
  0x3d   : > { %2079 = vmatprep.subr.bf16.mxu0 %v2266_v29  ;;  %v2293_v29 = vld [vmem:[%s2847_s1 + $0x2e0] sm:$0xff]  }
  0x3e   : > { %2100 = vmatpush3.bf16.msra.mxu1 %v2265_v37  ;;  %v1869_v37 = vld [vmem:[%s2486_s4 + $0xc] sm:$0x1] }
  0x3f   : > { %2101 = vmatprep.subr.bf16.mxu1 %v2267_v44  ;;  %v287_v39 = vunpack.c.l.bf16 %v1869_v37  ;;  %v293_v44 = vunpack.c.l.bf16 %v1870_v40  ;;  %v2330_v37 = vld [vmem:[%s2847_s1 + $0x368] sm:$0xff]  }
  0x40   : > { %2080 = vmatpush3.bf16.msra.mxu0 %v2268_v45  ;;  %v300_v45 = vunpack.c.l.bf16 %v1872_v41  ;;  %v2332_v40 = vld [vmem:[%s2847_s1 + $0x328] sm:$0xff]   ;;  %v2334_v41 = vld [vmem:[%s2847_s1 + $0x370] sm:$0xff]  }
  0x41   : > { %2081 = vmatprep.subr.bf16.mxu0 %v2270_v50  ;;  %v2301_v50 = vld [vmem:[%s2847_s1 + $0x2f0] sm:$0xff]   ;;  %v289_v52 = vrot.slane %v287_v39, 6  ;;  %v1871_v58 = vrot.slane %v293_v44, 9  ;;  %v2331_v39 = vld [vmem:[%s2847_s1 + $0x3e8] sm:$0xff]   ;;  %v336_v44 = vunpack.c.l.bf16 %v1880_v42 }
  0x42   : > { %2102 = vmatpush3.bf16.msra.mxu1 %v2269_v60  ;;  %v302_v60 = vrot.slane %v300_v45, 7 }
  0x43   : > { %2103 = vmatprep.subr.bf16.mxu1 %v2271_v61  ;;  %v1874_v61 = vrot.slane %v306_v46, 10  ;;  %291 = vst [vmem:[#allocation2 + $0x20] sm:$0xc] %v289_v52  ;;  %298 = vst [vmem:[#allocation2 + $0x24] sm:$0x3] %v1871_v58  ;;  %v369_v58 = vunpack.c.l.bf16 %v1888_v53 }
  0x44   : > { %2082 = vmatpush3.bf16.msra.mxu0 %v2272_v62  ;;  %v318_v62 = vcombine.high %v316_v54, %v316_v54  ;;  %304 = vst [vmem:[#allocation2 + $0x24] sm:$0xc] %v302_v60  ;;  %v1882_v46 = vld [vmem:[%s2486_s4 + $0xc] sm:$0x3]  ;;  %v1887_v52 = vld [vmem:[%s2486_s4 + $0x10] sm:$0x2] }
  0x45   : > { %2111 = vmatprep.subr.bf16.mxu0 %v2276_v3  ;;  %311 = vst [vmem:[#allocation2 + $0x28] sm:$0x3] %v1874_v61  ;;  %v2305_v3 = vld [vmem:[%s2847_s1 + $0x2f8] sm:$0xff]   ;;  %v346_v49 = vunpack.c.l.bf16 %v1882_v46  ;;  %v1890_v54 = vld [vmem:[%s2486_s4 + $0x10] sm:$0x6]  ;;  %v2333_v61 = vld [vmem:[%s2847_s1 + $0x3a8] sm:$0xff]  }
  0x46   : > { %2104 = vmatpush3.bf16.msra.mxu1 %v2273_v4  ;;  %v2306_v4 = vld [vmem:[%s2847_s1 + $0x238] sm:$0xff]   ;;  %v321_v5 = vrot.slane %v318_v62, 7  ;;  %337 = vst [vmem:[#allocation2 + $0x30] sm:$0x3] %v336_v44  ;;  %v379_v60 = vunpack.c.l.bf16 %v1890_v54  ;;  %v2336_v62 = vld [vmem:[%s2847_s1 + $0x330] sm:$0xff]  }
  0x47   : > { %2133 = vmatprep.subr.bf16.mxu1 %v2277_v6  ;;  %1580 = vmatmul.mubr.bf16.vlgmr.msra.gmra.mrb[4].mxu0 %v424_v8  ;;  %v331_v6 = vrot.slane %v328_v0, 5 }
  0x48   : > { %2112 = vmatpush3.bf16.msra.mxu0 %v2278_v9  ;;  %v322_v7 = vsel %vm2504_vm4, %v1877_v63, %v321_v5  ;;  %v2310_v9 = vld [vmem:[%s2847_s1 + $0x340] sm:$0xff]   ;;  %v1883_v63 = vrot.slane %v346_v49, 9  ;;  %v1889_v5 = vrot.slane %v369_v58, 11 }
  0x49   : > { %2113 = vmatprep.subr.bf16.mxu0 %v2280_v11  ;;  %1620 = vmatmul.mubr.bf16.vlgmr.msra.gmra.mrb[4].mxu1 %v426_v15  ;;  %v332_v8 = vsel %vm2510_vm5, %v1879_v1, %v331_v6  ;;  %324 = vst [vmem:[#allocation2 + $0x2c] sm:$0x3] %v322_v7  ;;  %v2312_v15 = vld [vmem:[%s2847_s1 + $0x300] sm:$0xff]   ;;  %v381_v6 = vcombine.high %v379_v60, %v379_v60  ;;  %v1891_v7 = vrot.slane %v379_v60, 9 }
  0x4a   : > { %2134 = vmatpush3.bf16.msra.mxu1 %v2279_v14  ;;  %334 = vst [vmem:[#allocation2 + $0x2c] sm:$0xc] %v332_v8  ;;  %351 = vst [vmem:[#allocation2 + $0x34] sm:$0x3] %v1883_v63 }
  0x4b   : > { %2135 = vmatprep.subr.bf16.mxu1 %v2281_v16  ;;  %v392_v11 = vld [vmem:[#allocation2 + $0x20] sm:$0xff] }
  0x4c   : > { %2114 = vmatpush3.bf16.msra.mxu0 %v2282_v18  ;;  %v408_v13 = vcombine.high %v392_v11, %v392_v11  ;;  %v428_v14 = vpack.c.bf16 %v392_v11, %v392_v11  ;;  %v2340_v11 = vld [vmem:[%s2847_s1 + $0x338] sm:$0xff]  }
  0x4d   : > { %2115 = vmatprep.subr.bf16.mxu0 %v2284_v19 }
  0x4e   : > { %2136 = vmatpush3.bf16.msra.mxu1 %v2283_v20  ;;  %v429_v16 = vpack.c.bf16 %v408_v13, %v408_v13  ;;  %v2313_v20 = vld [vmem:[%s2847_s1 + $0x380] sm:$0xff]  }
  0x4f   : > { %2137 = vmatprep.subr.bf16.mxu1 %v2285_v21 }
  0x50   : > { %2116 = vmatpush3.bf16.msra.mxu0 %v2286_v22  ;;  %1659 = vmatprep.mubr.bf16.mxu0 %v429_v16  ;;  %v2315_v22 = vld [vmem:[%s2847_s1 + $0x3c8] sm:$0xff]  }
  0x51   : > { %2117 = vmatprep.subr.bf16.mxu0 %v2288_v23  ;;  %v393_v18 = vld [vmem:[#allocation2 + $0x28] sm:$0xff] }
  0x52   : > { %2138 = vmatpush3.bf16.msra.mxu1 %v2287_v24  ;;  %v409_v19 = vcombine.high %v393_v18, %v393_v18  ;;  %v430_v21 = vpack.c.bf16 %v393_v18, %v393_v18  ;;  %v2316_v24 = vld [vmem:[%s2847_s1 + $0x308] sm:$0xff]  }
  0x53   : > { %2139 = vmatprep.subr.bf16.mxu1 %v2289_v25  ;;  %v2318_v25 = vld [vmem:[%s2847_s1 + $0x350] sm:$0xff]  }
  0x54   : > { %2118 = vmatpush3.bf16.msra.mxu0 %v2290_v26  ;;  %v431_v23 = vpack.c.bf16 %v409_v19, %v409_v19  ;;  %v2317_v26 = vld [vmem:[%s2847_s1 + $0x388] sm:$0xff]  }
  0x55   : > { %2119 = vmatprep.subr.bf16.mxu0 %v2292_v27  ;;  %v2319_v27 = vld [vmem:[%s2847_s1 + $0x3d0] sm:$0xff]  }
  0x56   : > { %2140 = vmatpush3.bf16.msra.mxu1 %v2291_v28  ;;  %1699 = vmatprep.mubr.bf16.mxu1 %v431_v23  ;;  %v2320_v28 = vld [vmem:[%s2847_s1 + $0x310] sm:$0xff]   ;;  %v1892_v23 = vld [vmem:[%s2848_s2] ss:$0 sm:$0xff] }
  0x57   : > { %2141 = vmatprep.subr.bf16.mxu1 %v2293_v29  ;;  %v2322_v29 = vld [vmem:[%s2847_s1 + $0x358] sm:$0xff]  }
  0x58   : > { %2120 = vmatpush3.bf16.msra.mxu0 %v2294_v30  ;;  %v2321_v30 = vld [vmem:[%s2847_s1 + $0x390] sm:$0xff]  }
  0x59   : > { %2121 = vmatprep.subr.bf16.mxu0 %v2296_v31  ;;  %v2323_v31 = vld [vmem:[%s2847_s1 + $0x3d8] sm:$0xff]  }
  0x5a   : > { %2142 = vmatpush3.bf16.msra.mxu1 %v2295_v32  ;;  %v2324_v32 = vld [vmem:[%s2847_s1 + $0x318] sm:$0xff]  }
  0x5b   : > { %2143 = vmatprep.subr.bf16.mxu1 %v2297_v33  ;;  %v2326_v33 = vld [vmem:[%s2847_s1 + $0x360] sm:$0xff]  }
  0x5c   : > { %2122 = vmatpush3.bf16.msra.mxu0 %v2298_v34  ;;  %v2325_v34 = vld [vmem:[%s2847_s1 + $0x398] sm:$0xff]  }
  0x5d   : > { %2123 = vmatprep.subr.bf16.mxu0 %v2300_v35  ;;  %v2327_v35 = vld [vmem:[%s2847_s1 + $0x3e0] sm:$0xff]  }
  0x5e   : > { %2144 = vmatpush3.bf16.msra.mxu1 %v2299_v43  ;;  %v1881_v43 = vld [vmem:[%s2486_s4 + $0x10] sm:$0x1] }
  0x5f   : > { %2145 = vmatprep.subr.bf16.mxu1 %v2301_v50  ;;  %v340_v45 = vunpack.c.l.bf16 %v1881_v43  ;;  %v353_v50 = vunpack.c.l.bf16 %v1884_v47 }
  0x60   : > { %2124 = vmatpush3.bf16.msra.mxu0 %v2302_v51  ;;  %v359_v51 = vunpack.c.l.bf16 %v1885_v48 }
  0x61   : > { %2125 = vmatprep.subr.bf16.mxu0 %v2304_v57  ;;  %v342_v56 = vrot.slane %v340_v45, 6  ;;  %v366_v57 = vunpack.c.l.bf16 %v1887_v52  ;;  %v355_v0 = vrot.slane %v353_v50, 7 }
  0x62   : > { %2146 = vmatpush3.bf16.msra.mxu1 %v2303_v2  ;;  %v1886_v1 = vrot.slane %v359_v51, 10  ;;  %v2335_v2 = vld [vmem:[%s2847_s1 + $0x3f0] sm:$0xff]  }
  0x63   : > { %2147 = vmatprep.subr.bf16.mxu1 %v2305_v3  ;;  %v2338_v3 = vld [vmem:[%s2847_s1 + $0x378] sm:$0xff]   ;;  %344 = vst [vmem:[#allocation2 + $0x30] sm:$0xc] %v342_v56  ;;  %367 = vst [vmem:[#allocation2 + $0x38] sm:$0xc] %v366_v57 }
  0x64   : > { %2126 = vmatpush3.bf16.msra.mxu0 %v2306_v4  ;;  %v371_v4 = vcombine.high %v369_v58, %v369_v58  ;;  %357 = vst [vmem:[#allocation2 + $0x34] sm:$0xc] %v355_v0  ;;  %364 = vst [vmem:[#allocation2 + $0x38] sm:$0x3] %v1886_v1 }
  0x65   : > { %2155 = vmatprep.subr.bf16.mxu0 %v2310_v9  ;;  %v384_v9 = vrot.slane %v381_v6, 5 }
  0x66   : > { %2148 = vmatpush3.bf16.msra.mxu1 %v2307_v10  ;;  %v374_v8 = vrot.slane %v371_v4, 7  ;;  %v2337_v10 = vld [vmem:[%s2847_s1 + $0x3b0] sm:$0xff]  }
  0x67   : > { %2177 = vmatprep.subr.bf16.mxu1 %v2311_v12  ;;  %1660 = vmatmul.mubr.bf16.vlgmr.msra.gmra.mrb[8].mxu0 %v428_v14  ;;  %v2339_v12 = vld [vmem:[%s2847_s1 + $0x3f8] sm:$0xff]   ;;  %v385_v14 = vsel %vm2510_vm5, %v1891_v7, %v384_v9 }
  0x68   : > { %2156 = vmatpush3.bf16.msra.mxu0 %v2312_v15  ;;  %v375_v13 = vsel %vm2504_vm4, %v1889_v5, %v374_v8  ;;  %387 = vst [vmem:[#allocation2 + $0x3c] sm:$0xc] %v385_v14  ;;  %v2341_v15 = vld [vmem:[%s2847_s1 + $0x3b8] sm:$0xff]  }
  0x69   : > { %2157 = vmatprep.subr.bf16.mxu0 %v2314_v17  ;;  %1700 = vmatmul.mubr.bf16.vlgmr.msra.gmra.mrb[8].mxu1 %v430_v21  ;;  %377 = vst [vmem:[#allocation2 + $0x3c] sm:$0x3] %v375_v13 }
  0x6a   : > { %2178 = vmatpush3.bf16.msra.mxu1 %v2313_v20 }
  0x6b   : > { %2179 = vmatprep.subr.bf16.mxu1 %v2315_v22  ;;  %v394_v16 = vld [vmem:[#allocation2 + $0x30] sm:$0xff] }
  0x6c   : > { %2158 = vmatpush3.bf16.msra.mxu0 %v2316_v24  ;;  %v410_v17 = vcombine.high %v394_v16, %v394_v16  ;;  %v432_v18 = vpack.c.bf16 %v394_v16, %v394_v16 }
  0x6d   : > { %2159 = vmatprep.subr.bf16.mxu0 %v2318_v25 }
  0x6e   : > { %2180 = vmatpush3.bf16.msra.mxu1 %v2317_v26  ;;  %v433_v19 = vpack.c.bf16 %v410_v17, %v410_v17 }
  0x6f   : > { %2181 = vmatprep.subr.bf16.mxu1 %v2319_v27 }
  0x70   : > { %2160 = vmatpush3.bf16.msra.mxu0 %v2320_v28  ;;  %v395_v20 = vld [vmem:[#allocation2 + $0x38] sm:$0xff]  ;;  %1739 = vmatprep.mubr.bf16.mxu0 %v433_v19 }
  0x71   : > { %2161 = vmatprep.subr.bf16.mxu0 %v2322_v29  ;;  %v411_v55 = vcombine.high %v395_v20, %v395_v20  ;;  %v434_v21 = vpack.c.bf16 %v395_v20, %v395_v20 }
  0x72   : > { %2182 = vmatpush3.bf16.msra.mxu1 %v2321_v30 }
  0x73   : > { %2183 = vmatprep.subr.bf16.mxu1 %v2323_v31  ;;  %v435_v59 = vpack.c.bf16 %v411_v55, %v411_v55 }
  0x74   : > { %2162 = vmatpush3.bf16.msra.mxu0 %v2324_v32 }
  0x75   : > { %2163 = vmatprep.subr.bf16.mxu0 %v2326_v33  ;;  %1779 = vmatprep.mubr.bf16.mxu1 %v435_v59 }
  0x76   : > { %2184 = vmatpush3.bf16.msra.mxu1 %v2325_v34 }
  0x77   : > { %2185 = vmatprep.subr.bf16.mxu1 %v2327_v35 }
  0x78   : > { %2164 = vmatpush3.bf16.msra.mxu0 %v2328_v36 }
  0x79   : > { %2165 = vmatprep.subr.bf16.mxu0 %v2330_v37 }
  0x7a   : > { %2186 = vmatpush3.bf16.msra.mxu1 %v2329_v38 }
  0x7b   : > { %2187 = vmatprep.subr.bf16.mxu1 %v2331_v39 }
  0x7c   : > { %2166 = vmatpush3.bf16.msra.mxu0 %v2332_v40 }
  0x7d   : > { %2167 = vmatprep.subr.bf16.mxu0 %v2334_v41 }
  0x7e   : > { %2188 = vmatpush3.bf16.msra.mxu1 %v2333_v61 }
  0x7f   : > { %2189 = vmatprep.subr.bf16.mxu1 %v2335_v2 }
  0x80   : > { %2168 = vmatpush3.bf16.msra.mxu0 %v2336_v62 }
  0x81   : > { %2169 = vmatprep.subr.bf16.mxu0 %v2338_v3 }
  0x82   : > { %2190 = vmatpush3.bf16.msra.mxu1 %v2337_v10 }
  0x83   : > { %2191 = vmatprep.subr.bf16.mxu1 %v2339_v12 }
  0x84   : > { %2170 = vmatpush3.bf16.msra.mxu0 %v2340_v11 }
  0x86   : > { %2192 = vmatpush3.bf16.msra.mxu1 %v2341_v15 }
  0x87   : > { %1740 = vmatmul.mubr.bf16.vlgmr.msra.gmra.mrb[12].mxu0 %v432_v18 }
  0x89   : > { %1780 = vmatmul.mubr.bf16.vlgmr.msra.gmra.mrb[12].mxu1 %v434_v21 }
  0xfa   : > { %v2039_v22 = vpop.f32.mrb[0].mxu0 }
  0xfb   : > { %v2040_v24 = vpop.f32.mrb[1].mxu0 }
  0xfc   : > { %v2041_v25 = vadd.f32 %v2040_v24, %v2039_v22  ;;  %v2042_v26 = vpop.f32.mrb[2].mxu0  ;;  %v2061_v28 = vpop.f32.mrb[0].mxu1 }
  0xfd   : > { %v2043_v27 = vpop.f32.mrb[3].mxu0  ;;  %v2062_v30 = vpop.f32.mrb[1].mxu1 }
  0xfe   : > { %v1502_v29 = vadd.f32 %v2041_v25, %v1892_v23  ;;  %v2063_v31 = vadd.f32 %v2062_v30, %v2061_v28  ;;  %v2064_v32 = vpop.f32.mrb[2].mxu1 }
  0xff   : > { %v2065_v33 = vpop.f32.mrb[3].mxu1 }
 0x100   : > { %v1542_v34 = vadd.f32 %v2063_v31, %v1502_v29 }
 0x11a   : > { %v2083_v35 = vpop.f32.mrb[4].mxu0 }
 0x11b   : > { %v2084_v36 = vpop.f32.mrb[5].mxu0 }
 0x11c   : > { %v2085_v37 = vadd.f32 %v2084_v36, %v2083_v35  ;;  %v2086_v38 = vpop.f32.mrb[6].mxu0  ;;  %v2105_v40 = vpop.f32.mrb[4].mxu1 }
 0x11d   : > { %v2087_v39 = vpop.f32.mrb[7].mxu0  ;;  %v2106_v42 = vpop.f32.mrb[5].mxu1 }
 0x11e   : > { %v1582_v41 = vadd.f32 %v2085_v37, %v1542_v34  ;;  %v2107_v43 = vadd.f32 %v2106_v42, %v2105_v40  ;;  %v2108_v44 = vpop.f32.mrb[6].mxu1 }
 0x11f   : > { %v2109_v45 = vpop.f32.mrb[7].mxu1 }
 0x120   : > { %v1622_v46 = vadd.f32 %v2107_v43, %v1582_v41 }
 0x13a   : > { %v2127_v47 = vpop.f32.mrb[8].mxu0 }
 0x13b   : > { %v2128_v48 = vpop.f32.mrb[9].mxu0 }
 0x13c   : > { %v2129_v49 = vadd.f32 %v2128_v48, %v2127_v47  ;;  %v2130_v50 = vpop.f32.mrb[10].mxu0  ;;  %v2149_v52 = vpop.f32.mrb[8].mxu1 }
 0x13d   : > { %v2131_v51 = vpop.f32.mrb[11].mxu0  ;;  %v2150_v54 = vpop.f32.mrb[9].mxu1 }
 0x13e   : > { %v1662_v53 = vadd.f32 %v2129_v49, %v1622_v46  ;;  %v2151_v56 = vadd.f32 %v2150_v54, %v2149_v52  ;;  %v2152_v57 = vpop.f32.mrb[10].mxu1 }
 0x13f   : > { %v2153_v58 = vpop.f32.mrb[11].mxu1 }
 0x140   : > { %v1702_v60 = vadd.f32 %v2151_v56, %v1662_v53 }
 0x15a   : > { %v2171_v61 = vpop.f32.mrb[12].mxu0 }
 0x15b   : > { %v2172_v62 = vpop.f32.mrb[13].mxu0 }
 0x15c   : > { %v2173_v63 = vadd.f32 %v2172_v62, %v2171_v61  ;;  %v2174_v0 = vpop.f32.mrb[14].mxu0  ;;  %v2193_v2 = vpop.f32.mrb[12].mxu1 }
 0x15d   : > { %v2175_v1 = vpop.f32.mrb[15].mxu0  ;;  %v2194_v4 = vpop.f32.mrb[13].mxu1 }
 0x15e   : > { %v1742_v3 = vadd.f32 %v2173_v63, %v1702_v60  ;;  %v2195_v5 = vadd.f32 %v2194_v4, %v2193_v2  ;;  %v2196_v6 = vpop.f32.mrb[14].mxu1 }
 0x15f   : > { %v2197_v7 = vpop.f32.mrb[15].mxu1 }
 0x160   : > { %v1782_v8 = vadd.f32 %v2195_v5, %v1742_v3 }
 0x162   : > { %1787 = vst [vmem:[%s168_s9] sm:$0xf] %v1782_v8 }
 0x163 PF: > { %s13_s12 = sadd.s32 1, %s2350_s12  }
 0x164   : > { %p10_p4 = scmp.ge.s32.totalorder %s13_s12, 4  }
 0x166   :  { %12 = sbr.rel (!%p10_p4) target bundleno = 1 (0x1), region = 66 }

</bundles_post_ra>
